<compile_context>
chip_gen: v6e
topology: v6e:2x2x1
jax: 0.10.0
libtpu: 0.0.40
codegen_flags: <defaults>
</compile_context>

<pallas_src>
import functools
import math

import jax
import jax.numpy as jnp
from jax.experimental import pallas as pl
from jax.experimental.pallas import tpu as pltpu

IMG_CHANNELS = 4
NUM_ACTIONS = 6


# ----------------------------------------------------------------------------
# Pallas kernels
# ----------------------------------------------------------------------------
def _matmul_bias_relu_kernel(x_ref, w_ref, b_ref, o_ref):
    """(tm, K) x (K, N) tile: MXU matmul (bf16 in, f32 accum) + bias + ReLU."""
    acc = jnp.dot(x_ref[...], w_ref[...], preferred_element_type=jnp.float32)
    o_ref[...] = jnp.maximum(acc + b_ref[...], 0.0).astype(o_ref.dtype)


def _maxpool_kernel(*refs, k, s, ho, wo):
    """Strided window max over s*s parity phases, unit-stride slices only.

    refs = (phase_00, phase_01, ..., out_ref) with phase_{ph,pw} = x[:, ph::s, pw::s, :],
    so window offset (kh, kw) lives in phase (kh % s, kw % s) at shift (kh//s, kw//s).
    Output block: (1, ho, wo, C).  Exactly ho*wo outputs are computed and stored.
    """
    o_ref = refs[-1]
    vals = [r[...] for r in refs[:-1]]
    out = None
    for kh in range(k):
        for kw in range(k):
            v = vals[(kh % s) * s + (kw % s)]
            v = v[:, kh // s:kh // s + ho, kw // s:kw // s + wo, :]
            out = v if out is None else jnp.maximum(out, v)
    o_ref[...] = out


def _tail_kernel(p2_ref, w2_ref, b2_ref, w3_ref, b3_ref, w1_ref, b1_ref,
                 wf2_ref, bf2_ref, wh_ref, bh_ref, o_ref):
    """Fused conv2+ReLU -> conv3+ReLU -> pool2 -> fc1+ReLU -> fc2+ReLU -> head.

    p2_ref : (36, tb, 512)  conv2 im2col patches, spatial-major (row = oh*6+ow),
                            patch columns ordered (kh, kw, cin).
    w2_ref : (512, 64)      conv2 weight, rows in (kh, kw, cin) order.
    w3_ref : (4, 64, 128)   conv3 weight per tap (row = kh*2+kw).
    w1_ref : (4, 128, 256)  fc1 weight per pooled tap (row = hp*2+wp), rows
                            already permuted to NHWC channel order.
    All weights stay VMEM-resident; intermediates never touch HBM.
    """
    # conv2 + ReLU: 6x6 output positions, each (tb, 64).
    y2 = []
    for t in range(36):
        a = jnp.dot(p2_ref[t], w2_ref[...], preferred_element_type=jnp.float32)
        y2.append(jnp.maximum(a + b2_ref[...], 0.0).astype(jnp.bfloat16))
    # conv3 (k=2, s=2) + ReLU: 3x3 output positions, each (tb, 128).
    y3 = []
    for oh in range(3):
        for ow in range(3):
            acc = None
            for kh in range(2):
                for kw in range(2):
                    t = (2 * oh + kh) * 6 + (2 * ow + kw)
                    d = jnp.dot(y2[t], w3_ref[kh * 2 + kw],
                                preferred_element_type=jnp.float32)
                    acc = d if acc is None else acc + d
            y3.append(jnp.maximum(acc + b3_ref[...], 0.0))
    # pool2 (k=2, s=1, p=0) taps + fc1 accumulated per tap, then ReLU.
    acc1 = None
    for hp in range(2):
        for wp in range(2):
            p = jnp.maximum(
                jnp.maximum(y3[hp * 3 + wp], y3[hp * 3 + wp + 1]),
                jnp.maximum(y3[(hp + 1) * 3 + wp], y3[(hp + 1) * 3 + wp + 1]),
            )
            d = jnp.dot(p.astype(jnp.bfloat16), w1_ref[hp * 2 + wp],
                        preferred_element_type=jnp.float32)
            acc1 = d if acc1 is None else acc1 + d
    h1 = jnp.maximum(acc1 + b1_ref[...], 0.0)                            # fc1 + ReLU
    h2 = jnp.dot(h1.astype(jnp.bfloat16), wf2_ref[...],
                 preferred_element_type=jnp.float32) + bf2_ref[...]
    h2 = jnp.maximum(h2, 0.0)                                            # fc2 + ReLU
    out = jnp.dot(h2.astype(jnp.bfloat16), wh_ref[...],
                  preferred_element_type=jnp.float32) + bh_ref[...]      # head
    o_ref[...] = out.astype(o_ref.dtype)


# ----------------------------------------------------------------------------
# Wrappers (all XLA glue is layout-only: slices / concats / reshapes / casts)
# ----------------------------------------------------------------------------
def _pick_row_tile(m):
    if m <= 512:      # single full block (full-extent blocks are exempt from (8,128))
        return m
    for t in (1024, 896, 784, 768, 640, 512, 448, 392, 384,
              256, 224, 128, 112, 64, 56, 32, 16, 8):     # all multiples of 8
        if t <= m and m % t == 0:
            return t
    return m


def linear_relu(x, w, b):
    """relu(x @ w + b); bf16 MXU inputs, f32 accumulate, row-tiled grid."""
    M, K = x.shape
    N = w.shape[1]
    tm = _pick_row_tile(M)
    return pl.pallas_call(
        _matmul_bias_relu_kernel,
        out_shape=jax.ShapeDtypeStruct((M, N), jnp.float32),
        grid=(M // tm,),
        in_specs=[
            pl.BlockSpec((tm, K), lambda i: (i, 0)),
            pl.BlockSpec((K, N), lambda i: (0, 0)),
            pl.BlockSpec((1, N), lambda i: (0, 0)),
        ],
        out_specs=pl.BlockSpec((tm, N), lambda i: (i, 0)),
        compiler_params=pltpu.CompilerParams(dimension_semantics=("parallel",)),
    )(x.astype(jnp.bfloat16), w.astype(jnp.bfloat16),
      b.reshape(1, N).astype(jnp.float32))


def maxpool2d(x, *, kernel, stride, padding):
    """torch.nn.MaxPool2d (floor mode) on an NHWC tensor; stride handled in-kernel."""
    B, H, W, C = x.shape
    if padding:
        x = jnp.pad(x, ((0, 0), (padding, padding), (padding, padding), (0, 0)),
                    constant_values=-jnp.inf)
    Hp, Wp = H + 2 * padding, W + 2 * padding
    Ho = (Hp - kernel) // stride + 1
    Wo = (Wp - kernel) // stride + 1
    # Parity-phase split (pure strided slices, XLA side) so the kernel needs only
    # unit-stride windows and computes exactly the Ho x Wo outputs it stores.
    phases = [x[:, ph::stride, pw::stride, :]
              for ph in range(stride) for pw in range(stride)]
    kern = functools.partial(_maxpool_kernel, k=kernel, s=stride, ho=Ho, wo=Wo)
    return pl.pallas_call(
        kern,
        out_shape=jax.ShapeDtypeStruct((B, Ho, Wo, C), x.dtype),
        grid=(B,),
        in_specs=[pl.BlockSpec((1,) + p.shape[1:], lambda b: (b, 0, 0, 0))
                  for p in phases],
        out_specs=pl.BlockSpec((1, Ho, Wo, C), lambda b: (b, 0, 0, 0)),
        compiler_params=pltpu.CompilerParams(dimension_semantics=("parallel",)),
    )(*phases)


def _im2col_nhwc(x, k, s):
    """NHWC -> (B, Ho, Wo, k*k*C) patches, last-dim order (kh, kw, c). No transpose."""
    B, H, W, C = x.shape
    Ho = (H - k) // s + 1
    Wo = (W - k) // s + 1
    cols = []
    for kh in range(k):
        for kw in range(k):
            cols.append(x[:, kh:kh + s * (Ho - 1) + 1:s, kw:kw + s * (Wo - 1) + 1:s, :])
    return jnp.concatenate(cols, axis=-1), Ho, Wo


def conv2d_relu(x, w, b, *, stride):
    """x: NHWC, w: torch layout (Cout, Cin, kh, kw). Returns NHWC with ReLU applied."""
    Cout, Cin, k, _ = w.shape
    B = x.shape[0]
    patches, Ho, Wo = _im2col_nhwc(x, k, stride)                       # (B,Ho,Wo,kkCin)
    wm = w.transpose(2, 3, 1, 0).reshape(k * k * Cin, Cout)            # rows (kh,kw,cin)
    y = linear_relu(patches.reshape(B * Ho * Wo, k * k * Cin), wm, b)
    return y.reshape(B, Ho, Wo, Cout)


def fused_tail(x, params):
    """conv2 -> conv3 -> pool2 -> view(B,-1) -> fc1 -> fc2 -> head, one pallas_call.

    x: pool1 output, NHWC (B, 14, 14, 32), float32.
    """
    B, H, W, C = x.shape
    assert (H, W, C) == (14, 14, 32)
    # conv2 im2col (k=4, s=2) on the tiny pooled activation; spatial-major rows.
    patches, Ho, Wo = _im2col_nhwc(x.astype(jnp.bfloat16), 4, 2)       # (B, 6, 6, 512)
    S, K2 = Ho * Wo, 4 * 4 * C                                         # 36, 512
    p2 = patches.reshape(B, S, K2).transpose(1, 0, 2)                  # (36, B, 512)

    n1 = params["fc1_b"].shape[0]
    n2 = params["fc2_b"].shape[0]
    na = params["head_b"].shape[0]
    # conv weights -> (kh,kw,cin) x cout (conv2) / per-tap (conv3), matching NHWC patches.
    w2 = params["conv2_w"].transpose(2, 3, 1, 0).reshape(K2, 64)
    w3 = params["conv3_w"].transpose(2, 3, 1, 0).reshape(4, 64, 128)
    # fc1 rows are stored in torch's NCHW flatten order (c, hp, wp); permute once to
    # tap-major (hp, wp, c) so the NHWC pooled taps hit the matching rows.
    w1 = params["fc1_w"].reshape(128, 2, 2, n1).transpose(1, 2, 0, 3).reshape(4, 128, n1)

    tb = _pick_row_tile(B)
    return pl.pallas_call(
        _tail_kernel,
        out_shape=jax.ShapeDtypeStruct((B, na), jnp.float32),
        grid=(B // tb,),
        in_specs=[
            pl.BlockSpec((S, tb, K2), lambda i: (0, i, 0)),
            pl.BlockSpec((K2, 64), lambda i: (0, 0)),
            pl.BlockSpec((1, 64), lambda i: (0, 0)),
            pl.BlockSpec((4, 64, 128), lambda i: (0, 0, 0)),
            pl.BlockSpec((1, 128), lambda i: (0, 0)),
            pl.BlockSpec((4, 128, n1), lambda i: (0, 0, 0)),
            pl.BlockSpec((1, n1), lambda i: (0, 0)),
            pl.BlockSpec((n1, n2), lambda i: (0, 0)),
            pl.BlockSpec((1, n2), lambda i: (0, 0)),
            pl.BlockSpec((n2, na), lambda i: (0, 0)),
            pl.BlockSpec((1, na), lambda i: (0, 0)),
        ],
        out_specs=pl.BlockSpec((tb, na), lambda i: (i, 0)),
        compiler_params=pltpu.CompilerParams(dimension_semantics=("parallel",)),
    )(
        p2,
        w2.astype(jnp.bfloat16),
        params["conv2_b"].reshape(1, 64).astype(jnp.float32),
        w3.astype(jnp.bfloat16),
        params["conv3_b"].reshape(1, 128).astype(jnp.float32),
        w1.astype(jnp.bfloat16),
        params["fc1_b"].reshape(1, n1).astype(jnp.float32),
        params["fc2_w"].astype(jnp.bfloat16),
        params["fc2_b"].reshape(1, n2).astype(jnp.float32),
        params["head_w"].astype(jnp.bfloat16),
        params["head_b"].reshape(1, na).astype(jnp.float32),
    )


# ----------------------------------------------------------------------------
# DQN forward
# ----------------------------------------------------------------------------
def dqn_forward(params, x):
    """x: NCHW float32 (torch convention). Returns (B, NUM_ACTIONS) float32."""
    x = jnp.transpose(x, (0, 2, 3, 1)).astype(jnp.bfloat16)             # one-time NHWC
    x = conv2d_relu(x, params["conv1_w"], params["conv1_b"], stride=4)  # relu(conv1)
    x = maxpool2d(x, kernel=4, stride=2, padding=1)                     # pool1
    return fused_tail(x, params)   # conv2+conv3+pool2+fc1+fc2+head, fully fused


def init_params(key):
    """Deterministic init mimicking PyTorch's default uniform(-1/sqrt(fan_in), ...)."""
    keys = jax.random.split(key, 12)

    def u(k, shape, fan_in):
        bound = 1.0 / math.sqrt(fan_in)
        return jax.random.uniform(k, shape, jnp.float32, -bound, bound)

    p = {}
    p["conv1_w"] = u(keys[0], (32, IMG_CHANNELS, 8, 8), IMG_CHANNELS * 64)
    p["conv1_b"] = u(keys[1], (32,), IMG_CHANNELS * 64)
    p["conv2_w"] = u(keys[2], (64, 32, 4, 4), 32 * 16)
    p["conv2_b"] = u(keys[3], (64,), 32 * 16)
    p["conv3_w"] = u(keys[4], (128, 64, 2, 2), 64 * 4)
    p["conv3_b"] = u(keys[5], (128,), 64 * 4)
    # Linear weights stored as (in, out) so kernels do x @ W directly (equivalent
    # to torch's x @ weight.T).  fc1 rows are in torch's NCHW flatten order.
    p["fc1_w"] = u(keys[6], (512, 256), 512)
    p["fc1_b"] = u(keys[7], (256,), 512)
    p["fc2_w"] = u(keys[8], (256, 10), 256)
    p["fc2_b"] = u(keys[9], (10,), 256)
    p["head_w"] = u(keys[10], (10, NUM_ACTIONS), 10)
    p["head_b"] = u(keys[11], (NUM_ACTIONS,), 10)
    return p


if __name__ == "__main__":
    root = jax.random.PRNGKey(0)
    k_params, k_x = jax.random.split(root)
    params = init_params(k_params)
    # 116x116 is the smallest input for which fc1's in_features=512 is consistent.
    x = jax.random.normal(k_x, (2, IMG_CHANNELS, 116, 116), dtype=jnp.float32)

    out = jax.jit(dqn_forward)(params, x)
    out = jax.block_until_ready(out)
    assert out.shape == (2, NUM_ACTIONS), out.shape
    assert out.dtype == jnp.float32
    print("KERNEL_OK")
</pallas_src>

<mosaic_0001>
module attributes {stable_mosaic.version = 11 : i64} {
  func.func @_matmul_bias_relu_kernel(%arg0: i32, %arg1: memref<784x256xbf16, #tpu.memory_space<vmem>>, %arg2: memref<256x32xbf16, #tpu.memory_space<vmem>>, %arg3: memref<1x32xf32, #tpu.memory_space<vmem>>, %arg4: memref<784x32xf32, #tpu.memory_space<vmem>>) attributes {dimension_semantics = [#tpu.dimension_semantics<parallel>], iteration_bounds = array<i64: 2>, scalar_prefetch = 0 : i64, scratch_operands = 0 : i64, tpu.core_type = #tpu.core_type<tc>, window_params = [{transform_indices = @transform_0, window_bounds = array<i64: 784, 256>}, {pipeline_mode = #tpu.pipeline_mode<synchronous>, transform_indices = @transform_1, window_bounds = array<i64: 256, 32>}, {pipeline_mode = #tpu.pipeline_mode<synchronous>, transform_indices = @transform_2, window_bounds = array<i64: 1, 32>}, {transform_indices = @transform_3, window_bounds = array<i64: 784, 32>}]} {
    %c0 = arith.constant 0 : index
    %c0_0 = arith.constant 0 : index
    %0 = vector.load %arg1[%c0, %c0_0] : memref<784x256xbf16, #tpu.memory_space<vmem>>, vector<784x256xbf16>
    %c0_1 = arith.constant 0 : index
    %c0_2 = arith.constant 0 : index
    %1 = vector.load %arg2[%c0_1, %c0_2] : memref<256x32xbf16, #tpu.memory_space<vmem>>, vector<256x32xbf16>
    %cst = arith.constant dense<0.000000e+00> : vector<784x32xf32>
    %2 = tpu.matmul %0, %1, %cst {dimension_numbers = #tpu.dot_dimension_numbers<[1], [0], [0], [1], [0, 0, 1, 1], [], []>} : vector<784x256xbf16>, vector<256x32xbf16>, vector<784x32xf32> -> vector<784x32xf32>
    %c0_3 = arith.constant 0 : index
    %c0_4 = arith.constant 0 : index
    %3 = vector.load %arg3[%c0_3, %c0_4] : memref<1x32xf32, #tpu.memory_space<vmem>>, vector<1x32xf32>
    %4 = vector.broadcast %3 : vector<1x32xf32> to vector<784x32xf32>
    %5 = arith.addf %2, %4 : vector<784x32xf32>
    %cst_5 = arith.constant 0.000000e+00 : f32
    %6 = vector.broadcast %cst_5 : f32 to vector<784x32xf32>
    %7 = arith.maximumf %5, %6 : vector<784x32xf32>
    %c0_6 = arith.constant 0 : index
    %c0_7 = arith.constant 0 : index
    %8 = vector.load %arg4[%c0_6, %c0_7] : memref<784x32xf32, #tpu.memory_space<vmem>>, vector<784x32xf32>
    tpu.vector_store %arg4[%c0_6, %c0_7], %7 {strides = array<i32>} : memref<784x32xf32, #tpu.memory_space<vmem>>, vector<784x32xf32>,
    return
  }
  func.func @transform_0(%arg0: i32) -> (i32, i32) {
    %c0_i32 = arith.constant 0 : i32
    %c0_i32_0 = arith.constant 0 : i32
    return %arg0, %c0_i32 : i32, i32
  }
  func.func @transform_1(%arg0: i32) -> (i32, i32) {
    %c0_i32 = arith.constant 0 : i32
    %c0_i32_0 = arith.constant 0 : i32
    %c0_i32_1 = arith.constant 0 : i32
    return %c0_i32, %c0_i32_0 : i32, i32
  }
  func.func @transform_2(%arg0: i32) -> (i32, i32) {
    %c0_i32 = arith.constant 0 : i32
    %c0_i32_0 = arith.constant 0 : i32
    %c0_i32_1 = arith.constant 0 : i32
    return %c0_i32, %c0_i32_0 : i32, i32
  }
  func.func @transform_3(%arg0: i32) -> (i32, i32) {
    %c0_i32 = arith.constant 0 : i32
    %c0_i32_0 = arith.constant 0 : i32
    return %arg0, %c0_i32 : i32, i32
  }
}

module attributes {stable_mosaic.version = 11 : i64} {
  func.func @_maxpool_kernel(%arg0: i32, %arg1: memref<1x15x15x32xf32, #tpu.memory_space<vmem>>, %arg2: memref<1x15x15x32xf32, #tpu.memory_space<vmem>>, %arg3: memref<1x15x15x32xf32, #tpu.memory_space<vmem>>, %arg4: memref<1x15x15x32xf32, #tpu.memory_space<vmem>>, %arg5: memref<1x14x14x32xf32, #tpu.memory_space<vmem>>) attributes {dimension_semantics = [#tpu.dimension_semantics<parallel>], iteration_bounds = array<i64: 2>, scalar_prefetch = 0 : i64, scratch_operands = 0 : i64, tpu.core_type = #tpu.core_type<tc>, window_params = [{transform_indices = @transform_0, window_bounds = array<i64: 1, 15, 15, 32>}, {transform_indices = @transform_1, window_bounds = array<i64: 1, 15, 15, 32>}, {transform_indices = @transform_2, window_bounds = array<i64: 1, 15, 15, 32>}, {transform_indices = @transform_3, window_bounds = array<i64: 1, 15, 15, 32>}, {transform_indices = @transform_4, window_bounds = array<i64: 1, 14, 14, 32>}]} {
    %c0 = arith.constant 0 : index
    %c0_0 = arith.constant 0 : index
    %c0_1 = arith.constant 0 : index
    %c0_2 = arith.constant 0 : index
    %0 = vector.load %arg1[%c0, %c0_0, %c0_1, %c0_2] : memref<1x15x15x32xf32, #tpu.memory_space<vmem>>, vector<1x15x15x32xf32>
    %c0_3 = arith.constant 0 : index
    %c0_4 = arith.constant 0 : index
    %c0_5 = arith.constant 0 : index
    %c0_6 = arith.constant 0 : index
    %1 = vector.load %arg2[%c0_3, %c0_4, %c0_5, %c0_6] : memref<1x15x15x32xf32, #tpu.memory_space<vmem>>, vector<1x15x15x32xf32>
    %c0_7 = arith.constant 0 : index
    %c0_8 = arith.constant 0 : index
    %c0_9 = arith.constant 0 : index
    %c0_10 = arith.constant 0 : index
    %2 = vector.load %arg3[%c0_7, %c0_8, %c0_9, %c0_10] : memref<1x15x15x32xf32, #tpu.memory_space<vmem>>, vector<1x15x15x32xf32>
    %c0_11 = arith.constant 0 : index
    %c0_12 = arith.constant 0 : index
    %c0_13 = arith.constant 0 : index
    %c0_14 = arith.constant 0 : index
    %3 = vector.load %arg4[%c0_11, %c0_12, %c0_13, %c0_14] : memref<1x15x15x32xf32, #tpu.memory_space<vmem>>, vector<1x15x15x32xf32>
    %4 = vector.extract_strided_slice %0 {offsets = [0, 0, 0, 0], sizes = [1, 14, 14, 32], strides = [1, 1, 1, 1]} : vector<1x15x15x32xf32> to vector<1x14x14x32xf32>
    %5 = vector.extract_strided_slice %1 {offsets = [0, 0, 0, 0], sizes = [1, 14, 14, 32], strides = [1, 1, 1, 1]} : vector<1x15x15x32xf32> to vector<1x14x14x32xf32>
    %6 = arith.maximumf %4, %5 : vector<1x14x14x32xf32>
    %7 = vector.extract_strided_slice %0 {offsets = [0, 0, 1, 0], sizes = [1, 14, 14, 32], strides = [1, 1, 1, 1]} : vector<1x15x15x32xf32> to vector<1x14x14x32xf32>
    %8 = arith.maximumf %6, %7 : vector<1x14x14x32xf32>
    %9 = vector.extract_strided_slice %1 {offsets = [0, 0, 1, 0], sizes = [1, 14, 14, 32], strides = [1, 1, 1, 1]} : vector<1x15x15x32xf32> to vector<1x14x14x32xf32>
    %10 = arith.maximumf %8, %9 : vector<1x14x14x32xf32>
    %11 = vector.extract_strided_slice %2 {offsets = [0, 0, 0, 0], sizes = [1, 14, 14, 32], strides = [1, 1, 1, 1]} : vector<1x15x15x32xf32> to vector<1x14x14x32xf32>
    %12 = arith.maximumf %10, %11 : vector<1x14x14x32xf32>
    %13 = vector.extract_strided_slice %3 {offsets = [0, 0, 0, 0], sizes = [1, 14, 14, 32], strides = [1, 1, 1, 1]} : vector<1x15x15x32xf32> to vector<1x14x14x32xf32>
    %14 = arith.maximumf %12, %13 : vector<1x14x14x32xf32>
    %15 = vector.extract_strided_slice %2 {offsets = [0, 0, 1, 0], sizes = [1, 14, 14, 32], strides = [1, 1, 1, 1]} : vector<1x15x15x32xf32> to vector<1x14x14x32xf32>
    %16 = arith.maximumf %14, %15 : vector<1x14x14x32xf32>
    %17 = vector.extract_strided_slice %3 {offsets = [0, 0, 1, 0], sizes = [1, 14, 14, 32], strides = [1, 1, 1, 1]} : vector<1x15x15x32xf32> to vector<1x14x14x32xf32>
    %18 = arith.maximumf %16, %17 : vector<1x14x14x32xf32>
    %19 = vector.extract_strided_slice %0 {offsets = [0, 1, 0, 0], sizes = [1, 14, 14, 32], strides = [1, 1, 1, 1]} : vector<1x15x15x32xf32> to vector<1x14x14x32xf32>
    %20 = arith.maximumf %18, %19 : vector<1x14x14x32xf32>
    %21 = vector.extract_strided_slice %1 {offsets = [0, 1, 0, 0], sizes = [1, 14, 14, 32], strides = [1, 1, 1, 1]} : vector<1x15x15x32xf32> to vector<1x14x14x32xf32>
    %22 = arith.maximumf %20, %21 : vector<1x14x14x32xf32>
    %23 = vector.extract_strided_slice %0 {offsets = [0, 1, 1, 0], sizes = [1, 14, 14, 32], strides = [1, 1, 1, 1]} : vector<1x15x15x32xf32> to vector<1x14x14x32xf32>
    %24 = arith.maximumf %22, %23 : vector<1x14x14x32xf32>
    %25 = vector.extract_strided_slice %1 {offsets = [0, 1, 1, 0], sizes = [1, 14, 14, 32], strides = [1, 1, 1, 1]} : vector<1x15x15x32xf32> to vector<1x14x14x32xf32>
    %26 = arith.maximumf %24, %25 : vector<1x14x14x32xf32>
    %27 = vector.extract_strided_slice %2 {offsets = [0, 1, 0, 0], sizes = [1, 14, 14, 32], strides = [1, 1, 1, 1]} : vector<1x15x15x32xf32> to vector<1x14x14x32xf32>
    %28 = arith.maximumf %26, %27 : vector<1x14x14x32xf32>
    %29 = vector.extract_strided_slice %3 {offsets = [0, 1, 0, 0], sizes = [1, 14, 14, 32], strides = [1, 1, 1, 1]} : vector<1x15x15x32xf32> to vector<1x14x14x32xf32>
    %30 = arith.maximumf %28, %29 : vector<1x14x14x32xf32>
    %31 = vector.extract_strided_slice %2 {offsets = [0, 1, 1, 0], sizes = [1, 14, 14, 32], strides = [1, 1, 1, 1]} : vector<1x15x15x32xf32> to vector<1x14x14x32xf32>
    %32 = arith.maximumf %30, %31 : vector<1x14x14x32xf32>
    %33 = vector.extract_strided_slice %3 {offsets = [0, 1, 1, 0], sizes = [1, 14, 14, 32], strides = [1, 1, 1, 1]} : vector<1x15x15x32xf32> to vector<1x14x14x32xf32>
    %34 = arith.maximumf %32, %33 : vector<1x14x14x32xf32>
    %c0_15 = arith.constant 0 : index
    %c0_16 = arith.constant 0 : index
    %c0_17 = arith.constant 0 : index
    %c0_18 = arith.constant 0 : index
    %35 = vector.load %arg5[%c0_15, %c0_16, %c0_17, %c0_18] : memref<1x14x14x32xf32, #tpu.memory_space<vmem>>, vector<1x14x14x32xf32>
    tpu.vector_store %arg5[%c0_15, %c0_16, %c0_17, %c0_18], %34 {strides = array<i32>} : memref<1x14x14x32xf32, #tpu.memory_space<vmem>>, vector<1x14x14x32xf32>,
    return
  }
  func.func @transform_0(%arg0: i32) -> (i32, i32, i32, i32) {
    %c0_i32 = arith.constant 0 : i32
    %c0_i32_0 = arith.constant 0 : i32
    %c0_i32_1 = arith.constant 0 : i32
    %c0_i32_2 = arith.constant 0 : i32
    return %arg0, %c0_i32, %c0_i32_0, %c0_i32_1 : i32, i32, i32, i32
  }
  func.func @transform_1(%arg0: i32) -> (i32, i32, i32, i32) {
    %c0_i32 = arith.constant 0 : i32
    %c0_i32_0 = arith.constant 0 : i32
    %c0_i32_1 = arith.constant 0 : i32
    %c0_i32_2 = arith.constant 0 : i32
    return %arg0, %c0_i32, %c0_i32_0, %c0_i32_1 : i32, i32, i32, i32
  }
  func.func @transform_2(%arg0: i32) -> (i32, i32, i32, i32) {
    %c0_i32 = arith.constant 0 : i32
    %c0_i32_0 = arith.constant 0 : i32
    %c0_i32_1 = arith.constant 0 : i32
    %c0_i32_2 = arith.constant 0 : i32
    return %arg0, %c0_i32, %c0_i32_0, %c0_i32_1 : i32, i32, i32, i32
  }
  func.func @transform_3(%arg0: i32) -> (i32, i32, i32, i32) {
    %c0_i32 = arith.constant 0 : i32
    %c0_i32_0 = arith.constant 0 : i32
    %c0_i32_1 = arith.constant 0 : i32
    %c0_i32_2 = arith.constant 0 : i32
    return %arg0, %c0_i32, %c0_i32_0, %c0_i32_1 : i32, i32, i32, i32
  }
  func.func @transform_4(%arg0: i32) -> (i32, i32, i32, i32) {
    %c0_i32 = arith.constant 0 : i32
    %c0_i32_0 = arith.constant 0 : i32
    %c0_i32_1 = arith.constant 0 : i32
    %c0_i32_2 = arith.constant 0 : i32
    return %arg0, %c0_i32, %c0_i32_0, %c0_i32_1 : i32, i32, i32, i32
  }
}

module attributes {stable_mosaic.version = 11 : i64} {
  func.func @_tail_kernel(%arg0: i32, %arg1: memref<36x2x512xbf16, #tpu.memory_space<vmem>>, %arg2: memref<512x64xbf16, #tpu.memory_space<vmem>>, %arg3: memref<1x64xf32, #tpu.memory_space<vmem>>, %arg4: memref<4x64x128xbf16, #tpu.memory_space<vmem>>, %arg5: memref<1x128xf32, #tpu.memory_space<vmem>>, %arg6: memref<4x128x256xbf16, #tpu.memory_space<vmem>>, %arg7: memref<1x256xf32, #tpu.memory_space<vmem>>, %arg8: memref<256x10xbf16, #tpu.memory_space<vmem>>, %arg9: memref<1x10xf32, #tpu.memory_space<vmem>>, %arg10: memref<10x6xbf16, #tpu.memory_space<vmem>>, %arg11: memref<1x6xf32, #tpu.memory_space<vmem>>, %arg12: memref<2x6xf32, #tpu.memory_space<vmem>>) attributes {dimension_semantics = [#tpu.dimension_semantics<parallel>], iteration_bounds = array<i64: 1>, scalar_prefetch = 0 : i64, scratch_operands = 0 : i64, tpu.core_type = #tpu.core_type<tc>, window_params = [{transform_indices = @transform_0, window_bounds = array<i64: 36, 2, 512>}, {pipeline_mode = #tpu.pipeline_mode<synchronous>, transform_indices = @transform_1, window_bounds = array<i64: 512, 64>}, {pipeline_mode = #tpu.pipeline_mode<synchronous>, transform_indices = @transform_2, window_bounds = array<i64: 1, 64>}, {pipeline_mode = #tpu.pipeline_mode<synchronous>, transform_indices = @transform_3, window_bounds = array<i64: 4, 64, 128>}, {pipeline_mode = #tpu.pipeline_mode<synchronous>, transform_indices = @transform_4, window_bounds = array<i64: 1, 128>}, {pipeline_mode = #tpu.pipeline_mode<synchronous>, transform_indices = @transform_5, window_bounds = array<i64: 4, 128, 256>}, {pipeline_mode = #tpu.pipeline_mode<synchronous>, transform_indices = @transform_6, window_bounds = array<i64: 1, 256>}, {pipeline_mode = #tpu.pipeline_mode<synchronous>, transform_indices = @transform_7, window_bounds = array<i64: 256, 10>}, {pipeline_mode = #tpu.pipeline_mode<synchronous>, transform_indices = @transform_8, window_bounds = array<i64: 1, 10>}, {pipeline_mode = #tpu.pipeline_mode<synchronous>, transform_indices = @transform_9, window_bounds = array<i64: 10, 6>}, {pipeline_mode = #tpu.pipeline_mode<synchronous>, transform_indices = @transform_10, window_bounds = array<i64: 1, 6>}, {transform_indices = @transform_11, window_bounds = array<i64: 2, 6>}]} {
    %c0 = arith.constant 0 : index
    %c0_0 = arith.constant 0 : index
    %c0_1 = arith.constant 0 : index
    %0 = vector.load %arg1[%c0, %c0_0, %c0_1] : memref<36x2x512xbf16, #tpu.memory_space<vmem>>, vector<1x2x512xbf16>
    %1 = vector.shape_cast %0 : vector<1x2x512xbf16> to vector<2x512xbf16>
    %c0_2 = arith.constant 0 : index
    %c0_3 = arith.constant 0 : index
    %2 = vector.load %arg2[%c0_2, %c0_3] : memref<512x64xbf16, #tpu.memory_space<vmem>>, vector<512x64xbf16>
    %cst = arith.constant dense<0.000000e+00> : vector<2x64xf32>
    %3 = tpu.matmul %1, %2, %cst {dimension_numbers = #tpu.dot_dimension_numbers<[1], [0], [0], [1], [0, 0, 1, 1], [], []>} : vector<2x512xbf16>, vector<512x64xbf16>, vector<2x64xf32> -> vector<2x64xf32>
    %c0_4 = arith.constant 0 : index
    %c0_5 = arith.constant 0 : index
    %4 = vector.load %arg3[%c0_4, %c0_5] : memref<1x64xf32, #tpu.memory_space<vmem>>, vector<1x64xf32>
    %5 = vector.broadcast %4 : vector<1x64xf32> to vector<2x64xf32>
    %6 = arith.addf %3, %5 : vector<2x64xf32>
    %cst_6 = arith.constant 0.000000e+00 : f32
    %7 = vector.broadcast %cst_6 : f32 to vector<2x64xf32>
    %8 = arith.maximumf %6, %7 : vector<2x64xf32>
    %9 = arith.truncf %8 : vector<2x64xf32> to vector<2x64xbf16>
    %c1 = arith.constant 1 : index
    %c0_7 = arith.constant 0 : index
    %c0_8 = arith.constant 0 : index
    %10 = vector.load %arg1[%c1, %c0_7, %c0_8] : memref<36x2x512xbf16, #tpu.memory_space<vmem>>, vector<1x2x512xbf16>
    %11 = vector.shape_cast %10 : vector<1x2x512xbf16> to vector<2x512xbf16>
    %c0_9 = arith.constant 0 : index
    %c0_10 = arith.constant 0 : index
    %12 = vector.load %arg2[%c0_9, %c0_10] : memref<512x64xbf16, #tpu.memory_space<vmem>>, vector<512x64xbf16>
    %cst_11 = arith.constant dense<0.000000e+00> : vector<2x64xf32>
    %13 = tpu.matmul %11, %12, %cst_11 {dimension_numbers = #tpu.dot_dimension_numbers<[1], [0], [0], [1], [0, 0, 1, 1], [], []>} : vector<2x512xbf16>, vector<512x64xbf16>, vector<2x64xf32> -> vector<2x64xf32>
    %c0_12 = arith.constant 0 : index
    %c0_13 = arith.constant 0 : index
    %14 = vector.load %arg3[%c0_12, %c0_13] : memref<1x64xf32, #tpu.memory_space<vmem>>, vector<1x64xf32>
    %15 = vector.broadcast %14 : vector<1x64xf32> to vector<2x64xf32>
    %16 = arith.addf %13, %15 : vector<2x64xf32>
    %cst_14 = arith.constant 0.000000e+00 : f32
    %17 = vector.broadcast %cst_14 : f32 to vector<2x64xf32>
    %18 = arith.maximumf %16, %17 : vector<2x64xf32>
    %19 = arith.truncf %18 : vector<2x64xf32> to vector<2x64xbf16>
    %c2 = arith.constant 2 : index
    %c0_15 = arith.constant 0 : index
    %c0_16 = arith.constant 0 : index
    %20 = vector.load %arg1[%c2, %c0_15, %c0_16] : memref<36x2x512xbf16, #tpu.memory_space<vmem>>, vector<1x2x512xbf16>
    %21 = vector.shape_cast %20 : vector<1x2x512xbf16> to vector<2x512xbf16>
    %c0_17 = arith.constant 0 : index
    %c0_18 = arith.constant 0 : index
    %22 = vector.load %arg2[%c0_17, %c0_18] : memref<512x64xbf16, #tpu.memory_space<vmem>>, vector<512x64xbf16>
    %cst_19 = arith.constant dense<0.000000e+00> : vector<2x64xf32>
    %23 = tpu.matmul %21, %22, %cst_19 {dimension_numbers = #tpu.dot_dimension_numbers<[1], [0], [0], [1], [0, 0, 1, 1], [], []>} : vector<2x512xbf16>, vector<512x64xbf16>, vector<2x64xf32> -> vector<2x64xf32>
    %c0_20 = arith.constant 0 : index
    %c0_21 = arith.constant 0 : index
    %24 = vector.load %arg3[%c0_20, %c0_21] : memref<1x64xf32, #tpu.memory_space<vmem>>, vector<1x64xf32>
    %25 = vector.broadcast %24 : vector<1x64xf32> to vector<2x64xf32>
    %26 = arith.addf %23, %25 : vector<2x64xf32>
    %cst_22 = arith.constant 0.000000e+00 : f32
    %27 = vector.broadcast %cst_22 : f32 to vector<2x64xf32>
    %28 = arith.maximumf %26, %27 : vector<2x64xf32>
    %29 = arith.truncf %28 : vector<2x64xf32> to vector<2x64xbf16>
    %c3 = arith.constant 3 : index
    %c0_23 = arith.constant 0 : index
    %c0_24 = arith.constant 0 : index
    %30 = vector.load %arg1[%c3, %c0_23, %c0_24] : memref<36x2x512xbf16, #tpu.memory_space<vmem>>, vector<1x2x512xbf16>
    %31 = vector.shape_cast %30 : vector<1x2x512xbf16> to vector<2x512xbf16>
    %c0_25 = arith.constant 0 : index
    %c0_26 = arith.constant 0 : index
    %32 = vector.load %arg2[%c0_25, %c0_26] : memref<512x64xbf16, #tpu.memory_space<vmem>>, vector<512x64xbf16>
    %cst_27 = arith.constant dense<0.000000e+00> : vector<2x64xf32>
    %33 = tpu.matmul %31, %32, %cst_27 {dimension_numbers = #tpu.dot_dimension_numbers<[1], [0], [0], [1], [0, 0, 1, 1], [], []>} : vector<2x512xbf16>, vector<512x64xbf16>, vector<2x64xf32> -> vector<2x64xf32>
    %c0_28 = arith.constant 0 : index
    %c0_29 = arith.constant 0 : index
    %34 = vector.load %arg3[%c0_28, %c0_29] : memref<1x64xf32, #tpu.memory_space<vmem>>, vector<1x64xf32>
    %35 = vector.broadcast %34 : vector<1x64xf32> to vector<2x64xf32>
    %36 = arith.addf %33, %35 : vector<2x64xf32>
    %cst_30 = arith.constant 0.000000e+00 : f32
    %37 = vector.broadcast %cst_30 : f32 to vector<2x64xf32>
    %38 = arith.maximumf %36, %37 : vector<2x64xf32>
    %39 = arith.truncf %38 : vector<2x64xf32> to vector<2x64xbf16>
    %c4 = arith.constant 4 : index
    %c0_31 = arith.constant 0 : index
    %c0_32 = arith.constant 0 : index
    %40 = vector.load %arg1[%c4, %c0_31, %c0_32] : memref<36x2x512xbf16, #tpu.memory_space<vmem>>, vector<1x2x512xbf16>
    %41 = vector.shape_cast %40 : vector<1x2x512xbf16> to vector<2x512xbf16>
    %c0_33 = arith.constant 0 : index
    %c0_34 = arith.constant 0 : index
    %42 = vector.load %arg2[%c0_33, %c0_34] : memref<512x64xbf16, #tpu.memory_space<vmem>>, vector<512x64xbf16>
    %cst_35 = arith.constant dense<0.000000e+00> : vector<2x64xf32>
    %43 = tpu.matmul %41, %42, %cst_35 {dimension_numbers = #tpu.dot_dimension_numbers<[1], [0], [0], [1], [0, 0, 1, 1], [], []>} : vector<2x512xbf16>, vector<512x64xbf16>, vector<2x64xf32> -> vector<2x64xf32>
    %c0_36 = arith.constant 0 : index
    %c0_37 = arith.constant 0 : index
    %44 = vector.load %arg3[%c0_36, %c0_37] : memref<1x64xf32, #tpu.memory_space<vmem>>, vector<1x64xf32>
    %45 = vector.broadcast %44 : vector<1x64xf32> to vector<2x64xf32>
    %46 = arith.addf %43, %45 : vector<2x64xf32>
    %cst_38 = arith.constant 0.000000e+00 : f32
    %47 = vector.broadcast %cst_38 : f32 to vector<2x64xf32>
    %48 = arith.maximumf %46, %47 : vector<2x64xf32>
    %49 = arith.truncf %48 : vector<2x64xf32> to vector<2x64xbf16>
    %c5 = arith.constant 5 : index
    %c0_39 = arith.constant 0 : index
    %c0_40 = arith.constant 0 : index
    %50 = vector.load %arg1[%c5, %c0_39, %c0_40] : memref<36x2x512xbf16, #tpu.memory_space<vmem>>, vector<1x2x512xbf16>
    %51 = vector.shape_cast %50 : vector<1x2x512xbf16> to vector<2x512xbf16>
    %c0_41 = arith.constant 0 : index
    %c0_42 = arith.constant 0 : index
    %52 = vector.load %arg2[%c0_41, %c0_42] : memref<512x64xbf16, #tpu.memory_space<vmem>>, vector<512x64xbf16>
    %cst_43 = arith.constant dense<0.000000e+00> : vector<2x64xf32>
    %53 = tpu.matmul %51, %52, %cst_43 {dimension_numbers = #tpu.dot_dimension_numbers<[1], [0], [0], [1], [0, 0, 1, 1], [], []>} : vector<2x512xbf16>, vector<512x64xbf16>, vector<2x64xf32> -> vector<2x64xf32>
    %c0_44 = arith.constant 0 : index
    %c0_45 = arith.constant 0 : index
    %54 = vector.load %arg3[%c0_44, %c0_45] : memref<1x64xf32, #tpu.memory_space<vmem>>, vector<1x64xf32>
    %55 = vector.broadcast %54 : vector<1x64xf32> to vector<2x64xf32>
    %56 = arith.addf %53, %55 : vector<2x64xf32>
    %cst_46 = arith.constant 0.000000e+00 : f32
    %57 = vector.broadcast %cst_46 : f32 to vector<2x64xf32>
    %58 = arith.maximumf %56, %57 : vector<2x64xf32>
    %59 = arith.truncf %58 : vector<2x64xf32> to vector<2x64xbf16>
    %c6 = arith.constant 6 : index
    %c0_47 = arith.constant 0 : index
    %c0_48 = arith.constant 0 : index
    %60 = vector.load %arg1[%c6, %c0_47, %c0_48] : memref<36x2x512xbf16, #tpu.memory_space<vmem>>, vector<1x2x512xbf16>
    %61 = vector.shape_cast %60 : vector<1x2x512xbf16> to vector<2x512xbf16>
    %c0_49 = arith.constant 0 : index
    %c0_50 = arith.constant 0 : index
    %62 = vector.load %arg2[%c0_49, %c0_50] : memref<512x64xbf16, #tpu.memory_space<vmem>>, vector<512x64xbf16>
    %cst_51 = arith.constant dense<0.000000e+00> : vector<2x64xf32>
    %63 = tpu.matmul %61, %62, %cst_51 {dimension_numbers = #tpu.dot_dimension_numbers<[1], [0], [0], [1], [0, 0, 1, 1], [], []>} : vector<2x512xbf16>, vector<512x64xbf16>, vector<2x64xf32> -> vector<2x64xf32>
    %c0_52 = arith.constant 0 : index
    %c0_53 = arith.constant 0 : index
    %64 = vector.load %arg3[%c0_52, %c0_53] : memref<1x64xf32, #tpu.memory_space<vmem>>, vector<1x64xf32>
    %65 = vector.broadcast %64 : vector<1x64xf32> to vector<2x64xf32>
    %66 = arith.addf %63, %65 : vector<2x64xf32>
    %cst_54 = arith.constant 0.000000e+00 : f32
    %67 = vector.broadcast %cst_54 : f32 to vector<2x64xf32>
    %68 = arith.maximumf %66, %67 : vector<2x64xf32>
    %69 = arith.truncf %68 : vector<2x64xf32> to vector<2x64xbf16>
    %c7 = arith.constant 7 : index
    %c0_55 = arith.constant 0 : index
    %c0_56 = arith.constant 0 : index
    %70 = vector.load %arg1[%c7, %c0_55, %c0_56] : memref<36x2x512xbf16, #tpu.memory_space<vmem>>, vector<1x2x512xbf16>
    %71 = vector.shape_cast %70 : vector<1x2x512xbf16> to vector<2x512xbf16>
    %c0_57 = arith.constant 0 : index
    %c0_58 = arith.constant 0 : index
    %72 = vector.load %arg2[%c0_57, %c0_58] : memref<512x64xbf16, #tpu.memory_space<vmem>>, vector<512x64xbf16>
    %cst_59 = arith.constant dense<0.000000e+00> : vector<2x64xf32>
    %73 = tpu.matmul %71, %72, %cst_59 {dimension_numbers = #tpu.dot_dimension_numbers<[1], [0], [0], [1], [0, 0, 1, 1], [], []>} : vector<2x512xbf16>, vector<512x64xbf16>, vector<2x64xf32> -> vector<2x64xf32>
    %c0_60 = arith.constant 0 : index
    %c0_61 = arith.constant 0 : index
    %74 = vector.load %arg3[%c0_60, %c0_61] : memref<1x64xf32, #tpu.memory_space<vmem>>, vector<1x64xf32>
    %75 = vector.broadcast %74 : vector<1x64xf32> to vector<2x64xf32>
    %76 = arith.addf %73, %75 : vector<2x64xf32>
    %cst_62 = arith.constant 0.000000e+00 : f32
    %77 = vector.broadcast %cst_62 : f32 to vector<2x64xf32>
    %78 = arith.maximumf %76, %77 : vector<2x64xf32>
    %79 = arith.truncf %78 : vector<2x64xf32> to vector<2x64xbf16>
    %c8 = arith.constant 8 : index
    %c0_63 = arith.constant 0 : index
    %c0_64 = arith.constant 0 : index
    %80 = vector.load %arg1[%c8, %c0_63, %c0_64] : memref<36x2x512xbf16, #tpu.memory_space<vmem>>, vector<1x2x512xbf16>
    %81 = vector.shape_cast %80 : vector<1x2x512xbf16> to vector<2x512xbf16>
    %c0_65 = arith.constant 0 : index
    %c0_66 = arith.constant 0 : index
    %82 = vector.load %arg2[%c0_65, %c0_66] : memref<512x64xbf16, #tpu.memory_space<vmem>>, vector<512x64xbf16>
    %cst_67 = arith.constant dense<0.000000e+00> : vector<2x64xf32>
    %83 = tpu.matmul %81, %82, %cst_67 {dimension_numbers = #tpu.dot_dimension_numbers<[1], [0], [0], [1], [0, 0, 1, 1], [], []>} : vector<2x512xbf16>, vector<512x64xbf16>, vector<2x64xf32> -> vector<2x64xf32>
    %c0_68 = arith.constant 0 : index
    %c0_69 = arith.constant 0 : index
    %84 = vector.load %arg3[%c0_68, %c0_69] : memref<1x64xf32, #tpu.memory_space<vmem>>, vector<1x64xf32>
    %85 = vector.broadcast %84 : vector<1x64xf32> to vector<2x64xf32>
    %86 = arith.addf %83, %85 : vector<2x64xf32>
    %cst_70 = arith.constant 0.000000e+00 : f32
    %87 = vector.broadcast %cst_70 : f32 to vector<2x64xf32>
    %88 = arith.maximumf %86, %87 : vector<2x64xf32>
    %89 = arith.truncf %88 : vector<2x64xf32> to vector<2x64xbf16>
    %c9 = arith.constant 9 : index
    %c0_71 = arith.constant 0 : index
    %c0_72 = arith.constant 0 : index
    %90 = vector.load %arg1[%c9, %c0_71, %c0_72] : memref<36x2x512xbf16, #tpu.memory_space<vmem>>, vector<1x2x512xbf16>
    %91 = vector.shape_cast %90 : vector<1x2x512xbf16> to vector<2x512xbf16>
    %c0_73 = arith.constant 0 : index
    %c0_74 = arith.constant 0 : index
    %92 = vector.load %arg2[%c0_73, %c0_74] : memref<512x64xbf16, #tpu.memory_space<vmem>>, vector<512x64xbf16>
    %cst_75 = arith.constant dense<0.000000e+00> : vector<2x64xf32>
    %93 = tpu.matmul %91, %92, %cst_75 {dimension_numbers = #tpu.dot_dimension_numbers<[1], [0], [0], [1], [0, 0, 1, 1], [], []>} : vector<2x512xbf16>, vector<512x64xbf16>, vector<2x64xf32> -> vector<2x64xf32>
    %c0_76 = arith.constant 0 : index
    %c0_77 = arith.constant 0 : index
    %94 = vector.load %arg3[%c0_76, %c0_77] : memref<1x64xf32, #tpu.memory_space<vmem>>, vector<1x64xf32>
    %95 = vector.broadcast %94 : vector<1x64xf32> to vector<2x64xf32>
    %96 = arith.addf %93, %95 : vector<2x64xf32>
    %cst_78 = arith.constant 0.000000e+00 : f32
    %97 = vector.broadcast %cst_78 : f32 to vector<2x64xf32>
    %98 = arith.maximumf %96, %97 : vector<2x64xf32>
    %99 = arith.truncf %98 : vector<2x64xf32> to vector<2x64xbf16>
    %c10 = arith.constant 10 : index
    %c0_79 = arith.constant 0 : index
    %c0_80 = arith.constant 0 : index
    %100 = vector.load %arg1[%c10, %c0_79, %c0_80] : memref<36x2x512xbf16, #tpu.memory_space<vmem>>, vector<1x2x512xbf16>
    %101 = vector.shape_cast %100 : vector<1x2x512xbf16> to vector<2x512xbf16>
    %c0_81 = arith.constant 0 : index
    %c0_82 = arith.constant 0 : index
    %102 = vector.load %arg2[%c0_81, %c0_82] : memref<512x64xbf16, #tpu.memory_space<vmem>>, vector<512x64xbf16>
    %cst_83 = arith.constant dense<0.000000e+00> : vector<2x64xf32>
    %103 = tpu.matmul %101, %102, %cst_83 {dimension_numbers = #tpu.dot_dimension_numbers<[1], [0], [0], [1], [0, 0, 1, 1], [], []>} : vector<2x512xbf16>, vector<512x64xbf16>, vector<2x64xf32> -> vector<2x64xf32>
    %c0_84 = arith.constant 0 : index
    %c0_85 = arith.constant 0 : index
    %104 = vector.load %arg3[%c0_84, %c0_85] : memref<1x64xf32, #tpu.memory_space<vmem>>, vector<1x64xf32>
    %105 = vector.broadcast %104 : vector<1x64xf32> to vector<2x64xf32>
    %106 = arith.addf %103, %105 : vector<2x64xf32>
    %cst_86 = arith.constant 0.000000e+00 : f32
    %107 = vector.broadcast %cst_86 : f32 to vector<2x64xf32>
    %108 = arith.maximumf %106, %107 : vector<2x64xf32>
    %109 = arith.truncf %108 : vector<2x64xf32> to vector<2x64xbf16>
    %c11 = arith.constant 11 : index
    %c0_87 = arith.constant 0 : index
    %c0_88 = arith.constant 0 : index
    %110 = vector.load %arg1[%c11, %c0_87, %c0_88] : memref<36x2x512xbf16, #tpu.memory_space<vmem>>, vector<1x2x512xbf16>
    %111 = vector.shape_cast %110 : vector<1x2x512xbf16> to vector<2x512xbf16>
    %c0_89 = arith.constant 0 : index
    %c0_90 = arith.constant 0 : index
    %112 = vector.load %arg2[%c0_89, %c0_90] : memref<512x64xbf16, #tpu.memory_space<vmem>>, vector<512x64xbf16>
    %cst_91 = arith.constant dense<0.000000e+00> : vector<2x64xf32>
    %113 = tpu.matmul %111, %112, %cst_91 {dimension_numbers = #tpu.dot_dimension_numbers<[1], [0], [0], [1], [0, 0, 1, 1], [], []>} : vector<2x512xbf16>, vector<512x64xbf16>, vector<2x64xf32> -> vector<2x64xf32>
    %c0_92 = arith.constant 0 : index
    %c0_93 = arith.constant 0 : index
    %114 = vector.load %arg3[%c0_92, %c0_93] : memref<1x64xf32, #tpu.memory_space<vmem>>, vector<1x64xf32>
    %115 = vector.broadcast %114 : vector<1x64xf32> to vector<2x64xf32>
    %116 = arith.addf %113, %115 : vector<2x64xf32>
    %cst_94 = arith.constant 0.000000e+00 : f32
    %117 = vector.broadcast %cst_94 : f32 to vector<2x64xf32>
    %118 = arith.maximumf %116, %117 : vector<2x64xf32>
    %119 = arith.truncf %118 : vector<2x64xf32> to vector<2x64xbf16>
    %c12 = arith.constant 12 : index
    %c0_95 = arith.constant 0 : index
    %c0_96 = arith.constant 0 : index
    %120 = vector.load %arg1[%c12, %c0_95, %c0_96] : memref<36x2x512xbf16, #tpu.memory_space<vmem>>, vector<1x2x512xbf16>
    %121 = vector.shape_cast %120 : vector<1x2x512xbf16> to vector<2x512xbf16>
    %c0_97 = arith.constant 0 : index
    %c0_98 = arith.constant 0 : index
    %122 = vector.load %arg2[%c0_97, %c0_98] : memref<512x64xbf16, #tpu.memory_space<vmem>>, vector<512x64xbf16>
    %cst_99 = arith.constant dense<0.000000e+00> : vector<2x64xf32>
    %123 = tpu.matmul %121, %122, %cst_99 {dimension_numbers = #tpu.dot_dimension_numbers<[1], [0], [0], [1], [0, 0, 1, 1], [], []>} : vector<2x512xbf16>, vector<512x64xbf16>, vector<2x64xf32> -> vector<2x64xf32>
    %c0_100 = arith.constant 0 : index
    %c0_101 = arith.constant 0 : index
    %124 = vector.load %arg3[%c0_100, %c0_101] : memref<1x64xf32, #tpu.memory_space<vmem>>, vector<1x64xf32>
    %125 = vector.broadcast %124 : vector<1x64xf32> to vector<2x64xf32>
    %126 = arith.addf %123, %125 : vector<2x64xf32>
    %cst_102 = arith.constant 0.000000e+00 : f32
    %127 = vector.broadcast %cst_102 : f32 to vector<2x64xf32>
    %128 = arith.maximumf %126, %127 : vector<2x64xf32>
    %129 = arith.truncf %128 : vector<2x64xf32> to vector<2x64xbf16>
    %c13 = arith.constant 13 : index
    %c0_103 = arith.constant 0 : index
    %c0_104 = arith.constant 0 : index
    %130 = vector.load %arg1[%c13, %c0_103, %c0_104] : memref<36x2x512xbf16, #tpu.memory_space<vmem>>, vector<1x2x512xbf16>
    %131 = vector.shape_cast %130 : vector<1x2x512xbf16> to vector<2x512xbf16>
    %c0_105 = arith.constant 0 : index
    %c0_106 = arith.constant 0 : index
    %132 = vector.load %arg2[%c0_105, %c0_106] : memref<512x64xbf16, #tpu.memory_space<vmem>>, vector<512x64xbf16>
    %cst_107 = arith.constant dense<0.000000e+00> : vector<2x64xf32>
    %133 = tpu.matmul %131, %132, %cst_107 {dimension_numbers = #tpu.dot_dimension_numbers<[1], [0], [0], [1], [0, 0, 1, 1], [], []>} : vector<2x512xbf16>, vector<512x64xbf16>, vector<2x64xf32> -> vector<2x64xf32>
    %c0_108 = arith.constant 0 : index
    %c0_109 = arith.constant 0 : index
    %134 = vector.load %arg3[%c0_108, %c0_109] : memref<1x64xf32, #tpu.memory_space<vmem>>, vector<1x64xf32>
    %135 = vector.broadcast %134 : vector<1x64xf32> to vector<2x64xf32>
    %136 = arith.addf %133, %135 : vector<2x64xf32>
    %cst_110 = arith.constant 0.000000e+00 : f32
    %137 = vector.broadcast %cst_110 : f32 to vector<2x64xf32>
    %138 = arith.maximumf %136, %137 : vector<2x64xf32>
    %139 = arith.truncf %138 : vector<2x64xf32> to vector<2x64xbf16>
    %c14 = arith.constant 14 : index
    %c0_111 = arith.constant 0 : index
    %c0_112 = arith.constant 0 : index
    %140 = vector.load %arg1[%c14, %c0_111, %c0_112] : memref<36x2x512xbf16, #tpu.memory_space<vmem>>, vector<1x2x512xbf16>
    %141 = vector.shape_cast %140 : vector<1x2x512xbf16> to vector<2x512xbf16>
    %c0_113 = arith.constant 0 : index
    %c0_114 = arith.constant 0 : index
    %142 = vector.load %arg2[%c0_113, %c0_114] : memref<512x64xbf16, #tpu.memory_space<vmem>>, vector<512x64xbf16>
    %cst_115 = arith.constant dense<0.000000e+00> : vector<2x64xf32>
    %143 = tpu.matmul %141, %142, %cst_115 {dimension_numbers = #tpu.dot_dimension_numbers<[1], [0], [0], [1], [0, 0, 1, 1], [], []>} : vector<2x512xbf16>, vector<512x64xbf16>, vector<2x64xf32> -> vector<2x64xf32>
    %c0_116 = arith.constant 0 : index
    %c0_117 = arith.constant 0 : index
    %144 = vector.load %arg3[%c0_116, %c0_117] : memref<1x64xf32, #tpu.memory_space<vmem>>, vector<1x64xf32>
    %145 = vector.broadcast %144 : vector<1x64xf32> to vector<2x64xf32>
    %146 = arith.addf %143, %145 : vector<2x64xf32>
    %cst_118 = arith.constant 0.000000e+00 : f32
    %147 = vector.broadcast %cst_118 : f32 to vector<2x64xf32>
    %148 = arith.maximumf %146, %147 : vector<2x64xf32>
    %149 = arith.truncf %148 : vector<2x64xf32> to vector<2x64xbf16>
    %c15 = arith.constant 15 : index
    %c0_119 = arith.constant 0 : index
    %c0_120 = arith.constant 0 : index
    %150 = vector.load %arg1[%c15, %c0_119, %c0_120] : memref<36x2x512xbf16, #tpu.memory_space<vmem>>, vector<1x2x512xbf16>
    %151 = vector.shape_cast %150 : vector<1x2x512xbf16> to vector<2x512xbf16>
    %c0_121 = arith.constant 0 : index
    %c0_122 = arith.constant 0 : index
    %152 = vector.load %arg2[%c0_121, %c0_122] : memref<512x64xbf16, #tpu.memory_space<vmem>>, vector<512x64xbf16>
    %cst_123 = arith.constant dense<0.000000e+00> : vector<2x64xf32>
    %153 = tpu.matmul %151, %152, %cst_123 {dimension_numbers = #tpu.dot_dimension_numbers<[1], [0], [0], [1], [0, 0, 1, 1], [], []>} : vector<2x512xbf16>, vector<512x64xbf16>, vector<2x64xf32> -> vector<2x64xf32>
    %c0_124 = arith.constant 0 : index
    %c0_125 = arith.constant 0 : index
    %154 = vector.load %arg3[%c0_124, %c0_125] : memref<1x64xf32, #tpu.memory_space<vmem>>, vector<1x64xf32>
    %155 = vector.broadcast %154 : vector<1x64xf32> to vector<2x64xf32>
    %156 = arith.addf %153, %155 : vector<2x64xf32>
    %cst_126 = arith.constant 0.000000e+00 : f32
    %157 = vector.broadcast %cst_126 : f32 to vector<2x64xf32>
    %158 = arith.maximumf %156, %157 : vector<2x64xf32>
    %159 = arith.truncf %158 : vector<2x64xf32> to vector<2x64xbf16>
    %c16 = arith.constant 16 : index
    %c0_127 = arith.constant 0 : index
    %c0_128 = arith.constant 0 : index
    %160 = vector.load %arg1[%c16, %c0_127, %c0_128] : memref<36x2x512xbf16, #tpu.memory_space<vmem>>, vector<1x2x512xbf16>
    %161 = vector.shape_cast %160 : vector<1x2x512xbf16> to vector<2x512xbf16>
    %c0_129 = arith.constant 0 : index
    %c0_130 = arith.constant 0 : index
    %162 = vector.load %arg2[%c0_129, %c0_130] : memref<512x64xbf16, #tpu.memory_space<vmem>>, vector<512x64xbf16>
    %cst_131 = arith.constant dense<0.000000e+00> : vector<2x64xf32>
    %163 = tpu.matmul %161, %162, %cst_131 {dimension_numbers = #tpu.dot_dimension_numbers<[1], [0], [0], [1], [0, 0, 1, 1], [], []>} : vector<2x512xbf16>, vector<512x64xbf16>, vector<2x64xf32> -> vector<2x64xf32>
    %c0_132 = arith.constant 0 : index
    %c0_133 = arith.constant 0 : index
    %164 = vector.load %arg3[%c0_132, %c0_133] : memref<1x64xf32, #tpu.memory_space<vmem>>, vector<1x64xf32>
    %165 = vector.broadcast %164 : vector<1x64xf32> to vector<2x64xf32>
    %166 = arith.addf %163, %165 : vector<2x64xf32>
    %cst_134 = arith.constant 0.000000e+00 : f32
    %167 = vector.broadcast %cst_134 : f32 to vector<2x64xf32>
    %168 = arith.maximumf %166, %167 : vector<2x64xf32>
    %169 = arith.truncf %168 : vector<2x64xf32> to vector<2x64xbf16>
    %c17 = arith.constant 17 : index
    %c0_135 = arith.constant 0 : index
    %c0_136 = arith.constant 0 : index
    %170 = vector.load %arg1[%c17, %c0_135, %c0_136] : memref<36x2x512xbf16, #tpu.memory_space<vmem>>, vector<1x2x512xbf16>
    %171 = vector.shape_cast %170 : vector<1x2x512xbf16> to vector<2x512xbf16>
    %c0_137 = arith.constant 0 : index
    %c0_138 = arith.constant 0 : index
    %172 = vector.load %arg2[%c0_137, %c0_138] : memref<512x64xbf16, #tpu.memory_space<vmem>>, vector<512x64xbf16>
    %cst_139 = arith.constant dense<0.000000e+00> : vector<2x64xf32>
    %173 = tpu.matmul %171, %172, %cst_139 {dimension_numbers = #tpu.dot_dimension_numbers<[1], [0], [0], [1], [0, 0, 1, 1], [], []>} : vector<2x512xbf16>, vector<512x64xbf16>, vector<2x64xf32> -> vector<2x64xf32>
    %c0_140 = arith.constant 0 : index
    %c0_141 = arith.constant 0 : index
    %174 = vector.load %arg3[%c0_140, %c0_141] : memref<1x64xf32, #tpu.memory_space<vmem>>, vector<1x64xf32>
    %175 = vector.broadcast %174 : vector<1x64xf32> to vector<2x64xf32>
    %176 = arith.addf %173, %175 : vector<2x64xf32>
    %cst_142 = arith.constant 0.000000e+00 : f32
    %177 = vector.broadcast %cst_142 : f32 to vector<2x64xf32>
    %178 = arith.maximumf %176, %177 : vector<2x64xf32>
    %179 = arith.truncf %178 : vector<2x64xf32> to vector<2x64xbf16>
    %c18 = arith.constant 18 : index
    %c0_143 = arith.constant 0 : index
    %c0_144 = arith.constant 0 : index
    %180 = vector.load %arg1[%c18, %c0_143, %c0_144] : memref<36x2x512xbf16, #tpu.memory_space<vmem>>, vector<1x2x512xbf16>
    %181 = vector.shape_cast %180 : vector<1x2x512xbf16> to vector<2x512xbf16>
    %c0_145 = arith.constant 0 : index
    %c0_146 = arith.constant 0 : index
    %182 = vector.load %arg2[%c0_145, %c0_146] : memref<512x64xbf16, #tpu.memory_space<vmem>>, vector<512x64xbf16>
    %cst_147 = arith.constant dense<0.000000e+00> : vector<2x64xf32>
    %183 = tpu.matmul %181, %182, %cst_147 {dimension_numbers = #tpu.dot_dimension_numbers<[1], [0], [0], [1], [0, 0, 1, 1], [], []>} : vector<2x512xbf16>, vector<512x64xbf16>, vector<2x64xf32> -> vector<2x64xf32>
    %c0_148 = arith.constant 0 : index
    %c0_149 = arith.constant 0 : index
    %184 = vector.load %arg3[%c0_148, %c0_149] : memref<1x64xf32, #tpu.memory_space<vmem>>, vector<1x64xf32>
    %185 = vector.broadcast %184 : vector<1x64xf32> to vector<2x64xf32>
    %186 = arith.addf %183, %185 : vector<2x64xf32>
    %cst_150 = arith.constant 0.000000e+00 : f32
    %187 = vector.broadcast %cst_150 : f32 to vector<2x64xf32>
    %188 = arith.maximumf %186, %187 : vector<2x64xf32>
    %189 = arith.truncf %188 : vector<2x64xf32> to vector<2x64xbf16>
    %c19 = arith.constant 19 : index
    %c0_151 = arith.constant 0 : index
    %c0_152 = arith.constant 0 : index
    %190 = vector.load %arg1[%c19, %c0_151, %c0_152] : memref<36x2x512xbf16, #tpu.memory_space<vmem>>, vector<1x2x512xbf16>
    %191 = vector.shape_cast %190 : vector<1x2x512xbf16> to vector<2x512xbf16>
    %c0_153 = arith.constant 0 : index
    %c0_154 = arith.constant 0 : index
    %192 = vector.load %arg2[%c0_153, %c0_154] : memref<512x64xbf16, #tpu.memory_space<vmem>>, vector<512x64xbf16>
    %cst_155 = arith.constant dense<0.000000e+00> : vector<2x64xf32>
    %193 = tpu.matmul %191, %192, %cst_155 {dimension_numbers = #tpu.dot_dimension_numbers<[1], [0], [0], [1], [0, 0, 1, 1], [], []>} : vector<2x512xbf16>, vector<512x64xbf16>, vector<2x64xf32> -> vector<2x64xf32>
    %c0_156 = arith.constant 0 : index
    %c0_157 = arith.constant 0 : index
    %194 = vector.load %arg3[%c0_156, %c0_157] : memref<1x64xf32, #tpu.memory_space<vmem>>, vector<1x64xf32>
    %195 = vector.broadcast %194 : vector<1x64xf32> to vector<2x64xf32>
    %196 = arith.addf %193, %195 : vector<2x64xf32>
    %cst_158 = arith.constant 0.000000e+00 : f32
    %197 = vector.broadcast %cst_158 : f32 to vector<2x64xf32>
    %198 = arith.maximumf %196, %197 : vector<2x64xf32>
    %199 = arith.truncf %198 : vector<2x64xf32> to vector<2x64xbf16>
    %c20 = arith.constant 20 : index
    %c0_159 = arith.constant 0 : index
    %c0_160 = arith.constant 0 : index
    %200 = vector.load %arg1[%c20, %c0_159, %c0_160] : memref<36x2x512xbf16, #tpu.memory_space<vmem>>, vector<1x2x512xbf16>
    %201 = vector.shape_cast %200 : vector<1x2x512xbf16> to vector<2x512xbf16>
    %c0_161 = arith.constant 0 : index
    %c0_162 = arith.constant 0 : index
    %202 = vector.load %arg2[%c0_161, %c0_162] : memref<512x64xbf16, #tpu.memory_space<vmem>>, vector<512x64xbf16>
    %cst_163 = arith.constant dense<0.000000e+00> : vector<2x64xf32>
    %203 = tpu.matmul %201, %202, %cst_163 {dimension_numbers = #tpu.dot_dimension_numbers<[1], [0], [0], [1], [0, 0, 1, 1], [], []>} : vector<2x512xbf16>, vector<512x64xbf16>, vector<2x64xf32> -> vector<2x64xf32>
    %c0_164 = arith.constant 0 : index
    %c0_165 = arith.constant 0 : index
    %204 = vector.load %arg3[%c0_164, %c0_165] : memref<1x64xf32, #tpu.memory_space<vmem>>, vector<1x64xf32>
    %205 = vector.broadcast %204 : vector<1x64xf32> to vector<2x64xf32>
    %206 = arith.addf %203, %205 : vector<2x64xf32>
    %cst_166 = arith.constant 0.000000e+00 : f32
    %207 = vector.broadcast %cst_166 : f32 to vector<2x64xf32>
    %208 = arith.maximumf %206, %207 : vector<2x64xf32>
    %209 = arith.truncf %208 : vector<2x64xf32> to vector<2x64xbf16>
    %c21 = arith.constant 21 : index
    %c0_167 = arith.constant 0 : index
    %c0_168 = arith.constant 0 : index
    %210 = vector.load %arg1[%c21, %c0_167, %c0_168] : memref<36x2x512xbf16, #tpu.memory_space<vmem>>, vector<1x2x512xbf16>
    %211 = vector.shape_cast %210 : vector<1x2x512xbf16> to vector<2x512xbf16>
    %c0_169 = arith.constant 0 : index
    %c0_170 = arith.constant 0 : index
    %212 = vector.load %arg2[%c0_169, %c0_170] : memref<512x64xbf16, #tpu.memory_space<vmem>>, vector<512x64xbf16>
    %cst_171 = arith.constant dense<0.000000e+00> : vector<2x64xf32>
    %213 = tpu.matmul %211, %212, %cst_171 {dimension_numbers = #tpu.dot_dimension_numbers<[1], [0], [0], [1], [0, 0, 1, 1], [], []>} : vector<2x512xbf16>, vector<512x64xbf16>, vector<2x64xf32> -> vector<2x64xf32>
    %c0_172 = arith.constant 0 : index
    %c0_173 = arith.constant 0 : index
    %214 = vector.load %arg3[%c0_172, %c0_173] : memref<1x64xf32, #tpu.memory_space<vmem>>, vector<1x64xf32>
    %215 = vector.broadcast %214 : vector<1x64xf32> to vector<2x64xf32>
    %216 = arith.addf %213, %215 : vector<2x64xf32>
    %cst_174 = arith.constant 0.000000e+00 : f32
    %217 = vector.broadcast %cst_174 : f32 to vector<2x64xf32>
    %218 = arith.maximumf %216, %217 : vector<2x64xf32>
    %219 = arith.truncf %218 : vector<2x64xf32> to vector<2x64xbf16>
    %c22 = arith.constant 22 : index
    %c0_175 = arith.constant 0 : index
    %c0_176 = arith.constant 0 : index
    %220 = vector.load %arg1[%c22, %c0_175, %c0_176] : memref<36x2x512xbf16, #tpu.memory_space<vmem>>, vector<1x2x512xbf16>
    %221 = vector.shape_cast %220 : vector<1x2x512xbf16> to vector<2x512xbf16>
    %c0_177 = arith.constant 0 : index
    %c0_178 = arith.constant 0 : index
    %222 = vector.load %arg2[%c0_177, %c0_178] : memref<512x64xbf16, #tpu.memory_space<vmem>>, vector<512x64xbf16>
    %cst_179 = arith.constant dense<0.000000e+00> : vector<2x64xf32>
    %223 = tpu.matmul %221, %222, %cst_179 {dimension_numbers = #tpu.dot_dimension_numbers<[1], [0], [0], [1], [0, 0, 1, 1], [], []>} : vector<2x512xbf16>, vector<512x64xbf16>, vector<2x64xf32> -> vector<2x64xf32>
    %c0_180 = arith.constant 0 : index
    %c0_181 = arith.constant 0 : index
    %224 = vector.load %arg3[%c0_180, %c0_181] : memref<1x64xf32, #tpu.memory_space<vmem>>, vector<1x64xf32>
    %225 = vector.broadcast %224 : vector<1x64xf32> to vector<2x64xf32>
    %226 = arith.addf %223, %225 : vector<2x64xf32>
    %cst_182 = arith.constant 0.000000e+00 : f32
    %227 = vector.broadcast %cst_182 : f32 to vector<2x64xf32>
    %228 = arith.maximumf %226, %227 : vector<2x64xf32>
    %229 = arith.truncf %228 : vector<2x64xf32> to vector<2x64xbf16>
    %c23 = arith.constant 23 : index
    %c0_183 = arith.constant 0 : index
    %c0_184 = arith.constant 0 : index
    %230 = vector.load %arg1[%c23, %c0_183, %c0_184] : memref<36x2x512xbf16, #tpu.memory_space<vmem>>, vector<1x2x512xbf16>
    %231 = vector.shape_cast %230 : vector<1x2x512xbf16> to vector<2x512xbf16>
    %c0_185 = arith.constant 0 : index
    %c0_186 = arith.constant 0 : index
    %232 = vector.load %arg2[%c0_185, %c0_186] : memref<512x64xbf16, #tpu.memory_space<vmem>>, vector<512x64xbf16>
    %cst_187 = arith.constant dense<0.000000e+00> : vector<2x64xf32>
    %233 = tpu.matmul %231, %232, %cst_187 {dimension_numbers = #tpu.dot_dimension_numbers<[1], [0], [0], [1], [0, 0, 1, 1], [], []>} : vector<2x512xbf16>, vector<512x64xbf16>, vector<2x64xf32> -> vector<2x64xf32>
    %c0_188 = arith.constant 0 : index
    %c0_189 = arith.constant 0 : index
    %234 = vector.load %arg3[%c0_188, %c0_189] : memref<1x64xf32, #tpu.memory_space<vmem>>, vector<1x64xf32>
    %235 = vector.broadcast %234 : vector<1x64xf32> to vector<2x64xf32>
    %236 = arith.addf %233, %235 : vector<2x64xf32>
    %cst_190 = arith.constant 0.000000e+00 : f32
    %237 = vector.broadcast %cst_190 : f32 to vector<2x64xf32>
    %238 = arith.maximumf %236, %237 : vector<2x64xf32>
    %239 = arith.truncf %238 : vector<2x64xf32> to vector<2x64xbf16>
    %c24 = arith.constant 24 : index
    %c0_191 = arith.constant 0 : index
    %c0_192 = arith.constant 0 : index
    %240 = vector.load %arg1[%c24, %c0_191, %c0_192] : memref<36x2x512xbf16, #tpu.memory_space<vmem>>, vector<1x2x512xbf16>
    %241 = vector.shape_cast %240 : vector<1x2x512xbf16> to vector<2x512xbf16>
    %c0_193 = arith.constant 0 : index
    %c0_194 = arith.constant 0 : index
    %242 = vector.load %arg2[%c0_193, %c0_194] : memref<512x64xbf16, #tpu.memory_space<vmem>>, vector<512x64xbf16>
    %cst_195 = arith.constant dense<0.000000e+00> : vector<2x64xf32>
    %243 = tpu.matmul %241, %242, %cst_195 {dimension_numbers = #tpu.dot_dimension_numbers<[1], [0], [0], [1], [0, 0, 1, 1], [], []>} : vector<2x512xbf16>, vector<512x64xbf16>, vector<2x64xf32> -> vector<2x64xf32>
    %c0_196 = arith.constant 0 : index
    %c0_197 = arith.constant 0 : index
    %244 = vector.load %arg3[%c0_196, %c0_197] : memref<1x64xf32, #tpu.memory_space<vmem>>, vector<1x64xf32>
    %245 = vector.broadcast %244 : vector<1x64xf32> to vector<2x64xf32>
    %246 = arith.addf %243, %245 : vector<2x64xf32>
    %cst_198 = arith.constant 0.000000e+00 : f32
    %247 = vector.broadcast %cst_198 : f32 to vector<2x64xf32>
    %248 = arith.maximumf %246, %247 : vector<2x64xf32>
    %249 = arith.truncf %248 : vector<2x64xf32> to vector<2x64xbf16>
    %c25 = arith.constant 25 : index
    %c0_199 = arith.constant 0 : index
    %c0_200 = arith.constant 0 : index
    %250 = vector.load %arg1[%c25, %c0_199, %c0_200] : memref<36x2x512xbf16, #tpu.memory_space<vmem>>, vector<1x2x512xbf16>
    %251 = vector.shape_cast %250 : vector<1x2x512xbf16> to vector<2x512xbf16>
    %c0_201 = arith.constant 0 : index
    %c0_202 = arith.constant 0 : index
    %252 = vector.load %arg2[%c0_201, %c0_202] : memref<512x64xbf16, #tpu.memory_space<vmem>>, vector<512x64xbf16>
    %cst_203 = arith.constant dense<0.000000e+00> : vector<2x64xf32>
    %253 = tpu.matmul %251, %252, %cst_203 {dimension_numbers = #tpu.dot_dimension_numbers<[1], [0], [0], [1], [0, 0, 1, 1], [], []>} : vector<2x512xbf16>, vector<512x64xbf16>, vector<2x64xf32> -> vector<2x64xf32>
    %c0_204 = arith.constant 0 : index
    %c0_205 = arith.constant 0 : index
    %254 = vector.load %arg3[%c0_204, %c0_205] : memref<1x64xf32, #tpu.memory_space<vmem>>, vector<1x64xf32>
    %255 = vector.broadcast %254 : vector<1x64xf32> to vector<2x64xf32>
    %256 = arith.addf %253, %255 : vector<2x64xf32>
    %cst_206 = arith.constant 0.000000e+00 : f32
    %257 = vector.broadcast %cst_206 : f32 to vector<2x64xf32>
    %258 = arith.maximumf %256, %257 : vector<2x64xf32>
    %259 = arith.truncf %258 : vector<2x64xf32> to vector<2x64xbf16>
    %c26 = arith.constant 26 : index
    %c0_207 = arith.constant 0 : index
    %c0_208 = arith.constant 0 : index
    %260 = vector.load %arg1[%c26, %c0_207, %c0_208] : memref<36x2x512xbf16, #tpu.memory_space<vmem>>, vector<1x2x512xbf16>
    %261 = vector.shape_cast %260 : vector<1x2x512xbf16> to vector<2x512xbf16>
    %c0_209 = arith.constant 0 : index
    %c0_210 = arith.constant 0 : index
    %262 = vector.load %arg2[%c0_209, %c0_210] : memref<512x64xbf16, #tpu.memory_space<vmem>>, vector<512x64xbf16>
    %cst_211 = arith.constant dense<0.000000e+00> : vector<2x64xf32>
    %263 = tpu.matmul %261, %262, %cst_211 {dimension_numbers = #tpu.dot_dimension_numbers<[1], [0], [0], [1], [0, 0, 1, 1], [], []>} : vector<2x512xbf16>, vector<512x64xbf16>, vector<2x64xf32> -> vector<2x64xf32>
    %c0_212 = arith.constant 0 : index
    %c0_213 = arith.constant 0 : index
    %264 = vector.load %arg3[%c0_212, %c0_213] : memref<1x64xf32, #tpu.memory_space<vmem>>, vector<1x64xf32>
    %265 = vector.broadcast %264 : vector<1x64xf32> to vector<2x64xf32>
    %266 = arith.addf %263, %265 : vector<2x64xf32>
    %cst_214 = arith.constant 0.000000e+00 : f32
    %267 = vector.broadcast %cst_214 : f32 to vector<2x64xf32>
    %268 = arith.maximumf %266, %267 : vector<2x64xf32>
    %269 = arith.truncf %268 : vector<2x64xf32> to vector<2x64xbf16>
    %c27 = arith.constant 27 : index
    %c0_215 = arith.constant 0 : index
    %c0_216 = arith.constant 0 : index
    %270 = vector.load %arg1[%c27, %c0_215, %c0_216] : memref<36x2x512xbf16, #tpu.memory_space<vmem>>, vector<1x2x512xbf16>
    %271 = vector.shape_cast %270 : vector<1x2x512xbf16> to vector<2x512xbf16>
    %c0_217 = arith.constant 0 : index
    %c0_218 = arith.constant 0 : index
    %272 = vector.load %arg2[%c0_217, %c0_218] : memref<512x64xbf16, #tpu.memory_space<vmem>>, vector<512x64xbf16>
    %cst_219 = arith.constant dense<0.000000e+00> : vector<2x64xf32>
    %273 = tpu.matmul %271, %272, %cst_219 {dimension_numbers = #tpu.dot_dimension_numbers<[1], [0], [0], [1], [0, 0, 1, 1], [], []>} : vector<2x512xbf16>, vector<512x64xbf16>, vector<2x64xf32> -> vector<2x64xf32>
    %c0_220 = arith.constant 0 : index
    %c0_221 = arith.constant 0 : index
    %274 = vector.load %arg3[%c0_220, %c0_221] : memref<1x64xf32, #tpu.memory_space<vmem>>, vector<1x64xf32>
    %275 = vector.broadcast %274 : vector<1x64xf32> to vector<2x64xf32>
    %276 = arith.addf %273, %275 : vector<2x64xf32>
    %cst_222 = arith.constant 0.000000e+00 : f32
    %277 = vector.broadcast %cst_222 : f32 to vector<2x64xf32>
    %278 = arith.maximumf %276, %277 : vector<2x64xf32>
    %279 = arith.truncf %278 : vector<2x64xf32> to vector<2x64xbf16>
    %c28 = arith.constant 28 : index
    %c0_223 = arith.constant 0 : index
    %c0_224 = arith.constant 0 : index
    %280 = vector.load %arg1[%c28, %c0_223, %c0_224] : memref<36x2x512xbf16, #tpu.memory_space<vmem>>, vector<1x2x512xbf16>
    %281 = vector.shape_cast %280 : vector<1x2x512xbf16> to vector<2x512xbf16>
    %c0_225 = arith.constant 0 : index
    %c0_226 = arith.constant 0 : index
    %282 = vector.load %arg2[%c0_225, %c0_226] : memref<512x64xbf16, #tpu.memory_space<vmem>>, vector<512x64xbf16>
    %cst_227 = arith.constant dense<0.000000e+00> : vector<2x64xf32>
    %283 = tpu.matmul %281, %282, %cst_227 {dimension_numbers = #tpu.dot_dimension_numbers<[1], [0], [0], [1], [0, 0, 1, 1], [], []>} : vector<2x512xbf16>, vector<512x64xbf16>, vector<2x64xf32> -> vector<2x64xf32>
    %c0_228 = arith.constant 0 : index
    %c0_229 = arith.constant 0 : index
    %284 = vector.load %arg3[%c0_228, %c0_229] : memref<1x64xf32, #tpu.memory_space<vmem>>, vector<1x64xf32>
    %285 = vector.broadcast %284 : vector<1x64xf32> to vector<2x64xf32>
    %286 = arith.addf %283, %285 : vector<2x64xf32>
    %cst_230 = arith.constant 0.000000e+00 : f32
    %287 = vector.broadcast %cst_230 : f32 to vector<2x64xf32>
    %288 = arith.maximumf %286, %287 : vector<2x64xf32>
    %289 = arith.truncf %288 : vector<2x64xf32> to vector<2x64xbf16>
    %c29 = arith.constant 29 : index
    %c0_231 = arith.constant 0 : index
    %c0_232 = arith.constant 0 : index
    %290 = vector.load %arg1[%c29, %c0_231, %c0_232] : memref<36x2x512xbf16, #tpu.memory_space<vmem>>, vector<1x2x512xbf16>
    %291 = vector.shape_cast %290 : vector<1x2x512xbf16> to vector<2x512xbf16>
    %c0_233 = arith.constant 0 : index
    %c0_234 = arith.constant 0 : index
    %292 = vector.load %arg2[%c0_233, %c0_234] : memref<512x64xbf16, #tpu.memory_space<vmem>>, vector<512x64xbf16>
    %cst_235 = arith.constant dense<0.000000e+00> : vector<2x64xf32>
    %293 = tpu.matmul %291, %292, %cst_235 {dimension_numbers = #tpu.dot_dimension_numbers<[1], [0], [0], [1], [0, 0, 1, 1], [], []>} : vector<2x512xbf16>, vector<512x64xbf16>, vector<2x64xf32> -> vector<2x64xf32>
    %c0_236 = arith.constant 0 : index
    %c0_237 = arith.constant 0 : index
    %294 = vector.load %arg3[%c0_236, %c0_237] : memref<1x64xf32, #tpu.memory_space<vmem>>, vector<1x64xf32>
    %295 = vector.broadcast %294 : vector<1x64xf32> to vector<2x64xf32>
    %296 = arith.addf %293, %295 : vector<2x64xf32>
    %cst_238 = arith.constant 0.000000e+00 : f32
    %297 = vector.broadcast %cst_238 : f32 to vector<2x64xf32>
    %298 = arith.maximumf %296, %297 : vector<2x64xf32>
    %299 = arith.truncf %298 : vector<2x64xf32> to vector<2x64xbf16>
    %c30 = arith.constant 30 : index
    %c0_239 = arith.constant 0 : index
    %c0_240 = arith.constant 0 : index
    %300 = vector.load %arg1[%c30, %c0_239, %c0_240] : memref<36x2x512xbf16, #tpu.memory_space<vmem>>, vector<1x2x512xbf16>
    %301 = vector.shape_cast %300 : vector<1x2x512xbf16> to vector<2x512xbf16>
    %c0_241 = arith.constant 0 : index
    %c0_242 = arith.constant 0 : index
    %302 = vector.load %arg2[%c0_241, %c0_242] : memref<512x64xbf16, #tpu.memory_space<vmem>>, vector<512x64xbf16>
    %cst_243 = arith.constant dense<0.000000e+00> : vector<2x64xf32>
    %303 = tpu.matmul %301, %302, %cst_243 {dimension_numbers = #tpu.dot_dimension_numbers<[1], [0], [0], [1], [0, 0, 1, 1], [], []>} : vector<2x512xbf16>, vector<512x64xbf16>, vector<2x64xf32> -> vector<2x64xf32>
    %c0_244 = arith.constant 0 : index
    %c0_245 = arith.constant 0 : index
    %304 = vector.load %arg3[%c0_244, %c0_245] : memref<1x64xf32, #tpu.memory_space<vmem>>, vector<1x64xf32>
    %305 = vector.broadcast %304 : vector<1x64xf32> to vector<2x64xf32>
    %306 = arith.addf %303, %305 : vector<2x64xf32>
    %cst_246 = arith.constant 0.000000e+00 : f32
    %307 = vector.broadcast %cst_246 : f32 to vector<2x64xf32>
    %308 = arith.maximumf %306, %307 : vector<2x64xf32>
    %309 = arith.truncf %308 : vector<2x64xf32> to vector<2x64xbf16>
    %c31 = arith.constant 31 : index
    %c0_247 = arith.constant 0 : index
    %c0_248 = arith.constant 0 : index
    %310 = vector.load %arg1[%c31, %c0_247, %c0_248] : memref<36x2x512xbf16, #tpu.memory_space<vmem>>, vector<1x2x512xbf16>
    %311 = vector.shape_cast %310 : vector<1x2x512xbf16> to vector<2x512xbf16>
    %c0_249 = arith.constant 0 : index
    %c0_250 = arith.constant 0 : index
    %312 = vector.load %arg2[%c0_249, %c0_250] : memref<512x64xbf16, #tpu.memory_space<vmem>>, vector<512x64xbf16>
    %cst_251 = arith.constant dense<0.000000e+00> : vector<2x64xf32>
    %313 = tpu.matmul %311, %312, %cst_251 {dimension_numbers = #tpu.dot_dimension_numbers<[1], [0], [0], [1], [0, 0, 1, 1], [], []>} : vector<2x512xbf16>, vector<512x64xbf16>, vector<2x64xf32> -> vector<2x64xf32>
    %c0_252 = arith.constant 0 : index
    %c0_253 = arith.constant 0 : index
    %314 = vector.load %arg3[%c0_252, %c0_253] : memref<1x64xf32, #tpu.memory_space<vmem>>, vector<1x64xf32>
    %315 = vector.broadcast %314 : vector<1x64xf32> to vector<2x64xf32>
    %316 = arith.addf %313, %315 : vector<2x64xf32>
    %cst_254 = arith.constant 0.000000e+00 : f32
    %317 = vector.broadcast %cst_254 : f32 to vector<2x64xf32>
    %318 = arith.maximumf %316, %317 : vector<2x64xf32>
    %319 = arith.truncf %318 : vector<2x64xf32> to vector<2x64xbf16>
    %c32 = arith.constant 32 : index
    %c0_255 = arith.constant 0 : index
    %c0_256 = arith.constant 0 : index
    %320 = vector.load %arg1[%c32, %c0_255, %c0_256] : memref<36x2x512xbf16, #tpu.memory_space<vmem>>, vector<1x2x512xbf16>
    %321 = vector.shape_cast %320 : vector<1x2x512xbf16> to vector<2x512xbf16>
    %c0_257 = arith.constant 0 : index
    %c0_258 = arith.constant 0 : index
    %322 = vector.load %arg2[%c0_257, %c0_258] : memref<512x64xbf16, #tpu.memory_space<vmem>>, vector<512x64xbf16>
    %cst_259 = arith.constant dense<0.000000e+00> : vector<2x64xf32>
    %323 = tpu.matmul %321, %322, %cst_259 {dimension_numbers = #tpu.dot_dimension_numbers<[1], [0], [0], [1], [0, 0, 1, 1], [], []>} : vector<2x512xbf16>, vector<512x64xbf16>, vector<2x64xf32> -> vector<2x64xf32>
    %c0_260 = arith.constant 0 : index
    %c0_261 = arith.constant 0 : index
    %324 = vector.load %arg3[%c0_260, %c0_261] : memref<1x64xf32, #tpu.memory_space<vmem>>, vector<1x64xf32>
    %325 = vector.broadcast %324 : vector<1x64xf32> to vector<2x64xf32>
    %326 = arith.addf %323, %325 : vector<2x64xf32>
    %cst_262 = arith.constant 0.000000e+00 : f32
    %327 = vector.broadcast %cst_262 : f32 to vector<2x64xf32>
    %328 = arith.maximumf %326, %327 : vector<2x64xf32>
    %329 = arith.truncf %328 : vector<2x64xf32> to vector<2x64xbf16>
    %c33 = arith.constant 33 : index
    %c0_263 = arith.constant 0 : index
    %c0_264 = arith.constant 0 : index
    %330 = vector.load %arg1[%c33, %c0_263, %c0_264] : memref<36x2x512xbf16, #tpu.memory_space<vmem>>, vector<1x2x512xbf16>
    %331 = vector.shape_cast %330 : vector<1x2x512xbf16> to vector<2x512xbf16>
    %c0_265 = arith.constant 0 : index
    %c0_266 = arith.constant 0 : index
    %332 = vector.load %arg2[%c0_265, %c0_266] : memref<512x64xbf16, #tpu.memory_space<vmem>>, vector<512x64xbf16>
    %cst_267 = arith.constant dense<0.000000e+00> : vector<2x64xf32>
    %333 = tpu.matmul %331, %332, %cst_267 {dimension_numbers = #tpu.dot_dimension_numbers<[1], [0], [0], [1], [0, 0, 1, 1], [], []>} : vector<2x512xbf16>, vector<512x64xbf16>, vector<2x64xf32> -> vector<2x64xf32>
    %c0_268 = arith.constant 0 : index
    %c0_269 = arith.constant 0 : index
    %334 = vector.load %arg3[%c0_268, %c0_269] : memref<1x64xf32, #tpu.memory_space<vmem>>, vector<1x64xf32>
    %335 = vector.broadcast %334 : vector<1x64xf32> to vector<2x64xf32>
    %336 = arith.addf %333, %335 : vector<2x64xf32>
    %cst_270 = arith.constant 0.000000e+00 : f32
    %337 = vector.broadcast %cst_270 : f32 to vector<2x64xf32>
    %338 = arith.maximumf %336, %337 : vector<2x64xf32>
    %339 = arith.truncf %338 : vector<2x64xf32> to vector<2x64xbf16>
    %c34 = arith.constant 34 : index
    %c0_271 = arith.constant 0 : index
    %c0_272 = arith.constant 0 : index
    %340 = vector.load %arg1[%c34, %c0_271, %c0_272] : memref<36x2x512xbf16, #tpu.memory_space<vmem>>, vector<1x2x512xbf16>
    %341 = vector.shape_cast %340 : vector<1x2x512xbf16> to vector<2x512xbf16>
    %c0_273 = arith.constant 0 : index
    %c0_274 = arith.constant 0 : index
    %342 = vector.load %arg2[%c0_273, %c0_274] : memref<512x64xbf16, #tpu.memory_space<vmem>>, vector<512x64xbf16>
    %cst_275 = arith.constant dense<0.000000e+00> : vector<2x64xf32>
    %343 = tpu.matmul %341, %342, %cst_275 {dimension_numbers = #tpu.dot_dimension_numbers<[1], [0], [0], [1], [0, 0, 1, 1], [], []>} : vector<2x512xbf16>, vector<512x64xbf16>, vector<2x64xf32> -> vector<2x64xf32>
    %c0_276 = arith.constant 0 : index
    %c0_277 = arith.constant 0 : index
    %344 = vector.load %arg3[%c0_276, %c0_277] : memref<1x64xf32, #tpu.memory_space<vmem>>, vector<1x64xf32>
    %345 = vector.broadcast %344 : vector<1x64xf32> to vector<2x64xf32>
    %346 = arith.addf %343, %345 : vector<2x64xf32>
    %cst_278 = arith.constant 0.000000e+00 : f32
    %347 = vector.broadcast %cst_278 : f32 to vector<2x64xf32>
    %348 = arith.maximumf %346, %347 : vector<2x64xf32>
    %349 = arith.truncf %348 : vector<2x64xf32> to vector<2x64xbf16>
    %c35 = arith.constant 35 : index
    %c0_279 = arith.constant 0 : index
    %c0_280 = arith.constant 0 : index
    %350 = vector.load %arg1[%c35, %c0_279, %c0_280] : memref<36x2x512xbf16, #tpu.memory_space<vmem>>, vector<1x2x512xbf16>
    %351 = vector.shape_cast %350 : vector<1x2x512xbf16> to vector<2x512xbf16>
    %c0_281 = arith.constant 0 : index
    %c0_282 = arith.constant 0 : index
    %352 = vector.load %arg2[%c0_281, %c0_282] : memref<512x64xbf16, #tpu.memory_space<vmem>>, vector<512x64xbf16>
    %cst_283 = arith.constant dense<0.000000e+00> : vector<2x64xf32>
    %353 = tpu.matmul %351, %352, %cst_283 {dimension_numbers = #tpu.dot_dimension_numbers<[1], [0], [0], [1], [0, 0, 1, 1], [], []>} : vector<2x512xbf16>, vector<512x64xbf16>, vector<2x64xf32> -> vector<2x64xf32>
    %c0_284 = arith.constant 0 : index
    %c0_285 = arith.constant 0 : index
    %354 = vector.load %arg3[%c0_284, %c0_285] : memref<1x64xf32, #tpu.memory_space<vmem>>, vector<1x64xf32>
    %355 = vector.broadcast %354 : vector<1x64xf32> to vector<2x64xf32>
    %356 = arith.addf %353, %355 : vector<2x64xf32>
    %cst_286 = arith.constant 0.000000e+00 : f32
    %357 = vector.broadcast %cst_286 : f32 to vector<2x64xf32>
    %358 = arith.maximumf %356, %357 : vector<2x64xf32>
    %359 = arith.truncf %358 : vector<2x64xf32> to vector<2x64xbf16>
    %c0_287 = arith.constant 0 : index
    %c0_288 = arith.constant 0 : index
    %c0_289 = arith.constant 0 : index
    %360 = vector.load %arg4[%c0_287, %c0_288, %c0_289] : memref<4x64x128xbf16, #tpu.memory_space<vmem>>, vector<1x64x128xbf16>
    %361 = vector.shape_cast %360 : vector<1x64x128xbf16> to vector<64x128xbf16>
    %cst_290 = arith.constant dense<0.000000e+00> : vector<2x128xf32>
    %362 = tpu.matmul %9, %361, %cst_290 {dimension_numbers = #tpu.dot_dimension_numbers<[1], [0], [0], [1], [0, 0, 1, 1], [], []>} : vector<2x64xbf16>, vector<64x128xbf16>, vector<2x128xf32> -> vector<2x128xf32>
    %c1_291 = arith.constant 1 : index
    %c0_292 = arith.constant 0 : index
    %c0_293 = arith.constant 0 : index
    %363 = vector.load %arg4[%c1_291, %c0_292, %c0_293] : memref<4x64x128xbf16, #tpu.memory_space<vmem>>, vector<1x64x128xbf16>
    %364 = vector.shape_cast %363 : vector<1x64x128xbf16> to vector<64x128xbf16>
    %cst_294 = arith.constant dense<0.000000e+00> : vector<2x128xf32>
    %365 = tpu.matmul %19, %364, %cst_294 {dimension_numbers = #tpu.dot_dimension_numbers<[1], [0], [0], [1], [0, 0, 1, 1], [], []>} : vector<2x64xbf16>, vector<64x128xbf16>, vector<2x128xf32> -> vector<2x128xf32>
    %366 = arith.addf %362, %365 : vector<2x128xf32>
    %c2_295 = arith.constant 2 : index
    %c0_296 = arith.constant 0 : index
    %c0_297 = arith.constant 0 : index
    %367 = vector.load %arg4[%c2_295, %c0_296, %c0_297] : memref<4x64x128xbf16, #tpu.memory_space<vmem>>, vector<1x64x128xbf16>
    %368 = vector.shape_cast %367 : vector<1x64x128xbf16> to vector<64x128xbf16>
    %cst_298 = arith.constant dense<0.000000e+00> : vector<2x128xf32>
    %369 = tpu.matmul %69, %368, %cst_298 {dimension_numbers = #tpu.dot_dimension_numbers<[1], [0], [0], [1], [0, 0, 1, 1], [], []>} : vector<2x64xbf16>, vector<64x128xbf16>, vector<2x128xf32> -> vector<2x128xf32>
    %370 = arith.addf %366, %369 : vector<2x128xf32>
    %c3_299 = arith.constant 3 : index
    %c0_300 = arith.constant 0 : index
    %c0_301 = arith.constant 0 : index
    %371 = vector.load %arg4[%c3_299, %c0_300, %c0_301] : memref<4x64x128xbf16, #tpu.memory_space<vmem>>, vector<1x64x128xbf16>
    %372 = vector.shape_cast %371 : vector<1x64x128xbf16> to vector<64x128xbf16>
    %cst_302 = arith.constant dense<0.000000e+00> : vector<2x128xf32>
    %373 = tpu.matmul %79, %372, %cst_302 {dimension_numbers = #tpu.dot_dimension_numbers<[1], [0], [0], [1], [0, 0, 1, 1], [], []>} : vector<2x64xbf16>, vector<64x128xbf16>, vector<2x128xf32> -> vector<2x128xf32>
    %374 = arith.addf %370, %373 : vector<2x128xf32>
    %c0_303 = arith.constant 0 : index
    %c0_304 = arith.constant 0 : index
    %375 = vector.load %arg5[%c0_303, %c0_304] : memref<1x128xf32, #tpu.memory_space<vmem>>, vector<1x128xf32>
    %376 = vector.broadcast %375 : vector<1x128xf32> to vector<2x128xf32>
    %377 = arith.addf %374, %376 : vector<2x128xf32>
    %cst_305 = arith.constant 0.000000e+00 : f32
    %378 = vector.broadcast %cst_305 : f32 to vector<2x128xf32>
    %379 = arith.maximumf %377, %378 : vector<2x128xf32>
    %c0_306 = arith.constant 0 : index
    %c0_307 = arith.constant 0 : index
    %c0_308 = arith.constant 0 : index
    %380 = vector.load %arg4[%c0_306, %c0_307, %c0_308] : memref<4x64x128xbf16, #tpu.memory_space<vmem>>, vector<1x64x128xbf16>
    %381 = vector.shape_cast %380 : vector<1x64x128xbf16> to vector<64x128xbf16>
    %cst_309 = arith.constant dense<0.000000e+00> : vector<2x128xf32>
    %382 = tpu.matmul %29, %381, %cst_309 {dimension_numbers = #tpu.dot_dimension_numbers<[1], [0], [0], [1], [0, 0, 1, 1], [], []>} : vector<2x64xbf16>, vector<64x128xbf16>, vector<2x128xf32> -> vector<2x128xf32>
    %c1_310 = arith.constant 1 : index
    %c0_311 = arith.constant 0 : index
    %c0_312 = arith.constant 0 : index
    %383 = vector.load %arg4[%c1_310, %c0_311, %c0_312] : memref<4x64x128xbf16, #tpu.memory_space<vmem>>, vector<1x64x128xbf16>
    %384 = vector.shape_cast %383 : vector<1x64x128xbf16> to vector<64x128xbf16>
    %cst_313 = arith.constant dense<0.000000e+00> : vector<2x128xf32>
    %385 = tpu.matmul %39, %384, %cst_313 {dimension_numbers = #tpu.dot_dimension_numbers<[1], [0], [0], [1], [0, 0, 1, 1], [], []>} : vector<2x64xbf16>, vector<64x128xbf16>, vector<2x128xf32> -> vector<2x128xf32>
    %386 = arith.addf %382, %385 : vector<2x128xf32>
    %c2_314 = arith.constant 2 : index
    %c0_315 = arith.constant 0 : index
    %c0_316 = arith.constant 0 : index
    %387 = vector.load %arg4[%c2_314, %c0_315, %c0_316] : memref<4x64x128xbf16, #tpu.memory_space<vmem>>, vector<1x64x128xbf16>
    %388 = vector.shape_cast %387 : vector<1x64x128xbf16> to vector<64x128xbf16>
    %cst_317 = arith.constant dense<0.000000e+00> : vector<2x128xf32>
    %389 = tpu.matmul %89, %388, %cst_317 {dimension_numbers = #tpu.dot_dimension_numbers<[1], [0], [0], [1], [0, 0, 1, 1], [], []>} : vector<2x64xbf16>, vector<64x128xbf16>, vector<2x128xf32> -> vector<2x128xf32>
    %390 = arith.addf %386, %389 : vector<2x128xf32>
    %c3_318 = arith.constant 3 : index
    %c0_319 = arith.constant 0 : index
    %c0_320 = arith.constant 0 : index
    %391 = vector.load %arg4[%c3_318, %c0_319, %c0_320] : memref<4x64x128xbf16, #tpu.memory_space<vmem>>, vector<1x64x128xbf16>
    %392 = vector.shape_cast %391 : vector<1x64x128xbf16> to vector<64x128xbf16>
    %cst_321 = arith.constant dense<0.000000e+00> : vector<2x128xf32>
    %393 = tpu.matmul %99, %392, %cst_321 {dimension_numbers = #tpu.dot_dimension_numbers<[1], [0], [0], [1], [0, 0, 1, 1], [], []>} : vector<2x64xbf16>, vector<64x128xbf16>, vector<2x128xf32> -> vector<2x128xf32>
    %394 = arith.addf %390, %393 : vector<2x128xf32>
    %c0_322 = arith.constant 0 : index
    %c0_323 = arith.constant 0 : index
    %395 = vector.load %arg5[%c0_322, %c0_323] : memref<1x128xf32, #tpu.memory_space<vmem>>, vector<1x128xf32>
    %396 = vector.broadcast %395 : vector<1x128xf32> to vector<2x128xf32>
    %397 = arith.addf %394, %396 : vector<2x128xf32>
    %cst_324 = arith.constant 0.000000e+00 : f32
    %398 = vector.broadcast %cst_324 : f32 to vector<2x128xf32>
    %399 = arith.maximumf %397, %398 : vector<2x128xf32>
    %c0_325 = arith.constant 0 : index
    %c0_326 = arith.constant 0 : index
    %c0_327 = arith.constant 0 : index
    %400 = vector.load %arg4[%c0_325, %c0_326, %c0_327] : memref<4x64x128xbf16, #tpu.memory_space<vmem>>, vector<1x64x128xbf16>
    %401 = vector.shape_cast %400 : vector<1x64x128xbf16> to vector<64x128xbf16>
    %cst_328 = arith.constant dense<0.000000e+00> : vector<2x128xf32>
    %402 = tpu.matmul %49, %401, %cst_328 {dimension_numbers = #tpu.dot_dimension_numbers<[1], [0], [0], [1], [0, 0, 1, 1], [], []>} : vector<2x64xbf16>, vector<64x128xbf16>, vector<2x128xf32> -> vector<2x128xf32>
    %c1_329 = arith.constant 1 : index
    %c0_330 = arith.constant 0 : index
    %c0_331 = arith.constant 0 : index
    %403 = vector.load %arg4[%c1_329, %c0_330, %c0_331] : memref<4x64x128xbf16, #tpu.memory_space<vmem>>, vector<1x64x128xbf16>
    %404 = vector.shape_cast %403 : vector<1x64x128xbf16> to vector<64x128xbf16>
    %cst_332 = arith.constant dense<0.000000e+00> : vector<2x128xf32>
    %405 = tpu.matmul %59, %404, %cst_332 {dimension_numbers = #tpu.dot_dimension_numbers<[1], [0], [0], [1], [0, 0, 1, 1], [], []>} : vector<2x64xbf16>, vector<64x128xbf16>, vector<2x128xf32> -> vector<2x128xf32>
    %406 = arith.addf %402, %405 : vector<2x128xf32>
    %c2_333 = arith.constant 2 : index
    %c0_334 = arith.constant 0 : index
    %c0_335 = arith.constant 0 : index
    %407 = vector.load %arg4[%c2_333, %c0_334, %c0_335] : memref<4x64x128xbf16, #tpu.memory_space<vmem>>, vector<1x64x128xbf16>
    %408 = vector.shape_cast %407 : vector<1x64x128xbf16> to vector<64x128xbf16>
    %cst_336 = arith.constant dense<0.000000e+00> : vector<2x128xf32>
    %409 = tpu.matmul %109, %408, %cst_336 {dimension_numbers = #tpu.dot_dimension_numbers<[1], [0], [0], [1], [0, 0, 1, 1], [], []>} : vector<2x64xbf16>, vector<64x128xbf16>, vector<2x128xf32> -> vector<2x128xf32>
    %410 = arith.addf %406, %409 : vector<2x128xf32>
    %c3_337 = arith.constant 3 : index
    %c0_338 = arith.constant 0 : index
    %c0_339 = arith.constant 0 : index
    %411 = vector.load %arg4[%c3_337, %c0_338, %c0_339] : memref<4x64x128xbf16, #tpu.memory_space<vmem>>, vector<1x64x128xbf16>
    %412 = vector.shape_cast %411 : vector<1x64x128xbf16> to vector<64x128xbf16>
    %cst_340 = arith.constant dense<0.000000e+00> : vector<2x128xf32>
    %413 = tpu.matmul %119, %412, %cst_340 {dimension_numbers = #tpu.dot_dimension_numbers<[1], [0], [0], [1], [0, 0, 1, 1], [], []>} : vector<2x64xbf16>, vector<64x128xbf16>, vector<2x128xf32> -> vector<2x128xf32>
    %414 = arith.addf %410, %413 : vector<2x128xf32>
    %c0_341 = arith.constant 0 : index
    %c0_342 = arith.constant 0 : index
    %415 = vector.load %arg5[%c0_341, %c0_342] : memref<1x128xf32, #tpu.memory_space<vmem>>, vector<1x128xf32>
    %416 = vector.broadcast %415 : vector<1x128xf32> to vector<2x128xf32>
    %417 = arith.addf %414, %416 : vector<2x128xf32>
    %cst_343 = arith.constant 0.000000e+00 : f32
    %418 = vector.broadcast %cst_343 : f32 to vector<2x128xf32>
    %419 = arith.maximumf %417, %418 : vector<2x128xf32>
    %c0_344 = arith.constant 0 : index
    %c0_345 = arith.constant 0 : index
    %c0_346 = arith.constant 0 : index
    %420 = vector.load %arg4[%c0_344, %c0_345, %c0_346] : memref<4x64x128xbf16, #tpu.memory_space<vmem>>, vector<1x64x128xbf16>
    %421 = vector.shape_cast %420 : vector<1x64x128xbf16> to vector<64x128xbf16>
    %cst_347 = arith.constant dense<0.000000e+00> : vector<2x128xf32>
    %422 = tpu.matmul %129, %421, %cst_347 {dimension_numbers = #tpu.dot_dimension_numbers<[1], [0], [0], [1], [0, 0, 1, 1], [], []>} : vector<2x64xbf16>, vector<64x128xbf16>, vector<2x128xf32> -> vector<2x128xf32>
    %c1_348 = arith.constant 1 : index
    %c0_349 = arith.constant 0 : index
    %c0_350 = arith.constant 0 : index
    %423 = vector.load %arg4[%c1_348, %c0_349, %c0_350] : memref<4x64x128xbf16, #tpu.memory_space<vmem>>, vector<1x64x128xbf16>
    %424 = vector.shape_cast %423 : vector<1x64x128xbf16> to vector<64x128xbf16>
    %cst_351 = arith.constant dense<0.000000e+00> : vector<2x128xf32>
    %425 = tpu.matmul %139, %424, %cst_351 {dimension_numbers = #tpu.dot_dimension_numbers<[1], [0], [0], [1], [0, 0, 1, 1], [], []>} : vector<2x64xbf16>, vector<64x128xbf16>, vector<2x128xf32> -> vector<2x128xf32>
    %426 = arith.addf %422, %425 : vector<2x128xf32>
    %c2_352 = arith.constant 2 : index
    %c0_353 = arith.constant 0 : index
    %c0_354 = arith.constant 0 : index
    %427 = vector.load %arg4[%c2_352, %c0_353, %c0_354] : memref<4x64x128xbf16, #tpu.memory_space<vmem>>, vector<1x64x128xbf16>
    %428 = vector.shape_cast %427 : vector<1x64x128xbf16> to vector<64x128xbf16>
    %cst_355 = arith.constant dense<0.000000e+00> : vector<2x128xf32>
    %429 = tpu.matmul %189, %428, %cst_355 {dimension_numbers = #tpu.dot_dimension_numbers<[1], [0], [0], [1], [0, 0, 1, 1], [], []>} : vector<2x64xbf16>, vector<64x128xbf16>, vector<2x128xf32> -> vector<2x128xf32>
    %430 = arith.addf %426, %429 : vector<2x128xf32>
    %c3_356 = arith.constant 3 : index
    %c0_357 = arith.constant 0 : index
    %c0_358 = arith.constant 0 : index
    %431 = vector.load %arg4[%c3_356, %c0_357, %c0_358] : memref<4x64x128xbf16, #tpu.memory_space<vmem>>, vector<1x64x128xbf16>
    %432 = vector.shape_cast %431 : vector<1x64x128xbf16> to vector<64x128xbf16>
    %cst_359 = arith.constant dense<0.000000e+00> : vector<2x128xf32>
    %433 = tpu.matmul %199, %432, %cst_359 {dimension_numbers = #tpu.dot_dimension_numbers<[1], [0], [0], [1], [0, 0, 1, 1], [], []>} : vector<2x64xbf16>, vector<64x128xbf16>, vector<2x128xf32> -> vector<2x128xf32>
    %434 = arith.addf %430, %433 : vector<2x128xf32>
    %c0_360 = arith.constant 0 : index
    %c0_361 = arith.constant 0 : index
    %435 = vector.load %arg5[%c0_360, %c0_361] : memref<1x128xf32, #tpu.memory_space<vmem>>, vector<1x128xf32>
    %436 = vector.broadcast %435 : vector<1x128xf32> to vector<2x128xf32>
    %437 = arith.addf %434, %436 : vector<2x128xf32>
    %cst_362 = arith.constant 0.000000e+00 : f32
    %438 = vector.broadcast %cst_362 : f32 to vector<2x128xf32>
    %439 = arith.maximumf %437, %438 : vector<2x128xf32>
    %c0_363 = arith.constant 0 : index
    %c0_364 = arith.constant 0 : index
    %c0_365 = arith.constant 0 : index
    %440 = vector.load %arg4[%c0_363, %c0_364, %c0_365] : memref<4x64x128xbf16, #tpu.memory_space<vmem>>, vector<1x64x128xbf16>
    %441 = vector.shape_cast %440 : vector<1x64x128xbf16> to vector<64x128xbf16>
    %cst_366 = arith.constant dense<0.000000e+00> : vector<2x128xf32>
    %442 = tpu.matmul %149, %441, %cst_366 {dimension_numbers = #tpu.dot_dimension_numbers<[1], [0], [0], [1], [0, 0, 1, 1], [], []>} : vector<2x64xbf16>, vector<64x128xbf16>, vector<2x128xf32> -> vector<2x128xf32>
    %c1_367 = arith.constant 1 : index
    %c0_368 = arith.constant 0 : index
    %c0_369 = arith.constant 0 : index
    %443 = vector.load %arg4[%c1_367, %c0_368, %c0_369] : memref<4x64x128xbf16, #tpu.memory_space<vmem>>, vector<1x64x128xbf16>
    %444 = vector.shape_cast %443 : vector<1x64x128xbf16> to vector<64x128xbf16>
    %cst_370 = arith.constant dense<0.000000e+00> : vector<2x128xf32>
    %445 = tpu.matmul %159, %444, %cst_370 {dimension_numbers = #tpu.dot_dimension_numbers<[1], [0], [0], [1], [0, 0, 1, 1], [], []>} : vector<2x64xbf16>, vector<64x128xbf16>, vector<2x128xf32> -> vector<2x128xf32>
    %446 = arith.addf %442, %445 : vector<2x128xf32>
    %c2_371 = arith.constant 2 : index
    %c0_372 = arith.constant 0 : index
    %c0_373 = arith.constant 0 : index
    %447 = vector.load %arg4[%c2_371, %c0_372, %c0_373] : memref<4x64x128xbf16, #tpu.memory_space<vmem>>, vector<1x64x128xbf16>
    %448 = vector.shape_cast %447 : vector<1x64x128xbf16> to vector<64x128xbf16>
    %cst_374 = arith.constant dense<0.000000e+00> : vector<2x128xf32>
    %449 = tpu.matmul %209, %448, %cst_374 {dimension_numbers = #tpu.dot_dimension_numbers<[1], [0], [0], [1], [0, 0, 1, 1], [], []>} : vector<2x64xbf16>, vector<64x128xbf16>, vector<2x128xf32> -> vector<2x128xf32>
    %450 = arith.addf %446, %449 : vector<2x128xf32>
    %c3_375 = arith.constant 3 : index
    %c0_376 = arith.constant 0 : index
    %c0_377 = arith.constant 0 : index
    %451 = vector.load %arg4[%c3_375, %c0_376, %c0_377] : memref<4x64x128xbf16, #tpu.memory_space<vmem>>, vector<1x64x128xbf16>
    %452 = vector.shape_cast %451 : vector<1x64x128xbf16> to vector<64x128xbf16>
    %cst_378 = arith.constant dense<0.000000e+00> : vector<2x128xf32>
    %453 = tpu.matmul %219, %452, %cst_378 {dimension_numbers = #tpu.dot_dimension_numbers<[1], [0], [0], [1], [0, 0, 1, 1], [], []>} : vector<2x64xbf16>, vector<64x128xbf16>, vector<2x128xf32> -> vector<2x128xf32>
    %454 = arith.addf %450, %453 : vector<2x128xf32>
    %c0_379 = arith.constant 0 : index
    %c0_380 = arith.constant 0 : index
    %455 = vector.load %arg5[%c0_379, %c0_380] : memref<1x128xf32, #tpu.memory_space<vmem>>, vector<1x128xf32>
    %456 = vector.broadcast %455 : vector<1x128xf32> to vector<2x128xf32>
    %457 = arith.addf %454, %456 : vector<2x128xf32>
    %cst_381 = arith.constant 0.000000e+00 : f32
    %458 = vector.broadcast %cst_381 : f32 to vector<2x128xf32>
    %459 = arith.maximumf %457, %458 : vector<2x128xf32>
    %c0_382 = arith.constant 0 : index
    %c0_383 = arith.constant 0 : index
    %c0_384 = arith.constant 0 : index
    %460 = vector.load %arg4[%c0_382, %c0_383, %c0_384] : memref<4x64x128xbf16, #tpu.memory_space<vmem>>, vector<1x64x128xbf16>
    %461 = vector.shape_cast %460 : vector<1x64x128xbf16> to vector<64x128xbf16>
    %cst_385 = arith.constant dense<0.000000e+00> : vector<2x128xf32>
    %462 = tpu.matmul %169, %461, %cst_385 {dimension_numbers = #tpu.dot_dimension_numbers<[1], [0], [0], [1], [0, 0, 1, 1], [], []>} : vector<2x64xbf16>, vector<64x128xbf16>, vector<2x128xf32> -> vector<2x128xf32>
    %c1_386 = arith.constant 1 : index
    %c0_387 = arith.constant 0 : index
    %c0_388 = arith.constant 0 : index
    %463 = vector.load %arg4[%c1_386, %c0_387, %c0_388] : memref<4x64x128xbf16, #tpu.memory_space<vmem>>, vector<1x64x128xbf16>
    %464 = vector.shape_cast %463 : vector<1x64x128xbf16> to vector<64x128xbf16>
    %cst_389 = arith.constant dense<0.000000e+00> : vector<2x128xf32>
    %465 = tpu.matmul %179, %464, %cst_389 {dimension_numbers = #tpu.dot_dimension_numbers<[1], [0], [0], [1], [0, 0, 1, 1], [], []>} : vector<2x64xbf16>, vector<64x128xbf16>, vector<2x128xf32> -> vector<2x128xf32>
    %466 = arith.addf %462, %465 : vector<2x128xf32>
    %c2_390 = arith.constant 2 : index
    %c0_391 = arith.constant 0 : index
    %c0_392 = arith.constant 0 : index
    %467 = vector.load %arg4[%c2_390, %c0_391, %c0_392] : memref<4x64x128xbf16, #tpu.memory_space<vmem>>, vector<1x64x128xbf16>
    %468 = vector.shape_cast %467 : vector<1x64x128xbf16> to vector<64x128xbf16>
    %cst_393 = arith.constant dense<0.000000e+00> : vector<2x128xf32>
    %469 = tpu.matmul %229, %468, %cst_393 {dimension_numbers = #tpu.dot_dimension_numbers<[1], [0], [0], [1], [0, 0, 1, 1], [], []>} : vector<2x64xbf16>, vector<64x128xbf16>, vector<2x128xf32> -> vector<2x128xf32>
    %470 = arith.addf %466, %469 : vector<2x128xf32>
    %c3_394 = arith.constant 3 : index
    %c0_395 = arith.constant 0 : index
    %c0_396 = arith.constant 0 : index
    %471 = vector.load %arg4[%c3_394, %c0_395, %c0_396] : memref<4x64x128xbf16, #tpu.memory_space<vmem>>, vector<1x64x128xbf16>
    %472 = vector.shape_cast %471 : vector<1x64x128xbf16> to vector<64x128xbf16>
    %cst_397 = arith.constant dense<0.000000e+00> : vector<2x128xf32>
    %473 = tpu.matmul %239, %472, %cst_397 {dimension_numbers = #tpu.dot_dimension_numbers<[1], [0], [0], [1], [0, 0, 1, 1], [], []>} : vector<2x64xbf16>, vector<64x128xbf16>, vector<2x128xf32> -> vector<2x128xf32>
    %474 = arith.addf %470, %473 : vector<2x128xf32>
    %c0_398 = arith.constant 0 : index
    %c0_399 = arith.constant 0 : index
    %475 = vector.load %arg5[%c0_398, %c0_399] : memref<1x128xf32, #tpu.memory_space<vmem>>, vector<1x128xf32>
    %476 = vector.broadcast %475 : vector<1x128xf32> to vector<2x128xf32>
    %477 = arith.addf %474, %476 : vector<2x128xf32>
    %cst_400 = arith.constant 0.000000e+00 : f32
    %478 = vector.broadcast %cst_400 : f32 to vector<2x128xf32>
    %479 = arith.maximumf %477, %478 : vector<2x128xf32>
    %c0_401 = arith.constant 0 : index
    %c0_402 = arith.constant 0 : index
    %c0_403 = arith.constant 0 : index
    %480 = vector.load %arg4[%c0_401, %c0_402, %c0_403] : memref<4x64x128xbf16, #tpu.memory_space<vmem>>, vector<1x64x128xbf16>
    %481 = vector.shape_cast %480 : vector<1x64x128xbf16> to vector<64x128xbf16>
    %cst_404 = arith.constant dense<0.000000e+00> : vector<2x128xf32>
    %482 = tpu.matmul %249, %481, %cst_404 {dimension_numbers = #tpu.dot_dimension_numbers<[1], [0], [0], [1], [0, 0, 1, 1], [], []>} : vector<2x64xbf16>, vector<64x128xbf16>, vector<2x128xf32> -> vector<2x128xf32>
    %c1_405 = arith.constant 1 : index
    %c0_406 = arith.constant 0 : index
    %c0_407 = arith.constant 0 : index
    %483 = vector.load %arg4[%c1_405, %c0_406, %c0_407] : memref<4x64x128xbf16, #tpu.memory_space<vmem>>, vector<1x64x128xbf16>
    %484 = vector.shape_cast %483 : vector<1x64x128xbf16> to vector<64x128xbf16>
    %cst_408 = arith.constant dense<0.000000e+00> : vector<2x128xf32>
    %485 = tpu.matmul %259, %484, %cst_408 {dimension_numbers = #tpu.dot_dimension_numbers<[1], [0], [0], [1], [0, 0, 1, 1], [], []>} : vector<2x64xbf16>, vector<64x128xbf16>, vector<2x128xf32> -> vector<2x128xf32>
    %486 = arith.addf %482, %485 : vector<2x128xf32>
    %c2_409 = arith.constant 2 : index
    %c0_410 = arith.constant 0 : index
    %c0_411 = arith.constant 0 : index
    %487 = vector.load %arg4[%c2_409, %c0_410, %c0_411] : memref<4x64x128xbf16, #tpu.memory_space<vmem>>, vector<1x64x128xbf16>
    %488 = vector.shape_cast %487 : vector<1x64x128xbf16> to vector<64x128xbf16>
    %cst_412 = arith.constant dense<0.000000e+00> : vector<2x128xf32>
    %489 = tpu.matmul %309, %488, %cst_412 {dimension_numbers = #tpu.dot_dimension_numbers<[1], [0], [0], [1], [0, 0, 1, 1], [], []>} : vector<2x64xbf16>, vector<64x128xbf16>, vector<2x128xf32> -> vector<2x128xf32>
    %490 = arith.addf %486, %489 : vector<2x128xf32>
    %c3_413 = arith.constant 3 : index
    %c0_414 = arith.constant 0 : index
    %c0_415 = arith.constant 0 : index
    %491 = vector.load %arg4[%c3_413, %c0_414, %c0_415] : memref<4x64x128xbf16, #tpu.memory_space<vmem>>, vector<1x64x128xbf16>
    %492 = vector.shape_cast %491 : vector<1x64x128xbf16> to vector<64x128xbf16>
    %cst_416 = arith.constant dense<0.000000e+00> : vector<2x128xf32>
    %493 = tpu.matmul %319, %492, %cst_416 {dimension_numbers = #tpu.dot_dimension_numbers<[1], [0], [0], [1], [0, 0, 1, 1], [], []>} : vector<2x64xbf16>, vector<64x128xbf16>, vector<2x128xf32> -> vector<2x128xf32>
    %494 = arith.addf %490, %493 : vector<2x128xf32>
    %c0_417 = arith.constant 0 : index
    %c0_418 = arith.constant 0 : index
    %495 = vector.load %arg5[%c0_417, %c0_418] : memref<1x128xf32, #tpu.memory_space<vmem>>, vector<1x128xf32>
    %496 = vector.broadcast %495 : vector<1x128xf32> to vector<2x128xf32>
    %497 = arith.addf %494, %496 : vector<2x128xf32>
    %cst_419 = arith.constant 0.000000e+00 : f32
    %498 = vector.broadcast %cst_419 : f32 to vector<2x128xf32>
    %499 = arith.maximumf %497, %498 : vector<2x128xf32>
    %c0_420 = arith.constant 0 : index
    %c0_421 = arith.constant 0 : index
    %c0_422 = arith.constant 0 : index
    %500 = vector.load %arg4[%c0_420, %c0_421, %c0_422] : memref<4x64x128xbf16, #tpu.memory_space<vmem>>, vector<1x64x128xbf16>
    %501 = vector.shape_cast %500 : vector<1x64x128xbf16> to vector<64x128xbf16>
    %cst_423 = arith.constant dense<0.000000e+00> : vector<2x128xf32>
    %502 = tpu.matmul %269, %501, %cst_423 {dimension_numbers = #tpu.dot_dimension_numbers<[1], [0], [0], [1], [0, 0, 1, 1], [], []>} : vector<2x64xbf16>, vector<64x128xbf16>, vector<2x128xf32> -> vector<2x128xf32>
    %c1_424 = arith.constant 1 : index
    %c0_425 = arith.constant 0 : index
    %c0_426 = arith.constant 0 : index
    %503 = vector.load %arg4[%c1_424, %c0_425, %c0_426] : memref<4x64x128xbf16, #tpu.memory_space<vmem>>, vector<1x64x128xbf16>
    %504 = vector.shape_cast %503 : vector<1x64x128xbf16> to vector<64x128xbf16>
    %cst_427 = arith.constant dense<0.000000e+00> : vector<2x128xf32>
    %505 = tpu.matmul %279, %504, %cst_427 {dimension_numbers = #tpu.dot_dimension_numbers<[1], [0], [0], [1], [0, 0, 1, 1], [], []>} : vector<2x64xbf16>, vector<64x128xbf16>, vector<2x128xf32> -> vector<2x128xf32>
    %506 = arith.addf %502, %505 : vector<2x128xf32>
    %c2_428 = arith.constant 2 : index
    %c0_429 = arith.constant 0 : index
    %c0_430 = arith.constant 0 : index
    %507 = vector.load %arg4[%c2_428, %c0_429, %c0_430] : memref<4x64x128xbf16, #tpu.memory_space<vmem>>, vector<1x64x128xbf16>
    %508 = vector.shape_cast %507 : vector<1x64x128xbf16> to vector<64x128xbf16>
    %cst_431 = arith.constant dense<0.000000e+00> : vector<2x128xf32>
    %509 = tpu.matmul %329, %508, %cst_431 {dimension_numbers = #tpu.dot_dimension_numbers<[1], [0], [0], [1], [0, 0, 1, 1], [], []>} : vector<2x64xbf16>, vector<64x128xbf16>, vector<2x128xf32> -> vector<2x128xf32>
    %510 = arith.addf %506, %509 : vector<2x128xf32>
    %c3_432 = arith.constant 3 : index
    %c0_433 = arith.constant 0 : index
    %c0_434 = arith.constant 0 : index
    %511 = vector.load %arg4[%c3_432, %c0_433, %c0_434] : memref<4x64x128xbf16, #tpu.memory_space<vmem>>, vector<1x64x128xbf16>
    %512 = vector.shape_cast %511 : vector<1x64x128xbf16> to vector<64x128xbf16>
    %cst_435 = arith.constant dense<0.000000e+00> : vector<2x128xf32>
    %513 = tpu.matmul %339, %512, %cst_435 {dimension_numbers = #tpu.dot_dimension_numbers<[1], [0], [0], [1], [0, 0, 1, 1], [], []>} : vector<2x64xbf16>, vector<64x128xbf16>, vector<2x128xf32> -> vector<2x128xf32>
    %514 = arith.addf %510, %513 : vector<2x128xf32>
    %c0_436 = arith.constant 0 : index
    %c0_437 = arith.constant 0 : index
    %515 = vector.load %arg5[%c0_436, %c0_437] : memref<1x128xf32, #tpu.memory_space<vmem>>, vector<1x128xf32>
    %516 = vector.broadcast %515 : vector<1x128xf32> to vector<2x128xf32>
    %517 = arith.addf %514, %516 : vector<2x128xf32>
    %cst_438 = arith.constant 0.000000e+00 : f32
    %518 = vector.broadcast %cst_438 : f32 to vector<2x128xf32>
    %519 = arith.maximumf %517, %518 : vector<2x128xf32>
    %c0_439 = arith.constant 0 : index
    %c0_440 = arith.constant 0 : index
    %c0_441 = arith.constant 0 : index
    %520 = vector.load %arg4[%c0_439, %c0_440, %c0_441] : memref<4x64x128xbf16, #tpu.memory_space<vmem>>, vector<1x64x128xbf16>
    %521 = vector.shape_cast %520 : vector<1x64x128xbf16> to vector<64x128xbf16>
    %cst_442 = arith.constant dense<0.000000e+00> : vector<2x128xf32>
    %522 = tpu.matmul %289, %521, %cst_442 {dimension_numbers = #tpu.dot_dimension_numbers<[1], [0], [0], [1], [0, 0, 1, 1], [], []>} : vector<2x64xbf16>, vector<64x128xbf16>, vector<2x128xf32> -> vector<2x128xf32>
    %c1_443 = arith.constant 1 : index
    %c0_444 = arith.constant 0 : index
    %c0_445 = arith.constant 0 : index
    %523 = vector.load %arg4[%c1_443, %c0_444, %c0_445] : memref<4x64x128xbf16, #tpu.memory_space<vmem>>, vector<1x64x128xbf16>
    %524 = vector.shape_cast %523 : vector<1x64x128xbf16> to vector<64x128xbf16>
    %cst_446 = arith.constant dense<0.000000e+00> : vector<2x128xf32>
    %525 = tpu.matmul %299, %524, %cst_446 {dimension_numbers = #tpu.dot_dimension_numbers<[1], [0], [0], [1], [0, 0, 1, 1], [], []>} : vector<2x64xbf16>, vector<64x128xbf16>, vector<2x128xf32> -> vector<2x128xf32>
    %526 = arith.addf %522, %525 : vector<2x128xf32>
    %c2_447 = arith.constant 2 : index
    %c0_448 = arith.constant 0 : index
    %c0_449 = arith.constant 0 : index
    %527 = vector.load %arg4[%c2_447, %c0_448, %c0_449] : memref<4x64x128xbf16, #tpu.memory_space<vmem>>, vector<1x64x128xbf16>
    %528 = vector.shape_cast %527 : vector<1x64x128xbf16> to vector<64x128xbf16>
    %cst_450 = arith.constant dense<0.000000e+00> : vector<2x128xf32>
    %529 = tpu.matmul %349, %528, %cst_450 {dimension_numbers = #tpu.dot_dimension_numbers<[1], [0], [0], [1], [0, 0, 1, 1], [], []>} : vector<2x64xbf16>, vector<64x128xbf16>, vector<2x128xf32> -> vector<2x128xf32>
    %530 = arith.addf %526, %529 : vector<2x128xf32>
    %c3_451 = arith.constant 3 : index
    %c0_452 = arith.constant 0 : index
    %c0_453 = arith.constant 0 : index
    %531 = vector.load %arg4[%c3_451, %c0_452, %c0_453] : memref<4x64x128xbf16, #tpu.memory_space<vmem>>, vector<1x64x128xbf16>
    %532 = vector.shape_cast %531 : vector<1x64x128xbf16> to vector<64x128xbf16>
    %cst_454 = arith.constant dense<0.000000e+00> : vector<2x128xf32>
    %533 = tpu.matmul %359, %532, %cst_454 {dimension_numbers = #tpu.dot_dimension_numbers<[1], [0], [0], [1], [0, 0, 1, 1], [], []>} : vector<2x64xbf16>, vector<64x128xbf16>, vector<2x128xf32> -> vector<2x128xf32>
    %534 = arith.addf %530, %533 : vector<2x128xf32>
    %c0_455 = arith.constant 0 : index
    %c0_456 = arith.constant 0 : index
    %535 = vector.load %arg5[%c0_455, %c0_456] : memref<1x128xf32, #tpu.memory_space<vmem>>, vector<1x128xf32>
    %536 = vector.broadcast %535 : vector<1x128xf32> to vector<2x128xf32>
    %537 = arith.addf %534, %536 : vector<2x128xf32>
    %cst_457 = arith.constant 0.000000e+00 : f32
    %538 = vector.broadcast %cst_457 : f32 to vector<2x128xf32>
    %539 = arith.maximumf %537, %538 : vector<2x128xf32>
    %540 = arith.maximumf %379, %399 : vector<2x128xf32>
    %541 = arith.maximumf %439, %459 : vector<2x128xf32>
    %542 = arith.maximumf %540, %541 : vector<2x128xf32>
    %543 = arith.truncf %542 : vector<2x128xf32> to vector<2x128xbf16>
    %c0_458 = arith.constant 0 : index
    %c0_459 = arith.constant 0 : index
    %c0_460 = arith.constant 0 : index
    %544 = vector.load %arg6[%c0_458, %c0_459, %c0_460] : memref<4x128x256xbf16, #tpu.memory_space<vmem>>, vector<1x128x256xbf16>
    %545 = vector.shape_cast %544 : vector<1x128x256xbf16> to vector<128x256xbf16>
    %cst_461 = arith.constant dense<0.000000e+00> : vector<2x256xf32>
    %546 = tpu.matmul %543, %545, %cst_461 {dimension_numbers = #tpu.dot_dimension_numbers<[1], [0], [0], [1], [0, 0, 1, 1], [], []>} : vector<2x128xbf16>, vector<128x256xbf16>, vector<2x256xf32> -> vector<2x256xf32>
    %547 = arith.maximumf %399, %419 : vector<2x128xf32>
    %548 = arith.maximumf %459, %479 : vector<2x128xf32>
    %549 = arith.maximumf %547, %548 : vector<2x128xf32>
    %550 = arith.truncf %549 : vector<2x128xf32> to vector<2x128xbf16>
    %c1_462 = arith.constant 1 : index
    %c0_463 = arith.constant 0 : index
    %c0_464 = arith.constant 0 : index
    %551 = vector.load %arg6[%c1_462, %c0_463, %c0_464] : memref<4x128x256xbf16, #tpu.memory_space<vmem>>, vector<1x128x256xbf16>
    %552 = vector.shape_cast %551 : vector<1x128x256xbf16> to vector<128x256xbf16>
    %cst_465 = arith.constant dense<0.000000e+00> : vector<2x256xf32>
    %553 = tpu.matmul %550, %552, %cst_465 {dimension_numbers = #tpu.dot_dimension_numbers<[1], [0], [0], [1], [0, 0, 1, 1], [], []>} : vector<2x128xbf16>, vector<128x256xbf16>, vector<2x256xf32> -> vector<2x256xf32>
    %554 = arith.addf %546, %553 : vector<2x256xf32>
    %555 = arith.maximumf %439, %459 : vector<2x128xf32>
    %556 = arith.maximumf %499, %519 : vector<2x128xf32>
    %557 = arith.maximumf %555, %556 : vector<2x128xf32>
    %558 = arith.truncf %557 : vector<2x128xf32> to vector<2x128xbf16>
    %c2_466 = arith.constant 2 : index
    %c0_467 = arith.constant 0 : index
    %c0_468 = arith.constant 0 : index
    %559 = vector.load %arg6[%c2_466, %c0_467, %c0_468] : memref<4x128x256xbf16, #tpu.memory_space<vmem>>, vector<1x128x256xbf16>
    %560 = vector.shape_cast %559 : vector<1x128x256xbf16> to vector<128x256xbf16>
    %cst_469 = arith.constant dense<0.000000e+00> : vector<2x256xf32>
    %561 = tpu.matmul %558, %560, %cst_469 {dimension_numbers = #tpu.dot_dimension_numbers<[1], [0], [0], [1], [0, 0, 1, 1], [], []>} : vector<2x128xbf16>, vector<128x256xbf16>, vector<2x256xf32> -> vector<2x256xf32>
    %562 = arith.addf %554, %561 : vector<2x256xf32>
    %563 = arith.maximumf %459, %479 : vector<2x128xf32>
    %564 = arith.maximumf %519, %539 : vector<2x128xf32>
    %565 = arith.maximumf %563, %564 : vector<2x128xf32>
    %566 = arith.truncf %565 : vector<2x128xf32> to vector<2x128xbf16>
    %c3_470 = arith.constant 3 : index
    %c0_471 = arith.constant 0 : index
    %c0_472 = arith.constant 0 : index
    %567 = vector.load %arg6[%c3_470, %c0_471, %c0_472] : memref<4x128x256xbf16, #tpu.memory_space<vmem>>, vector<1x128x256xbf16>
    %568 = vector.shape_cast %567 : vector<1x128x256xbf16> to vector<128x256xbf16>
    %cst_473 = arith.constant dense<0.000000e+00> : vector<2x256xf32>
    %569 = tpu.matmul %566, %568, %cst_473 {dimension_numbers = #tpu.dot_dimension_numbers<[1], [0], [0], [1], [0, 0, 1, 1], [], []>} : vector<2x128xbf16>, vector<128x256xbf16>, vector<2x256xf32> -> vector<2x256xf32>
    %570 = arith.addf %562, %569 : vector<2x256xf32>
    %c0_474 = arith.constant 0 : index
    %c0_475 = arith.constant 0 : index
    %571 = vector.load %arg7[%c0_474, %c0_475] : memref<1x256xf32, #tpu.memory_space<vmem>>, vector<1x256xf32>
    %572 = vector.broadcast %571 : vector<1x256xf32> to vector<2x256xf32>
    %573 = arith.addf %570, %572 : vector<2x256xf32>
    %cst_476 = arith.constant 0.000000e+00 : f32
    %574 = vector.broadcast %cst_476 : f32 to vector<2x256xf32>
    %575 = arith.maximumf %573, %574 : vector<2x256xf32>
    %576 = arith.truncf %575 : vector<2x256xf32> to vector<2x256xbf16>
    %c0_477 = arith.constant 0 : index
    %c0_478 = arith.constant 0 : index
    %577 = vector.load %arg8[%c0_477, %c0_478] : memref<256x10xbf16, #tpu.memory_space<vmem>>, vector<256x10xbf16>
    %cst_479 = arith.constant dense<0.000000e+00> : vector<2x10xf32>
    %578 = tpu.matmul %576, %577, %cst_479 {dimension_numbers = #tpu.dot_dimension_numbers<[1], [0], [0], [1], [0, 0, 1, 1], [], []>} : vector<2x256xbf16>, vector<256x10xbf16>, vector<2x10xf32> -> vector<2x10xf32>
    %c0_480 = arith.constant 0 : index
    %c0_481 = arith.constant 0 : index
    %579 = vector.load %arg9[%c0_480, %c0_481] : memref<1x10xf32, #tpu.memory_space<vmem>>, vector<1x10xf32>
    %580 = vector.broadcast %579 : vector<1x10xf32> to vector<2x10xf32>
    %581 = arith.addf %578, %580 : vector<2x10xf32>
    %cst_482 = arith.constant 0.000000e+00 : f32
    %582 = vector.broadcast %cst_482 : f32 to vector<2x10xf32>
    %583 = arith.maximumf %581, %582 : vector<2x10xf32>
    %584 = arith.truncf %583 : vector<2x10xf32> to vector<2x10xbf16>
    %c0_483 = arith.constant 0 : index
    %c0_484 = arith.constant 0 : index
    %585 = vector.load %arg10[%c0_483, %c0_484] : memref<10x6xbf16, #tpu.memory_space<vmem>>, vector<10x6xbf16>
    %cst_485 = arith.constant dense<0.000000e+00> : vector<2x6xf32>
    %586 = tpu.matmul %584, %585, %cst_485 {dimension_numbers = #tpu.dot_dimension_numbers<[1], [0], [0], [1], [0, 0, 1, 1], [], []>} : vector<2x10xbf16>, vector<10x6xbf16>, vector<2x6xf32> -> vector<2x6xf32>
    %c0_486 = arith.constant 0 : index
    %c0_487 = arith.constant 0 : index
    %587 = vector.load %arg11[%c0_486, %c0_487] : memref<1x6xf32, #tpu.memory_space<vmem>>, vector<1x6xf32>
    %588 = vector.broadcast %587 : vector<1x6xf32> to vector<2x6xf32>
    %589 = arith.addf %586, %588 : vector<2x6xf32>
    %c0_488 = arith.constant 0 : index
    %c0_489 = arith.constant 0 : index
    %590 = vector.load %arg12[%c0_488, %c0_489] : memref<2x6xf32, #tpu.memory_space<vmem>>, vector<2x6xf32>
    tpu.vector_store %arg12[%c0_488, %c0_489], %589 {strides = array<i32>} : memref<2x6xf32, #tpu.memory_space<vmem>>, vector<2x6xf32>,
    return
  }
  func.func @transform_0(%arg0: i32) -> (i32, i32, i32) {
    %c0_i32 = arith.constant 0 : i32
    %c0_i32_0 = arith.constant 0 : i32
    %c0_i32_1 = arith.constant 0 : i32
    return %c0_i32, %arg0, %c0_i32_0 : i32, i32, i32
  }
  func.func @transform_1(%arg0: i32) -> (i32, i32) {
    %c0_i32 = arith.constant 0 : i32
    %c0_i32_0 = arith.constant 0 : i32
    %c0_i32_1 = arith.constant 0 : i32
    return %c0_i32, %c0_i32_0 : i32, i32
  }
  func.func @transform_2(%arg0: i32) -> (i32, i32) {
    %c0_i32 = arith.constant 0 : i32
    %c0_i32_0 = arith.constant 0 : i32
    %c0_i32_1 = arith.constant 0 : i32
    return %c0_i32, %c0_i32_0 : i32, i32
  }
  func.func @transform_3(%arg0: i32) -> (i32, i32, i32) {
    %c0_i32 = arith.constant 0 : i32
    %c0_i32_0 = arith.constant 0 : i32
    %c0_i32_1 = arith.constant 0 : i32
    %c0_i32_2 = arith.constant 0 : i32
    return %c0_i32, %c0_i32_0, %c0_i32_1 : i32, i32, i32
  }
  func.func @transform_4(%arg0: i32) -> (i32, i32) {
    %c0_i32 = arith.constant 0 : i32
    %c0_i32_0 = arith.constant 0 : i32
    %c0_i32_1 = arith.constant 0 : i32
    return %c0_i32, %c0_i32_0 : i32, i32
  }
  func.func @transform_5(%arg0: i32) -> (i32, i32, i32) {
    %c0_i32 = arith.constant 0 : i32
    %c0_i32_0 = arith.constant 0 : i32
    %c0_i32_1 = arith.constant 0 : i32
    %c0_i32_2 = arith.constant 0 : i32
    return %c0_i32, %c0_i32_0, %c0_i32_1 : i32, i32, i32
  }
  func.func @transform_6(%arg0: i32) -> (i32, i32) {
    %c0_i32 = arith.constant 0 : i32
    %c0_i32_0 = arith.constant 0 : i32
    %c0_i32_1 = arith.constant 0 : i32
    return %c0_i32, %c0_i32_0 : i32, i32
  }
  func.func @transform_7(%arg0: i32) -> (i32, i32) {
    %c0_i32 = arith.constant 0 : i32
    %c0_i32_0 = arith.constant 0 : i32
    %c0_i32_1 = arith.constant 0 : i32
    return %c0_i32, %c0_i32_0 : i32, i32
  }
  func.func @transform_8(%arg0: i32) -> (i32, i32) {
    %c0_i32 = arith.constant 0 : i32
    %c0_i32_0 = arith.constant 0 : i32
    %c0_i32_1 = arith.constant 0 : i32
    return %c0_i32, %c0_i32_0 : i32, i32
  }
  func.func @transform_9(%arg0: i32) -> (i32, i32) {
    %c0_i32 = arith.constant 0 : i32
    %c0_i32_0 = arith.constant 0 : i32
    %c0_i32_1 = arith.constant 0 : i32
    return %c0_i32, %c0_i32_0 : i32, i32
  }
  func.func @transform_10(%arg0: i32) -> (i32, i32) {
    %c0_i32 = arith.constant 0 : i32
    %c0_i32_0 = arith.constant 0 : i32
    %c0_i32_1 = arith.constant 0 : i32
    return %c0_i32, %c0_i32_0 : i32, i32
  }
  func.func @transform_11(%arg0: i32) -> (i32, i32) {
    %c0_i32 = arith.constant 0 : i32
    %c0_i32_0 = arith.constant 0 : i32
    return %arg0, %c0_i32 : i32, i32
  }
}

</mosaic_0001>

<bundles_post_ra>
// kernel: dqn_forward.3
= control target key start
LH: loop header
LB: loop body
LE: loop exit
PB: predicated region body
PF: predicated region fallthrough
CT: control target
= control target key end

     0   :  { %s1937_s12 = smov 0   ;;  %s2443_s0 = inlined_call_operand.vmem [shape: bf16[1568,256], index: 0, kind: input, shape index: {}]   ;;  %s2444_s1 = inlined_call_operand.vmem [shape: bf16[256,32], index: 1, kind: input, shape index: {}]   ;;  %s2445_s2 = inlined_call_operand.vmem [shape: f32[1,32], index: 2, kind: input, shape index: {}]   ;;  %s2446_s3 = inlined_call_operand.vmem [shape: f32[1568,32], index: 3, kind: output, shape index: {}]  }
   0x1 LB: > { %s1579_s13 = sadd.s32 4294967295, %s1914_s12   ;;  %p1583_p0 = scmp.ge.s32.totalorder %s1914_s12, 1  ;;  %s1914_s12 = sphi %s1937_s12, %s13_s12  }
   0x2   : > { %p139_p1 = scmp.lt.s32.totalorder %s1914_s12, 3 }
   0x4   : > { %p140_p2 = pnand %p1583_p0, %p139_p1 }
   0x5   : > { %s164_s16 = smul.u32 (!%p140_p2), 98, %s1579_s13 }
   0x6   : > { %143 = sbr.rel (%p140_p2) target bundleno = 470 (0x1d6), region = 32 }
   0x7   : > { %p165_p3 = scmp.lt.s32.totalorder (!%p140_p2), %s164_s16, 195 }
   0xb   : > { %v1746_v0 = vld [vmem:[%s2444_s1 + $0x38] sm:$0xff]   ;;  %v1916_v1 = vmov 0   ;;  %v1747_v2 = vld [vmem:[%s2444_s1 + $0x30] sm:$0xff]   ;;  %v1748_v3 = vld [vmem:[%s2444_s1 + $0x28] sm:$0xff]   ;;  %s2448_s16 = smov (!%p165_p3, %s164_s16), 195  ;;  %vm1424_vm0 = vcmask 261120  }
   0xc   : > { %901 = vmatprep.subr.bf16.mxu0 %v1916_v1  ;;  %1705 = vmatprep.subr.bf16.mxu1 %v1916_v1  ;;  %v1749_v4 = vld [vmem:[%s2444_s1 + $0x20] sm:$0xff]   ;;  %s1704_s23 = sshll.u32 %s2448_s16, 3  ;;  %v1750_v5 = vld [vmem:[%s2444_s1 + $0x18] sm:$0xff]   ;;  %v1751_v7 = vld [vmem:[%s2444_s1 + $0x10] sm:$0xff]  }
   0xd   : > { %902 = vmatpush1.bf16.msra.mxu0 %v1746_v0  ;;  %1721 = vmatpush1.bf16.msra.mxu1 %v1746_v0  ;;  %s1976_s28 = scalar_lea.vmem %s2443_s0, %s1704_s23  ;;  %v1752_v9 = vld [vmem:[%s2444_s1 + $0x8] sm:$0xff]   ;;  %v1753_v10 = vld [vmem:[%s2444_s1] sm:$0xff]   ;;  %v1754_v11 = vld [vmem:[%s2444_s1 + $0x78] sm:$0xff]   ;;  %s2146_s5 = scalar_lea.vmem %s2446_s3, %s1704_s23 }
   0xe   : > { %903 = vmatprep.subr.bf16.mxu0 %v1916_v1  ;;  %1706 = vmatprep.subr.bf16.mxu1 %v1916_v1  ;;  %v1764_v6 = vld [vmem:[%s1976_s28 + $0x4] ss:$8 sps:$4 sm:$0xff]   ;;  %v1767_v8 = vld [vmem:[%s1976_s28 + $0x194] ss:$8 sps:$4 sm:$0xff]   ;;  %v1762_v19 = vld [vmem:[%s1976_s28] ss:$8 sps:$4 sm:$0xff]  }
   0xf   : > { %933 = vmatprep.mubr.bf16.mxu0 %v1764_v6  ;;  %1133 = vmatprep.mubr.bf16.mxu1 %v1767_v8  ;;  %v1755_v12 = vld [vmem:[%s2444_s1 + $0x70] sm:$0xff]   ;;  %v1756_v13 = vld [vmem:[%s2444_s1 + $0x68] sm:$0xff]   ;;  %v1757_v14 = vld [vmem:[%s2444_s1 + $0x60] sm:$0xff]  }
  0x10   : > { %v1758_v15 = vld [vmem:[%s2444_s1 + $0x58] sm:$0xff]   ;;  %v1759_v16 = vld [vmem:[%s2444_s1 + $0x50] sm:$0xff]   ;;  %v1760_v17 = vld [vmem:[%s2444_s1 + $0x48] sm:$0xff]  }
  0x11   : > { %904 = vmatpush1.bf16.msra.mxu0 %v1747_v2  ;;  %1722 = vmatpush1.bf16.msra.mxu1 %v1747_v2  ;;  %v1761_v18 = vld [vmem:[%s2444_s1 + $0x40] sm:$0xff]   ;;  %v1765_v20 = vld [vmem:[%s1976_s28 + $0x190] ss:$8 sps:$4 sm:$0xff]   ;;  %v1768_v21 = vld [vmem:[%s1976_s28 + $0x14] ss:$8 sps:$4 sm:$0xff]  }
  0x12   : > { %905 = vmatprep.subr.bf16.mxu0 %v1916_v1  ;;  %1707 = vmatprep.subr.bf16.mxu1 %v1916_v1  ;;  %v1771_v22 = vld [vmem:[%s1976_s28 + $0x1a4] ss:$8 sps:$4 sm:$0xff]   ;;  %v1770_v23 = vld [vmem:[%s1976_s28 + $0x10] ss:$8 sps:$4 sm:$0xff]   ;;  %v1773_v24 = vld [vmem:[%s1976_s28 + $0x1a0] ss:$8 sps:$4 sm:$0xff]  }
  0x13   : > { %v1774_v25 = vld [vmem:[%s1976_s28 + $0x24] ss:$8 sps:$4 sm:$0xff]   ;;  %v1777_v26 = vld [vmem:[%s1976_s28 + $0x1b4] ss:$8 sps:$4 sm:$0xff]   ;;  %v1776_v27 = vld [vmem:[%s1976_s28 + $0x20] ss:$8 sps:$4 sm:$0xff]  }
  0x14   : > { %v1779_v28 = vld [vmem:[%s1976_s28 + $0x1b0] ss:$8 sps:$4 sm:$0xff]   ;;  %v1780_v29 = vld [vmem:[%s1976_s28 + $0x34] ss:$8 sps:$4 sm:$0xff]   ;;  %v1783_v30 = vld [vmem:[%s1976_s28 + $0x1c4] ss:$8 sps:$4 sm:$0xff]  }
  0x15   : > { %906 = vmatpush1.bf16.msra.mxu0 %v1748_v3  ;;  %1723 = vmatpush1.bf16.msra.mxu1 %v1748_v3  ;;  %v1782_v31 = vld [vmem:[%s1976_s28 + $0x30] ss:$8 sps:$4 sm:$0xff]   ;;  %v1785_v32 = vld [vmem:[%s1976_s28 + $0x1c0] ss:$8 sps:$4 sm:$0xff]   ;;  %v1786_v33 = vld [vmem:[%s1976_s28 + $0x44] ss:$8 sps:$4 sm:$0xff]  }
  0x16   : > { %907 = vmatprep.subr.bf16.mxu0 %v1916_v1  ;;  %1708 = vmatprep.subr.bf16.mxu1 %v1916_v1  ;;  %v1789_v34 = vld [vmem:[%s1976_s28 + $0x1d4] ss:$8 sps:$4 sm:$0xff]   ;;  %v1788_v35 = vld [vmem:[%s1976_s28 + $0x40] ss:$8 sps:$4 sm:$0xff]   ;;  %v1791_v36 = vld [vmem:[%s1976_s28 + $0x1d0] ss:$8 sps:$4 sm:$0xff]  }
  0x17   : > { %v1792_v37 = vld [vmem:[%s1976_s28 + $0x54] ss:$8 sps:$4 sm:$0xff]   ;;  %v1795_v38 = vld [vmem:[%s1976_s28 + $0x1e4] ss:$8 sps:$4 sm:$0xff]   ;;  %v1794_v39 = vld [vmem:[%s1976_s28 + $0x50] ss:$8 sps:$4 sm:$0xff]  }
  0x18   : > { %v1797_v40 = vld [vmem:[%s1976_s28 + $0x1e0] ss:$8 sps:$4 sm:$0xff]   ;;  %v1798_v41 = vld [vmem:[%s1976_s28 + $0x64] ss:$8 sps:$4 sm:$0xff]   ;;  %v1801_v42 = vld [vmem:[%s1976_s28 + $0x1f4] ss:$8 sps:$4 sm:$0xff]  }
  0x19   : > { %908 = vmatpush1.bf16.msra.mxu0 %v1749_v4  ;;  %1724 = vmatpush1.bf16.msra.mxu1 %v1749_v4  ;;  %v1800_v43 = vld [vmem:[%s1976_s28 + $0x60] ss:$8 sps:$4 sm:$0xff]   ;;  %v1803_v44 = vld [vmem:[%s1976_s28 + $0x1f0] ss:$8 sps:$4 sm:$0xff]   ;;  %v1804_v45 = vld [vmem:[%s1976_s28 + $0x74] ss:$8 sps:$4 sm:$0xff]  }
  0x1a   : > { %909 = vmatprep.subr.bf16.mxu0 %v1916_v1  ;;  %1709 = vmatprep.subr.bf16.mxu1 %v1916_v1  ;;  %v1807_v46 = vld [vmem:[%s1976_s28 + $0x204] ss:$8 sps:$4 sm:$0xff]   ;;  %v1806_v47 = vld [vmem:[%s1976_s28 + $0x70] ss:$8 sps:$4 sm:$0xff]   ;;  %v1809_v48 = vld [vmem:[%s1976_s28 + $0x200] ss:$8 sps:$4 sm:$0xff]  }
  0x1b   : > { %v1810_v49 = vld [vmem:[%s1976_s28 + $0x84] ss:$8 sps:$4 sm:$0xff]   ;;  %v1813_v50 = vld [vmem:[%s1976_s28 + $0x214] ss:$8 sps:$4 sm:$0xff]   ;;  %v1812_v51 = vld [vmem:[%s1976_s28 + $0x80] ss:$8 sps:$4 sm:$0xff]  }
  0x1c   : > { %v1815_v52 = vld [vmem:[%s1976_s28 + $0x210] ss:$8 sps:$4 sm:$0xff]   ;;  %v1816_v53 = vld [vmem:[%s1976_s28 + $0x94] ss:$8 sps:$4 sm:$0xff]   ;;  %v1819_v54 = vld [vmem:[%s1976_s28 + $0x224] ss:$8 sps:$4 sm:$0xff]  }
  0x1d   : > { %910 = vmatpush1.bf16.msra.mxu0 %v1750_v5  ;;  %1725 = vmatpush1.bf16.msra.mxu1 %v1750_v5  ;;  %v1818_v55 = vld [vmem:[%s1976_s28 + $0x90] ss:$8 sps:$4 sm:$0xff]   ;;  %v1821_v56 = vld [vmem:[%s1976_s28 + $0x220] ss:$8 sps:$4 sm:$0xff]   ;;  %v1822_v57 = vld [vmem:[%s1976_s28 + $0xa4] ss:$8 sps:$4 sm:$0xff]  }
  0x1e   : > { %911 = vmatprep.subr.bf16.mxu0 %v1916_v1  ;;  %1710 = vmatprep.subr.bf16.mxu1 %v1916_v1  ;;  %v1825_v58 = vld [vmem:[%s1976_s28 + $0x234] ss:$8 sps:$4 sm:$0xff]   ;;  %v1824_v59 = vld [vmem:[%s1976_s28 + $0xa0] ss:$8 sps:$4 sm:$0xff]   ;;  %v1827_v60 = vld [vmem:[%s1976_s28 + $0x230] ss:$8 sps:$4 sm:$0xff]  }
  0x1f   : > { %v1828_v61 = vld [vmem:[%s1976_s28 + $0xb4] ss:$8 sps:$4 sm:$0xff]   ;;  %v1831_v62 = vld [vmem:[%s1976_s28 + $0x244] ss:$8 sps:$4 sm:$0xff]   ;;  %v1830_v63 = vld [vmem:[%s1976_s28 + $0xb0] ss:$8 sps:$4 sm:$0xff]  }
  0x20   : > { %v1833_v0 = vld [vmem:[%s1976_s28 + $0x240] ss:$8 sps:$4 sm:$0xff]   ;;  %v1837_v2 = vld [vmem:[%s1976_s28 + $0x254] ss:$8 sps:$4 sm:$0xff]   ;;  %v1839_v4 = vld [vmem:[%s1976_s28 + $0x250] ss:$8 sps:$4 sm:$0xff]  }
  0x21   : > { %912 = vmatpush1.bf16.msra.mxu0 %v1751_v7  ;;  %1726 = vmatpush1.bf16.msra.mxu1 %v1751_v7  ;;  %v1836_v3 = vld [vmem:[%s1976_s28 + $0xc0] ss:$8 sps:$4 sm:$0xff]   ;;  %v1840_v5 = vld [vmem:[%s1976_s28 + $0xd4] ss:$8 sps:$4 sm:$0xff]   ;;  %v1843_v6 = vld [vmem:[%s1976_s28 + $0x264] ss:$8 sps:$4 sm:$0xff]  }
  0x22   : > { %913 = vmatprep.subr.bf16.mxu0 %v1916_v1  ;;  %1711 = vmatprep.subr.bf16.mxu1 %v1916_v1  ;;  %v1842_v7 = vld [vmem:[%s1976_s28 + $0xd0] ss:$8 sps:$4 sm:$0xff]   ;;  %v1845_v8 = vld [vmem:[%s1976_s28 + $0x260] ss:$8 sps:$4 sm:$0xff]  }
  0x25   : > { %914 = vmatpush1.bf16.msra.mxu0 %v1752_v9  ;;  %1727 = vmatpush1.bf16.msra.mxu1 %v1752_v9  ;;  %v1846_v9 = vld [vmem:[%s1976_s28 + $0xe4] ss:$8 sps:$4 sm:$0xff]  }
  0x26   : > { %915 = vmatprep.subr.bf16.mxu0 %v1916_v1  ;;  %1712 = vmatprep.subr.bf16.mxu1 %v1916_v1 }
  0x29   : > { %916 = vmatpush1.bf16.msra.mxu0 %v1753_v10  ;;  %1728 = vmatpush1.bf16.msra.mxu1 %v1753_v10  ;;  %v1849_v10 = vld [vmem:[%s1976_s28 + $0x274] ss:$8 sps:$4 sm:$0xff]  }
  0x2a   : > { %917 = vmatprep.subr.bf16.mxu0 %v1916_v1  ;;  %1713 = vmatprep.subr.bf16.mxu1 %v1916_v1 }
  0x2d   : > { %918 = vmatpush2.bf16.msra.mxu0 %v1754_v11  ;;  %1729 = vmatpush2.bf16.msra.mxu1 %v1754_v11  ;;  %v1848_v11 = vld [vmem:[%s1976_s28 + $0xe0] ss:$8 sps:$4 sm:$0xff]  }
  0x2e   : > { %919 = vmatprep.subr.bf16.mxu0 %v1916_v1  ;;  %1714 = vmatprep.subr.bf16.mxu1 %v1916_v1 }
  0x31   : > { %920 = vmatpush2.bf16.msra.mxu0 %v1755_v12  ;;  %1730 = vmatpush2.bf16.msra.mxu1 %v1755_v12  ;;  %v1851_v12 = vld [vmem:[%s1976_s28 + $0x270] ss:$8 sps:$4 sm:$0xff]  }
  0x32   : > { %921 = vmatprep.subr.bf16.mxu0 %v1916_v1  ;;  %1715 = vmatprep.subr.bf16.mxu1 %v1916_v1 }
  0x35   : > { %922 = vmatpush2.bf16.msra.mxu0 %v1756_v13  ;;  %1731 = vmatpush2.bf16.msra.mxu1 %v1756_v13  ;;  %v1852_v13 = vld [vmem:[%s1976_s28 + $0xf4] ss:$8 sps:$4 sm:$0xff]  }
  0x36   : > { %923 = vmatprep.subr.bf16.mxu0 %v1916_v1  ;;  %1716 = vmatprep.subr.bf16.mxu1 %v1916_v1 }
  0x39   : > { %924 = vmatpush2.bf16.msra.mxu0 %v1757_v14  ;;  %1732 = vmatpush2.bf16.msra.mxu1 %v1757_v14  ;;  %v1855_v14 = vld [vmem:[%s1976_s28 + $0x284] ss:$8 sps:$4 sm:$0xff]  }
  0x3a   : > { %925 = vmatprep.subr.bf16.mxu0 %v1916_v1  ;;  %1717 = vmatprep.subr.bf16.mxu1 %v1916_v1 }
  0x3d   : > { %926 = vmatpush2.bf16.msra.mxu0 %v1758_v15  ;;  %1733 = vmatpush2.bf16.msra.mxu1 %v1758_v15  ;;  %v1854_v15 = vld [vmem:[%s1976_s28 + $0xf0] ss:$8 sps:$4 sm:$0xff]  }
  0x3e   : > { %927 = vmatprep.subr.bf16.mxu0 %v1916_v1  ;;  %1718 = vmatprep.subr.bf16.mxu1 %v1916_v1 }
  0x41   : > { %928 = vmatpush2.bf16.msra.mxu0 %v1759_v16  ;;  %1734 = vmatpush2.bf16.msra.mxu1 %v1759_v16  ;;  %v1857_v16 = vld [vmem:[%s1976_s28 + $0x280] ss:$8 sps:$4 sm:$0xff]  }
  0x42   : > { %929 = vmatprep.subr.bf16.mxu0 %v1916_v1  ;;  %1719 = vmatprep.subr.bf16.mxu1 %v1916_v1 }
  0x45   : > { %930 = vmatpush2.bf16.msra.mxu0 %v1760_v17  ;;  %1735 = vmatpush2.bf16.msra.mxu1 %v1760_v17  ;;  %v1858_v17 = vld [vmem:[%s1976_s28 + $0x104] ss:$8 sps:$4 sm:$0xff]  }
  0x46   : > { %931 = vmatprep.subr.bf16.mxu0 %v1916_v1  ;;  %1720 = vmatprep.subr.bf16.mxu1 %v1916_v1  ;;  %v1834_v1 = vld [vmem:[%s1976_s28 + $0xc4] ss:$8 sps:$4 sm:$0xff]  }
  0x49   : > { %932 = vmatpush2.bf16.msra.mxu0 %v1761_v18  ;;  %1736 = vmatpush2.bf16.msra.mxu1 %v1761_v18  ;;  %v1861_v18 = vld [vmem:[%s1976_s28 + $0x294] ss:$8 sps:$4 sm:$0xff]  }
  0x4c   : > { %934 = vmatmul.mubr.bf16.vlgmr.msra.gmra.mxu0 %v1762_v19  ;;  %1134 = vmatmul.mubr.bf16.vlgmr.msra.gmra.mxu1 %v1765_v20  ;;  %v1860_v19 = vld [vmem:[%s1976_s28 + $0x100] ss:$8 sps:$4 sm:$0xff]   ;;  %v1863_v20 = vld [vmem:[%s1976_s28 + $0x290] ss:$8 sps:$4 sm:$0xff]  }
  0x4d   : > { %941 = vmatprep.mubr.bf16.mxu0 %v1768_v21  ;;  %1141 = vmatprep.mubr.bf16.mxu1 %v1771_v22  ;;  %v1864_v21 = vld [vmem:[%s1976_s28 + $0x114] ss:$8 sps:$4 sm:$0xff]   ;;  %v1867_v22 = vld [vmem:[%s1976_s28 + $0x2a4] ss:$8 sps:$4 sm:$0xff]  }
  0x54   : > { %942 = vmatmul.mubr.bf16.gmra.mxu0 %v1770_v23  ;;  %1142 = vmatmul.mubr.bf16.gmra.mxu1 %v1773_v24  ;;  %v1866_v23 = vld [vmem:[%s1976_s28 + $0x110] ss:$8 sps:$4 sm:$0xff]   ;;  %v1869_v24 = vld [vmem:[%s1976_s28 + $0x2a0] ss:$8 sps:$4 sm:$0xff]  }
  0x55   : > { %949 = vmatprep.mubr.bf16.mxu0 %v1774_v25  ;;  %1149 = vmatprep.mubr.bf16.mxu1 %v1777_v26  ;;  %v1870_v25 = vld [vmem:[%s1976_s28 + $0x124] ss:$8 sps:$4 sm:$0xff]   ;;  %v1873_v26 = vld [vmem:[%s1976_s28 + $0x2b4] ss:$8 sps:$4 sm:$0xff]  }
  0x5c   : > { %950 = vmatmul.mubr.bf16.gmra.mxu0 %v1776_v27  ;;  %1150 = vmatmul.mubr.bf16.gmra.mxu1 %v1779_v28  ;;  %v1872_v27 = vld [vmem:[%s1976_s28 + $0x120] ss:$8 sps:$4 sm:$0xff]   ;;  %v1875_v28 = vld [vmem:[%s1976_s28 + $0x2b0] ss:$8 sps:$4 sm:$0xff]  }
  0x5d   : > { %957 = vmatprep.mubr.bf16.mxu0 %v1780_v29  ;;  %1157 = vmatprep.mubr.bf16.mxu1 %v1783_v30  ;;  %v1876_v29 = vld [vmem:[%s1976_s28 + $0x134] ss:$8 sps:$4 sm:$0xff]   ;;  %v1879_v30 = vld [vmem:[%s1976_s28 + $0x2c4] ss:$8 sps:$4 sm:$0xff]  }
  0x64   : > { %958 = vmatmul.mubr.bf16.gmra.mxu0 %v1782_v31  ;;  %1158 = vmatmul.mubr.bf16.gmra.mxu1 %v1785_v32  ;;  %v1878_v31 = vld [vmem:[%s1976_s28 + $0x130] ss:$8 sps:$4 sm:$0xff]   ;;  %v1881_v32 = vld [vmem:[%s1976_s28 + $0x2c0] ss:$8 sps:$4 sm:$0xff]  }
  0x65   : > { %965 = vmatprep.mubr.bf16.mxu0 %v1786_v33  ;;  %1165 = vmatprep.mubr.bf16.mxu1 %v1789_v34  ;;  %v1882_v33 = vld [vmem:[%s1976_s28 + $0x144] ss:$8 sps:$4 sm:$0xff]   ;;  %v1885_v34 = vld [vmem:[%s1976_s28 + $0x2d4] ss:$8 sps:$4 sm:$0xff]  }
  0x6c   : > { %966 = vmatmul.mubr.bf16.gmra.mxu0 %v1788_v35  ;;  %1166 = vmatmul.mubr.bf16.gmra.mxu1 %v1791_v36  ;;  %v1884_v35 = vld [vmem:[%s1976_s28 + $0x140] ss:$8 sps:$4 sm:$0xff]   ;;  %v1887_v36 = vld [vmem:[%s1976_s28 + $0x2d0] ss:$8 sps:$4 sm:$0xff]  }
  0x6d   : > { %973 = vmatprep.mubr.bf16.mxu0 %v1792_v37  ;;  %1173 = vmatprep.mubr.bf16.mxu1 %v1795_v38  ;;  %v1888_v37 = vld [vmem:[%s1976_s28 + $0x154] ss:$8 sps:$4 sm:$0xff]   ;;  %v1891_v38 = vld [vmem:[%s1976_s28 + $0x2e4] ss:$8 sps:$4 sm:$0xff]  }
  0x74   : > { %974 = vmatmul.mubr.bf16.gmra.mxu0 %v1794_v39  ;;  %1174 = vmatmul.mubr.bf16.gmra.mxu1 %v1797_v40  ;;  %v1890_v39 = vld [vmem:[%s1976_s28 + $0x150] ss:$8 sps:$4 sm:$0xff]   ;;  %v1893_v40 = vld [vmem:[%s1976_s28 + $0x2e0] ss:$8 sps:$4 sm:$0xff]  }
  0x75   : > { %981 = vmatprep.mubr.bf16.mxu0 %v1798_v41  ;;  %1181 = vmatprep.mubr.bf16.mxu1 %v1801_v42  ;;  %v1894_v41 = vld [vmem:[%s1976_s28 + $0x164] ss:$8 sps:$4 sm:$0xff]   ;;  %v1897_v42 = vld [vmem:[%s1976_s28 + $0x2f4] ss:$8 sps:$4 sm:$0xff]  }
  0x7c   : > { %982 = vmatmul.mubr.bf16.gmra.mxu0 %v1800_v43  ;;  %1182 = vmatmul.mubr.bf16.gmra.mxu1 %v1803_v44  ;;  %v1896_v43 = vld [vmem:[%s1976_s28 + $0x160] ss:$8 sps:$4 sm:$0xff]   ;;  %v1899_v44 = vld [vmem:[%s1976_s28 + $0x2f0] ss:$8 sps:$4 sm:$0xff]  }
  0x7d   : > { %989 = vmatprep.mubr.bf16.mxu0 %v1804_v45  ;;  %1189 = vmatprep.mubr.bf16.mxu1 %v1807_v46  ;;  %v1900_v45 = vld [vmem:[%s1976_s28 + $0x174] ss:$8 sps:$4 sm:$0xff]   ;;  %v1903_v46 = vld [vmem:[%s1976_s28 + $0x304] ss:$8 sps:$4 sm:$0xff]  }
  0x84   : > { %990 = vmatmul.mubr.bf16.gmra.mxu0 %v1806_v47  ;;  %1190 = vmatmul.mubr.bf16.gmra.mxu1 %v1809_v48  ;;  %v1902_v47 = vld [vmem:[%s1976_s28 + $0x170] ss:$8 sps:$4 sm:$0xff]   ;;  %v1905_v48 = vld [vmem:[%s1976_s28 + $0x300] ss:$8 sps:$4 sm:$0xff]  }
  0x85   : > { %997 = vmatprep.mubr.bf16.mxu0 %v1810_v49  ;;  %1197 = vmatprep.mubr.bf16.mxu1 %v1813_v50  ;;  %v1906_v49 = vld [vmem:[%s1976_s28 + $0x184] ss:$8 sps:$4 sm:$0xff]  }
  0x86   : > { %v226_v50 = vld [vmem:[%s1976_s28 + $0x180] sm:$0xff] }
  0x8c   : > { %998 = vmatmul.mubr.bf16.gmra.mxu0 %v1812_v51  ;;  %1198 = vmatmul.mubr.bf16.gmra.mxu1 %v1815_v52  ;;  %v227_v51 = vld [vmem:[%s1976_s28 + $0x188] sm:$0xff] }
  0x8d   : > { %1005 = vmatprep.mubr.bf16.mxu0 %v1816_v53  ;;  %1205 = vmatprep.mubr.bf16.mxu1 %v1819_v54  ;;  %v1636_v52 = vcombine.low %v226_v50, %v227_v51  ;;  %v2137_v53 = vld [vmem:[%s2445_s2] ss:$0 sm:$0xff] }
  0x94   : > { %1006 = vmatmul.mubr.bf16.gmra.mxu0 %v1818_v55  ;;  %1206 = vmatmul.mubr.bf16.gmra.mxu1 %v1821_v56 }
  0x95   : > { %1013 = vmatprep.mubr.bf16.mxu0 %v1822_v57  ;;  %1213 = vmatprep.mubr.bf16.mxu1 %v1825_v58 }
  0x9c   : > { %1014 = vmatmul.mubr.bf16.gmra.mxu0 %v1824_v59  ;;  %1214 = vmatmul.mubr.bf16.gmra.mxu1 %v1827_v60 }
  0x9d   : > { %1021 = vmatprep.mubr.bf16.mxu0 %v1828_v61  ;;  %1221 = vmatprep.mubr.bf16.mxu1 %v1831_v62 }
  0xa4   : > { %1022 = vmatmul.mubr.bf16.gmra.mxu0 %v1830_v63  ;;  %1222 = vmatmul.mubr.bf16.gmra.mxu1 %v1833_v0 }
  0xa5   : > { %1029 = vmatprep.mubr.bf16.mxu0 %v1834_v1  ;;  %1229 = vmatprep.mubr.bf16.mxu1 %v1837_v2 }
  0xac   : > { %1030 = vmatmul.mubr.bf16.gmra.mxu0 %v1836_v3  ;;  %1230 = vmatmul.mubr.bf16.gmra.mxu1 %v1839_v4 }
  0xad   : > { %1037 = vmatprep.mubr.bf16.mxu0 %v1840_v5  ;;  %1237 = vmatprep.mubr.bf16.mxu1 %v1843_v6 }
  0xb4   : > { %1038 = vmatmul.mubr.bf16.gmra.mxu0 %v1842_v7  ;;  %1238 = vmatmul.mubr.bf16.gmra.mxu1 %v1845_v8 }
  0xb5   : > { %1045 = vmatprep.mubr.bf16.mxu0 %v1846_v9  ;;  %1245 = vmatprep.mubr.bf16.mxu1 %v1849_v10 }
  0xbc   : > { %1046 = vmatmul.mubr.bf16.gmra.mxu0 %v1848_v11  ;;  %1246 = vmatmul.mubr.bf16.gmra.mxu1 %v1851_v12 }
  0xbd   : > { %1053 = vmatprep.mubr.bf16.mxu0 %v1852_v13  ;;  %1253 = vmatprep.mubr.bf16.mxu1 %v1855_v14 }
  0xc4   : > { %1054 = vmatmul.mubr.bf16.gmra.mxu0 %v1854_v15  ;;  %1254 = vmatmul.mubr.bf16.gmra.mxu1 %v1857_v16 }
  0xc5   : > { %1061 = vmatprep.mubr.bf16.mxu0 %v1858_v17  ;;  %1261 = vmatprep.mubr.bf16.mxu1 %v1861_v18 }
  0xcc   : > { %1062 = vmatmul.mubr.bf16.gmra.mxu0 %v1860_v19  ;;  %1262 = vmatmul.mubr.bf16.gmra.mxu1 %v1863_v20 }
  0xcd   : > { %1069 = vmatprep.mubr.bf16.mxu0 %v1864_v21  ;;  %1269 = vmatprep.mubr.bf16.mxu1 %v1867_v22 }
  0xd4   : > { %1070 = vmatmul.mubr.bf16.gmra.mxu0 %v1866_v23  ;;  %1270 = vmatmul.mubr.bf16.gmra.mxu1 %v1869_v24 }
  0xd5   : > { %1077 = vmatprep.mubr.bf16.mxu0 %v1870_v25  ;;  %1277 = vmatprep.mubr.bf16.mxu1 %v1873_v26 }
  0xdc   : > { %1078 = vmatmul.mubr.bf16.gmra.mxu0 %v1872_v27  ;;  %1278 = vmatmul.mubr.bf16.gmra.mxu1 %v1875_v28 }
  0xdd   : > { %1085 = vmatprep.mubr.bf16.mxu0 %v1876_v29  ;;  %1285 = vmatprep.mubr.bf16.mxu1 %v1879_v30 }
  0xe4   : > { %1086 = vmatmul.mubr.bf16.gmra.mxu0 %v1878_v31  ;;  %1286 = vmatmul.mubr.bf16.gmra.mxu1 %v1881_v32 }
  0xe5   : > { %1093 = vmatprep.mubr.bf16.mxu0 %v1882_v33  ;;  %1293 = vmatprep.mubr.bf16.mxu1 %v1885_v34 }
  0xec   : > { %1094 = vmatmul.mubr.bf16.gmra.mxu0 %v1884_v35  ;;  %1294 = vmatmul.mubr.bf16.gmra.mxu1 %v1887_v36 }
  0xed   : > { %1101 = vmatprep.mubr.bf16.mxu0 %v1888_v37  ;;  %1301 = vmatprep.mubr.bf16.mxu1 %v1891_v38 }
  0xf4   : > { %1102 = vmatmul.mubr.bf16.gmra.mxu0 %v1890_v39  ;;  %1302 = vmatmul.mubr.bf16.gmra.mxu1 %v1893_v40 }
  0xf5   : > { %1109 = vmatprep.mubr.bf16.mxu0 %v1894_v41  ;;  %1309 = vmatprep.mubr.bf16.mxu1 %v1897_v42 }
  0xfc   : > { %1110 = vmatmul.mubr.bf16.gmra.mxu0 %v1896_v43  ;;  %1310 = vmatmul.mubr.bf16.gmra.mxu1 %v1899_v44 }
  0xfd   : > { %1117 = vmatprep.mubr.bf16.mxu0 %v1900_v45  ;;  %1317 = vmatprep.mubr.bf16.mxu1 %v1903_v46 }
 0x104   : > { %1118 = vmatmul.mubr.bf16.gmra.mxu0 %v1902_v47  ;;  %1318 = vmatmul.mubr.bf16.gmra.mxu1 %v1905_v48 }
 0x105   : > { %1125 = vmatprep.mubr.bf16.mxu0 %v1906_v49 }
 0x10c   : > { %v935_v54 = vpop.f32.mrf.mxu0  ;;  %1126 = vmatmul.mubr.bf16.gmra.mxu0 %v1636_v52  ;;  %v1135_v55 = vpop.f32.mrf.mxu1 }
 0x10d   : > { %v936_v56 = vadd.f32 %v2137_v53, %v935_v54  ;;  %v1136_v57 = vadd.f32 %v2137_v53, %v1135_v55 }
 0x10e   : > { %v937_v58 = vpop.f32.mrf.mxu0  ;;  %v1137_v59 = vpop.f32.mrf.mxu1 }
 0x10f   : > { %v1326_v60 = vmax.f32 %v936_v56, 0.0  ;;  %v1376_v61 = vmax.f32 %v1136_v57, 0.0 }
 0x110   : > { %v938_v62 = vpop.f32.mrf.mxu0  ;;  %v1138_v63 = vpop.f32.mrf.mxu1 }
 0x111   : > { %1425 = vst.msk [vmem:[%s2146_s5] sm:$0xff] %vm1424_vm0, %v1326_v60  ;;  %1475 = vst.msk [vmem:[%s2146_s5 + $0x190] sm:$0xff] %vm1424_vm0, %v1376_v61  ;;  %v939_v0 = vadd.f32 %v2137_v53, %v938_v62  ;;  %v1139_v1 = vadd.f32 %v2137_v53, %v1138_v63 }
 0x112   : > { %v940_v2 = vpop.f32.mrf.mxu0  ;;  %v1140_v3 = vpop.f32.mrf.mxu1 }
 0x113   : > { %v1327_v4 = vmax.f32 %v939_v0, 0.0  ;;  %v1377_v5 = vmax.f32 %v1139_v1, 0.0 }
 0x114   : > { %v943_v6 = vpop.f32.mrf.mxu0  ;;  %v1143_v7 = vpop.f32.mrf.mxu1 }
 0x115   : > { %1426 = vst.msk [vmem:[%s2146_s5 + $0x8] sm:$0xff] %vm1424_vm0, %v1327_v4  ;;  %1476 = vst.msk [vmem:[%s2146_s5 + $0x198] sm:$0xff] %vm1424_vm0, %v1377_v5  ;;  %v944_v8 = vadd.f32 %v2137_v53, %v943_v6  ;;  %v1144_v9 = vadd.f32 %v2137_v53, %v1143_v7 }
 0x116   : > { %v945_v10 = vpop.f32.mrf.mxu0  ;;  %v1145_v11 = vpop.f32.mrf.mxu1 }
 0x117   : > { %v1328_v12 = vmax.f32 %v944_v8, 0.0  ;;  %v1378_v13 = vmax.f32 %v1144_v9, 0.0 }
 0x118   : > { %v946_v14 = vpop.f32.mrf.mxu0  ;;  %v1146_v15 = vpop.f32.mrf.mxu1 }
 0x119   : > { %1427 = vst.msk [vmem:[%s2146_s5 + $0x10] sm:$0xff] %vm1424_vm0, %v1328_v12  ;;  %1477 = vst.msk [vmem:[%s2146_s5 + $0x1a0] sm:$0xff] %vm1424_vm0, %v1378_v13  ;;  %v947_v16 = vadd.f32 %v2137_v53, %v946_v14  ;;  %v1147_v17 = vadd.f32 %v2137_v53, %v1146_v15 }
 0x11a   : > { %v948_v18 = vpop.f32.mrf.mxu0  ;;  %v1148_v19 = vpop.f32.mrf.mxu1 }
 0x11b   : > { %v1329_v20 = vmax.f32 %v947_v16, 0.0  ;;  %v1379_v21 = vmax.f32 %v1147_v17, 0.0 }
 0x11c   : > { %v951_v22 = vpop.f32.mrf.mxu0  ;;  %v1151_v23 = vpop.f32.mrf.mxu1 }
 0x11d   : > { %1428 = vst.msk [vmem:[%s2146_s5 + $0x18] sm:$0xff] %vm1424_vm0, %v1329_v20  ;;  %1478 = vst.msk [vmem:[%s2146_s5 + $0x1a8] sm:$0xff] %vm1424_vm0, %v1379_v21  ;;  %v952_v24 = vadd.f32 %v2137_v53, %v951_v22  ;;  %v1152_v25 = vadd.f32 %v2137_v53, %v1151_v23 }
 0x11e   : > { %v953_v26 = vpop.f32.mrf.mxu0  ;;  %v1153_v27 = vpop.f32.mrf.mxu1 }
 0x11f   : > { %v1330_v28 = vmax.f32 %v952_v24, 0.0  ;;  %v1380_v29 = vmax.f32 %v1152_v25, 0.0 }
 0x120   : > { %v954_v30 = vpop.f32.mrf.mxu0  ;;  %v1154_v31 = vpop.f32.mrf.mxu1 }
 0x121   : > { %1429 = vst.msk [vmem:[%s2146_s5 + $0x20] sm:$0xff] %vm1424_vm0, %v1330_v28  ;;  %1479 = vst.msk [vmem:[%s2146_s5 + $0x1b0] sm:$0xff] %vm1424_vm0, %v1380_v29  ;;  %v955_v32 = vadd.f32 %v2137_v53, %v954_v30  ;;  %v1155_v33 = vadd.f32 %v2137_v53, %v1154_v31 }
 0x122   : > { %v956_v34 = vpop.f32.mrf.mxu0  ;;  %v1156_v35 = vpop.f32.mrf.mxu1 }
 0x123   : > { %v1331_v36 = vmax.f32 %v955_v32, 0.0  ;;  %v1381_v37 = vmax.f32 %v1155_v33, 0.0 }
 0x124   : > { %v959_v38 = vpop.f32.mrf.mxu0  ;;  %v1159_v39 = vpop.f32.mrf.mxu1 }
 0x125   : > { %1430 = vst.msk [vmem:[%s2146_s5 + $0x28] sm:$0xff] %vm1424_vm0, %v1331_v36  ;;  %1480 = vst.msk [vmem:[%s2146_s5 + $0x1b8] sm:$0xff] %vm1424_vm0, %v1381_v37  ;;  %v960_v40 = vadd.f32 %v2137_v53, %v959_v38  ;;  %v1160_v41 = vadd.f32 %v2137_v53, %v1159_v39 }
 0x126   : > { %v961_v42 = vpop.f32.mrf.mxu0  ;;  %v1161_v43 = vpop.f32.mrf.mxu1 }
 0x127   : > { %v1332_v44 = vmax.f32 %v960_v40, 0.0  ;;  %v1382_v45 = vmax.f32 %v1160_v41, 0.0 }
 0x128   : > { %v962_v46 = vpop.f32.mrf.mxu0  ;;  %v1162_v47 = vpop.f32.mrf.mxu1 }
 0x129   : > { %1431 = vst.msk [vmem:[%s2146_s5 + $0x30] sm:$0xff] %vm1424_vm0, %v1332_v44  ;;  %1481 = vst.msk [vmem:[%s2146_s5 + $0x1c0] sm:$0xff] %vm1424_vm0, %v1382_v45  ;;  %v963_v48 = vadd.f32 %v2137_v53, %v962_v46  ;;  %v1163_v49 = vadd.f32 %v2137_v53, %v1162_v47 }
 0x12a   : > { %v964_v50 = vpop.f32.mrf.mxu0  ;;  %v1164_v51 = vpop.f32.mrf.mxu1 }
 0x12b   : > { %v1333_v52 = vmax.f32 %v963_v48, 0.0  ;;  %v1383_v54 = vmax.f32 %v1163_v49, 0.0 }
 0x12c   : > { %v967_v55 = vpop.f32.mrf.mxu0  ;;  %v1167_v56 = vpop.f32.mrf.mxu1 }
 0x12d   : > { %1432 = vst.msk [vmem:[%s2146_s5 + $0x38] sm:$0xff] %vm1424_vm0, %v1333_v52  ;;  %1482 = vst.msk [vmem:[%s2146_s5 + $0x1c8] sm:$0xff] %vm1424_vm0, %v1383_v54  ;;  %v968_v57 = vadd.f32 %v2137_v53, %v967_v55  ;;  %v1168_v58 = vadd.f32 %v2137_v53, %v1167_v56 }
 0x12e   : > { %v969_v59 = vpop.f32.mrf.mxu0  ;;  %v1169_v60 = vpop.f32.mrf.mxu1 }
 0x12f   : > { %v1334_v61 = vmax.f32 %v968_v57, 0.0  ;;  %v1384_v62 = vmax.f32 %v1168_v58, 0.0 }
 0x130   : > { %v970_v63 = vpop.f32.mrf.mxu0  ;;  %v1170_v0 = vpop.f32.mrf.mxu1 }
 0x131   : > { %1433 = vst.msk [vmem:[%s2146_s5 + $0x40] sm:$0xff] %vm1424_vm0, %v1334_v61  ;;  %1483 = vst.msk [vmem:[%s2146_s5 + $0x1d0] sm:$0xff] %vm1424_vm0, %v1384_v62  ;;  %v971_v1 = vadd.f32 %v2137_v53, %v970_v63  ;;  %v1171_v2 = vadd.f32 %v2137_v53, %v1170_v0 }
 0x132   : > { %v972_v3 = vpop.f32.mrf.mxu0  ;;  %v1172_v4 = vpop.f32.mrf.mxu1 }
 0x133   : > { %v1335_v5 = vmax.f32 %v971_v1, 0.0  ;;  %v1385_v6 = vmax.f32 %v1171_v2, 0.0 }
 0x134   : > { %v975_v7 = vpop.f32.mrf.mxu0  ;;  %v1175_v8 = vpop.f32.mrf.mxu1 }
 0x135   : > { %1434 = vst.msk [vmem:[%s2146_s5 + $0x48] sm:$0xff] %vm1424_vm0, %v1335_v5  ;;  %1484 = vst.msk [vmem:[%s2146_s5 + $0x1d8] sm:$0xff] %vm1424_vm0, %v1385_v6  ;;  %v976_v9 = vadd.f32 %v2137_v53, %v975_v7  ;;  %v1176_v10 = vadd.f32 %v2137_v53, %v1175_v8 }
 0x136   : > { %v977_v11 = vpop.f32.mrf.mxu0  ;;  %v1177_v12 = vpop.f32.mrf.mxu1 }
 0x137   : > { %v1336_v13 = vmax.f32 %v976_v9, 0.0  ;;  %v1386_v14 = vmax.f32 %v1176_v10, 0.0 }
 0x138   : > { %v978_v15 = vpop.f32.mrf.mxu0  ;;  %v1178_v16 = vpop.f32.mrf.mxu1 }
 0x139   : > { %1435 = vst.msk [vmem:[%s2146_s5 + $0x50] sm:$0xff] %vm1424_vm0, %v1336_v13  ;;  %1485 = vst.msk [vmem:[%s2146_s5 + $0x1e0] sm:$0xff] %vm1424_vm0, %v1386_v14  ;;  %v979_v17 = vadd.f32 %v2137_v53, %v978_v15  ;;  %v1179_v18 = vadd.f32 %v2137_v53, %v1178_v16 }
 0x13a   : > { %v980_v19 = vpop.f32.mrf.mxu0  ;;  %v1180_v20 = vpop.f32.mrf.mxu1 }
 0x13b   : > { %v1337_v21 = vmax.f32 %v979_v17, 0.0  ;;  %v1387_v22 = vmax.f32 %v1179_v18, 0.0 }
 0x13c   : > { %v983_v23 = vpop.f32.mrf.mxu0  ;;  %v1183_v24 = vpop.f32.mrf.mxu1 }
 0x13d   : > { %1436 = vst.msk [vmem:[%s2146_s5 + $0x58] sm:$0xff] %vm1424_vm0, %v1337_v21  ;;  %1486 = vst.msk [vmem:[%s2146_s5 + $0x1e8] sm:$0xff] %vm1424_vm0, %v1387_v22  ;;  %v984_v25 = vadd.f32 %v2137_v53, %v983_v23  ;;  %v1184_v26 = vadd.f32 %v2137_v53, %v1183_v24 }
 0x13e   : > { %v985_v27 = vpop.f32.mrf.mxu0  ;;  %v1185_v28 = vpop.f32.mrf.mxu1 }
 0x13f   : > { %v1338_v29 = vmax.f32 %v984_v25, 0.0  ;;  %v1388_v30 = vmax.f32 %v1184_v26, 0.0 }
 0x140   : > { %v986_v31 = vpop.f32.mrf.mxu0  ;;  %v1186_v32 = vpop.f32.mrf.mxu1 }
 0x141   : > { %1437 = vst.msk [vmem:[%s2146_s5 + $0x60] sm:$0xff] %vm1424_vm0, %v1338_v29  ;;  %1487 = vst.msk [vmem:[%s2146_s5 + $0x1f0] sm:$0xff] %vm1424_vm0, %v1388_v30  ;;  %v987_v33 = vadd.f32 %v2137_v53, %v986_v31  ;;  %v1187_v34 = vadd.f32 %v2137_v53, %v1186_v32 }
 0x142   : > { %v988_v35 = vpop.f32.mrf.mxu0  ;;  %v1188_v36 = vpop.f32.mrf.mxu1 }
 0x143   : > { %v1339_v37 = vmax.f32 %v987_v33, 0.0  ;;  %v1389_v38 = vmax.f32 %v1187_v34, 0.0 }
 0x144   : > { %v991_v39 = vpop.f32.mrf.mxu0  ;;  %v1191_v40 = vpop.f32.mrf.mxu1 }
 0x145   : > { %1438 = vst.msk [vmem:[%s2146_s5 + $0x68] sm:$0xff] %vm1424_vm0, %v1339_v37  ;;  %1488 = vst.msk [vmem:[%s2146_s5 + $0x1f8] sm:$0xff] %vm1424_vm0, %v1389_v38  ;;  %v992_v41 = vadd.f32 %v2137_v53, %v991_v39  ;;  %v1192_v42 = vadd.f32 %v2137_v53, %v1191_v40 }
 0x146   : > { %v993_v43 = vpop.f32.mrf.mxu0  ;;  %v1193_v44 = vpop.f32.mrf.mxu1 }
 0x147   : > { %v1340_v45 = vmax.f32 %v992_v41, 0.0  ;;  %v1390_v46 = vmax.f32 %v1192_v42, 0.0 }
 0x148   : > { %v994_v47 = vpop.f32.mrf.mxu0  ;;  %v1194_v48 = vpop.f32.mrf.mxu1 }
 0x149   : > { %1439 = vst.msk [vmem:[%s2146_s5 + $0x70] sm:$0xff] %vm1424_vm0, %v1340_v45  ;;  %1489 = vst.msk [vmem:[%s2146_s5 + $0x200] sm:$0xff] %vm1424_vm0, %v1390_v46  ;;  %v995_v49 = vadd.f32 %v2137_v53, %v994_v47  ;;  %v1195_v50 = vadd.f32 %v2137_v53, %v1194_v48 }
 0x14a   : > { %v996_v51 = vpop.f32.mrf.mxu0  ;;  %v1196_v52 = vpop.f32.mrf.mxu1 }
 0x14b   : > { %v1341_v54 = vmax.f32 %v995_v49, 0.0  ;;  %v1391_v55 = vmax.f32 %v1195_v50, 0.0 }
 0x14c   : > { %v999_v56 = vpop.f32.mrf.mxu0  ;;  %v1199_v57 = vpop.f32.mrf.mxu1 }
 0x14d   : > { %1440 = vst.msk [vmem:[%s2146_s5 + $0x78] sm:$0xff] %vm1424_vm0, %v1341_v54  ;;  %1490 = vst.msk [vmem:[%s2146_s5 + $0x208] sm:$0xff] %vm1424_vm0, %v1391_v55  ;;  %v1000_v58 = vadd.f32 %v2137_v53, %v999_v56  ;;  %v1200_v59 = vadd.f32 %v2137_v53, %v1199_v57 }
 0x14e   : > { %v1001_v60 = vpop.f32.mrf.mxu0  ;;  %v1201_v61 = vpop.f32.mrf.mxu1 }
 0x14f   : > { %v1342_v62 = vmax.f32 %v1000_v58, 0.0  ;;  %v1392_v63 = vmax.f32 %v1200_v59, 0.0 }
 0x150   : > { %v1002_v0 = vpop.f32.mrf.mxu0  ;;  %v1202_v1 = vpop.f32.mrf.mxu1 }
 0x151   : > { %1441 = vst.msk [vmem:[%s2146_s5 + $0x80] sm:$0xff] %vm1424_vm0, %v1342_v62  ;;  %1491 = vst.msk [vmem:[%s2146_s5 + $0x210] sm:$0xff] %vm1424_vm0, %v1392_v63  ;;  %v1003_v2 = vadd.f32 %v2137_v53, %v1002_v0  ;;  %v1203_v3 = vadd.f32 %v2137_v53, %v1202_v1 }
 0x152   : > { %v1004_v4 = vpop.f32.mrf.mxu0  ;;  %v1204_v5 = vpop.f32.mrf.mxu1 }
 0x153   : > { %v1343_v6 = vmax.f32 %v1003_v2, 0.0  ;;  %v1393_v7 = vmax.f32 %v1203_v3, 0.0 }
 0x154   : > { %v1007_v8 = vpop.f32.mrf.mxu0  ;;  %v1207_v9 = vpop.f32.mrf.mxu1 }
 0x155   : > { %1442 = vst.msk [vmem:[%s2146_s5 + $0x88] sm:$0xff] %vm1424_vm0, %v1343_v6  ;;  %1492 = vst.msk [vmem:[%s2146_s5 + $0x218] sm:$0xff] %vm1424_vm0, %v1393_v7  ;;  %v1008_v10 = vadd.f32 %v2137_v53, %v1007_v8  ;;  %v1208_v11 = vadd.f32 %v2137_v53, %v1207_v9 }
 0x156   : > { %v1009_v12 = vpop.f32.mrf.mxu0  ;;  %v1209_v13 = vpop.f32.mrf.mxu1 }
 0x157   : > { %v1344_v14 = vmax.f32 %v1008_v10, 0.0  ;;  %v1394_v15 = vmax.f32 %v1208_v11, 0.0 }
 0x158   : > { %v1010_v16 = vpop.f32.mrf.mxu0  ;;  %v1210_v17 = vpop.f32.mrf.mxu1 }
 0x159   : > { %1443 = vst.msk [vmem:[%s2146_s5 + $0x90] sm:$0xff] %vm1424_vm0, %v1344_v14  ;;  %1493 = vst.msk [vmem:[%s2146_s5 + $0x220] sm:$0xff] %vm1424_vm0, %v1394_v15  ;;  %v1011_v18 = vadd.f32 %v2137_v53, %v1010_v16  ;;  %v1211_v19 = vadd.f32 %v2137_v53, %v1210_v17 }
 0x15a   : > { %v1012_v20 = vpop.f32.mrf.mxu0  ;;  %v1212_v21 = vpop.f32.mrf.mxu1 }
 0x15b   : > { %v1345_v22 = vmax.f32 %v1011_v18, 0.0  ;;  %v1395_v23 = vmax.f32 %v1211_v19, 0.0 }
 0x15c   : > { %v1015_v24 = vpop.f32.mrf.mxu0  ;;  %v1215_v25 = vpop.f32.mrf.mxu1 }
 0x15d   : > { %1444 = vst.msk [vmem:[%s2146_s5 + $0x98] sm:$0xff] %vm1424_vm0, %v1345_v22  ;;  %1494 = vst.msk [vmem:[%s2146_s5 + $0x228] sm:$0xff] %vm1424_vm0, %v1395_v23  ;;  %v1016_v26 = vadd.f32 %v2137_v53, %v1015_v24  ;;  %v1216_v27 = vadd.f32 %v2137_v53, %v1215_v25 }
 0x15e   : > { %v1017_v28 = vpop.f32.mrf.mxu0  ;;  %v1217_v29 = vpop.f32.mrf.mxu1 }
 0x15f   : > { %v1346_v30 = vmax.f32 %v1016_v26, 0.0  ;;  %v1396_v31 = vmax.f32 %v1216_v27, 0.0 }
 0x160   : > { %v1018_v32 = vpop.f32.mrf.mxu0  ;;  %v1218_v33 = vpop.f32.mrf.mxu1 }
 0x161   : > { %1445 = vst.msk [vmem:[%s2146_s5 + $0xa0] sm:$0xff] %vm1424_vm0, %v1346_v30  ;;  %1495 = vst.msk [vmem:[%s2146_s5 + $0x230] sm:$0xff] %vm1424_vm0, %v1396_v31  ;;  %v1019_v34 = vadd.f32 %v2137_v53, %v1018_v32  ;;  %v1219_v35 = vadd.f32 %v2137_v53, %v1218_v33 }
 0x162   : > { %v1020_v36 = vpop.f32.mrf.mxu0  ;;  %v1220_v37 = vpop.f32.mrf.mxu1 }
 0x163   : > { %v1347_v38 = vmax.f32 %v1019_v34, 0.0  ;;  %v1397_v39 = vmax.f32 %v1219_v35, 0.0 }
 0x164   : > { %v1023_v40 = vpop.f32.mrf.mxu0  ;;  %v1223_v41 = vpop.f32.mrf.mxu1 }
 0x165   : > { %1446 = vst.msk [vmem:[%s2146_s5 + $0xa8] sm:$0xff] %vm1424_vm0, %v1347_v38  ;;  %1496 = vst.msk [vmem:[%s2146_s5 + $0x238] sm:$0xff] %vm1424_vm0, %v1397_v39  ;;  %v1024_v42 = vadd.f32 %v2137_v53, %v1023_v40  ;;  %v1224_v43 = vadd.f32 %v2137_v53, %v1223_v41 }
 0x166   : > { %v1025_v44 = vpop.f32.mrf.mxu0  ;;  %v1225_v45 = vpop.f32.mrf.mxu1 }
 0x167   : > { %v1348_v46 = vmax.f32 %v1024_v42, 0.0  ;;  %v1398_v47 = vmax.f32 %v1224_v43, 0.0 }
 0x168   : > { %v1026_v48 = vpop.f32.mrf.mxu0  ;;  %v1226_v49 = vpop.f32.mrf.mxu1 }
 0x169   : > { %1447 = vst.msk [vmem:[%s2146_s5 + $0xb0] sm:$0xff] %vm1424_vm0, %v1348_v46  ;;  %1497 = vst.msk [vmem:[%s2146_s5 + $0x240] sm:$0xff] %vm1424_vm0, %v1398_v47  ;;  %v1027_v50 = vadd.f32 %v2137_v53, %v1026_v48  ;;  %v1227_v51 = vadd.f32 %v2137_v53, %v1226_v49 }
 0x16a   : > { %v1028_v52 = vpop.f32.mrf.mxu0  ;;  %v1228_v54 = vpop.f32.mrf.mxu1 }
 0x16b   : > { %v1349_v55 = vmax.f32 %v1027_v50, 0.0  ;;  %v1399_v56 = vmax.f32 %v1227_v51, 0.0 }
 0x16c   : > { %v1031_v57 = vpop.f32.mrf.mxu0  ;;  %v1231_v58 = vpop.f32.mrf.mxu1 }
 0x16d   : > { %1448 = vst.msk [vmem:[%s2146_s5 + $0xb8] sm:$0xff] %vm1424_vm0, %v1349_v55  ;;  %1498 = vst.msk [vmem:[%s2146_s5 + $0x248] sm:$0xff] %vm1424_vm0, %v1399_v56  ;;  %v1032_v59 = vadd.f32 %v2137_v53, %v1031_v57  ;;  %v1232_v60 = vadd.f32 %v2137_v53, %v1231_v58 }
 0x16e   : > { %v1033_v61 = vpop.f32.mrf.mxu0  ;;  %v1233_v62 = vpop.f32.mrf.mxu1 }
 0x16f   : > { %v1350_v63 = vmax.f32 %v1032_v59, 0.0  ;;  %v1400_v0 = vmax.f32 %v1232_v60, 0.0 }
 0x170   : > { %v1034_v1 = vpop.f32.mrf.mxu0  ;;  %v1234_v2 = vpop.f32.mrf.mxu1 }
 0x171   : > { %1449 = vst.msk [vmem:[%s2146_s5 + $0xc0] sm:$0xff] %vm1424_vm0, %v1350_v63  ;;  %1499 = vst.msk [vmem:[%s2146_s5 + $0x250] sm:$0xff] %vm1424_vm0, %v1400_v0  ;;  %v1035_v3 = vadd.f32 %v2137_v53, %v1034_v1  ;;  %v1235_v4 = vadd.f32 %v2137_v53, %v1234_v2 }
 0x172   : > { %v1036_v5 = vpop.f32.mrf.mxu0  ;;  %v1236_v6 = vpop.f32.mrf.mxu1 }
 0x173   : > { %v1351_v7 = vmax.f32 %v1035_v3, 0.0  ;;  %v1401_v8 = vmax.f32 %v1235_v4, 0.0 }
 0x174   : > { %v1039_v9 = vpop.f32.mrf.mxu0  ;;  %v1239_v10 = vpop.f32.mrf.mxu1 }
 0x175   : > { %1450 = vst.msk [vmem:[%s2146_s5 + $0xc8] sm:$0xff] %vm1424_vm0, %v1351_v7  ;;  %1500 = vst.msk [vmem:[%s2146_s5 + $0x258] sm:$0xff] %vm1424_vm0, %v1401_v8  ;;  %v1040_v11 = vadd.f32 %v2137_v53, %v1039_v9  ;;  %v1240_v12 = vadd.f32 %v2137_v53, %v1239_v10 }
 0x176   : > { %v1041_v13 = vpop.f32.mrf.mxu0  ;;  %v1241_v14 = vpop.f32.mrf.mxu1 }
 0x177   : > { %v1352_v15 = vmax.f32 %v1040_v11, 0.0  ;;  %v1402_v16 = vmax.f32 %v1240_v12, 0.0 }
 0x178   : > { %v1042_v17 = vpop.f32.mrf.mxu0  ;;  %v1242_v18 = vpop.f32.mrf.mxu1 }
 0x179   : > { %1451 = vst.msk [vmem:[%s2146_s5 + $0xd0] sm:$0xff] %vm1424_vm0, %v1352_v15  ;;  %1501 = vst.msk [vmem:[%s2146_s5 + $0x260] sm:$0xff] %vm1424_vm0, %v1402_v16  ;;  %v1043_v19 = vadd.f32 %v2137_v53, %v1042_v17  ;;  %v1243_v20 = vadd.f32 %v2137_v53, %v1242_v18 }
 0x17a   : > { %v1044_v21 = vpop.f32.mrf.mxu0  ;;  %v1244_v22 = vpop.f32.mrf.mxu1 }
 0x17b   : > { %v1353_v23 = vmax.f32 %v1043_v19, 0.0  ;;  %v1403_v24 = vmax.f32 %v1243_v20, 0.0 }
 0x17c   : > { %v1047_v25 = vpop.f32.mrf.mxu0  ;;  %v1247_v26 = vpop.f32.mrf.mxu1 }
 0x17d   : > { %1452 = vst.msk [vmem:[%s2146_s5 + $0xd8] sm:$0xff] %vm1424_vm0, %v1353_v23  ;;  %1502 = vst.msk [vmem:[%s2146_s5 + $0x268] sm:$0xff] %vm1424_vm0, %v1403_v24  ;;  %v1048_v27 = vadd.f32 %v2137_v53, %v1047_v25  ;;  %v1248_v28 = vadd.f32 %v2137_v53, %v1247_v26 }
 0x17e   : > { %v1049_v29 = vpop.f32.mrf.mxu0  ;;  %v1249_v30 = vpop.f32.mrf.mxu1 }
 0x17f   : > { %v1354_v31 = vmax.f32 %v1048_v27, 0.0  ;;  %v1404_v32 = vmax.f32 %v1248_v28, 0.0 }
 0x180   : > { %v1050_v33 = vpop.f32.mrf.mxu0  ;;  %v1250_v34 = vpop.f32.mrf.mxu1 }
 0x181   : > { %1453 = vst.msk [vmem:[%s2146_s5 + $0xe0] sm:$0xff] %vm1424_vm0, %v1354_v31  ;;  %1503 = vst.msk [vmem:[%s2146_s5 + $0x270] sm:$0xff] %vm1424_vm0, %v1404_v32  ;;  %v1051_v35 = vadd.f32 %v2137_v53, %v1050_v33  ;;  %v1251_v36 = vadd.f32 %v2137_v53, %v1250_v34 }
 0x182   : > { %v1052_v37 = vpop.f32.mrf.mxu0  ;;  %v1252_v38 = vpop.f32.mrf.mxu1 }
 0x183   : > { %v1355_v39 = vmax.f32 %v1051_v35, 0.0  ;;  %v1405_v40 = vmax.f32 %v1251_v36, 0.0 }
 0x184   : > { %v1055_v41 = vpop.f32.mrf.mxu0  ;;  %v1255_v42 = vpop.f32.mrf.mxu1 }
 0x185   : > { %1454 = vst.msk [vmem:[%s2146_s5 + $0xe8] sm:$0xff] %vm1424_vm0, %v1355_v39  ;;  %1504 = vst.msk [vmem:[%s2146_s5 + $0x278] sm:$0xff] %vm1424_vm0, %v1405_v40  ;;  %v1056_v43 = vadd.f32 %v2137_v53, %v1055_v41  ;;  %v1256_v44 = vadd.f32 %v2137_v53, %v1255_v42 }
 0x186   : > { %v1057_v45 = vpop.f32.mrf.mxu0  ;;  %v1257_v46 = vpop.f32.mrf.mxu1 }
 0x187   : > { %v1356_v47 = vmax.f32 %v1056_v43, 0.0  ;;  %v1406_v48 = vmax.f32 %v1256_v44, 0.0 }
 0x188   : > { %v1058_v49 = vpop.f32.mrf.mxu0  ;;  %v1258_v50 = vpop.f32.mrf.mxu1 }
 0x189   : > { %1455 = vst.msk [vmem:[%s2146_s5 + $0xf0] sm:$0xff] %vm1424_vm0, %v1356_v47  ;;  %1505 = vst.msk [vmem:[%s2146_s5 + $0x280] sm:$0xff] %vm1424_vm0, %v1406_v48  ;;  %v1059_v51 = vadd.f32 %v2137_v53, %v1058_v49  ;;  %v1259_v52 = vadd.f32 %v2137_v53, %v1258_v50 }
 0x18a   : > { %v1060_v54 = vpop.f32.mrf.mxu0  ;;  %v1260_v55 = vpop.f32.mrf.mxu1 }
 0x18b   : > { %v1357_v56 = vmax.f32 %v1059_v51, 0.0  ;;  %v1407_v57 = vmax.f32 %v1259_v52, 0.0 }
 0x18c   : > { %v1063_v58 = vpop.f32.mrf.mxu0  ;;  %v1263_v59 = vpop.f32.mrf.mxu1 }
 0x18d   : > { %1456 = vst.msk [vmem:[%s2146_s5 + $0xf8] sm:$0xff] %vm1424_vm0, %v1357_v56  ;;  %1506 = vst.msk [vmem:[%s2146_s5 + $0x288] sm:$0xff] %vm1424_vm0, %v1407_v57  ;;  %v1064_v60 = vadd.f32 %v2137_v53, %v1063_v58  ;;  %v1264_v61 = vadd.f32 %v2137_v53, %v1263_v59 }
 0x18e   : > { %v1065_v62 = vpop.f32.mrf.mxu0  ;;  %v1265_v63 = vpop.f32.mrf.mxu1 }
 0x18f   : > { %v1358_v0 = vmax.f32 %v1064_v60, 0.0  ;;  %v1408_v1 = vmax.f32 %v1264_v61, 0.0 }
 0x190   : > { %v1066_v2 = vpop.f32.mrf.mxu0  ;;  %v1266_v3 = vpop.f32.mrf.mxu1 }
 0x191   : > { %1457 = vst.msk [vmem:[%s2146_s5 + $0x100] sm:$0xff] %vm1424_vm0, %v1358_v0  ;;  %1507 = vst.msk [vmem:[%s2146_s5 + $0x290] sm:$0xff] %vm1424_vm0, %v1408_v1  ;;  %v1067_v4 = vadd.f32 %v2137_v53, %v1066_v2  ;;  %v1267_v5 = vadd.f32 %v2137_v53, %v1266_v3 }
 0x192   : > { %v1068_v6 = vpop.f32.mrf.mxu0  ;;  %v1268_v7 = vpop.f32.mrf.mxu1 }
 0x193   : > { %v1359_v8 = vmax.f32 %v1067_v4, 0.0  ;;  %v1409_v9 = vmax.f32 %v1267_v5, 0.0 }
 0x194   : > { %v1071_v10 = vpop.f32.mrf.mxu0  ;;  %v1271_v11 = vpop.f32.mrf.mxu1 }
 0x195   : > { %1458 = vst.msk [vmem:[%s2146_s5 + $0x108] sm:$0xff] %vm1424_vm0, %v1359_v8  ;;  %1508 = vst.msk [vmem:[%s2146_s5 + $0x298] sm:$0xff] %vm1424_vm0, %v1409_v9  ;;  %v1072_v12 = vadd.f32 %v2137_v53, %v1071_v10  ;;  %v1272_v13 = vadd.f32 %v2137_v53, %v1271_v11 }
 0x196   : > { %v1073_v14 = vpop.f32.mrf.mxu0  ;;  %v1273_v15 = vpop.f32.mrf.mxu1 }
 0x197   : > { %v1360_v16 = vmax.f32 %v1072_v12, 0.0  ;;  %v1410_v17 = vmax.f32 %v1272_v13, 0.0 }
 0x198   : > { %v1074_v18 = vpop.f32.mrf.mxu0  ;;  %v1274_v19 = vpop.f32.mrf.mxu1 }
 0x199   : > { %1459 = vst.msk [vmem:[%s2146_s5 + $0x110] sm:$0xff] %vm1424_vm0, %v1360_v16  ;;  %1509 = vst.msk [vmem:[%s2146_s5 + $0x2a0] sm:$0xff] %vm1424_vm0, %v1410_v17  ;;  %v1075_v20 = vadd.f32 %v2137_v53, %v1074_v18  ;;  %v1275_v21 = vadd.f32 %v2137_v53, %v1274_v19 }
 0x19a   : > { %v1076_v22 = vpop.f32.mrf.mxu0  ;;  %v1276_v23 = vpop.f32.mrf.mxu1 }
 0x19b   : > { %v1361_v24 = vmax.f32 %v1075_v20, 0.0  ;;  %v1411_v25 = vmax.f32 %v1275_v21, 0.0 }
 0x19c   : > { %v1079_v26 = vpop.f32.mrf.mxu0  ;;  %v1279_v27 = vpop.f32.mrf.mxu1 }
 0x19d   : > { %1460 = vst.msk [vmem:[%s2146_s5 + $0x118] sm:$0xff] %vm1424_vm0, %v1361_v24  ;;  %1510 = vst.msk [vmem:[%s2146_s5 + $0x2a8] sm:$0xff] %vm1424_vm0, %v1411_v25  ;;  %v1080_v28 = vadd.f32 %v2137_v53, %v1079_v26  ;;  %v1280_v29 = vadd.f32 %v2137_v53, %v1279_v27 }
 0x19e   : > { %v1081_v30 = vpop.f32.mrf.mxu0  ;;  %v1281_v31 = vpop.f32.mrf.mxu1 }
 0x19f   : > { %v1362_v32 = vmax.f32 %v1080_v28, 0.0  ;;  %v1412_v33 = vmax.f32 %v1280_v29, 0.0 }
 0x1a0   : > { %v1082_v34 = vpop.f32.mrf.mxu0  ;;  %v1282_v35 = vpop.f32.mrf.mxu1 }
 0x1a1   : > { %1461 = vst.msk [vmem:[%s2146_s5 + $0x120] sm:$0xff] %vm1424_vm0, %v1362_v32  ;;  %1511 = vst.msk [vmem:[%s2146_s5 + $0x2b0] sm:$0xff] %vm1424_vm0, %v1412_v33  ;;  %v1083_v36 = vadd.f32 %v2137_v53, %v1082_v34  ;;  %v1283_v37 = vadd.f32 %v2137_v53, %v1282_v35 }
 0x1a2   : > { %v1084_v38 = vpop.f32.mrf.mxu0  ;;  %v1284_v39 = vpop.f32.mrf.mxu1 }
 0x1a3   : > { %v1363_v40 = vmax.f32 %v1083_v36, 0.0  ;;  %v1413_v41 = vmax.f32 %v1283_v37, 0.0 }
 0x1a4   : > { %v1087_v42 = vpop.f32.mrf.mxu0  ;;  %v1287_v43 = vpop.f32.mrf.mxu1 }
 0x1a5   : > { %1462 = vst.msk [vmem:[%s2146_s5 + $0x128] sm:$0xff] %vm1424_vm0, %v1363_v40  ;;  %1512 = vst.msk [vmem:[%s2146_s5 + $0x2b8] sm:$0xff] %vm1424_vm0, %v1413_v41  ;;  %v1088_v44 = vadd.f32 %v2137_v53, %v1087_v42  ;;  %v1288_v45 = vadd.f32 %v2137_v53, %v1287_v43 }
 0x1a6   : > { %v1089_v46 = vpop.f32.mrf.mxu0  ;;  %v1289_v47 = vpop.f32.mrf.mxu1 }
 0x1a7   : > { %v1364_v48 = vmax.f32 %v1088_v44, 0.0  ;;  %v1414_v49 = vmax.f32 %v1288_v45, 0.0 }
 0x1a8   : > { %v1090_v50 = vpop.f32.mrf.mxu0  ;;  %v1290_v51 = vpop.f32.mrf.mxu1 }
 0x1a9   : > { %1463 = vst.msk [vmem:[%s2146_s5 + $0x130] sm:$0xff] %vm1424_vm0, %v1364_v48  ;;  %1513 = vst.msk [vmem:[%s2146_s5 + $0x2c0] sm:$0xff] %vm1424_vm0, %v1414_v49  ;;  %v1091_v52 = vadd.f32 %v2137_v53, %v1090_v50  ;;  %v1291_v54 = vadd.f32 %v2137_v53, %v1290_v51 }
 0x1aa   : > { %v1092_v55 = vpop.f32.mrf.mxu0  ;;  %v1292_v56 = vpop.f32.mrf.mxu1 }
 0x1ab   : > { %v1365_v57 = vmax.f32 %v1091_v52, 0.0  ;;  %v1415_v58 = vmax.f32 %v1291_v54, 0.0 }
 0x1ac   : > { %v1095_v59 = vpop.f32.mrf.mxu0  ;;  %v1295_v60 = vpop.f32.mrf.mxu1 }
 0x1ad   : > { %1464 = vst.msk [vmem:[%s2146_s5 + $0x138] sm:$0xff] %vm1424_vm0, %v1365_v57  ;;  %1514 = vst.msk [vmem:[%s2146_s5 + $0x2c8] sm:$0xff] %vm1424_vm0, %v1415_v58  ;;  %v1096_v61 = vadd.f32 %v2137_v53, %v1095_v59  ;;  %v1296_v62 = vadd.f32 %v2137_v53, %v1295_v60 }
 0x1ae   : > { %v1097_v63 = vpop.f32.mrf.mxu0  ;;  %v1297_v0 = vpop.f32.mrf.mxu1 }
 0x1af   : > { %v1366_v1 = vmax.f32 %v1096_v61, 0.0  ;;  %v1416_v2 = vmax.f32 %v1296_v62, 0.0 }
 0x1b0   : > { %v1098_v3 = vpop.f32.mrf.mxu0  ;;  %v1298_v4 = vpop.f32.mrf.mxu1 }
 0x1b1   : > { %1465 = vst.msk [vmem:[%s2146_s5 + $0x140] sm:$0xff] %vm1424_vm0, %v1366_v1  ;;  %1515 = vst.msk [vmem:[%s2146_s5 + $0x2d0] sm:$0xff] %vm1424_vm0, %v1416_v2  ;;  %v1099_v5 = vadd.f32 %v2137_v53, %v1098_v3  ;;  %v1299_v6 = vadd.f32 %v2137_v53, %v1298_v4 }
 0x1b2   : > { %v1100_v7 = vpop.f32.mrf.mxu0  ;;  %v1300_v8 = vpop.f32.mrf.mxu1 }
 0x1b3   : > { %v1367_v9 = vmax.f32 %v1099_v5, 0.0  ;;  %v1417_v10 = vmax.f32 %v1299_v6, 0.0 }
 0x1b4   : > { %v1103_v11 = vpop.f32.mrf.mxu0  ;;  %v1303_v12 = vpop.f32.mrf.mxu1 }
 0x1b5   : > { %1466 = vst.msk [vmem:[%s2146_s5 + $0x148] sm:$0xff] %vm1424_vm0, %v1367_v9  ;;  %1516 = vst.msk [vmem:[%s2146_s5 + $0x2d8] sm:$0xff] %vm1424_vm0, %v1417_v10  ;;  %v1104_v13 = vadd.f32 %v2137_v53, %v1103_v11  ;;  %v1304_v14 = vadd.f32 %v2137_v53, %v1303_v12 }
 0x1b6   : > { %v1105_v15 = vpop.f32.mrf.mxu0  ;;  %v1305_v16 = vpop.f32.mrf.mxu1 }
 0x1b7   : > { %v1368_v17 = vmax.f32 %v1104_v13, 0.0  ;;  %v1418_v18 = vmax.f32 %v1304_v14, 0.0 }
 0x1b8   : > { %v1106_v19 = vpop.f32.mrf.mxu0  ;;  %v1306_v20 = vpop.f32.mrf.mxu1 }
 0x1b9   : > { %1467 = vst.msk [vmem:[%s2146_s5 + $0x150] sm:$0xff] %vm1424_vm0, %v1368_v17  ;;  %1517 = vst.msk [vmem:[%s2146_s5 + $0x2e0] sm:$0xff] %vm1424_vm0, %v1418_v18  ;;  %v1107_v21 = vadd.f32 %v2137_v53, %v1106_v19  ;;  %v1307_v22 = vadd.f32 %v2137_v53, %v1306_v20 }
 0x1ba   : > { %v1108_v23 = vpop.f32.mrf.mxu0  ;;  %v1308_v24 = vpop.f32.mrf.mxu1 }
 0x1bb   : > { %v1369_v25 = vmax.f32 %v1107_v21, 0.0  ;;  %v1419_v26 = vmax.f32 %v1307_v22, 0.0 }
 0x1bc   : > { %v1111_v27 = vpop.f32.mrf.mxu0  ;;  %v1311_v28 = vpop.f32.mrf.mxu1 }
 0x1bd   : > { %1468 = vst.msk [vmem:[%s2146_s5 + $0x158] sm:$0xff] %vm1424_vm0, %v1369_v25  ;;  %1518 = vst.msk [vmem:[%s2146_s5 + $0x2e8] sm:$0xff] %vm1424_vm0, %v1419_v26  ;;  %v1112_v29 = vadd.f32 %v2137_v53, %v1111_v27  ;;  %v1312_v30 = vadd.f32 %v2137_v53, %v1311_v28 }
 0x1be   : > { %v1113_v31 = vpop.f32.mrf.mxu0  ;;  %v1313_v32 = vpop.f32.mrf.mxu1 }
 0x1bf   : > { %v1370_v33 = vmax.f32 %v1112_v29, 0.0  ;;  %v1420_v34 = vmax.f32 %v1312_v30, 0.0 }
 0x1c0   : > { %v1114_v35 = vpop.f32.mrf.mxu0  ;;  %v1314_v36 = vpop.f32.mrf.mxu1 }
 0x1c1   : > { %1469 = vst.msk [vmem:[%s2146_s5 + $0x160] sm:$0xff] %vm1424_vm0, %v1370_v33  ;;  %1519 = vst.msk [vmem:[%s2146_s5 + $0x2f0] sm:$0xff] %vm1424_vm0, %v1420_v34  ;;  %v1115_v37 = vadd.f32 %v2137_v53, %v1114_v35  ;;  %v1315_v38 = vadd.f32 %v2137_v53, %v1314_v36 }
 0x1c2   : > { %v1116_v39 = vpop.f32.mrf.mxu0  ;;  %v1316_v40 = vpop.f32.mrf.mxu1 }
 0x1c3   : > { %v1371_v41 = vmax.f32 %v1115_v37, 0.0  ;;  %v1421_v42 = vmax.f32 %v1315_v38, 0.0 }
 0x1c4   : > { %v1119_v43 = vpop.f32.mrf.mxu0  ;;  %v1319_v44 = vpop.f32.mrf.mxu1 }
 0x1c5   : > { %1470 = vst.msk [vmem:[%s2146_s5 + $0x168] sm:$0xff] %vm1424_vm0, %v1371_v41  ;;  %1520 = vst.msk [vmem:[%s2146_s5 + $0x2f8] sm:$0xff] %vm1424_vm0, %v1421_v42  ;;  %v1120_v45 = vadd.f32 %v2137_v53, %v1119_v43  ;;  %v1320_v46 = vadd.f32 %v2137_v53, %v1319_v44 }
 0x1c6   : > { %v1121_v47 = vpop.f32.mrf.mxu0  ;;  %v1321_v48 = vpop.f32.mrf.mxu1 }
 0x1c7   : > { %v1372_v49 = vmax.f32 %v1120_v45, 0.0  ;;  %v1422_v50 = vmax.f32 %v1320_v46, 0.0 }
 0x1c8   : > { %v1122_v51 = vpop.f32.mrf.mxu0  ;;  %v1322_v52 = vpop.f32.mrf.mxu1 }
 0x1c9   : > { %1471 = vst.msk [vmem:[%s2146_s5 + $0x170] sm:$0xff] %vm1424_vm0, %v1372_v49  ;;  %1521 = vst.msk [vmem:[%s2146_s5 + $0x300] sm:$0xff] %vm1424_vm0, %v1422_v50  ;;  %v1123_v54 = vadd.f32 %v2137_v53, %v1122_v51  ;;  %v1323_v55 = vadd.f32 %v2137_v53, %v1322_v52 }
 0x1ca   : > { %v1124_v56 = vpop.f32.mrf.mxu0  ;;  %v1324_v57 = vpop.f32.mrf.mxu1 }
 0x1cb   : > { %v1373_v58 = vmax.f32 %v1123_v54, 0.0  ;;  %v1423_v59 = vmax.f32 %v1323_v55, 0.0 }
 0x1cc   : > { %v1127_v60 = vpop.f32.mrf.mxu0 }
 0x1cd   : > { %1472 = vst.msk [vmem:[%s2146_s5 + $0x178] sm:$0xff] %vm1424_vm0, %v1373_v58  ;;  %1522 = vst.msk [vmem:[%s2146_s5 + $0x308] sm:$0xff] %vm1424_vm0, %v1423_v59  ;;  %v1128_v61 = vadd.f32 %v2137_v53, %v1127_v60 }
 0x1ce   : > { %v1129_v62 = vpop.f32.mrf.mxu0 }
 0x1cf   : > { %v1374_v63 = vmax.f32 %v1128_v61, 0.0 }
 0x1d0   : > { %v1130_v0 = vpop.f32.mrf.mxu0 }
 0x1d1   : > { %1473 = vst.msk [vmem:[%s2146_s5 + $0x180] sm:$0xff] %vm1424_vm0, %v1374_v63  ;;  %v1131_v1 = vadd.f32 %v2137_v53, %v1130_v0 }
 0x1d2   : > { %v1132_v2 = vpop.f32.mrf.mxu0 }
 0x1d3   : > { %v1375_v3 = vmax.f32 %v1131_v1, 0.0 }
 0x1d5   : > { %1474 = vst.msk [vmem:[%s2146_s5 + $0x188] sm:$0xff] %vm1424_vm0, %v1375_v3 }
 0x1d6 PF: > { %s13_s12 = sadd.s32 1, %s1914_s12  }
 0x1d7   : > { %p10_p4 = scmp.ge.s32.totalorder %s13_s12, 4  }
 0x1d9   :  { %12 = sbr.rel (!%p10_p4) target bundleno = 1 (0x1), region = 62 }

// kernel: dqn_forward.4
= control target key start
LH: loop header
LB: loop body
LE: loop exit
PB: predicated region body
PF: predicated region fallthrough
CT: control target
= control target key end

     0   :  { %s1395_s15 = smov 0   ;;  %s2351_s0 = inlined_call_operand.vmem [shape: f32[2,15,15,32], index: 0, kind: input, shape index: {}]   ;;  %s2352_s1 = inlined_call_operand.vmem [shape: f32[2,15,15,32], index: 1, kind: input, shape index: {}]   ;;  %s2353_s2 = inlined_call_operand.vmem [shape: f32[2,15,15,32], index: 2, kind: input, shape index: {}]   ;;  %s2354_s3 = inlined_call_operand.vmem [shape: f32[2,15,15,32], index: 3, kind: input, shape index: {}]   ;;  %s2355_s4 = inlined_call_operand.vmem [shape: f32[2,14,14,32], index: 4, kind: output, shape index: {}]  }
   0x1 LB: > { %s1340_s16 = sadd.s32 4294967295, %s1368_s15   ;;  %p1344_p0 = scmp.ge.s32.totalorder %s1368_s15, 1  ;;  %s1368_s15 = sphi %s1395_s15, %s14_s15  }
   0x2   : > { %p192_p1 = scmp.lt.s32.totalorder %s1368_s15, 3 }
   0x4   : > { %p193_p2 = pnand %p1344_p0, %p192_p1 }
   0x5   : > { %p233_p3 = scmp.lt.s32.totalorder (!%p193_p2), %s1340_s16, 1 }
   0x6   : > { %196 = sbr.rel (%p193_p2) target bundleno = 179 (0xb3), region = 36 }
   0xb   : > { %s2357_s16 = smov (!%p233_p3, %s1340_s16), 1  ;;  %vm434_vm0 = vcmask 1046528   ;;  %vm1219_vm1 = vcmask 261120   ;;  %vm1221_vm2 = vcmask 259072  }
   0xc   : > { %s1352_s17 = smul.u32 240, %s2357_s16 }
   0xd   : > { %s1353_s30 = smul.u32 224, %s2357_s16 }
   0xe   : > { %s1409_s20 = scalar_lea.vmem %s2351_s0, %s1352_s17  ;;  %s1414_s23 = scalar_lea.vmem %s2352_s1, %s1352_s17 }
   0xf   : > { %v258_v0 = vld [vmem:[%s1409_s20] sm:$0xff]  ;;  %v1418_v1 = vld [vmem:[%s1409_s20 + $0x8] sm:$0x7f]  ;;  %v1421_v2 = vld [vmem:[%s1409_s20 + $0x10] sm:$0xff]  ;;  %s1435_s26 = scalar_lea.vmem %s2353_s2, %s1352_s17  ;;  %s1449_s29 = scalar_lea.vmem %s2354_s3, %s1352_s17 }
  0x10   : > { %v1424_v3 = vld [vmem:[%s1409_s20 + $0x18] sm:$0x7f]  ;;  %v1427_v4 = vld [vmem:[%s1409_s20 + $0x20] sm:$0xff]  ;;  %v1430_v5 = vld [vmem:[%s1409_s20 + $0x28] sm:$0x7f]  ;;  %v435_v6 = vrot.slane %v258_v0, 1  ;;  %s1674_s7 = scalar_lea.vmem %s2355_s4, %s1353_s30 }
  0x11   : > { %v288_v7 = vld [vmem:[%s1414_s23] sm:$0xff]  ;;  %v1439_v8 = vld [vmem:[%s1414_s23 + $0x8] sm:$0x7f]  ;;  %v1442_v9 = vld [vmem:[%s1414_s23 + $0x10] sm:$0xff]  ;;  %v436_v10 = vrot.slane %v1418_v1, 1  ;;  %v438_v11 = vrot.slane %v1421_v2, 1 }
  0x12   : > { %v1452_v12 = vld [vmem:[%s1414_s23 + $0x18] sm:$0x7f]  ;;  %v1455_v13 = vld [vmem:[%s1414_s23 + $0x20] sm:$0xff]  ;;  %v378_v14 = vmax.f32 %v258_v0, %v288_v7  ;;  %v380_v15 = vmax.f32 %v1421_v2, %v1442_v9  ;;  %v1460_v16 = vrot.slane %v1424_v3, 1  ;;  %v441_v17 = vrot.slane %v1427_v4, 1  ;;  %v1478_v24 = vld [vmem:[%s1435_s26 + $0x10] sm:$0xff] }
  0x13   : > { %v381_v18 = vmax.f32 %v1424_v3, %v1452_v12  ;;  %v382_v19 = vmax.f32 %v1427_v4, %v1455_v13  ;;  %v437_v20 = vsel %vm434_vm0, %v435_v6, %v436_v10  ;;  %v1471_v21 = vrot.slane %v1430_v5, 1  ;;  %v318_v22 = vld [vmem:[%s1435_s26] sm:$0xff]  ;;  %v1475_v23 = vld [vmem:[%s1435_s26 + $0x8] sm:$0x7f]  ;;  %v1486_v29 = vld [vmem:[%s1435_s26 + $0x18] sm:$0x7f] }
  0x14   : > { %v1482_v25 = vsel %vm434_vm0, %v438_v11, %v1460_v16  ;;  %v505_v26 = vmax.f32 %v378_v14, %v437_v20  ;;  %v561_v27 = vrot.slane %v288_v7, 1  ;;  %v562_v28 = vrot.slane %v1439_v8, 1  ;;  %v348_v30 = vld [vmem:[%s1449_s29] sm:$0xff]  ;;  %v1497_v35 = vld [vmem:[%s1449_s29 + $0x8] sm:$0x7f]  ;;  %v1508_v40 = vld [vmem:[%s1449_s29 + $0x10] sm:$0xff] }
  0x15   : > { %v1491_v31 = vsel %vm434_vm0, %v441_v17, %v1471_v21  ;;  %v507_v32 = vmax.f32 %v380_v15, %v1482_v25  ;;  %v508_v33 = vmax.f32 %v381_v18, %v1460_v16  ;;  %v564_v34 = vrot.slane %v1442_v9, 1  ;;  %v1511_v41 = vld [vmem:[%s1449_s29 + $0x18] sm:$0x7f]  ;;  %v1529_v54 = vld [vmem:[%s1409_s20 + $0x30] sm:$0xff]  ;;  %v1532_v55 = vld [vmem:[%s1414_s23 + $0x28] sm:$0x7f] }
  0x16   : > { %v1500_v36 = vmax.f32 %v382_v19, %v1491_v31  ;;  %v563_v37 = vsel %vm434_vm0, %v561_v27, %v562_v28  ;;  %v1504_v38 = vrot.slane %v1452_v12, 1  ;;  %v567_v39 = vrot.slane %v1455_v13, 1  ;;  %v1535_v56 = vld [vmem:[%s1414_s23 + $0x30] sm:$0xff]  ;;  %v1553_v6 = vld [vmem:[%s1409_s20 + $0x38] sm:$0x7f] }
  0x17   : > { %v631_v42 = vmax.f32 %v505_v26, %v563_v37  ;;  %v743_v43 = vrot.slane %v318_v22, 1  ;;  %v744_v44 = vrot.slane %v1475_v23, 1  ;;  %v746_v45 = vrot.slane %v1478_v24, 1 }
  0x18   : > { %v1517_v46 = vsel %vm434_vm0, %v564_v34, %v1504_v38  ;;  %v634_v47 = vmax.f32 %v508_v33, %v1504_v38  ;;  %v1521_v48 = vrot.slane %v1486_v29, 1  ;;  %v869_v49 = vrot.slane %v348_v30, 1 }
  0x19   : > { %v633_v50 = vmax.f32 %v507_v32, %v1517_v46  ;;  %v659_v51 = vmax.f32 %v631_v42, %v318_v22  ;;  %v745_v52 = vsel %vm434_vm0, %v743_v43, %v744_v44  ;;  %v870_v53 = vrot.slane %v1497_v35, 1 }
  0x1a   : > { %v662_v57 = vmax.f32 %v634_v47, %v1486_v29  ;;  %v1540_v58 = vsel %vm434_vm0, %v746_v45, %v1521_v48  ;;  %v872_v59 = vrot.slane %v1508_v40, 1  ;;  %v1544_v60 = vrot.slane %v1511_v41, 1 }
  0x1b   : > { %v661_v61 = vmax.f32 %v633_v50, %v1478_v24  ;;  %v687_v62 = vmax.f32 %v659_v51, %v348_v30  ;;  %v871_v63 = vsel %vm434_vm0, %v869_v49, %v870_v53  ;;  %v379_v0 = vmax.f32 %v1418_v1, %v1439_v8  ;;  %v322_v1 = vld [vmem:[%s1435_s26 + $0x20] sm:$0xff]  ;;  %v1595_v51 = vld [vmem:[%s1449_s29 + $0x28] sm:$0x7f] }
  0x1c   : > { %v690_v7 = vmax.f32 %v662_v57, %v1511_v41  ;;  %v1558_v11 = vsel %vm434_vm0, %v872_v59, %v1544_v60  ;;  %v383_v14 = vmax.f32 %v1430_v5, %v1532_v55  ;;  %v384_v15 = vmax.f32 %v1529_v54, %v1535_v56  ;;  %v1592_v50 = vld [vmem:[%s1449_s29 + $0x20] sm:$0xff] }
  0x1d   : > { %v689_v17 = vmax.f32 %v661_v61, %v1508_v40  ;;  %v813_v18 = vmax.f32 %v687_v62, %v745_v52  ;;  %v506_v8 = vmax.f32 %v379_v0, %v436_v10  ;;  %v444_v19 = vrot.slane %v1529_v54, 1  ;;  %v323_v10 = vld [vmem:[%s1435_s26 + $0x28] sm:$0x7f] }
  0x1e   : > { %v816_v20 = vmax.f32 %v690_v7, %v1521_v48  ;;  %v1570_v22 = vrot.slane %v1553_v6, 1  ;;  %v510_v26 = vmax.f32 %v383_v14, %v1471_v21  ;;  %v1574_v27 = vrot.slane %v1532_v55, 1 }
  0x1f   : > { %v815_v30 = vmax.f32 %v689_v17, %v1540_v58  ;;  %v939_v32 = vmax.f32 %v813_v18, %v871_v63  ;;  %v632_v33 = vmax.f32 %v506_v8, %v562_v28  ;;  %v570_v34 = vrot.slane %v1535_v56, 1  ;;  %v1619_v8 = vld [vmem:[%s1409_s20 + $0x40] sm:$0xff] }
  0x20   : > { %v942_v37 = vmax.f32 %v816_v20, %v1544_v60  ;;  %v1583_v42 = vsel %vm434_vm0, %v444_v19, %v1570_v22  ;;  %v569_v43 = vsel %vm434_vm0, %v567_v39, %v1574_v27  ;;  %v636_v45 = vmax.f32 %v510_v26, %v1574_v27  ;;  %v1622_v19 = vld [vmem:[%s1414_s23 + $0x40] sm:$0xff] }
  0x21   : > { %v941_v47 = vmax.f32 %v815_v30, %v1558_v11  ;;  %v967_v49 = vmax.f32 %v939_v32, %v1421_v2  ;;  %v660_v28 = vmax.f32 %v632_v33, %v1475_v23  ;;  %v1598_v52 = vmax.f32 %v384_v15, %v1583_v42  ;;  %v1635_v32 = vld [vmem:[%s1409_s20 + $0x48] sm:$0x7f] }
  0x22   : > { %v970_v57 = vmax.f32 %v942_v37, %v1430_v5  ;;  %v635_v39 = vmax.f32 %v1500_v36, %v569_v43  ;;  %v664_v59 = vmax.f32 %v636_v45, %v323_v10  ;;  %v749_v61 = vrot.slane %v322_v1, 1  ;;  %v1611_v36 = vld [vmem:[%s1414_s23 + $0x38] sm:$0x7f] }
  0x23   : > { %v969_v2 = vmax.f32 %v941_v47, %v1427_v4  ;;  %v995_v62 = vmax.f32 %v967_v49, %v1442_v9  ;;  %v688_v63 = vmax.f32 %v660_v28, %v1497_v35  ;;  %v750_v0 = vrot.slane %v323_v10, 1 }
  0x24   : > { %v663_v7 = vmax.f32 %v635_v39, %v322_v1  ;;  %v692_v14 = vmax.f32 %v664_v59, %v1595_v51  ;;  %v875_v15 = vrot.slane %v1592_v50, 1  ;;  %v1608_v5 = vrot.slane %v1595_v51, 1 }
  0x25   : > { %v997_v17 = vmax.f32 %v969_v2, %v1455_v13  ;;  %v1030_v4 = vmax.f32 %v995_v62, %v1482_v25  ;;  %v814_v9 = vmax.f32 %v688_v63, %v744_v44  ;;  %v751_v18 = vsel %vm434_vm0, %v749_v61, %v750_v0  ;;  %v325_v63 = vld [vmem:[%s1435_s26 + $0x38] sm:$0x7f] }
  0x26   : > { %v691_v20 = vmax.f32 %v663_v7, %v1592_v50  ;;  %v818_v26 = vmax.f32 %v692_v14, %v750_v0  ;;  %v1627_v30 = vsel %vm434_vm0, %v875_v15, %v1608_v5  ;;  %v998_v13 = vmax.f32 %v970_v57, %v1532_v55  ;;  %v354_v15 = vld [vmem:[%s1449_s29 + $0x30] sm:$0xff] }
  0x27   : > { %v1032_v23 = vmax.f32 %v997_v17, %v1491_v31  ;;  %v1065_v25 = vmax.f32 %v1030_v4, %v1517_v46  ;;  %v940_v44 = vmax.f32 %v814_v9, %v870_v53  ;;  %v385_v33 = vmax.f32 %v1553_v6, %v1611_v36  ;;  %v1688_v17 = vld [vmem:[%s1449_s29 + $0x38] sm:$0x7f] }
  0x28   : > { %v817_v37 = vmax.f32 %v691_v20, %v751_v18  ;;  %v944_v45 = vmax.f32 %v818_v26, %v1608_v5  ;;  %v1033_v47 = vmax.f32 %v998_v13, %v1471_v21  ;;  %v386_v55 = vmax.f32 %v1619_v8, %v1622_v19 }
  0x29   : > { %v1093_v31 = vmax.f32 %v1065_v25, %v1478_v24  ;;  %v968_v46 = vmax.f32 %v940_v44, %v1424_v3  ;;  %v1067_v35 = vmax.f32 %v1032_v23, %v569_v43  ;;  %v447_v53 = vrot.slane %v1619_v8, 1  ;;  %v1707_v23 = vld [vmem:[%s1409_s20 + $0x50] sm:$0xff] }
  0x2a   : > { %v943_v49 = vmax.f32 %v817_v37, %v1627_v30  ;;  %v972_v28 = vmax.f32 %v944_v45, %v1553_v6  ;;  %v1068_v57 = vmax.f32 %v1033_v47, %v1574_v27  ;;  %v1651_v21 = vrot.slane %v1635_v32, 1  ;;  %v1710_v25 = vld [vmem:[%s1414_s23 + $0x50] sm:$0xff]  ;;  %v1718_v37 = vld [vmem:[%s1409_s20 + $0x58] sm:$0x7f] }
  0x2b   : > { %v1121_v39 = vmax.f32 %v1093_v31, %v1508_v40  ;;  %v996_v3 = vmax.f32 %v968_v46, %v1452_v12  ;;  %v1095_v24 = vmax.f32 %v1067_v35, %v322_v1  ;;  %v512_v43 = vmax.f32 %v385_v33, %v1570_v22  ;;  %v324_v1 = vld [vmem:[%s1435_s26 + $0x30] sm:$0xff] }
  0x2c   : > { %v971_v59 = vmax.f32 %v943_v49, %v1529_v54  ;;  %v1096_v61 = vmax.f32 %v1068_v57, %v323_v10  ;;  %v1659_v2 = vsel %vm434_vm0, %v447_v53, %v1651_v21  ;;  %v1662_v6 = vrot.slane %v1611_v36, 1 }
  0x2d   : > { %v1156_v40 = vmax.f32 %v1121_v39, %v1540_v58  ;;  %v1031_v27 = vmax.f32 %v996_v3, %v1460_v16  ;;  %v1123_v12 = vmax.f32 %v1095_v24, %v1592_v50  ;;  %v1669_v62 = vmax.f32 %v386_v55, %v1659_v2 }
  0x2e   : > { %v999_v54 = vmax.f32 %v971_v59, %v1535_v56  ;;  %v1124_v10 = vmax.f32 %v1096_v61, %v1595_v51  ;;  %v572_v16 = vsel %vm434_vm0, %v570_v34, %v1662_v6  ;;  %v573_v58 = vrot.slane %v1622_v19, 1  ;;  %v326_v59 = vld [vmem:[%s1435_s26 + $0x40] sm:$0xff] }
  0x2f   : > { %v1191_v50 = vmax.f32 %v1156_v40, %v1558_v11  ;;  %v1066_v7 = vmax.f32 %v1031_v27, %v1504_v38  ;;  %v1158_v14 = vmax.f32 %v1123_v12, %v751_v18  ;;  %v637_v51 = vmax.f32 %v1598_v52, %v572_v16  ;;  %v1700_v52 = vld [vmem:[%s1414_s23 + $0x48] sm:$0x7f]  ;;  %v356_v12 = vld [vmem:[%s1449_s29 + $0x40] sm:$0xff] }
  0x30   : > { %v1034_v4 = vmax.f32 %v999_v54, %v1583_v42  ;;  %v1159_v56 = vmax.f32 %v1124_v10, %v750_v0  ;;  %v638_v34 = vmax.f32 %v512_v43, %v1662_v6  ;;  %v752_v9 = vrot.slane %v324_v1, 1  ;;  %v327_v27 = vld [vmem:[%s1435_s26 + $0x48] sm:$0x7f] }
  0x31   : > { %1220 = vst.msk [vmem:[%s1674_s7] sm:$0xff] %vm1219_vm1, %v1191_v50  ;;  %v1094_v11 = vmax.f32 %v1066_v7, %v1486_v29  ;;  %v1193_v38 = vmax.f32 %v1158_v14, %v1627_v30  ;;  %v665_v18 = vmax.f32 %v637_v51, %v324_v1  ;;  %v1697_v20 = vrot.slane %v325_v63, 1 }
  0x32   : > { %v1194_v42 = vmax.f32 %v1159_v56, %v1608_v5  ;;  %v666_v0 = vmax.f32 %v638_v34, %v325_v63  ;;  %v878_v26 = vrot.slane %v354_v15, 1  ;;  %v1704_v13 = vrot.slane %v1688_v17, 1 }
  0x33   : > { %v1122_v29 = vmax.f32 %v1094_v11, %v1511_v41  ;;  %1223 = vst.msk [vmem:[%s1674_s7 + $0x10] sm:$0xff] %vm1219_vm1, %v1193_v38  ;;  %v693_v30 = vmax.f32 %v665_v18, %v354_v15  ;;  %v754_v44 = vsel %vm434_vm0, %v752_v9, %v1697_v20  ;;  %v1069_v33 = vmax.f32 %v1034_v4, %v572_v16  ;;  %v1758_v16 = vld [vmem:[%s1449_s29 + $0x48] sm:$0x7f]  ;;  %v1764_v4 = vld [vmem:[%s1414_s23 + $0x58] sm:$0x7f]  ;;  %v1778_v38 = vld [vmem:[%s1414_s23 + $0x60] sm:$0xff] }
  0x34   : > { %1224 = vst.msk [vmem:[%s1674_s7 + $0x18] sm:$0x3f] %vm1221_vm2, %v1194_v42  ;;  %v694_v5 = vmax.f32 %v666_v0, %v1688_v17  ;;  %v880_v45 = vsel %vm434_vm0, %v878_v26, %v1704_v13  ;;  %v1000_v47 = vmax.f32 %v972_v28, %v1611_v36  ;;  %v387_v41 = vmax.f32 %v1635_v32, %v1700_v52 }
  0x35   : > { %v1157_v55 = vmax.f32 %v1122_v29, %v1521_v48  ;;  %v819_v31 = vmax.f32 %v693_v30, %v754_v44  ;;  %v1097_v46 = vmax.f32 %v1069_v33, %v324_v1  ;;  %v388_v35 = vmax.f32 %v1707_v23, %v1710_v25 }
  0x36   : > { %v820_v53 = vmax.f32 %v694_v5, %v1697_v20  ;;  %v1035_v49 = vmax.f32 %v1000_v47, %v1570_v22  ;;  %v450_v36 = vrot.slane %v1707_v23, 1  ;;  %v1735_v28 = vrot.slane %v1718_v37, 1 }
  0x37   : > { %v1192_v57 = vmax.f32 %v1157_v55, %v1544_v60  ;;  %v945_v48 = vmax.f32 %v819_v31, %v880_v45  ;;  %v1125_v39 = vmax.f32 %v1097_v46, %v354_v15  ;;  %v514_v3 = vmax.f32 %v387_v41, %v1651_v21 }
  0x38   : > { %v946_v24 = vmax.f32 %v820_v53, %v1704_v13  ;;  %v1070_v43 = vmax.f32 %v1035_v49, %v1662_v6  ;;  %v1744_v22 = vsel %vm434_vm0, %v450_v36, %v1735_v28  ;;  %v574_v61 = vrot.slane %v1700_v52, 1  ;;  %v328_v36 = vld [vmem:[%s1435_s26 + $0x50] sm:$0xff] }
  0x39   : > { %1222 = vst.msk [vmem:[%s1674_s7 + $0x8] sm:$0x3f] %vm1221_vm2, %v1192_v57  ;;  %v973_v60 = vmax.f32 %v945_v48, %v1619_v8  ;;  %v1160_v40 = vmax.f32 %v1125_v39, %v754_v44  ;;  %v1753_v1 = vmax.f32 %v388_v35, %v1744_v22  ;;  %v576_v6 = vrot.slane %v1710_v25, 1  ;;  %v329_v57 = vld [vmem:[%s1435_s26 + $0x58] sm:$0x7f]  ;;  %v1807_v48 = vld [vmem:[%s1449_s29 + $0x50] sm:$0xff] }
  0x3a   : > { %v974_v54 = vmax.f32 %v946_v24, %v1635_v32  ;;  %v1098_v10 = vmax.f32 %v1070_v43, %v325_v63  ;;  %v575_v50 = vsel %vm434_vm0, %v573_v58, %v574_v61  ;;  %v640_v7 = vmax.f32 %v514_v3, %v574_v61 }
  0x3b   : > { %v1001_v8 = vmax.f32 %v973_v60, %v1622_v19  ;;  %v1195_v14 = vmax.f32 %v1160_v40, %v880_v45  ;;  %v639_v15 = vmax.f32 %v1669_v62, %v575_v50  ;;  %v755_v51 = vrot.slane %v326_v59, 1  ;;  %v1775_v62 = vld [vmem:[%s1409_s20 + $0x60] sm:$0xff] }
  0x3c   : > { %v1126_v56 = vmax.f32 %v1098_v10, %v1688_v17  ;;  %v668_v32 = vmax.f32 %v640_v7, %v327_v27  ;;  %v756_v63 = vrot.slane %v327_v27, 1  ;;  %v881_v34 = vrot.slane %v356_v12, 1  ;;  %v1824_v7 = vld [vmem:[%s1414_s23 + $0x68] sm:$0x7f] }
  0x3d   : > { %v1036_v9 = vmax.f32 %v1001_v8, %v1659_v2  ;;  %1225 = vst.msk [vmem:[%s1674_s7 + $0x20] sm:$0xff] %vm1219_vm1, %v1195_v14  ;;  %v667_v58 = vmax.f32 %v639_v15, %v326_v59  ;;  %v1771_v11 = vrot.slane %v1758_v16, 1  ;;  %v1002_v19 = vmax.f32 %v974_v54, %v1700_v52  ;;  %v1784_v2 = vld [vmem:[%s1409_s20 + $0x68] sm:$0x7f]  ;;  %v1828_v15 = vld [vmem:[%s1409_s20 + $0x70] sm:$0xff] }
  0x3e   : > { %v1161_v18 = vmax.f32 %v1126_v56, %v1697_v20  ;;  %v696_v17 = vmax.f32 %v668_v32, %v1758_v16  ;;  %v757_v42 = vsel %vm434_vm0, %v755_v51, %v756_v63  ;;  %v389_v0 = vmax.f32 %v1718_v37, %v1764_v4 }
  0x3f   : > { %v695_v26 = vmax.f32 %v667_v58, %v356_v12  ;;  %v883_v52 = vsel %vm434_vm0, %v881_v34, %v1771_v11  ;;  %v1071_v29 = vmax.f32 %v1036_v9, %v575_v50  ;;  %v1037_v30 = vmax.f32 %v1002_v19, %v1651_v21  ;;  %v1838_v34 = vld [vmem:[%s1409_s20 + $0x78] sm:$0x7f] }
  0x40   : > { %v1196_v44 = vmax.f32 %v1161_v18, %v1704_v13  ;;  %v822_v20 = vmax.f32 %v696_v17, %v756_v63  ;;  %v390_v33 = vmax.f32 %v1775_v62, %v1778_v38  ;;  %v453_v5 = vrot.slane %v1775_v62, 1 }
  0x41   : > { %v821_v45 = vmax.f32 %v695_v26, %v757_v42  ;;  %v1099_v47 = vmax.f32 %v1071_v29, %v326_v59  ;;  %v1072_v41 = vmax.f32 %v1037_v30, %v574_v61  ;;  %v1796_v55 = vrot.slane %v1784_v2, 1 }
  0x42   : > { %1226 = vst.msk [vmem:[%s1674_s7 + $0x28] sm:$0x3f] %vm1221_vm2, %v1196_v44  ;;  %v948_v21 = vmax.f32 %v822_v20, %v1771_v11  ;;  %v516_v13 = vmax.f32 %v389_v0, %v1735_v28  ;;  %v577_v31 = vrot.slane %v1764_v4, 1  ;;  %v579_v46 = vrot.slane %v1778_v38, 1  ;;  %v330_v20 = vld [vmem:[%s1435_s26 + $0x60] sm:$0xff] }
  0x43   : > { %v947_v35 = vmax.f32 %v821_v45, %v883_v52  ;;  %v1127_v53 = vmax.f32 %v1099_v47, %v356_v12  ;;  %v1100_v49 = vmax.f32 %v1072_v41, %v327_v27  ;;  %v1811_v39 = vsel %vm434_vm0, %v453_v5, %v1796_v55  ;;  %v359_v27 = vld [vmem:[%s1449_s29 + $0x58] sm:$0x7f]  ;;  %v1864_v5 = vld [vmem:[%s1449_s29 + $0x60] sm:$0xff] }
  0x44   : > { %v976_v3 = vmax.f32 %v948_v21, %v1718_v37  ;;  %v1815_v24 = vmax.f32 %v390_v33, %v1811_v39  ;;  %v578_v43 = vsel %vm434_vm0, %v576_v6, %v577_v31  ;;  %v642_v59 = vmax.f32 %v516_v13, %v577_v31  ;;  %v331_v33 = vld [vmem:[%s1435_s26 + $0x68] sm:$0x7f] }
  0x45   : > { %v975_v61 = vmax.f32 %v947_v35, %v1707_v23  ;;  %v1162_v60 = vmax.f32 %v1127_v53, %v757_v42  ;;  %v1128_v40 = vmax.f32 %v1100_v49, %v1758_v16  ;;  %v641_v12 = vmax.f32 %v1753_v1, %v578_v43  ;;  %v1831_v16 = vld [vmem:[%s1414_s23 + $0x70] sm:$0xff]  ;;  %v1879_v49 = vld [vmem:[%s1449_s29 + $0x68] sm:$0x7f] }
  0x46   : > { %v670_v54 = vmax.f32 %v642_v59, %v329_v57  ;;  %v758_v10 = vrot.slane %v328_v36, 1  ;;  %v759_v37 = vrot.slane %v329_v57, 1  ;;  %v884_v50 = vrot.slane %v1807_v48, 1 }
  0x47   : > { %v1003_v6 = vmax.f32 %v975_v61, %v1710_v25  ;;  %v1197_v8 = vmax.f32 %v1162_v60, %v883_v52  ;;  %v1163_v14 = vmax.f32 %v1128_v40, %v756_v63  ;;  %v669_v23 = vmax.f32 %v641_v12, %v328_v36  ;;  %v1885_v40 = vld [vmem:[%s1414_s23 + $0x78] sm:$0x7f] }
  0x48   : > { %v698_v1 = vmax.f32 %v670_v54, %v359_v27  ;;  %v760_v51 = vsel %vm434_vm0, %v758_v10, %v759_v37  ;;  %v1834_v56 = vrot.slane %v359_v27, 1  ;;  %v1004_v32 = vmax.f32 %v976_v3, %v1764_v4  ;;  %v1893_v54 = vld [vmem:[%s1409_s20 + $0x80] sm:$0xff] }
  0x49   : > { %v1038_v9 = vmax.f32 %v1003_v6, %v1744_v22  ;;  %1227 = vst.msk [vmem:[%s1674_s7 + $0x30] sm:$0xff] %vm1219_vm1, %v1197_v8  ;;  %v1198_v25 = vmax.f32 %v1163_v14, %v1771_v11  ;;  %v697_v63 = vmax.f32 %v669_v23, %v1807_v48  ;;  %v391_v58 = vmax.f32 %v1784_v2, %v1824_v7  ;;  %v1896_v10 = vld [vmem:[%s1414_s23 + $0x80] sm:$0xff]  ;;  %v1902_v8 = vld [vmem:[%s1409_s20 + $0x88] sm:$0x7f] }
  0x4a   : > { %v824_v19 = vmax.f32 %v698_v1, %v759_v37  ;;  %v886_v18 = vsel %vm434_vm0, %v884_v50, %v1834_v56  ;;  %v1039_v4 = vmax.f32 %v1004_v32, %v1735_v28  ;;  %v392_v22 = vmax.f32 %v1828_v15, %v1831_v16 }
  0x4b   : > { %1228 = vst.msk [vmem:[%s1674_s7 + $0x38] sm:$0x3f] %vm1221_vm2, %v1198_v25  ;;  %v823_v11 = vmax.f32 %v697_v63, %v760_v51  ;;  %v1073_v17 = vmax.f32 %v1038_v9, %v578_v43  ;;  %v456_v42 = vrot.slane %v1828_v15, 1  ;;  %v1856_v0 = vrot.slane %v1838_v34, 1  ;;  %v332_v9 = vld [vmem:[%s1435_s26 + $0x70] sm:$0xff] }
  0x4c   : > { %v950_v26 = vmax.f32 %v824_v19, %v1834_v56  ;;  %v1074_v52 = vmax.f32 %v1039_v4, %v577_v31  ;;  %v518_v29 = vmax.f32 %v391_v58, %v1796_v55  ;;  %v580_v28 = vrot.slane %v1824_v7, 1 }
  0x4d   : > { %v949_v30 = vmax.f32 %v823_v11, %v886_v18  ;;  %v1101_v44 = vmax.f32 %v1073_v17, %v328_v36  ;;  %v1868_v45 = vsel %vm434_vm0, %v456_v42, %v1856_v0  ;;  %v582_v47 = vrot.slane %v1831_v16, 1  ;;  %v1926_v42 = vld [vmem:[%s1449_s29 + $0x70] sm:$0xff] }
  0x4e   : > { %v978_v41 = vmax.f32 %v950_v26, %v1784_v2  ;;  %v1102_v21 = vmax.f32 %v1074_v52, %v329_v57  ;;  %v1873_v13 = vmax.f32 %v392_v22, %v1868_v45  ;;  %v581_v31 = vsel %vm434_vm0, %v579_v46, %v580_v28  ;;  %v333_v22 = vld [vmem:[%s1435_s26 + $0x78] sm:$0x7f] }
  0x4f   : > { %v977_v35 = vmax.f32 %v949_v30, %v1775_v62  ;;  %v1129_v53 = vmax.f32 %v1101_v44, %v1807_v48  ;;  %v643_v36 = vmax.f32 %v1815_v24, %v581_v31  ;;  %v644_v3 = vmax.f32 %v518_v29, %v580_v28 }
  0x50   : > { %v1130_v43 = vmax.f32 %v1102_v21, %v359_v27  ;;  %v761_v2 = vrot.slane %v330_v20, 1  ;;  %v762_v57 = vrot.slane %v331_v33, 1  ;;  %v887_v59 = vrot.slane %v1864_v5, 1 }
  0x51   : > { %v1005_v61 = vmax.f32 %v977_v35, %v1778_v38  ;;  %v1164_v46 = vmax.f32 %v1129_v53, %v760_v51  ;;  %v671_v60 = vmax.f32 %v643_v36, %v330_v20  ;;  %v672_v62 = vmax.f32 %v644_v3, %v331_v33  ;;  %v1950_v36 = vld [vmem:[%s1414_s23 + $0x88] sm:$0x7f] }
  0x52   : > { %v1165_v48 = vmax.f32 %v1130_v43, %v759_v37  ;;  %v763_v12 = vsel %vm434_vm0, %v761_v2, %v762_v57  ;;  %v1889_v24 = vrot.slane %v1879_v49, 1  ;;  %v1006_v27 = vmax.f32 %v978_v41, %v1824_v7  ;;  %v1958_v2 = vld [vmem:[%s1409_s20 + $0x90] sm:$0xff] }
  0x53   : > { %v1040_v38 = vmax.f32 %v1005_v61, %v1811_v39  ;;  %v1199_v50 = vmax.f32 %v1164_v46, %v886_v18  ;;  %v699_v6 = vmax.f32 %v671_v60, %v1864_v5  ;;  %v700_v37 = vmax.f32 %v672_v62, %v1879_v49 }
  0x54   : > { %v1200_v14 = vmax.f32 %v1165_v48, %v1834_v56  ;;  %v889_v7 = vsel %vm434_vm0, %v887_v59, %v1889_v24  ;;  %v1041_v23 = vmax.f32 %v1006_v27, %v1796_v55  ;;  %v393_v1 = vmax.f32 %v1838_v34, %v1885_v40 }
  0x55   : > { %1229 = vst.msk [vmem:[%s1674_s7 + $0x40] sm:$0xff] %vm1219_vm1, %v1199_v50  ;;  %v825_v39 = vmax.f32 %v699_v6, %v763_v12  ;;  %v826_v51 = vmax.f32 %v700_v37, %v762_v57  ;;  %v1075_v32 = vmax.f32 %v1040_v38, %v581_v31  ;;  %v394_v25 = vmax.f32 %v1893_v54, %v1896_v10  ;;  %v1979_v38 = vld [vmem:[%s1435_s26 + $0x80] sm:$0xff] }
  0x56   : > { %1230 = vst.msk [vmem:[%s1674_s7 + $0x48] sm:$0x3f] %vm1221_vm2, %v1200_v14  ;;  %v1076_v56 = vmax.f32 %v1041_v23, %v580_v28  ;;  %v459_v63 = vrot.slane %v1893_v54, 1  ;;  %v1919_v55 = vrot.slane %v1902_v8, 1  ;;  %v520_v58 = vmax.f32 %v393_v1, %v1856_v0  ;;  %v335_v1 = vld [vmem:[%s1435_s26 + $0x88] sm:$0x7f] }
  0x57   : > { %v951_v19 = vmax.f32 %v825_v39, %v889_v7  ;;  %v952_v18 = vmax.f32 %v826_v51, %v1889_v24  ;;  %v1103_v4 = vmax.f32 %v1075_v32, %v330_v20  ;;  %v583_v11 = vrot.slane %v1885_v40, 1  ;;  %v1937_v20 = vld [vmem:[%s1449_s29 + $0x78] sm:$0x7f] }
  0x58   : > { %v1104_v17 = vmax.f32 %v1076_v56, %v331_v33  ;;  %v1930_v26 = vsel %vm434_vm0, %v459_v63, %v1919_v55  ;;  %v585_v52 = vrot.slane %v1896_v10, 1  ;;  %v764_v29 = vrot.slane %v332_v9, 1 }
  0x59   : > { %v979_v28 = vmax.f32 %v951_v19, %v1828_v15  ;;  %v980_v30 = vmax.f32 %v952_v18, %v1838_v34  ;;  %v1131_v44 = vmax.f32 %v1103_v4, %v1864_v5  ;;  %v1940_v33 = vmax.f32 %v394_v25, %v1930_v26  ;;  %v2005_v18 = vld [vmem:[%s1449_s29 + $0x88] sm:$0x7f] }
  0x5a   : > { %v1132_v41 = vmax.f32 %v1104_v17, %v1879_v49  ;;  %v584_v21 = vsel %vm434_vm0, %v582_v47, %v583_v11  ;;  %v646_v31 = vmax.f32 %v520_v58, %v583_v11  ;;  %v1944_v35 = vrot.slane %v333_v22, 1 }
  0x5b   : > { %v1007_v15 = vmax.f32 %v979_v28, %v1831_v16  ;;  %v1166_v34 = vmax.f32 %v1131_v44, %v763_v12  ;;  %v645_v5 = vmax.f32 %v1873_v13, %v584_v21  ;;  %v890_v53 = vrot.slane %v1926_v42, 1  ;;  %v1961_v16 = vld [vmem:[%s1414_s23 + $0x90] sm:$0xff] }
  0x5c   : > { %v1167_v3 = vmax.f32 %v1132_v41, %v762_v57  ;;  %v674_v43 = vmax.f32 %v646_v31, %v333_v22  ;;  %v766_v49 = vsel %vm434_vm0, %v764_v29, %v1944_v35  ;;  %v1955_v47 = vrot.slane %v1937_v20, 1  ;;  %v1966_v57 = vld [vmem:[%s1409_s20 + $0x98] sm:$0x7f] }
  0x5d   : > { %v1042_v13 = vmax.f32 %v1007_v15, %v1868_v45  ;;  %v1201_v59 = vmax.f32 %v1166_v34, %v889_v7  ;;  %v673_v61 = vmax.f32 %v645_v5, %v332_v9  ;;  %v1008_v46 = vmax.f32 %v980_v30, %v1885_v40  ;;  %v2016_v41 = vld [vmem:[%s1414_s23 + $0x98] sm:$0x7f]  ;;  %v2025_v15 = vld [vmem:[%s1409_s20 + $0xa0] sm:$0xff] }
  0x5e   : > { %v1202_v60 = vmax.f32 %v1167_v3, %v1889_v24  ;;  %v702_v62 = vmax.f32 %v674_v43, %v1937_v20  ;;  %v892_v48 = vsel %vm434_vm0, %v890_v53, %v1955_v47  ;;  %v395_v12 = vmax.f32 %v1902_v8, %v1950_v36  ;;  %v2034_v53 = vld [vmem:[%s1409_s20 + $0xa8] sm:$0x7f] }
  0x5f   : > { %1231 = vst.msk [vmem:[%s1674_s7 + $0x50] sm:$0xff] %vm1219_vm1, %v1201_v59  ;;  %v701_v45 = vmax.f32 %v673_v61, %v1926_v42  ;;  %v1077_v27 = vmax.f32 %v1042_v13, %v584_v21  ;;  %v1043_v40 = vmax.f32 %v1008_v46, %v1856_v0  ;;  %v396_v24 = vmax.f32 %v1958_v2, %v1961_v16 }
  0x60   : > { %1232 = vst.msk [vmem:[%s1674_s7 + $0x58] sm:$0x3f] %vm1221_vm2, %v1202_v60  ;;  %v828_v50 = vmax.f32 %v702_v62, %v1944_v35  ;;  %v462_v6 = vrot.slane %v1958_v2, 1  ;;  %v1988_v37 = vrot.slane %v1966_v57, 1  ;;  %v522_v14 = vmax.f32 %v395_v12, %v1919_v55 }
  0x61   : > { %v827_v7 = vmax.f32 %v701_v45, %v766_v49  ;;  %v1105_v0 = vmax.f32 %v1077_v27, %v332_v9  ;;  %v1078_v23 = vmax.f32 %v1043_v40, %v583_v11  ;;  %v586_v39 = vrot.slane %v1950_v36, 1  ;;  %v2002_v9 = vld [vmem:[%s1449_s29 + $0x80] sm:$0xff]  ;;  %v337_v40 = vld [vmem:[%s1435_s26 + $0x98] sm:$0x7f] }
  0x62   : > { %v954_v51 = vmax.f32 %v828_v50, %v1955_v47  ;;  %v1996_v32 = vsel %vm434_vm0, %v462_v6, %v1988_v37  ;;  %v588_v25 = vrot.slane %v1961_v16, 1  ;;  %v767_v56 = vrot.slane %v1979_v38, 1 }
  0x63   : > { %v953_v63 = vmax.f32 %v827_v7, %v892_v48  ;;  %v1133_v58 = vmax.f32 %v1105_v0, %v1926_v42  ;;  %v1106_v19 = vmax.f32 %v1078_v23, %v333_v22  ;;  %v523_v4 = vmax.f32 %v396_v24, %v1996_v32  ;;  %v2071_v7 = vld [vmem:[%s1449_s29 + $0x90] sm:$0xff] }
  0x64   : > { %v982_v11 = vmax.f32 %v954_v51, %v1902_v8  ;;  %v587_v17 = vsel %vm434_vm0, %v585_v52, %v586_v39  ;;  %v648_v29 = vmax.f32 %v522_v14, %v586_v39  ;;  %v2010_v28 = vrot.slane %v335_v1, 1 }
  0x65   : > { %v981_v30 = vmax.f32 %v953_v63, %v1893_v54  ;;  %v1168_v42 = vmax.f32 %v1133_v58, %v766_v49  ;;  %v1134_v22 = vmax.f32 %v1106_v19, %v1937_v20  ;;  %v647_v44 = vmax.f32 %v1940_v33, %v587_v17  ;;  %v2028_v54 = vld [vmem:[%s1414_s23 + $0xa0] sm:$0xff] }
  0x66   : > { %v676_v21 = vmax.f32 %v648_v29, %v335_v1  ;;  %v769_v8 = vsel %vm434_vm0, %v767_v56, %v2010_v28  ;;  %v893_v52 = vrot.slane %v2002_v9, 1  ;;  %v2022_v31 = vrot.slane %v2005_v18, 1  ;;  %v2080_v56 = vld [vmem:[%s1449_s29 + $0x98] sm:$0x7f] }
  0x67   : > { %v1009_v20 = vmax.f32 %v981_v30, %v1896_v10  ;;  %v1203_v34 = vmax.f32 %v1168_v42, %v892_v48  ;;  %v1169_v33 = vmax.f32 %v1134_v22, %v1944_v35  ;;  %v675_v5 = vmax.f32 %v647_v44, %v1979_v38 }
  0x68   : > { %v704_v3 = vmax.f32 %v676_v21, %v2005_v18  ;;  %v895_v43 = vsel %vm434_vm0, %v893_v52, %v2022_v31  ;;  %v1010_v49 = vmax.f32 %v982_v11, %v1950_v36  ;;  %v397_v13 = vmax.f32 %v1966_v57, %v2016_v41  ;;  %v2100_v52 = vld [vmem:[%s1409_s20 + $0xb0] sm:$0xff] }
  0x69   : > { %v1044_v10 = vmax.f32 %v1009_v20, %v1930_v26  ;;  %1233 = vst.msk [vmem:[%s1674_s7 + $0x60] sm:$0xff] %vm1219_vm1, %v1203_v34  ;;  %v1204_v35 = vmax.f32 %v1169_v33, %v1955_v47  ;;  %v703_v59 = vmax.f32 %v675_v5, %v2002_v9  ;;  %v398_v61 = vmax.f32 %v2025_v15, %v2028_v54  ;;  %v2103_v20 = vld [vmem:[%s1409_s20 + $0xb8] sm:$0x7f] }
  0x6a   : > { %v830_v46 = vmax.f32 %v704_v3, %v2010_v28  ;;  %v1045_v36 = vmax.f32 %v1010_v49, %v1919_v55  ;;  %v465_v60 = vrot.slane %v2025_v15, 1  ;;  %v2053_v26 = vrot.slane %v2034_v53, 1  ;;  %v336_v55 = vld [vmem:[%s1435_s26 + $0x90] sm:$0xff] }
  0x6b   : > { %1234 = vst.msk [vmem:[%s1674_s7 + $0x68] sm:$0x3f] %vm1221_vm2, %v1204_v35  ;;  %v829_v62 = vmax.f32 %v703_v59, %v769_v8  ;;  %v1079_v48 = vmax.f32 %v1044_v10, %v587_v17  ;;  %v524_v47 = vmax.f32 %v397_v13, %v1988_v37  ;;  %v2059_v12 = vrot.slane %v2016_v41, 1  ;;  %v338_v59 = vld [vmem:[%s1435_s26 + $0xa0] sm:$0xff] }
  0x6c   : > { %v956_v45 = vmax.f32 %v830_v46, %v2022_v31  ;;  %v1080_v27 = vmax.f32 %v1045_v36, %v586_v39  ;;  %v2066_v24 = vsel %vm434_vm0, %v465_v60, %v2053_v26  ;;  %v591_v50 = vrot.slane %v2028_v54, 1  ;;  %v339_v36 = vld [vmem:[%s1435_s26 + $0xa8] sm:$0x7f] }
  0x6d   : > { %v955_v6 = vmax.f32 %v829_v62, %v895_v43  ;;  %v1107_v14 = vmax.f32 %v1079_v48, %v1979_v38  ;;  %v2074_v0 = vmax.f32 %v398_v61, %v2066_v24  ;;  %v590_v23 = vsel %vm434_vm0, %v588_v25, %v2059_v12 }
  0x6e   : > { %v984_v39 = vmax.f32 %v956_v45, %v1966_v57  ;;  %v1108_v51 = vmax.f32 %v1080_v27, %v335_v1  ;;  %v649_v63 = vmax.f32 %v523_v4, %v590_v23  ;;  %v650_v58 = vmax.f32 %v524_v47, %v2059_v12  ;;  %v2088_v1 = vld [vmem:[%s1414_s23 + $0xa8] sm:$0x7f] }
  0x6f   : > { %v983_v19 = vmax.f32 %v955_v6, %v1958_v2  ;;  %v1135_v38 = vmax.f32 %v1107_v14, %v2002_v9  ;;  %v770_v11 = vrot.slane %v336_v55, 1  ;;  %v771_v17 = vrot.slane %v337_v40, 1  ;;  %v2140_v6 = vld [vmem:[%s1449_s29 + $0xa8] sm:$0x7f] }
  0x70   : > { %v1136_v29 = vmax.f32 %v1108_v51, %v2005_v18  ;;  %v677_v25 = vmax.f32 %v649_v63, %v336_v55  ;;  %v678_v30 = vmax.f32 %v650_v58, %v337_v40  ;;  %v896_v57 = vrot.slane %v2071_v7, 1 }
  0x71   : > { %v1011_v4 = vmax.f32 %v983_v19, %v1961_v16  ;;  %v1170_v42 = vmax.f32 %v1135_v38, %v769_v8  ;;  %v772_v2 = vsel %vm434_vm0, %v770_v11, %v771_v17  ;;  %v2093_v9 = vrot.slane %v2080_v56, 1  ;;  %v2106_v16 = vld [vmem:[%s1414_s23 + $0xb0] sm:$0xff]  ;;  %v2156_v11 = vld [vmem:[%s1414_s23 + $0xb8] sm:$0x7f] }
  0x72   : > { %v1171_v22 = vmax.f32 %v1136_v29, %v2010_v28  ;;  %v705_v44 = vmax.f32 %v677_v25, %v2071_v7  ;;  %v706_v18 = vmax.f32 %v678_v30, %v2080_v56  ;;  %v1012_v21 = vmax.f32 %v984_v39, %v2016_v41 }
  0x73   : > { %v1046_v8 = vmax.f32 %v1011_v4, %v1996_v32  ;;  %v1205_v34 = vmax.f32 %v1170_v42, %v895_v43  ;;  %v898_v28 = vsel %vm434_vm0, %v896_v57, %v2093_v9  ;;  %v399_v33 = vmax.f32 %v2034_v53, %v2088_v1 }
  0x74   : > { %v1206_v5 = vmax.f32 %v1171_v22, %v2022_v31  ;;  %v831_v41 = vmax.f32 %v705_v44, %v772_v2  ;;  %v832_v3 = vmax.f32 %v706_v18, %v771_v17  ;;  %v1047_v49 = vmax.f32 %v1012_v21, %v1988_v37 }
  0x75   : > { %1235 = vst.msk [vmem:[%s1674_s7 + $0x70] sm:$0xff] %vm1219_vm1, %v1205_v34  ;;  %v1081_v13 = vmax.f32 %v1046_v8, %v590_v23  ;;  %v400_v32 = vmax.f32 %v2100_v52, %v2106_v16  ;;  %v468_v43 = vrot.slane %v2100_v52, 1  ;;  %v2121_v10 = vrot.slane %v2103_v20, 1  ;;  %v2180_v8 = vld [vmem:[%s1435_s26 + $0xb0] sm:$0xff] }
  0x76   : > { %1236 = vst.msk [vmem:[%s1674_s7 + $0x78] sm:$0x3f] %vm1221_vm2, %v1206_v5  ;;  %v957_v31 = vmax.f32 %v831_v41, %v898_v28  ;;  %v958_v35 = vmax.f32 %v832_v3, %v2093_v9  ;;  %v1082_v37 = vmax.f32 %v1047_v49, %v2059_v12  ;;  %v526_v61 = vmax.f32 %v399_v33, %v2053_v26  ;;  %v368_v12 = vld [vmem:[%s1449_s29 + $0xa0] sm:$0xff] }
  0x77   : > { %v1109_v46 = vmax.f32 %v1081_v13, %v336_v55  ;;  %v2132_v60 = vsel %vm434_vm0, %v468_v43, %v2121_v10  ;;  %v592_v62 = vrot.slane %v2088_v1, 1  ;;  %v594_v48 = vrot.slane %v2106_v16, 1  ;;  %v341_v43 = vld [vmem:[%s1435_s26 + $0xb8] sm:$0x7f] }
  0x78   : > { %v985_v47 = vmax.f32 %v957_v31, %v2025_v15  ;;  %v986_v45 = vmax.f32 %v958_v35, %v2034_v53  ;;  %v1110_v27 = vmax.f32 %v1082_v37, %v337_v40  ;;  %v2143_v55 = vmax.f32 %v400_v32, %v2132_v60  ;;  %v2196_v31 = vld [vmem:[%s1449_s29 + $0xb0] sm:$0xff]  ;;  %v2199_v35 = vld [vmem:[%s1449_s29 + $0xb8] sm:$0x7f] }
  0x79   : > { %v1137_v14 = vmax.f32 %v1109_v46, %v2071_v7  ;;  %v593_v23 = vsel %vm434_vm0, %v591_v50, %v592_v62  ;;  %v652_v39 = vmax.f32 %v526_v61, %v592_v62  ;;  %v773_v15 = vrot.slane %v338_v59, 1 }
  0x7a   : > { %v1013_v53 = vmax.f32 %v985_v47, %v2028_v54  ;;  %v1138_v40 = vmax.f32 %v1110_v27, %v2080_v56  ;;  %v651_v51 = vmax.f32 %v2074_v0, %v593_v23  ;;  %v774_v63 = vrot.slane %v339_v36, 1  ;;  %v2161_v56 = vld [vmem:[%s1409_s20 + $0xc0] sm:$0xff] }
  0x7b   : > { %v1172_v58 = vmax.f32 %v1137_v14, %v772_v2  ;;  %v680_v19 = vmax.f32 %v652_v39, %v339_v36  ;;  %v899_v38 = vrot.slane %v368_v12, 1  ;;  %v2153_v7 = vrot.slane %v2140_v6, 1  ;;  %v2164_v0 = vld [vmem:[%s1414_s23 + $0xc0] sm:$0xff]  ;;  %v2171_v2 = vld [vmem:[%s1409_s20 + $0xc8] sm:$0x7f] }
  0x7c   : > { %v1048_v50 = vmax.f32 %v1013_v53, %v2066_v24  ;;  %v1173_v29 = vmax.f32 %v1138_v40, %v771_v17  ;;  %v679_v25 = vmax.f32 %v651_v51, %v338_v59  ;;  %v775_v54 = vsel %vm434_vm0, %v773_v15, %v774_v63  ;;  %v2219_v15 = vld [vmem:[%s1414_s23 + $0xc8] sm:$0x7f]  ;;  %v2227_v51 = vld [vmem:[%s1414_s23 + $0xd0] sm:$0xff] }
  0x7d   : > { %v1207_v30 = vmax.f32 %v1172_v58, %v898_v28  ;;  %v708_v57 = vmax.f32 %v680_v19, %v2140_v6  ;;  %v901_v4 = vsel %vm434_vm0, %v899_v38, %v2153_v7  ;;  %v1014_v42 = vmax.f32 %v986_v45, %v2088_v1 }
  0x7e   : > { %v1208_v24 = vmax.f32 %v1173_v29, %v2093_v9  ;;  %v707_v17 = vmax.f32 %v679_v25, %v368_v12  ;;  %v1083_v22 = vmax.f32 %v1048_v50, %v593_v23  ;;  %v401_v44 = vmax.f32 %v2103_v20, %v2156_v11  ;;  %v2234_v50 = vld [vmem:[%s1409_s20 + $0xd8] sm:$0x7f] }
  0x7f   : > { %1237 = vst.msk [vmem:[%s1674_s7 + $0x80] sm:$0xff] %vm1219_vm1, %v1207_v30  ;;  %v834_v18 = vmax.f32 %v708_v57, %v774_v63  ;;  %v1049_v21 = vmax.f32 %v1014_v42, %v2053_v26  ;;  %v402_v1 = vmax.f32 %v2161_v56, %v2164_v0  ;;  %v471_v9 = vrot.slane %v2161_v56, 1 }
  0x80   : > { %1238 = vst.msk [vmem:[%s1674_s7 + $0x88] sm:$0x3f] %vm1221_vm2, %v1208_v24  ;;  %v833_v34 = vmax.f32 %v707_v17, %v775_v54  ;;  %v1111_v28 = vmax.f32 %v1083_v22, %v338_v59  ;;  %v2188_v33 = vrot.slane %v2171_v2, 1  ;;  %v528_v5 = vmax.f32 %v401_v44, %v2121_v10 }
  0x81   : > { %v960_v26 = vmax.f32 %v834_v18, %v2153_v7  ;;  %v1084_v41 = vmax.f32 %v1049_v21, %v592_v62  ;;  %v595_v3 = vrot.slane %v2156_v11, 1  ;;  %v597_v49 = vrot.slane %v2164_v0, 1 }
  0x82   : > { %v959_v13 = vmax.f32 %v833_v34, %v901_v4  ;;  %v1139_v32 = vmax.f32 %v1111_v28, %v368_v12  ;;  %v2203_v37 = vsel %vm434_vm0, %v471_v9, %v2188_v33  ;;  %v776_v59 = vrot.slane %v2180_v8, 1  ;;  %v343_v9 = vld [vmem:[%s1435_s26 + $0xc8] sm:$0x7f] }
  0x83   : > { %v988_v61 = vmax.f32 %v960_v26, %v2103_v20  ;;  %v1112_v46 = vmax.f32 %v1084_v41, %v339_v36  ;;  %v2208_v62 = vmax.f32 %v402_v1, %v2203_v37  ;;  %v596_v47 = vsel %vm434_vm0, %v594_v48, %v595_v3  ;;  %v342_v1 = vld [vmem:[%s1435_s26 + $0xc0] sm:$0xff] }
  0x84   : > { %v987_v45 = vmax.f32 %v959_v13, %v2100_v52  ;;  %v1174_v27 = vmax.f32 %v1139_v32, %v775_v54  ;;  %v653_v12 = vmax.f32 %v2143_v55, %v596_v47  ;;  %v654_v14 = vmax.f32 %v528_v5, %v595_v3  ;;  %v2224_v55 = vld [vmem:[%s1409_s20 + $0xd0] sm:$0xff]  ;;  %v372_v5 = vld [vmem:[%s1449_s29 + $0xc0] sm:$0xff] }
  0x85   : > { %v1140_v23 = vmax.f32 %v1112_v46, %v2140_v6  ;;  %v777_v39 = vrot.slane %v341_v43, 1  ;;  %v902_v20 = vrot.slane %v2196_v31, 1  ;;  %v2216_v36 = vrot.slane %v2199_v35, 1 }
  0x86   : > { %v1015_v48 = vmax.f32 %v987_v45, %v2106_v16  ;;  %v1209_v53 = vmax.f32 %v1174_v27, %v901_v4  ;;  %v681_v52 = vmax.f32 %v653_v12, %v2180_v8  ;;  %v682_v40 = vmax.f32 %v654_v14, %v341_v43 }
  0x87   : > { %v1175_v6 = vmax.f32 %v1140_v23, %v774_v63  ;;  %v778_v58 = vsel %vm434_vm0, %v776_v59, %v777_v39  ;;  %v904_v19 = vsel %vm434_vm0, %v902_v20, %v2216_v36  ;;  %v1016_v38 = vmax.f32 %v988_v61, %v2156_v11  ;;  %v373_v59 = vld [vmem:[%s1449_s29 + $0xc8] sm:$0x7f] }
  0x88   : > { %v1050_v16 = vmax.f32 %v1015_v48, %v2132_v60  ;;  %1239 = vst.msk [vmem:[%s1674_s7 + $0x90] sm:$0xff] %vm1219_vm1, %v1209_v53  ;;  %v709_v29 = vmax.f32 %v681_v52, %v2196_v31  ;;  %v710_v25 = vmax.f32 %v682_v40, %v2199_v35  ;;  %v403_v63 = vmax.f32 %v2171_v2, %v2219_v15  ;;  %v344_v53 = vld [vmem:[%s1435_s26 + $0xd0] sm:$0xff]  ;;  %v2288_v52 = vld [vmem:[%s1435_s26 + $0xd8] sm:$0x7f] }
  0x89   : > { %v1210_v54 = vmax.f32 %v1175_v6, %v2153_v7  ;;  %v1051_v30 = vmax.f32 %v1016_v38, %v2121_v10  ;;  %v404_v11 = vmax.f32 %v2224_v55, %v2227_v51  ;;  %v474_v60 = vrot.slane %v2224_v55, 1 }
  0x8a   : > { %v835_v57 = vmax.f32 %v709_v29, %v778_v58  ;;  %v836_v4 = vmax.f32 %v710_v25, %v777_v39  ;;  %v1085_v42 = vmax.f32 %v1050_v16, %v596_v47  ;;  %v2249_v24 = vrot.slane %v2234_v50, 1  ;;  %v374_v16 = vld [vmem:[%s1449_s29 + $0xd0] sm:$0xff] }
  0x8b   : > { %1240 = vst.msk [vmem:[%s1674_s7 + $0x98] sm:$0x3f] %vm1221_vm2, %v1210_v54  ;;  %v1086_v17 = vmax.f32 %v1051_v30, %v595_v3  ;;  %v530_v7 = vmax.f32 %v403_v63, %v2188_v33  ;;  %v2255_v10 = vrot.slane %v2219_v15, 1  ;;  %v600_v22 = vrot.slane %v2227_v51, 1 }
  0x8c   : > { %v961_v44 = vmax.f32 %v835_v57, %v904_v19  ;;  %v962_v18 = vmax.f32 %v836_v4, %v2216_v36  ;;  %v1113_v21 = vmax.f32 %v1085_v42, %v2180_v8  ;;  %v2264_v34 = vsel %vm434_vm0, %v474_v60, %v2249_v24  ;;  %v375_v60 = vld [vmem:[%s1449_s29 + $0xd8] sm:$0x7f] }
  0x8d   : > { %v1114_v28 = vmax.f32 %v1086_v17, %v341_v43  ;;  %v531_v26 = vmax.f32 %v404_v11, %v2264_v34  ;;  %v599_v41 = vsel %vm434_vm0, %v597_v49, %v2255_v10  ;;  %v656_v3 = vmax.f32 %v530_v7, %v2255_v10 }
  0x8e   : > { %v989_v13 = vmax.f32 %v961_v44, %v2161_v56  ;;  %v990_v8 = vmax.f32 %v962_v18, %v2171_v2  ;;  %v1141_v32 = vmax.f32 %v1113_v21, %v2196_v31  ;;  %v655_v61 = vmax.f32 %v2208_v62, %v599_v41  ;;  %v2279_v56 = vld [vmem:[%s1414_s23 + $0xd8] sm:$0x7f] }
  0x8f   : > { %v1142_v43 = vmax.f32 %v1114_v28, %v2199_v35  ;;  %v684_v46 = vmax.f32 %v656_v3, %v343_v9  ;;  %v779_v47 = vrot.slane %v342_v1, 1  ;;  %v780_v45 = vrot.slane %v343_v9, 1  ;;  %v287_v3 = vld [vmem:[%s1409_s20 + $0xe8] sm:$0x7f] }
  0x90   : > { %v1017_v49 = vmax.f32 %v989_v13, %v2164_v0  ;;  %v1176_v27 = vmax.f32 %v1141_v32, %v778_v58  ;;  %v683_v12 = vmax.f32 %v655_v61, %v342_v1  ;;  %v905_v14 = vrot.slane %v372_v5, 1  ;;  %v316_v61 = vld [vmem:[%s1414_s23 + $0xe0] sm:$0xff] }
  0x91   : > { %v1177_v2 = vmax.f32 %v1142_v43, %v777_v39  ;;  %v712_v31 = vmax.f32 %v684_v46, %v373_v59  ;;  %v781_v23 = vsel %vm434_vm0, %v779_v47, %v780_v45  ;;  %v2282_v62 = vrot.slane %v373_v59, 1  ;;  %v317_v46 = vld [vmem:[%s1414_s23 + $0xe8] sm:$0x7f] }
  0x92   : > { %v1052_v35 = vmax.f32 %v1017_v49, %v2203_v37  ;;  %v1211_v20 = vmax.f32 %v1176_v27, %v904_v19  ;;  %v711_v48 = vmax.f32 %v683_v12, %v372_v5  ;;  %v1018_v0 = vmax.f32 %v990_v8, %v2219_v15 }
  0x93   : > { %v1212_v40 = vmax.f32 %v1177_v2, %v2216_v36  ;;  %v838_v6 = vmax.f32 %v712_v31, %v780_v45  ;;  %v907_v39 = vsel %vm434_vm0, %v905_v14, %v2282_v62  ;;  %v405_v58 = vmax.f32 %v2234_v50, %v2279_v56 }
  0x94   : > { %1241 = vst.msk [vmem:[%s1674_s7 + $0xa0] sm:$0xff] %vm1219_vm1, %v1211_v20  ;;  %v837_v37 = vmax.f32 %v711_v48, %v781_v23  ;;  %v1087_v19 = vmax.f32 %v1052_v35, %v599_v41  ;;  %v1053_v38 = vmax.f32 %v1018_v0, %v2188_v33  ;;  %v601_v15 = vrot.slane %v2279_v56, 1 }
  0x95   : > { %1242 = vst.msk [vmem:[%s1674_s7 + $0xa8] sm:$0x3f] %vm1221_vm2, %v1212_v40  ;;  %v964_v36 = vmax.f32 %v838_v6, %v2282_v62  ;;  %v532_v29 = vmax.f32 %v405_v58, %v2249_v24  ;;  %v782_v25 = vrot.slane %v344_v53, 1  ;;  %v2305_v63 = vrot.slane %v2288_v52, 1  ;;  %v346_v6 = vld [vmem:[%s1435_s26 + $0xe0] sm:$0xff] }
  0x96   : > { %v963_v54 = vmax.f32 %v837_v37, %v907_v39  ;;  %v1115_v30 = vmax.f32 %v1087_v19, %v342_v1  ;;  %v1088_v11 = vmax.f32 %v1053_v38, %v2255_v10  ;;  %v602_v33 = vsel %vm434_vm0, %v600_v22, %v601_v15  ;;  %v376_v38 = vld [vmem:[%s1449_s29 + $0xe0] sm:$0xff] }
  0x97   : > { %v992_v57 = vmax.f32 %v964_v36, %v2234_v50  ;;  %v657_v4 = vmax.f32 %v531_v26, %v602_v33  ;;  %v658_v42 = vmax.f32 %v532_v29, %v601_v15  ;;  %v908_v18 = vrot.slane %v374_v16, 1  ;;  %v286_v26 = vld [vmem:[%s1409_s20 + $0xe0] sm:$0xff]  ;;  %v377_v36 = vld [vmem:[%s1449_s29 + $0xe8] sm:$0x7f] }
  0x98   : > { %v991_v17 = vmax.f32 %v963_v54, %v2224_v55  ;;  %v1143_v7 = vmax.f32 %v1115_v30, %v372_v5  ;;  %v1116_v44 = vmax.f32 %v1088_v11, %v343_v9  ;;  %v909_v28 = vrot.slane %v375_v60, 1 }
  0x99   : > { %v685_v21 = vmax.f32 %v657_v4, %v344_v53  ;;  %v686_v1 = vmax.f32 %v658_v42, %v2288_v52  ;;  %v784_v50 = vsel %vm434_vm0, %v782_v25, %v2305_v63  ;;  %v1025_v49 = vrot.slane %v286_v26, 1 }
  0x9a   : > { %v1019_v10 = vmax.f32 %v991_v17, %v2227_v51  ;;  %v1178_v41 = vmax.f32 %v1143_v7, %v781_v23  ;;  %v1144_v22 = vmax.f32 %v1116_v44, %v373_v59  ;;  %v910_v32 = vsel %vm434_vm0, %v908_v18, %v909_v28 }
  0x9b   : > { %v713_v55 = vmax.f32 %v685_v21, %v374_v16  ;;  %v714_v5 = vmax.f32 %v686_v1, %v375_v60  ;;  %v1020_v59 = vmax.f32 %v992_v57, %v2279_v56  ;;  %v1026_v27 = vrot.slane %v287_v3, 1 }
  0x9c   : > { %v1054_v9 = vmax.f32 %v1019_v10, %v2264_v34  ;;  %v1213_v13 = vmax.f32 %v1178_v41, %v907_v39  ;;  %v1179_v8 = vmax.f32 %v1144_v22, %v780_v45  ;;  %v1060_v2 = vrot.slane %v316_v61, 1  ;;  %v347_v39 = vld [vmem:[%s1435_s26 + $0xe8] sm:$0x7f] }
  0x9d   : > { %v839_v51 = vmax.f32 %v713_v55, %v784_v50  ;;  %v840_v43 = vmax.f32 %v714_v5, %v2305_v63  ;;  %v1055_v14 = vmax.f32 %v1020_v59, %v2249_v24  ;;  %v1061_v56 = vrot.slane %v317_v46, 1 }
  0x9e   : > { %1243 = vst.msk [vmem:[%s1674_s7 + $0xb0] sm:$0xff] %vm1219_vm1, %v1213_v13  ;;  %v1214_v47 = vmax.f32 %v1179_v8, %v2282_v62  ;;  %v1089_v34 = vmax.f32 %v1054_v9, %v602_v33  ;;  %v1027_v62 = vsel %vm434_vm0, %v1025_v49, %v1026_v27  ;;  %v1151_v25 = vrot.slane %v346_v6, 1 }
  0x9f   : > { %v965_v12 = vmax.f32 %v839_v51, %v910_v32  ;;  %v966_v45 = vmax.f32 %v840_v43, %v909_v28  ;;  %v1090_v20 = vmax.f32 %v1055_v14, %v601_v15  ;;  %v1062_v37 = vsel %vm434_vm0, %v1060_v2, %v1061_v56 }
  0xa0   : > { %1244 = vst.msk [vmem:[%s1674_s7 + $0xb8] sm:$0x3f] %vm1221_vm2, %v1214_v47  ;;  %v1117_v31 = vmax.f32 %v1089_v34, %v344_v53  ;;  %v1152_v54 = vrot.slane %v347_v39, 1  ;;  %v1186_v11 = vrot.slane %v376_v38, 1  ;;  %v1187_v33 = vrot.slane %v377_v36, 1 }
  0xa1   : > { %v993_v23 = vmax.f32 %v965_v12, %v286_v26  ;;  %v994_v35 = vmax.f32 %v966_v45, %v287_v3  ;;  %v1118_v40 = vmax.f32 %v1090_v20, %v2288_v52 }
  0xa2   : > { %v1145_v48 = vmax.f32 %v1117_v31, %v374_v16  ;;  %v1153_v42 = vsel %vm434_vm0, %v1151_v25, %v1152_v54  ;;  %v1188_v44 = vsel %vm434_vm0, %v1186_v11, %v1187_v33 }
  0xa3   : > { %v1021_v0 = vmax.f32 %v993_v23, %v316_v61  ;;  %v1022_v24 = vmax.f32 %v994_v35, %v317_v46  ;;  %v1146_v19 = vmax.f32 %v1118_v40, %v375_v60 }
  0xa4   : > { %v1180_v58 = vmax.f32 %v1145_v48, %v784_v50 }
  0xa5   : > { %v1056_v53 = vmax.f32 %v1021_v0, %v1027_v62  ;;  %v1057_v29 = vmax.f32 %v1022_v24, %v1026_v27  ;;  %v1181_v16 = vmax.f32 %v1146_v19, %v2305_v63 }
  0xa6   : > { %v1215_v15 = vmax.f32 %v1180_v58, %v910_v32 }
  0xa7   : > { %v1091_v30 = vmax.f32 %v1056_v53, %v1062_v37  ;;  %v1092_v52 = vmax.f32 %v1057_v29, %v1061_v56  ;;  %v1216_v57 = vmax.f32 %v1181_v16, %v909_v28 }
  0xa8   : > { %1245 = vst.msk [vmem:[%s1674_s7 + $0xc0] sm:$0xff] %vm1219_vm1, %v1215_v15 }
  0xa9   : > { %v1119_v4 = vmax.f32 %v1091_v30, %v346_v6  ;;  %v1120_v60 = vmax.f32 %v1092_v52, %v347_v39  ;;  %1246 = vst.msk [vmem:[%s1674_s7 + $0xc8] sm:$0x3f] %vm1221_vm2, %v1216_v57 }
  0xab   : > { %v1147_v17 = vmax.f32 %v1119_v4, %v376_v38  ;;  %v1148_v7 = vmax.f32 %v1120_v60, %v377_v36 }
  0xad   : > { %v1182_v63 = vmax.f32 %v1147_v17, %v1153_v42  ;;  %v1183_v18 = vmax.f32 %v1148_v7, %v1152_v54 }
  0xaf   : > { %v1217_v21 = vmax.f32 %v1182_v63, %v1188_v44  ;;  %v1218_v1 = vmax.f32 %v1183_v18, %v1187_v33 }
  0xb1   : > { %1247 = vst.msk [vmem:[%s1674_s7 + $0xd0] sm:$0xff] %vm1219_vm1, %v1217_v21 }
  0xb2   : > { %1248 = vst.msk [vmem:[%s1674_s7 + $0xd8] sm:$0x3f] %vm1221_vm2, %v1218_v1 }
  0xb3 PF: > { %s14_s15 = sadd.s32 1, %s1368_s15  }
  0xb4   : > { %p11_p4 = scmp.ge.s32.totalorder %s14_s15, 4  }
  0xb6   :  { %13 = sbr.rel (!%p11_p4) target bundleno = 1 (0x1), region = 75 }

// kernel: dqn_forward.5
= control target key start
LH: loop header
LB: loop body
LE: loop exit
PB: predicated region body
PF: predicated region fallthrough
CT: control target
= control target key end

     0   :  { %v124_v28 = vlaneseq  ;;  %v9772_v35 = vmov 1966171168   ;;  %s12853_s0 = inlined_call_operand.vmem [shape: bf16[36,2,512], index: 0, kind: input, shape index: {}]   ;;  %s12854_s1 = inlined_call_operand.vmem [shape: bf16[512,64], index: 1, kind: input, shape index: {}]   ;;  %s12855_s2 = inlined_call_operand.vmem [shape: f32[1,64], index: 2, kind: input, shape index: {}]   ;;  %s12856_s3 = inlined_call_operand.vmem [shape: bf16[4,64,128], index: 3, kind: input, shape index: {}]   ;;  %s12857_s4 = inlined_call_operand.vmem [shape: f32[1,128], index: 4, kind: input, shape index: {}]   ;;  %s12858_s5 = inlined_call_operand.vmem [shape: bf16[4,128,256], index: 5, kind: input, shape index: {}]   ;;  %s12859_s6 = inlined_call_operand.vmem [shape: f32[1,256], index: 6, kind: input, shape index: {}]   ;;  %s12860_s7 = inlined_call_operand.vmem [shape: bf16[256,10], index: 7, kind: input, shape index: {}]   ;;  %s12861_s8 = inlined_call_operand.vmem [shape: f32[1,10], index: 8, kind: input, shape index: {}]   ;;  %s12862_s9 = inlined_call_operand.vmem [shape: bf16[10,6], index: 9, kind: input, shape index: {}]   ;;  %s12863_s10 = inlined_call_operand.vmem [shape: f32[1,6], index: 10, kind: input, shape index: {}]   ;;  %s12864_s11 = inlined_call_operand.hbm [shape: f32[2,6], index: 11, kind: output, shape index: {}]  }
   0x1   :  { %v9840_v0 = vld [vmem:[%s12854_s1 + $0x78] sm:$0xff]   ;;  %v9863_v4 = vld [vmem:[%s12854_s1 + $0x70] sm:$0xff]   ;;  %v9887_v8 = vld [vmem:[%s12854_s1 + $0x68] sm:$0xff]   ;;  %v122_v36 = vunpack.c.l.s4 %v9772_v35 }
   0x2   :  { %v9845_v1 = vld [vmem:[%s12854_s1 + $0xf8] sm:$0xff]   ;;  %7248 = vmatprep.subr.bf16.mxu0 %v9840_v0  ;;  %v9869_v5 = vld [vmem:[%s12854_s1 + $0xf0] sm:$0xff]   ;;  %v9893_v9 = vld [vmem:[%s12854_s1 + $0xe8] sm:$0xff]   ;;  %v10027_v33 = vshrl.u32 %v124_v28, 7 }
   0x3   :  { %v9851_v2 = vld [vmem:[%s12854_s1 + $0x38] sm:$0xff]   ;;  %7270 = vmatprep.subr.bf16.mxu1 %v9845_v1  ;;  %v9875_v6 = vld [vmem:[%s12854_s1 + $0x30] sm:$0xff]   ;;  %v9899_v10 = vld [vmem:[%s12854_s1 + $0x28] sm:$0xff]   ;;  %v123_v39 = vunpack.c.0.s8 %v122_v36 }
   0x4   :  { %v9857_v3 = vld [vmem:[%s12854_s1 + $0xb8] sm:$0xff]   ;;  %7249 = vmatpush3.bf16.msra.mxu0 %v9851_v2  ;;  %v9881_v7 = vld [vmem:[%s12854_s1 + $0xb0] sm:$0xff]   ;;  %v9905_v11 = vld [vmem:[%s12854_s1 + $0xa8] sm:$0xff]   ;;  %12867 = vst [vmem:[#allocation5_spill] sm:$0xff] %v10027_v33 }
   0x5   :  { %7271 = vmatpush3.bf16.msra.mxu1 %v9857_v3  ;;  %7250 = vmatprep.subr.bf16.mxu0 %v9863_v4  ;;  %v9911_v12 = vld [vmem:[%s12854_s1 + $0x60] sm:$0xff]   ;;  %v9935_v16 = vld [vmem:[%s12854_s1 + $0x58] sm:$0xff]   ;;  %v9959_v20 = vld [vmem:[%s12854_s1 + $0x50] sm:$0xff]   ;;  %v10040_v41 = vsub.s32 %v123_v39, %v10027_v33 }
   0x6   :  { %7272 = vmatprep.subr.bf16.mxu1 %v9869_v5  ;;  %v9917_v13 = vld [vmem:[%s12854_s1 + $0xe0] sm:$0xff]   ;;  %v9941_v17 = vld [vmem:[%s12854_s1 + $0xd8] sm:$0xff]   ;;  %v9965_v21 = vld [vmem:[%s12854_s1 + $0xd0] sm:$0xff]  }
   0x7   :  { %v9923_v14 = vld [vmem:[%s12854_s1 + $0x20] sm:$0xff]   ;;  %v9947_v18 = vld [vmem:[%s12854_s1 + $0x18] sm:$0xff]   ;;  %v9971_v22 = vld [vmem:[%s12854_s1 + $0x10] sm:$0xff]  }
   0x8   :  { %7251 = vmatpush3.bf16.msra.mxu0 %v9875_v6  ;;  %v9929_v15 = vld [vmem:[%s12854_s1 + $0xa0] sm:$0xff]   ;;  %v9953_v19 = vld [vmem:[%s12854_s1 + $0x98] sm:$0xff]   ;;  %v9977_v23 = vld [vmem:[%s12854_s1 + $0x90] sm:$0xff]  }
   0x9   :  { %7273 = vmatpush3.bf16.msra.mxu1 %v9881_v7  ;;  %7252 = vmatprep.subr.bf16.mxu0 %v9887_v8  ;;  %v9983_v24 = vld [vmem:[%s12854_s1 + $0x48] sm:$0xff]   ;;  %v10007_v29 = vld [vmem:[%s12854_s1 + $0x40] sm:$0xff]  }
   0xa   :  { %7274 = vmatprep.subr.bf16.mxu1 %v9893_v9  ;;  %v9989_v25 = vld [vmem:[%s12854_s1 + $0xc8] sm:$0xff]   ;;  %v10013_v30 = vld [vmem:[%s12854_s1 + $0xc0] sm:$0xff]  }
   0xb   :  { %v9995_v26 = vld [vmem:[%s12854_s1 + $0x8] sm:$0xff]   ;;  %v10019_v31 = vld [vmem:[%s12854_s1] sm:$0xff]  }
   0xc   :  { %7253 = vmatpush3.bf16.msra.mxu0 %v9899_v10  ;;  %v10001_v27 = vld [vmem:[%s12854_s1 + $0x88] sm:$0xff]   ;;  %v10025_v32 = vld [vmem:[%s12854_s1 + $0x80] sm:$0xff]  }
   0xd   :  { %7275 = vmatpush3.bf16.msra.mxu1 %v9905_v11  ;;  %7254 = vmatprep.subr.bf16.mxu0 %v9911_v12  ;;  %v6936_v34 = vld.sshfl [vmem:[%s12853_s0] sm:$0x33 pattern:$0x75316420] }
   0xe   :  { %7276 = vmatprep.subr.bf16.mxu1 %v9917_v13  ;;  %v6970_v37 = vld.sshfl [vmem:[%s12853_s0 + $0x4] sm:$0x33 pattern:$0x75316420]  ;;  %v120_v38 = vcombine.high %v6936_v34, %v6936_v34  ;;  %v127_v43 = vrot.slane %v6936_v34, %v10040_v41 }
   0xf   :  { %v425_v40 = vcombine.high %v6970_v37, %v6970_v37  ;;  %v6972_v48 = vld.sshfl [vmem:[%s12853_s0 + $0x8] sm:$0x33 pattern:$0x75316420]  ;;  %v432_v50 = vrot.slane %v6970_v37, %v10040_v41 }
  0x10   :  { %7255 = vmatpush3.bf16.msra.mxu0 %v9923_v14  ;;  %v134_v42 = vrot.slane %v120_v38, %v10040_v41  ;;  %v135_v46 = vcombine.high %v127_v43, %v127_v43  ;;  %v538_v49 = vcombine.high %v6972_v48, %v6972_v48 }
  0x11   :  { %7277 = vmatpush3.bf16.msra.mxu1 %v9929_v15  ;;  %7256 = vmatprep.subr.bf16.mxu0 %v9935_v16  ;;  %v439_v44 = vrot.slane %v425_v40, %v10040_v41  ;;  %v440_v52 = vcombine.high %v432_v50, %v432_v50 }
  0x12   :  { %7278 = vmatprep.subr.bf16.mxu1 %v9941_v17  ;;  %365 = vmatprep.mubr.bf16.mxu0 %v134_v42  ;;  %v136_v45 = vcombine.high %v134_v42, %v134_v42  ;;  %v552_v51 = vrot.slane %v538_v49, %v10040_v41 }
  0x13   :  { %v441_v47 = vcombine.high %v439_v44, %v439_v44 }
  0x14   :  { %7257 = vmatpush3.bf16.msra.mxu0 %v9947_v18  ;;  %405 = vmatprep.mubr.bf16.mxu1 %v136_v45  ;;  %v554_v53 = vcombine.high %v552_v51, %v552_v51 }
  0x15   :  { %7279 = vmatpush3.bf16.msra.mxu1 %v9953_v19  ;;  %7258 = vmatprep.subr.bf16.mxu0 %v9959_v20 }
  0x16   :  { %7280 = vmatprep.subr.bf16.mxu1 %v9965_v21 }
  0x18   :  { %7259 = vmatpush3.bf16.msra.mxu0 %v9971_v22 }
  0x19   :  { %7281 = vmatpush3.bf16.msra.mxu1 %v9977_v23  ;;  %7260 = vmatprep.subr.bf16.mxu0 %v9983_v24 }
  0x1a   :  { %7282 = vmatprep.subr.bf16.mxu1 %v9989_v25 }
  0x1c   :  { %7261 = vmatpush3.bf16.msra.mxu0 %v9995_v26 }
  0x1d   :  { %7283 = vmatpush3.bf16.msra.mxu1 %v10001_v27  ;;  %7262 = vmatprep.subr.bf16.mxu0 %v10007_v29 }
  0x1e   :  { %7284 = vmatprep.subr.bf16.mxu1 %v10013_v30 }
  0x20   :  { %7263 = vmatpush3.bf16.msra.mxu0 %v10019_v31 }
  0x21   :  { %7285 = vmatpush3.bf16.msra.mxu1 %v10025_v32  ;;  %7292 = vmatprep.subr.bf16.mxu0 %v9840_v0 }
  0x22   :  { %7314 = vmatprep.subr.bf16.mxu1 %v9845_v1 }
  0x23   :  { %366 = vmatmul.mubr.bf16.vlgmr.msra.gmra.mxu0 %v127_v43 }
  0x24   :  { %7293 = vmatpush3.bf16.msra.mxu0 %v9851_v2  ;;  %406 = vmatmul.mubr.bf16.vlgmr.msra.gmra.mxu1 %v135_v46 }
  0x25   :  { %7294 = vmatprep.subr.bf16.mxu0 %v9863_v4  ;;  %7315 = vmatpush3.bf16.msra.mxu1 %v9857_v3 }
  0x26   :  { %478 = vmatprep.mubr.bf16.mxu0 %v439_v44  ;;  %7316 = vmatprep.subr.bf16.mxu1 %v9869_v5 }
  0x27   :  { %518 = vmatprep.mubr.bf16.mxu1 %v441_v47 }
  0x28   :  { %7295 = vmatpush3.bf16.msra.mxu0 %v9875_v6 }
  0x29   :  { %7296 = vmatprep.subr.bf16.mxu0 %v9887_v8  ;;  %7317 = vmatpush3.bf16.msra.mxu1 %v9881_v7 }
  0x2a   :  { %7318 = vmatprep.subr.bf16.mxu1 %v9893_v9 }
  0x2c   :  { %7297 = vmatpush3.bf16.msra.mxu0 %v9899_v10 }
  0x2d   :  { %7298 = vmatprep.subr.bf16.mxu0 %v9911_v12  ;;  %7319 = vmatpush3.bf16.msra.mxu1 %v9905_v11 }
  0x2e   :  { %7320 = vmatprep.subr.bf16.mxu1 %v9917_v13 }
  0x30   :  { %7299 = vmatpush3.bf16.msra.mxu0 %v9923_v14 }
  0x31   :  { %7300 = vmatprep.subr.bf16.mxu0 %v9935_v16  ;;  %7321 = vmatpush3.bf16.msra.mxu1 %v9929_v15 }
  0x32   :  { %7322 = vmatprep.subr.bf16.mxu1 %v9941_v17 }
  0x34   :  { %7301 = vmatpush3.bf16.msra.mxu0 %v9947_v18 }
  0x35   :  { %7302 = vmatprep.subr.bf16.mxu0 %v9959_v20  ;;  %7323 = vmatpush3.bf16.msra.mxu1 %v9953_v19 }
  0x36   :  { %7324 = vmatprep.subr.bf16.mxu1 %v9965_v21 }
  0x38   :  { %7303 = vmatpush3.bf16.msra.mxu0 %v9971_v22 }
  0x39   :  { %7304 = vmatprep.subr.bf16.mxu0 %v9983_v24  ;;  %7325 = vmatpush3.bf16.msra.mxu1 %v9977_v23 }
  0x3a   :  { %7326 = vmatprep.subr.bf16.mxu1 %v9989_v25 }
  0x3c   :  { %7305 = vmatpush3.bf16.msra.mxu0 %v9995_v26 }
  0x3d   :  { %7306 = vmatprep.subr.bf16.mxu0 %v10007_v29  ;;  %7327 = vmatpush3.bf16.msra.mxu1 %v10001_v27 }
  0x3e   :  { %7328 = vmatprep.subr.bf16.mxu1 %v10013_v30 }
  0x40   :  { %7307 = vmatpush3.bf16.msra.mxu0 %v10019_v31 }
  0x41   :  { %7336 = vmatprep.subr.bf16.mxu0 %v9840_v0  ;;  %7329 = vmatpush3.bf16.msra.mxu1 %v10025_v32 }
  0x42   :  { %7358 = vmatprep.subr.bf16.mxu1 %v9845_v1 }
  0x43   :  { %479 = vmatmul.mubr.bf16.vlgmr.msra.gmra.mxu0 %v432_v50 }
  0x44   :  { %7337 = vmatpush3.bf16.msra.mxu0 %v9851_v2  ;;  %591 = vmatprep.mubr.bf16.mxu0 %v552_v51 }
  0x45   :  { %519 = vmatmul.mubr.bf16.vlgmr.msra.gmra.mxu1 %v440_v52  ;;  %7338 = vmatprep.subr.bf16.mxu0 %v9863_v4 }
  0x46   :  { %7359 = vmatpush3.bf16.msra.mxu1 %v9857_v3  ;;  %631 = vmatprep.mubr.bf16.mxu1 %v554_v53 }
  0x47   :  { %7360 = vmatprep.subr.bf16.mxu1 %v9869_v5 }
  0x48   :  { %7339 = vmatpush3.bf16.msra.mxu0 %v9875_v6 }
  0x49   :  { %16 = vsyncpa [#allocation3], 0  ;;  %7340 = vmatprep.subr.bf16.mxu0 %v9887_v8  ;;  %v6974_v54 = vld.sshfl [vmem:[%s12853_s0 + $0xc] sm:$0x33 pattern:$0x75316420]  ;;  %v545_v56 = vrot.slane %v6972_v48, %v10040_v41 }
  0x4a   :  { %7361 = vmatpush3.bf16.msra.mxu1 %v9881_v7  ;;  %v651_v55 = vcombine.high %v6974_v54, %v6974_v54  ;;  %v6976_v60 = vld.sshfl [vmem:[%s12853_s0 + $0x10] sm:$0x33 pattern:$0x75316420]  ;;  %v658_v62 = vrot.slane %v6974_v54, %v10040_v41  ;;  %v10301_v50 = vld [vmem:[%s12854_s1 + $0xb8] sm:$0xff]   ;;  %vm9774_vm0 = vmmov 0  }
  0x4b   :  { %7362 = vmatprep.subr.bf16.mxu1 %v9893_v9  ;;  %v553_v58 = vcombine.high %v545_v56, %v545_v56  ;;  %v764_v61 = vcombine.high %v6976_v60, %v6976_v60  ;;  %v6978_v35 = vld.sshfl [vmem:[%s12853_s0 + $0x14] sm:$0x33 pattern:$0x75316420]  ;;  %v771_v37 = vrot.slane %v6976_v60, %v10040_v41  ;;  %vm4411_vm1 = vcmask 523264  }
  0x4c   :  { %7341 = vmatpush3.bf16.msra.mxu0 %v9899_v10  ;;  %v665_v57 = vrot.slane %v651_v55, %v10040_v41  ;;  %v666_v28 = vcombine.high %v658_v62, %v658_v62  ;;  %v877_v36 = vcombine.high %v6978_v35, %v6978_v35  ;;  %v6980_v42 = vld.sshfl [vmem:[%s12853_s0 + $0x18] sm:$0x33 pattern:$0x75316420]  ;;  %v884_v44 = vrot.slane %v6978_v35, %v10040_v41  ;;  %v10295_v49 = vld [vmem:[%s12854_s1 + $0x70] sm:$0xff]   ;;  %v10347_v35 = vld [vmem:[%s12854_s1 + $0xa8] sm:$0xff]  }
  0x4d   :  { %7342 = vmatprep.subr.bf16.mxu0 %v9911_v12  ;;  %v778_v63 = vrot.slane %v764_v61, %v10040_v41  ;;  %v779_v39 = vcombine.high %v771_v37, %v771_v37  ;;  %v990_v43 = vcombine.high %v6980_v42, %v6980_v42  ;;  %v10307_v53 = vld [vmem:[%s12854_s1 + $0xf0] sm:$0xff]   ;;  %vm6875_vm2 = vcmask 1044480  }
  0x4e   :  { %7363 = vmatpush3.bf16.msra.mxu1 %v9905_v11  ;;  %v667_v59 = vcombine.high %v665_v57, %v665_v57  ;;  %v891_v38 = vrot.slane %v877_v36, %v10040_v41  ;;  %v892_v46 = vcombine.high %v884_v44, %v884_v44  ;;  %v10403_v36 = vld [vmem:[%s12854_s1 + $0xe0] sm:$0xff]   ;;  %vm6871_vm3 = vcmask 80896  }
  0x4f   :  { %7364 = vmatprep.subr.bf16.mxu1 %v9917_v13  ;;  %v780_v34 = vcombine.high %v778_v63, %v778_v63  ;;  %v1004_v45 = vrot.slane %v990_v43, %v10040_v41  ;;  %v10439_v43 = vld [vmem:[%s12854_s1 + $0x50] sm:$0xff]   ;;  %vm6919_vm4 = vcmask 41984  }
  0x50   :  { %7343 = vmatpush3.bf16.msra.mxu0 %v9923_v14  ;;  %v893_v40 = vcombine.high %v891_v38, %v891_v38 }
  0x51   :  { %7344 = vmatprep.subr.bf16.mxu0 %v9935_v16  ;;  %v1006_v47 = vcombine.high %v1004_v45, %v1004_v45 }
  0x52   :  { %7365 = vmatpush3.bf16.msra.mxu1 %v9929_v15 }
  0x53   :  { %7366 = vmatprep.subr.bf16.mxu1 %v9941_v17 }
  0x54   :  { %7345 = vmatpush3.bf16.msra.mxu0 %v9947_v18 }
  0x55   :  { %7346 = vmatprep.subr.bf16.mxu0 %v9959_v20 }
  0x56   :  { %7367 = vmatpush3.bf16.msra.mxu1 %v9953_v19 }
  0x57   :  { %7368 = vmatprep.subr.bf16.mxu1 %v9965_v21 }
  0x58   :  { %7347 = vmatpush3.bf16.msra.mxu0 %v9971_v22 }
  0x59   :  { %7348 = vmatprep.subr.bf16.mxu0 %v9983_v24 }
  0x5a   :  { %7369 = vmatpush3.bf16.msra.mxu1 %v9977_v23 }
  0x5b   :  { %7370 = vmatprep.subr.bf16.mxu1 %v9989_v25 }
  0x5c   :  { %7349 = vmatpush3.bf16.msra.mxu0 %v9995_v26 }
  0x5d   :  { %7350 = vmatprep.subr.bf16.mxu0 %v10007_v29 }
  0x5e   :  { %7371 = vmatpush3.bf16.msra.mxu1 %v10001_v27 }
  0x5f   :  { %7372 = vmatprep.subr.bf16.mxu1 %v10013_v30 }
  0x60   :  { %7351 = vmatpush3.bf16.msra.mxu0 %v10019_v31 }
  0x61   :  { %7380 = vmatprep.subr.bf16.mxu0 %v9840_v0 }
  0x62   :  { %7373 = vmatpush3.bf16.msra.mxu1 %v10025_v32 }
  0x63   :  { %592 = vmatmul.mubr.bf16.vlgmr.msra.gmra.mxu0 %v545_v56  ;;  %7402 = vmatprep.subr.bf16.mxu1 %v9845_v1 }
  0x64   :  { %7381 = vmatpush3.bf16.msra.mxu0 %v9851_v2  ;;  %704 = vmatprep.mubr.bf16.mxu0 %v665_v57  ;;  %v10314_v57 = vld [vmem:[%s12854_s1 + $0x30] sm:$0xff]  }
  0x65   :  { %632 = vmatmul.mubr.bf16.vlgmr.msra.gmra.mxu1 %v553_v58  ;;  %7382 = vmatprep.subr.bf16.mxu0 %v9863_v4 }
  0x66   :  { %7403 = vmatpush3.bf16.msra.mxu1 %v9857_v3  ;;  %744 = vmatprep.mubr.bf16.mxu1 %v667_v59  ;;  %v10320_v59 = vld [vmem:[%s12854_s1 + $0x68] sm:$0xff]  }
  0x67   :  { %7404 = vmatprep.subr.bf16.mxu1 %v9869_v5 }
  0x68   :  { %7383 = vmatpush3.bf16.msra.mxu0 %v9875_v6 }
  0x69   :  { %7384 = vmatprep.subr.bf16.mxu0 %v9887_v8 }
  0x6a   :  { %7405 = vmatpush3.bf16.msra.mxu1 %v9881_v7 }
  0x6b   :  { %7406 = vmatprep.subr.bf16.mxu1 %v9893_v9 }
  0x6c   :  { %7385 = vmatpush3.bf16.msra.mxu0 %v9899_v10 }
  0x6d   :  { %7386 = vmatprep.subr.bf16.mxu0 %v9911_v12 }
  0x6e   :  { %7407 = vmatpush3.bf16.msra.mxu1 %v9905_v11 }
  0x6f   :  { %7408 = vmatprep.subr.bf16.mxu1 %v9917_v13 }
  0x70   :  { %7387 = vmatpush3.bf16.msra.mxu0 %v9923_v14 }
  0x71   :  { %7388 = vmatprep.subr.bf16.mxu0 %v9935_v16 }
  0x72   :  { %7409 = vmatpush3.bf16.msra.mxu1 %v9929_v15 }
  0x73   :  { %7410 = vmatprep.subr.bf16.mxu1 %v9941_v17 }
  0x74   :  { %7389 = vmatpush3.bf16.msra.mxu0 %v9947_v18 }
  0x75   :  { %7390 = vmatprep.subr.bf16.mxu0 %v9959_v20 }
  0x76   :  { %7411 = vmatpush3.bf16.msra.mxu1 %v9953_v19 }
  0x77   :  { %7412 = vmatprep.subr.bf16.mxu1 %v9965_v21 }
  0x78   :  { %7391 = vmatpush3.bf16.msra.mxu0 %v9971_v22 }
  0x79   :  { %7392 = vmatprep.subr.bf16.mxu0 %v9983_v24 }
  0x7a   :  { %7413 = vmatpush3.bf16.msra.mxu1 %v9977_v23 }
  0x7b   :  { %7414 = vmatprep.subr.bf16.mxu1 %v9989_v25 }
  0x7c   :  { %7393 = vmatpush3.bf16.msra.mxu0 %v9995_v26 }
  0x7d   :  { %7394 = vmatprep.subr.bf16.mxu0 %v10007_v29 }
  0x7e   :  { %7415 = vmatpush3.bf16.msra.mxu1 %v10001_v27 }
  0x7f   :  { %7416 = vmatprep.subr.bf16.mxu1 %v10013_v30 }
  0x80   :  { %7395 = vmatpush3.bf16.msra.mxu0 %v10019_v31 }
  0x81   :  { %7424 = vmatprep.subr.bf16.mxu0 %v9840_v0 }
  0x82   :  { %7417 = vmatpush3.bf16.msra.mxu1 %v10025_v32 }
  0x83   :  { %705 = vmatmul.mubr.bf16.vlgmr.msra.gmra.mxu0 %v658_v62  ;;  %7446 = vmatprep.subr.bf16.mxu1 %v9845_v1  ;;  %v10328_v62 = vld [vmem:[%s12854_s1 + $0xb0] sm:$0xff]  }
  0x84   :  { %7425 = vmatpush3.bf16.msra.mxu0 %v9851_v2  ;;  %817 = vmatprep.mubr.bf16.mxu0 %v778_v63 }
  0x85   :  { %745 = vmatmul.mubr.bf16.vlgmr.msra.gmra.mxu1 %v666_v28  ;;  %7426 = vmatprep.subr.bf16.mxu0 %v9863_v4  ;;  %v10334_v28 = vld [vmem:[%s12854_s1 + $0xe8] sm:$0xff]  }
  0x86   :  { %7447 = vmatpush3.bf16.msra.mxu1 %v9857_v3  ;;  %857 = vmatprep.mubr.bf16.mxu1 %v780_v34  ;;  %v10340_v34 = vld [vmem:[%s12854_s1 + $0x28] sm:$0xff]  }
  0x87   :  { %7448 = vmatprep.subr.bf16.mxu1 %v9869_v5 }
  0x88   :  { %7427 = vmatpush3.bf16.msra.mxu0 %v9875_v6 }
  0x89   :  { %7428 = vmatprep.subr.bf16.mxu0 %v9887_v8 }
  0x8a   :  { %7449 = vmatpush3.bf16.msra.mxu1 %v9881_v7 }
  0x8b   :  { %7450 = vmatprep.subr.bf16.mxu1 %v9893_v9 }
  0x8c   :  { %7429 = vmatpush3.bf16.msra.mxu0 %v9899_v10 }
  0x8d   :  { %7430 = vmatprep.subr.bf16.mxu0 %v9911_v12 }
  0x8e   :  { %7451 = vmatpush3.bf16.msra.mxu1 %v9905_v11 }
  0x8f   :  { %7452 = vmatprep.subr.bf16.mxu1 %v9917_v13 }
  0x90   :  { %7431 = vmatpush3.bf16.msra.mxu0 %v9923_v14 }
  0x91   :  { %7432 = vmatprep.subr.bf16.mxu0 %v9935_v16 }
  0x92   :  { %7453 = vmatpush3.bf16.msra.mxu1 %v9929_v15 }
  0x93   :  { %7454 = vmatprep.subr.bf16.mxu1 %v9941_v17 }
  0x94   :  { %7433 = vmatpush3.bf16.msra.mxu0 %v9947_v18 }
  0x95   :  { %7434 = vmatprep.subr.bf16.mxu0 %v9959_v20 }
  0x96   :  { %7455 = vmatpush3.bf16.msra.mxu1 %v9953_v19 }
  0x97   :  { %7456 = vmatprep.subr.bf16.mxu1 %v9965_v21 }
  0x98   :  { %7435 = vmatpush3.bf16.msra.mxu0 %v9971_v22 }
  0x99   :  { %7436 = vmatprep.subr.bf16.mxu0 %v9983_v24 }
  0x9a   :  { %7457 = vmatpush3.bf16.msra.mxu1 %v9977_v23 }
  0x9b   :  { %7458 = vmatprep.subr.bf16.mxu1 %v9989_v25 }
  0x9c   :  { %7437 = vmatpush3.bf16.msra.mxu0 %v9995_v26 }
  0x9d   :  { %7438 = vmatprep.subr.bf16.mxu0 %v10007_v29 }
  0x9e   :  { %7459 = vmatpush3.bf16.msra.mxu1 %v10001_v27 }
  0x9f   :  { %7460 = vmatprep.subr.bf16.mxu1 %v10013_v30 }
  0xa0   :  { %7439 = vmatpush3.bf16.msra.mxu0 %v10019_v31 }
  0xa1   :  { %7468 = vmatprep.subr.bf16.mxu0 %v9840_v0 }
  0xa2   :  { %7461 = vmatpush3.bf16.msra.mxu1 %v10025_v32 }
  0xa3   :  { %818 = vmatmul.mubr.bf16.vlgmr.msra.gmra.mxu0 %v771_v37  ;;  %7490 = vmatprep.subr.bf16.mxu1 %v9845_v1  ;;  %v10409_v37 = vld [vmem:[%s12854_s1 + $0x20] sm:$0xff]  }
  0xa4   :  { %7469 = vmatpush3.bf16.msra.mxu0 %v9851_v2  ;;  %930 = vmatprep.mubr.bf16.mxu0 %v891_v38  ;;  %v10415_v38 = vld [vmem:[%s12854_s1 + $0x58] sm:$0xff]  }
  0xa5   :  { %858 = vmatmul.mubr.bf16.vlgmr.msra.gmra.mxu1 %v779_v39  ;;  %7470 = vmatprep.subr.bf16.mxu0 %v9863_v4  ;;  %v10421_v39 = vld [vmem:[%s12854_s1 + $0xa0] sm:$0xff]  }
  0xa6   :  { %7491 = vmatpush3.bf16.msra.mxu1 %v9857_v3  ;;  %970 = vmatprep.mubr.bf16.mxu1 %v893_v40  ;;  %v10427_v40 = vld [vmem:[%s12854_s1 + $0xd8] sm:$0xff]  }
  0xa7   :  { %7492 = vmatprep.subr.bf16.mxu1 %v9869_v5 }
  0xa8   :  { %7471 = vmatpush3.bf16.msra.mxu0 %v9875_v6 }
  0xa9   :  { %7472 = vmatprep.subr.bf16.mxu0 %v9887_v8 }
  0xaa   :  { %7493 = vmatpush3.bf16.msra.mxu1 %v9881_v7 }
  0xab   :  { %7494 = vmatprep.subr.bf16.mxu1 %v9893_v9 }
  0xac   :  { %7473 = vmatpush3.bf16.msra.mxu0 %v9899_v10 }
  0xad   :  { %7474 = vmatprep.subr.bf16.mxu0 %v9911_v12 }
  0xae   :  { %7495 = vmatpush3.bf16.msra.mxu1 %v9905_v11 }
  0xaf   :  { %7496 = vmatprep.subr.bf16.mxu1 %v9917_v13 }
  0xb0   :  { %7475 = vmatpush3.bf16.msra.mxu0 %v9923_v14 }
  0xb1   :  { %7476 = vmatprep.subr.bf16.mxu0 %v9935_v16 }
  0xb2   :  { %7497 = vmatpush3.bf16.msra.mxu1 %v9929_v15 }
  0xb3   :  { %7498 = vmatprep.subr.bf16.mxu1 %v9941_v17 }
  0xb4   :  { %7477 = vmatpush3.bf16.msra.mxu0 %v9947_v18 }
  0xb5   :  { %7478 = vmatprep.subr.bf16.mxu0 %v9959_v20 }
  0xb6   :  { %7499 = vmatpush3.bf16.msra.mxu1 %v9953_v19 }
  0xb7   :  { %7500 = vmatprep.subr.bf16.mxu1 %v9965_v21 }
  0xb8   :  { %7479 = vmatpush3.bf16.msra.mxu0 %v9971_v22 }
  0xb9   :  { %7480 = vmatprep.subr.bf16.mxu0 %v9983_v24 }
  0xba   :  { %7501 = vmatpush3.bf16.msra.mxu1 %v9977_v23 }
  0xbb   :  { %7502 = vmatprep.subr.bf16.mxu1 %v9989_v25 }
  0xbc   :  { %7481 = vmatpush3.bf16.msra.mxu0 %v9995_v26 }
  0xbd   :  { %7482 = vmatprep.subr.bf16.mxu0 %v10007_v29 }
  0xbe   :  { %7503 = vmatpush3.bf16.msra.mxu1 %v10001_v27 }
  0xbf   :  { %7504 = vmatprep.subr.bf16.mxu1 %v10013_v30 }
  0xc0   :  { %7483 = vmatpush3.bf16.msra.mxu0 %v10019_v31 }
  0xc1   :  { %7512 = vmatprep.subr.bf16.mxu0 %v9840_v0  ;;  %v10253_v0 = vld.sshfl [vmem:[%s12853_s0 + $0x1c] sm:$0x33 pattern:$0x75316420] }
  0xc2   :  { %7505 = vmatpush3.bf16.msra.mxu1 %v10025_v32 }
  0xc3   :  { %931 = vmatmul.mubr.bf16.vlgmr.msra.gmra.mxu0 %v884_v44  ;;  %7534 = vmatprep.subr.bf16.mxu1 %v9845_v1  ;;  %v1103_v1 = vcombine.high %v10253_v0, %v10253_v0  ;;  %v10445_v44 = vld [vmem:[%s12854_s1 + $0x98] sm:$0xff]  }
  0xc4   :  { %7513 = vmatpush3.bf16.msra.mxu0 %v9851_v2  ;;  %1043 = vmatprep.mubr.bf16.mxu0 %v1004_v45  ;;  %v997_v2 = vrot.slane %v6980_v42, %v10040_v41  ;;  %v10433_v42 = vld [vmem:[%s12854_s1 + $0x18] sm:$0xff]   ;;  %v10451_v45 = vld [vmem:[%s12854_s1 + $0xd0] sm:$0xff]  }
  0xc5   :  { %971 = vmatmul.mubr.bf16.vlgmr.msra.gmra.mxu1 %v892_v46  ;;  %7514 = vmatprep.subr.bf16.mxu0 %v9863_v4  ;;  %v10457_v46 = vld.sshfl [vmem:[%s12853_s0 + $0x24] sm:$0x33 pattern:$0x75316420] }
  0xc6   :  { %7535 = vmatpush3.bf16.msra.mxu1 %v9857_v3  ;;  %1083 = vmatprep.mubr.bf16.mxu1 %v1006_v47  ;;  %v1117_v3 = vrot.slane %v1103_v1, %v10040_v41  ;;  %v1005_v4 = vcombine.high %v997_v2, %v997_v2  ;;  %v10462_v47 = vld [vmem:[%s12854_s1 + $0x10] sm:$0xff]  }
  0xc7   :  { %7536 = vmatprep.subr.bf16.mxu1 %v9869_v5  ;;  %v10271_v5 = vld [vmem:[%s12854_s1 + $0x78] sm:$0xff]   ;;  %v10474_v1 = vld [vmem:[%s12854_s1 + $0x90] sm:$0xff]  }
  0xc8   :  { %7515 = vmatpush3.bf16.msra.mxu0 %v9875_v6  ;;  %v1119_v6 = vcombine.high %v1117_v3, %v1117_v3 }
  0xc9   :  { %7516 = vmatprep.subr.bf16.mxu0 %v9887_v8  ;;  %v10278_v8 = vld [vmem:[%s12854_s1 + $0xf8] sm:$0xff]  }
  0xca   :  { %7537 = vmatpush3.bf16.msra.mxu1 %v9881_v7 }
  0xcb   :  { %7538 = vmatprep.subr.bf16.mxu1 %v9893_v9  ;;  %v10284_v9 = vld [vmem:[%s12854_s1 + $0x38] sm:$0xff]  }
  0xcc   :  { %7517 = vmatpush3.bf16.msra.mxu0 %v9899_v10 }
  0xcd   :  { %7518 = vmatprep.subr.bf16.mxu0 %v9911_v12 }
  0xce   :  { %7539 = vmatpush3.bf16.msra.mxu1 %v9905_v11  ;;  %v10290_v11 = vld [vmem:[%s12855_s2] ss:$0 sm:$0xff] }
  0xcf   :  { %7540 = vmatprep.subr.bf16.mxu1 %v9917_v13 }
  0xd0   :  { %7519 = vmatpush3.bf16.msra.mxu0 %v9923_v14 }
  0xd1   :  { %7520 = vmatprep.subr.bf16.mxu0 %v9935_v16 }
  0xd2   :  { %7541 = vmatpush3.bf16.msra.mxu1 %v9929_v15 }
  0xd3   :  { %7542 = vmatprep.subr.bf16.mxu1 %v9941_v17 }
  0xd4   :  { %7521 = vmatpush3.bf16.msra.mxu0 %v9947_v18 }
  0xd5   :  { %7522 = vmatprep.subr.bf16.mxu0 %v9959_v20 }
  0xd6   :  { %7543 = vmatpush3.bf16.msra.mxu1 %v9953_v19 }
  0xd7   :  { %7544 = vmatprep.subr.bf16.mxu1 %v9965_v21 }
  0xd8   :  { %7523 = vmatpush3.bf16.msra.mxu0 %v9971_v22 }
  0xd9   :  { %7524 = vmatprep.subr.bf16.mxu0 %v9983_v24 }
  0xda   :  { %7545 = vmatpush3.bf16.msra.mxu1 %v9977_v23 }
  0xdb   :  { %7546 = vmatprep.subr.bf16.mxu1 %v9989_v25 }
  0xdc   :  { %7525 = vmatpush3.bf16.msra.mxu0 %v9995_v26 }
  0xdd   :  { %7526 = vmatprep.subr.bf16.mxu0 %v10007_v29 }
  0xde   :  { %7547 = vmatpush3.bf16.msra.mxu1 %v10001_v27 }
  0xdf   :  { %7548 = vmatprep.subr.bf16.mxu1 %v10013_v30 }
  0xe0   :  { %7527 = vmatpush3.bf16.msra.mxu0 %v10019_v31 }
  0xe1   :  { %7556 = vmatprep.subr.bf16.mxu0 %v10271_v5 }
  0xe2   :  { %7549 = vmatpush3.bf16.msra.mxu1 %v10025_v32 }
  0xe3   :  { %v7264_v7 = vpop.f32.mrf.mxu0  ;;  %1044 = vmatmul.mubr.bf16.vlgmr.msra.gmra.mxu0 %v997_v2  ;;  %7578 = vmatprep.subr.bf16.mxu1 %v10278_v8  ;;  %v1329_v2 = vcombine.high %v10457_v46, %v10457_v46 }
  0xe4   :  { %7557 = vmatpush3.bf16.msra.mxu0 %v10284_v9  ;;  %1156 = vmatprep.mubr.bf16.mxu0 %v1117_v3  ;;  %v7286_v10 = vpop.f32.mrf.mxu1  ;;  %v10482_v3 = vld [vmem:[%s12854_s1 + $0xc8] sm:$0xff]  }
  0xe5   :  { %1084 = vmatmul.mubr.bf16.vlgmr.msra.gmra.mxu1 %v1005_v4  ;;  %v7265_v48 = vpop.f32.mrf.mxu0  ;;  %7558 = vmatprep.subr.bf16.mxu0 %v10295_v49  ;;  %v10488_v4 = vld [vmem:[%s12854_s1 + $0x8] sm:$0xff]  }
  0xe6   :  { %7579 = vmatpush3.bf16.msra.mxu1 %v10301_v50  ;;  %v7266_v51 = vadd.f32 %v7265_v48, %v7264_v7  ;;  %1196 = vmatprep.mubr.bf16.mxu1 %v1119_v6  ;;  %v7287_v52 = vpop.f32.mrf.mxu1  ;;  %v10494_v6 = vld [vmem:[%s12854_s1 + $0x40] sm:$0xff]   ;;  %v1343_v48 = vrot.slane %v1329_v2, %v10040_v41 }
  0xe7   :  { %7580 = vmatprep.subr.bf16.mxu1 %v10307_v53  ;;  %v7267_v54 = vpop.f32.mrf.mxu0  ;;  %v7288_v56 = vadd.f32 %v7287_v52, %v7286_v10  ;;  %v10502_v10 = vld [vmem:[%s12854_s1 + $0x88] sm:$0xff]   ;;  %v10515_v52 = vld [vmem:[%s12854_s1] sm:$0xff]  }
  0xe8   :  { %v368_v55 = vadd.f32 %v7266_v51, %v10290_v11  ;;  %7559 = vmatpush3.bf16.msra.mxu0 %v10314_v57  ;;  %v7289_v58 = vpop.f32.mrf.mxu1  ;;  %v10509_v51 = vld [vmem:[%s12854_s1 + $0xc0] sm:$0xff]  }
  0xe9   :  { %7560 = vmatprep.subr.bf16.mxu0 %v10320_v59  ;;  %v7268_v60 = vpop.f32.mrf.mxu0 }
  0xea   :  { %v10323_v61 = vadd.f32 %v7288_v56, %v368_v55  ;;  %7581 = vmatpush3.bf16.msra.mxu1 %v10328_v62  ;;  %v7290_v63 = vpop.f32.mrf.mxu1  ;;  %v1345_v55 = vcombine.high %v1343_v48, %v1343_v48 }
  0xeb   :  { %7582 = vmatprep.subr.bf16.mxu1 %v10334_v28 }
  0xec   :  { %7561 = vmatpush3.bf16.msra.mxu0 %v10340_v34 }
  0xed   :  { %7562 = vmatprep.subr.bf16.mxu0 %v9911_v12  ;;  %v10362_v12 = vld.sshfl [vmem:[%s12853_s0 + $0x20] sm:$0x33 pattern:$0x75316420] }
  0xee   :  { %7583 = vmatpush3.bf16.msra.mxu1 %v10347_v35  ;;  %v1223_v7 = vrot.slane %v10362_v12, %v10040_v41 }
  0xef   :  { %7584 = vmatprep.subr.bf16.mxu1 %v9917_v13  ;;  %v1216_v13 = vcombine.high %v10362_v12, %v10362_v12 }
  0xf0   :  { %7563 = vmatpush3.bf16.msra.mxu0 %v9923_v14  ;;  %v1110_v14 = vrot.slane %v10253_v0, %v10040_v41  ;;  %v10468_v0 = vld [vmem:[%s12854_s1 + $0x48] sm:$0xff]   ;;  %v1231_v54 = vcombine.high %v1223_v7, %v1223_v7 }
  0xf1   :  { %7564 = vmatprep.subr.bf16.mxu0 %v9935_v16 }
  0xf2   :  { %7585 = vmatpush3.bf16.msra.mxu1 %v9929_v15  ;;  %v1230_v15 = vrot.slane %v1216_v13, %v10040_v41  ;;  %v1118_v16 = vcombine.high %v1110_v14, %v1110_v14 }
  0xf3   :  { %7586 = vmatprep.subr.bf16.mxu1 %v9941_v17 }
  0xf4   :  { %7565 = vmatpush3.bf16.msra.mxu0 %v9947_v18  ;;  %v1232_v17 = vcombine.high %v1230_v15, %v1230_v15 }
  0xf5   :  { %7566 = vmatprep.subr.bf16.mxu0 %v9959_v20 }
  0xf6   :  { %7587 = vmatpush3.bf16.msra.mxu1 %v9953_v19 }
  0xf7   :  { %7588 = vmatprep.subr.bf16.mxu1 %v9965_v21 }
  0xf8   :  { %7567 = vmatpush3.bf16.msra.mxu0 %v9971_v22 }
  0xf9   :  { %7568 = vmatprep.subr.bf16.mxu0 %v9983_v24 }
  0xfa   :  { %7589 = vmatpush3.bf16.msra.mxu1 %v9977_v23 }
  0xfb   :  { %7590 = vmatprep.subr.bf16.mxu1 %v9989_v25 }
  0xfc   :  { %7569 = vmatpush3.bf16.msra.mxu0 %v9995_v26 }
  0xfd   :  { %7570 = vmatprep.subr.bf16.mxu0 %v10007_v29 }
  0xfe   :  { %7591 = vmatpush3.bf16.msra.mxu1 %v10001_v27 }
  0xff   :  { %7592 = vmatprep.subr.bf16.mxu1 %v10013_v30 }
 0x100   :  { %7571 = vmatpush3.bf16.msra.mxu0 %v10019_v31  ;;  %v10396_v31 = vld [vmem:[%s12854_s1 + $0x60] sm:$0xff]  }
 0x101   :  { %7600 = vmatprep.subr.bf16.mxu0 %v10271_v5 }
 0x102   :  { %7593 = vmatpush3.bf16.msra.mxu1 %v10025_v32 }
 0x103   :  { %v7308_v18 = vpop.f32.mrf.mxu0  ;;  %1157 = vmatmul.mubr.bf16.vlgmr.msra.gmra.mxu0 %v1110_v14  ;;  %7622 = vmatprep.subr.bf16.mxu1 %v10278_v8 }
 0x104   :  { %7601 = vmatpush3.bf16.msra.mxu0 %v10284_v9  ;;  %1269 = vmatprep.mubr.bf16.mxu0 %v1230_v15 }
 0x105   :  { %v7330_v19 = vpop.f32.mrf.mxu1  ;;  %1197 = vmatmul.mubr.bf16.vlgmr.msra.gmra.mxu1 %v1118_v16  ;;  %v7309_v20 = vpop.f32.mrf.mxu0  ;;  %7602 = vmatprep.subr.bf16.mxu0 %v10295_v49 }
 0x106   :  { %7623 = vmatpush3.bf16.msra.mxu1 %v10301_v50  ;;  %v7310_v21 = vadd.f32 %v7309_v20, %v7308_v18  ;;  %1309 = vmatprep.mubr.bf16.mxu1 %v1232_v17 }
 0x107   :  { %v7331_v22 = vpop.f32.mrf.mxu1  ;;  %7624 = vmatprep.subr.bf16.mxu1 %v10307_v53  ;;  %v7311_v23 = vpop.f32.mrf.mxu0 }
 0x108   :  { %v481_v24 = vadd.f32 %v7310_v21, %v10290_v11  ;;  %v7332_v25 = vadd.f32 %v7331_v22, %v7330_v19  ;;  %7603 = vmatpush3.bf16.msra.mxu0 %v10314_v57  ;;  %v10547_v19 = vld.sshfl [vmem:[%s12853_s0 + $0x28] sm:$0x33 pattern:$0x75316420]  ;;  %v1336_v21 = vrot.slane %v10457_v46, %v10040_v41 }
 0x109   :  { %v7333_v26 = vpop.f32.mrf.mxu1  ;;  %7604 = vmatprep.subr.bf16.mxu0 %v10320_v59  ;;  %v7312_v27 = vpop.f32.mrf.mxu0  ;;  %v1442_v20 = vcombine.high %v10547_v19, %v10547_v19 }
 0x10a   :  { %v10388_v29 = vadd.f32 %v7332_v25, %v481_v24  ;;  %7625 = vmatpush3.bf16.msra.mxu1 %v10328_v62  ;;  %v1344_v23 = vcombine.high %v1336_v21, %v1336_v21  ;;  %v10567_v24 = vld [vmem:[%s12854_s1 + $0x80] sm:$0xff]  }
 0x10b   :  { %v7334_v30 = vpop.f32.mrf.mxu1  ;;  %7626 = vmatprep.subr.bf16.mxu1 %v10334_v28  ;;  %v1456_v22 = vrot.slane %v1442_v20, %v10040_v41 }
 0x10c   :  { %7605 = vmatpush3.bf16.msra.mxu0 %v10340_v34 }
 0x10d   :  { %7606 = vmatprep.subr.bf16.mxu0 %v10396_v31  ;;  %v1458_v25 = vcombine.high %v1456_v22, %v1456_v22 }
 0x10e   :  { %7627 = vmatpush3.bf16.msra.mxu1 %v10347_v35 }
 0x10f   :  { %7628 = vmatprep.subr.bf16.mxu1 %v10403_v36 }
 0x110   :  { %7607 = vmatpush3.bf16.msra.mxu0 %v10409_v37 }
 0x111   :  { %7608 = vmatprep.subr.bf16.mxu0 %v10415_v38 }
 0x112   :  { %7629 = vmatpush3.bf16.msra.mxu1 %v10421_v39 }
 0x113   :  { %7630 = vmatprep.subr.bf16.mxu1 %v10427_v40 }
 0x114   :  { %7609 = vmatpush3.bf16.msra.mxu0 %v10433_v42 }
 0x115   :  { %7610 = vmatprep.subr.bf16.mxu0 %v10439_v43 }
 0x116   :  { %7631 = vmatpush3.bf16.msra.mxu1 %v10445_v44 }
 0x117   :  { %7632 = vmatprep.subr.bf16.mxu1 %v10451_v45 }
 0x118   :  { %7611 = vmatpush3.bf16.msra.mxu0 %v10462_v47 }
 0x119   :  { %7612 = vmatprep.subr.bf16.mxu0 %v10468_v0 }
 0x11a   :  { %7633 = vmatpush3.bf16.msra.mxu1 %v10474_v1 }
 0x11b   :  { %7634 = vmatprep.subr.bf16.mxu1 %v10482_v3 }
 0x11c   :  { %7613 = vmatpush3.bf16.msra.mxu0 %v10488_v4 }
 0x11d   :  { %7614 = vmatprep.subr.bf16.mxu0 %v10494_v6 }
 0x11e   :  { %7635 = vmatpush3.bf16.msra.mxu1 %v10502_v10 }
 0x11f   :  { %7636 = vmatprep.subr.bf16.mxu1 %v10509_v51 }
 0x120   :  { %7615 = vmatpush3.bf16.msra.mxu0 %v10515_v52 }
 0x121   :  { %7644 = vmatprep.subr.bf16.mxu0 %v10271_v5 }
 0x122   :  { %7637 = vmatpush3.bf16.msra.mxu1 %v10025_v32 }
 0x123   :  { %v7352_v56 = vpop.f32.mrf.mxu0  ;;  %1270 = vmatmul.mubr.bf16.vlgmr.msra.gmra.mxu0 %v1223_v7  ;;  %7666 = vmatprep.subr.bf16.mxu1 %v10278_v8 }
 0x124   :  { %7645 = vmatpush3.bf16.msra.mxu0 %v10284_v9  ;;  %1382 = vmatprep.mubr.bf16.mxu0 %v1343_v48 }
 0x125   :  { %v7374_v58 = vpop.f32.mrf.mxu1  ;;  %1310 = vmatmul.mubr.bf16.vlgmr.msra.gmra.mxu1 %v1231_v54  ;;  %v7353_v60 = vpop.f32.mrf.mxu0  ;;  %7646 = vmatprep.subr.bf16.mxu0 %v10295_v49 }
 0x126   :  { %7667 = vmatpush3.bf16.msra.mxu1 %v10301_v50  ;;  %v7354_v63 = vadd.f32 %v7353_v60, %v7352_v56  ;;  %1422 = vmatprep.mubr.bf16.mxu1 %v1345_v55 }
 0x127   :  { %v7375_v12 = vpop.f32.mrf.mxu1  ;;  %7668 = vmatprep.subr.bf16.mxu1 %v10307_v53  ;;  %v7355_v32 = vpop.f32.mrf.mxu0 }
 0x128   :  { %v594_v13 = vadd.f32 %v7354_v63, %v10290_v11  ;;  %v7376_v14 = vadd.f32 %v7375_v12, %v7374_v58  ;;  %7647 = vmatpush3.bf16.msra.mxu0 %v10314_v57  ;;  %v6990_v63 = vld.sshfl [vmem:[%s12853_s0 + $0x2c] sm:$0x33 pattern:$0x75316420]  ;;  %v1449_v32 = vrot.slane %v10547_v19, %v10040_v41 }
 0x129   :  { %v7377_v15 = vpop.f32.mrf.mxu1  ;;  %7648 = vmatprep.subr.bf16.mxu0 %v10320_v59  ;;  %v7356_v16 = vpop.f32.mrf.mxu0  ;;  %v1555_v12 = vcombine.high %v6990_v63, %v6990_v63 }
 0x12a   :  { %v10528_v17 = vadd.f32 %v7376_v14, %v594_v13  ;;  %7669 = vmatpush3.bf16.msra.mxu1 %v10328_v62  ;;  %v1457_v14 = vcombine.high %v1449_v32, %v1449_v32 }
 0x12b   :  { %v7378_v18 = vpop.f32.mrf.mxu1  ;;  %7670 = vmatprep.subr.bf16.mxu1 %v10334_v28  ;;  %v1569_v13 = vrot.slane %v1555_v12, %v10040_v41 }
 0x12c   :  { %7649 = vmatpush3.bf16.msra.mxu0 %v10340_v34 }
 0x12d   :  { %7650 = vmatprep.subr.bf16.mxu0 %v10396_v31  ;;  %v1571_v15 = vcombine.high %v1569_v13, %v1569_v13 }
 0x12e   :  { %7671 = vmatpush3.bf16.msra.mxu1 %v10347_v35 }
 0x12f   :  { %7672 = vmatprep.subr.bf16.mxu1 %v10403_v36 }
 0x130   :  { %7651 = vmatpush3.bf16.msra.mxu0 %v10409_v37 }
 0x131   :  { %7652 = vmatprep.subr.bf16.mxu0 %v10415_v38 }
 0x132   :  { %7673 = vmatpush3.bf16.msra.mxu1 %v10421_v39 }
 0x133   :  { %7674 = vmatprep.subr.bf16.mxu1 %v10427_v40 }
 0x134   :  { %7653 = vmatpush3.bf16.msra.mxu0 %v10433_v42 }
 0x135   :  { %7654 = vmatprep.subr.bf16.mxu0 %v10439_v43 }
 0x136   :  { %7675 = vmatpush3.bf16.msra.mxu1 %v10445_v44 }
 0x137   :  { %7676 = vmatprep.subr.bf16.mxu1 %v10451_v45 }
 0x138   :  { %7655 = vmatpush3.bf16.msra.mxu0 %v10462_v47 }
 0x139   :  { %7656 = vmatprep.subr.bf16.mxu0 %v10468_v0 }
 0x13a   :  { %7677 = vmatpush3.bf16.msra.mxu1 %v10474_v1 }
 0x13b   :  { %7678 = vmatprep.subr.bf16.mxu1 %v10482_v3 }
 0x13c   :  { %7657 = vmatpush3.bf16.msra.mxu0 %v10488_v4 }
 0x13d   :  { %7658 = vmatprep.subr.bf16.mxu0 %v10494_v6 }
 0x13e   :  { %7679 = vmatpush3.bf16.msra.mxu1 %v10502_v10 }
 0x13f   :  { %7680 = vmatprep.subr.bf16.mxu1 %v10509_v51 }
 0x140   :  { %7659 = vmatpush3.bf16.msra.mxu0 %v10515_v52 }
 0x141   :  { %7688 = vmatprep.subr.bf16.mxu0 %v10271_v5 }
 0x142   :  { %7681 = vmatpush3.bf16.msra.mxu1 %v10567_v24 }
 0x143   :  { %v7396_v26 = vpop.f32.mrf.mxu0  ;;  %1383 = vmatmul.mubr.bf16.vlgmr.msra.gmra.mxu0 %v1336_v21  ;;  %7710 = vmatprep.subr.bf16.mxu1 %v10278_v8 }
 0x144   :  { %7689 = vmatpush3.bf16.msra.mxu0 %v10284_v9  ;;  %1495 = vmatprep.mubr.bf16.mxu0 %v1456_v22 }
 0x145   :  { %v7418_v27 = vpop.f32.mrf.mxu1  ;;  %1423 = vmatmul.mubr.bf16.vlgmr.msra.gmra.mxu1 %v1344_v23  ;;  %v7397_v30 = vpop.f32.mrf.mxu0  ;;  %7690 = vmatprep.subr.bf16.mxu0 %v10295_v49 }
 0x146   :  { %7711 = vmatpush3.bf16.msra.mxu1 %v10301_v50  ;;  %v7398_v46 = vadd.f32 %v7397_v30, %v7396_v26  ;;  %1535 = vmatprep.mubr.bf16.mxu1 %v1458_v25 }
 0x147   :  { %v7419_v2 = vpop.f32.mrf.mxu1  ;;  %7712 = vmatprep.subr.bf16.mxu1 %v10307_v53  ;;  %v7399_v7 = vpop.f32.mrf.mxu0 }
 0x148   :  { %v707_v48 = vadd.f32 %v7398_v46, %v10290_v11  ;;  %v7420_v54 = vadd.f32 %v7419_v2, %v7418_v27  ;;  %7691 = vmatpush3.bf16.msra.mxu0 %v10314_v57  ;;  %v6992_v2 = vld.sshfl [vmem:[%s12853_s0 + $0x30] sm:$0x33 pattern:$0x75316420] }
 0x149   :  { %v7421_v55 = vpop.f32.mrf.mxu1  ;;  %7692 = vmatprep.subr.bf16.mxu0 %v10320_v59  ;;  %v7400_v56 = vpop.f32.mrf.mxu0  ;;  %v1668_v7 = vcombine.high %v6992_v2, %v6992_v2 }
 0x14a   :  { %v10578_v58 = vadd.f32 %v7420_v54, %v707_v48  ;;  %7713 = vmatpush3.bf16.msra.mxu1 %v10328_v62  ;;  %v1562_v48 = vrot.slane %v6990_v63, %v10040_v41 }
 0x14b   :  { %v7422_v60 = vpop.f32.mrf.mxu1  ;;  %7714 = vmatprep.subr.bf16.mxu1 %v10334_v28  ;;  %v1682_v54 = vrot.slane %v1668_v7, %v10040_v41 }
 0x14c   :  { %7693 = vmatpush3.bf16.msra.mxu0 %v10340_v34  ;;  %v1570_v55 = vcombine.high %v1562_v48, %v1562_v48 }
 0x14d   :  { %7694 = vmatprep.subr.bf16.mxu0 %v10396_v31  ;;  %v1684_v56 = vcombine.high %v1682_v54, %v1682_v54 }
 0x14e   :  { %7715 = vmatpush3.bf16.msra.mxu1 %v10347_v35 }
 0x14f   :  { %7716 = vmatprep.subr.bf16.mxu1 %v10403_v36 }
 0x150   :  { %7695 = vmatpush3.bf16.msra.mxu0 %v10409_v37 }
 0x151   :  { %7696 = vmatprep.subr.bf16.mxu0 %v10415_v38 }
 0x152   :  { %7717 = vmatpush3.bf16.msra.mxu1 %v10421_v39 }
 0x153   :  { %7718 = vmatprep.subr.bf16.mxu1 %v10427_v40 }
 0x154   :  { %7697 = vmatpush3.bf16.msra.mxu0 %v10433_v42 }
 0x155   :  { %7698 = vmatprep.subr.bf16.mxu0 %v10439_v43 }
 0x156   :  { %7719 = vmatpush3.bf16.msra.mxu1 %v10445_v44 }
 0x157   :  { %7720 = vmatprep.subr.bf16.mxu1 %v10451_v45 }
 0x158   :  { %7699 = vmatpush3.bf16.msra.mxu0 %v10462_v47 }
 0x159   :  { %7700 = vmatprep.subr.bf16.mxu0 %v10468_v0 }
 0x15a   :  { %7721 = vmatpush3.bf16.msra.mxu1 %v10474_v1 }
 0x15b   :  { %7722 = vmatprep.subr.bf16.mxu1 %v10482_v3 }
 0x15c   :  { %7701 = vmatpush3.bf16.msra.mxu0 %v10488_v4 }
 0x15d   :  { %7702 = vmatprep.subr.bf16.mxu0 %v10494_v6 }
 0x15e   :  { %7723 = vmatpush3.bf16.msra.mxu1 %v10502_v10 }
 0x15f   :  { %7724 = vmatprep.subr.bf16.mxu1 %v10509_v51 }
 0x160   :  { %7703 = vmatpush3.bf16.msra.mxu0 %v10515_v52 }
 0x161   :  { %7732 = vmatprep.subr.bf16.mxu0 %v10271_v5 }
 0x162   :  { %7725 = vmatpush3.bf16.msra.mxu1 %v10567_v24 }
 0x163   :  { %v7440_v16 = vpop.f32.mrf.mxu0  ;;  %1496 = vmatmul.mubr.bf16.vlgmr.msra.gmra.mxu0 %v1449_v32  ;;  %7754 = vmatprep.subr.bf16.mxu1 %v10278_v8 }
 0x164   :  { %7733 = vmatpush3.bf16.msra.mxu0 %v10284_v9  ;;  %1608 = vmatprep.mubr.bf16.mxu0 %v1569_v13 }
 0x165   :  { %v7462_v18 = vpop.f32.mrf.mxu1  ;;  %1536 = vmatmul.mubr.bf16.vlgmr.msra.gmra.mxu1 %v1457_v14  ;;  %v7441_v19 = vpop.f32.mrf.mxu0  ;;  %7734 = vmatprep.subr.bf16.mxu0 %v10295_v49 }
 0x166   :  { %7755 = vmatpush3.bf16.msra.mxu1 %v10301_v50  ;;  %v7442_v20 = vadd.f32 %v7441_v19, %v7440_v16  ;;  %1648 = vmatprep.mubr.bf16.mxu1 %v1571_v15 }
 0x167   :  { %v7463_v21 = vpop.f32.mrf.mxu1  ;;  %7756 = vmatprep.subr.bf16.mxu1 %v10307_v53  ;;  %v7443_v22 = vpop.f32.mrf.mxu0 }
 0x168   :  { %v820_v23 = vadd.f32 %v7442_v20, %v10290_v11  ;;  %v7464_v25 = vadd.f32 %v7463_v21, %v7462_v18  ;;  %7735 = vmatpush3.bf16.msra.mxu0 %v10314_v57  ;;  %v6994_v22 = vld.sshfl [vmem:[%s12853_s0 + $0x34] sm:$0x33 pattern:$0x75316420] }
 0x169   :  { %v7465_v26 = vpop.f32.mrf.mxu1  ;;  %7736 = vmatprep.subr.bf16.mxu0 %v10320_v59  ;;  %v7444_v27 = vpop.f32.mrf.mxu0 }
 0x16a   :  { %v10619_v30 = vadd.f32 %v7464_v25, %v820_v23  ;;  %7757 = vmatpush3.bf16.msra.mxu1 %v10328_v62  ;;  %v1781_v23 = vcombine.high %v6994_v22, %v6994_v22  ;;  %v1675_v25 = vrot.slane %v6992_v2, %v10040_v41 }
 0x16b   :  { %v7466_v46 = vpop.f32.mrf.mxu1  ;;  %7758 = vmatprep.subr.bf16.mxu1 %v10334_v28 }
 0x16c   :  { %7737 = vmatpush3.bf16.msra.mxu0 %v10340_v34  ;;  %v1795_v26 = vrot.slane %v1781_v23, %v10040_v41  ;;  %v1683_v27 = vcombine.high %v1675_v25, %v1675_v25 }
 0x16d   :  { %7738 = vmatprep.subr.bf16.mxu0 %v10396_v31 }
 0x16e   :  { %7759 = vmatpush3.bf16.msra.mxu1 %v10347_v35  ;;  %v1797_v46 = vcombine.high %v1795_v26, %v1795_v26 }
 0x16f   :  { %7760 = vmatprep.subr.bf16.mxu1 %v10403_v36 }
 0x170   :  { %7739 = vmatpush3.bf16.msra.mxu0 %v10409_v37 }
 0x171   :  { %7740 = vmatprep.subr.bf16.mxu0 %v10415_v38 }
 0x172   :  { %7761 = vmatpush3.bf16.msra.mxu1 %v10421_v39 }
 0x173   :  { %7762 = vmatprep.subr.bf16.mxu1 %v10427_v40 }
 0x174   :  { %7741 = vmatpush3.bf16.msra.mxu0 %v10433_v42 }
 0x175   :  { %7742 = vmatprep.subr.bf16.mxu0 %v10439_v43 }
 0x176   :  { %7763 = vmatpush3.bf16.msra.mxu1 %v10445_v44 }
 0x177   :  { %7764 = vmatprep.subr.bf16.mxu1 %v10451_v45 }
 0x178   :  { %7743 = vmatpush3.bf16.msra.mxu0 %v10462_v47 }
 0x179   :  { %7744 = vmatprep.subr.bf16.mxu0 %v10468_v0 }
 0x17a   :  { %7765 = vmatpush3.bf16.msra.mxu1 %v10474_v1 }
 0x17b   :  { %7766 = vmatprep.subr.bf16.mxu1 %v10482_v3 }
 0x17c   :  { %7745 = vmatpush3.bf16.msra.mxu0 %v10488_v4 }
 0x17d   :  { %7746 = vmatprep.subr.bf16.mxu0 %v10494_v6 }
 0x17e   :  { %7767 = vmatpush3.bf16.msra.mxu1 %v10502_v10 }
 0x17f   :  { %7768 = vmatprep.subr.bf16.mxu1 %v10509_v51 }
 0x180   :  { %7747 = vmatpush3.bf16.msra.mxu0 %v10515_v52 }
 0x181   :  { %7776 = vmatprep.subr.bf16.mxu0 %v10271_v5 }
 0x182   :  { %7769 = vmatpush3.bf16.msra.mxu1 %v10567_v24 }
 0x183   :  { %v7484_v60 = vpop.f32.mrf.mxu0  ;;  %1609 = vmatmul.mubr.bf16.vlgmr.msra.gmra.mxu0 %v1562_v48  ;;  %7798 = vmatprep.subr.bf16.mxu1 %v10278_v8 }
 0x184   :  { %7777 = vmatpush3.bf16.msra.mxu0 %v10284_v9  ;;  %1721 = vmatprep.mubr.bf16.mxu0 %v1682_v54 }
 0x185   :  { %v7506_v63 = vpop.f32.mrf.mxu1  ;;  %1649 = vmatmul.mubr.bf16.vlgmr.msra.gmra.mxu1 %v1570_v55  ;;  %v7485_v12 = vpop.f32.mrf.mxu0  ;;  %7778 = vmatprep.subr.bf16.mxu0 %v10295_v49 }
 0x186   :  { %7799 = vmatpush3.bf16.msra.mxu1 %v10301_v50  ;;  %v7486_v32 = vadd.f32 %v7485_v12, %v7484_v60  ;;  %1761 = vmatprep.mubr.bf16.mxu1 %v1684_v56 }
 0x187   :  { %v7507_v13 = vpop.f32.mrf.mxu1  ;;  %7800 = vmatprep.subr.bf16.mxu1 %v10307_v53  ;;  %v7487_v14 = vpop.f32.mrf.mxu0 }
 0x188   :  { %v933_v15 = vadd.f32 %v7486_v32, %v10290_v11  ;;  %v7508_v16 = vadd.f32 %v7507_v13, %v7506_v63  ;;  %7779 = vmatpush3.bf16.msra.mxu0 %v10314_v57 }
 0x189   :  { %v7509_v18 = vpop.f32.mrf.mxu1  ;;  %7780 = vmatprep.subr.bf16.mxu0 %v10320_v59  ;;  %v7488_v19 = vpop.f32.mrf.mxu0 }
 0x18a   :  { %v10659_v20 = vadd.f32 %v7508_v16, %v933_v15  ;;  %7801 = vmatpush3.bf16.msra.mxu1 %v10328_v62  ;;  %v6996_v15 = vld.sshfl [vmem:[%s12853_s0 + $0x38] sm:$0x33 pattern:$0x75316420]  ;;  %v1788_v18 = vrot.slane %v6994_v22, %v10040_v41 }
 0x18b   :  { %v7510_v21 = vpop.f32.mrf.mxu1  ;;  %7802 = vmatprep.subr.bf16.mxu1 %v10334_v28  ;;  %v1894_v16 = vcombine.high %v6996_v15, %v6996_v15 }
 0x18c   :  { %7781 = vmatpush3.bf16.msra.mxu0 %v10340_v34  ;;  %v1796_v21 = vcombine.high %v1788_v18, %v1788_v18 }
 0x18d   :  { %7782 = vmatprep.subr.bf16.mxu0 %v10396_v31  ;;  %v1908_v19 = vrot.slane %v1894_v16, %v10040_v41 }
 0x18e   :  { %7803 = vmatpush3.bf16.msra.mxu1 %v10347_v35 }
 0x18f   :  { %7804 = vmatprep.subr.bf16.mxu1 %v10403_v36  ;;  %v1910_v23 = vcombine.high %v1908_v19, %v1908_v19 }
 0x190   :  { %7783 = vmatpush3.bf16.msra.mxu0 %v10409_v37 }
 0x191   :  { %7784 = vmatprep.subr.bf16.mxu0 %v10415_v38 }
 0x192   :  { %7805 = vmatpush3.bf16.msra.mxu1 %v10421_v39 }
 0x193   :  { %7806 = vmatprep.subr.bf16.mxu1 %v10427_v40 }
 0x194   :  { %7785 = vmatpush3.bf16.msra.mxu0 %v10433_v42 }
 0x195   :  { %7786 = vmatprep.subr.bf16.mxu0 %v10439_v43 }
 0x196   :  { %7807 = vmatpush3.bf16.msra.mxu1 %v10445_v44 }
 0x197   :  { %7808 = vmatprep.subr.bf16.mxu1 %v10451_v45 }
 0x198   :  { %7787 = vmatpush3.bf16.msra.mxu0 %v10462_v47 }
 0x199   :  { %7788 = vmatprep.subr.bf16.mxu0 %v10468_v0 }
 0x19a   :  { %7809 = vmatpush3.bf16.msra.mxu1 %v10474_v1 }
 0x19b   :  { %7810 = vmatprep.subr.bf16.mxu1 %v10482_v3 }
 0x19c   :  { %7789 = vmatpush3.bf16.msra.mxu0 %v10488_v4 }
 0x19d   :  { %7790 = vmatprep.subr.bf16.mxu0 %v10494_v6 }
 0x19e   :  { %7811 = vmatpush3.bf16.msra.mxu1 %v10502_v10 }
 0x19f   :  { %7812 = vmatprep.subr.bf16.mxu1 %v10509_v51 }
 0x1a0   :  { %7791 = vmatpush3.bf16.msra.mxu0 %v10515_v52 }
 0x1a1   :  { %7820 = vmatprep.subr.bf16.mxu0 %v10271_v5 }
 0x1a2   :  { %7813 = vmatpush3.bf16.msra.mxu1 %v10567_v24 }
 0x1a3   :  { %v7528_v7 = vpop.f32.mrf.mxu0  ;;  %1722 = vmatmul.mubr.bf16.vlgmr.msra.gmra.mxu0 %v1675_v25  ;;  %7842 = vmatprep.subr.bf16.mxu1 %v10278_v8 }
 0x1a4   :  { %7821 = vmatpush3.bf16.msra.mxu0 %v10284_v9  ;;  %1834 = vmatprep.mubr.bf16.mxu0 %v1795_v26 }
 0x1a5   :  { %v7550_v2 = vpop.f32.mrf.mxu1  ;;  %1762 = vmatmul.mubr.bf16.vlgmr.msra.gmra.mxu1 %v1683_v27  ;;  %v7529_v48 = vpop.f32.mrf.mxu0  ;;  %7822 = vmatprep.subr.bf16.mxu0 %v10295_v49 }
 0x1a6   :  { %7843 = vmatpush3.bf16.msra.mxu1 %v10301_v50  ;;  %v7530_v54 = vadd.f32 %v7529_v48, %v7528_v7  ;;  %1874 = vmatprep.mubr.bf16.mxu1 %v1797_v46 }
 0x1a7   :  { %v7551_v55 = vpop.f32.mrf.mxu1  ;;  %7844 = vmatprep.subr.bf16.mxu1 %v10307_v53  ;;  %v7531_v56 = vpop.f32.mrf.mxu0 }
 0x1a8   :  { %v1046_v60 = vadd.f32 %v7530_v54, %v10290_v11  ;;  %v7552_v63 = vadd.f32 %v7551_v55, %v7550_v2  ;;  %7823 = vmatpush3.bf16.msra.mxu0 %v10314_v57 }
 0x1a9   :  { %v7553_v12 = vpop.f32.mrf.mxu1  ;;  %7824 = vmatprep.subr.bf16.mxu0 %v10320_v59  ;;  %v7532_v32 = vpop.f32.mrf.mxu0 }
 0x1aa   :  { %v10699_v13 = vadd.f32 %v7552_v63, %v1046_v60  ;;  %7845 = vmatpush3.bf16.msra.mxu1 %v10328_v62  ;;  %v6998_v63 = vld.sshfl [vmem:[%s12853_s0 + $0x3c] sm:$0x33 pattern:$0x75316420]  ;;  %v1901_v32 = vrot.slane %v6996_v15, %v10040_v41 }
 0x1ab   :  { %v7554_v14 = vpop.f32.mrf.mxu1  ;;  %7846 = vmatprep.subr.bf16.mxu1 %v10334_v28  ;;  %v2007_v12 = vcombine.high %v6998_v63, %v6998_v63 }
 0x1ac   :  { %7825 = vmatpush3.bf16.msra.mxu0 %v10340_v34  ;;  %v1909_v16 = vcombine.high %v1901_v32, %v1901_v32 }
 0x1ad   :  { %7826 = vmatprep.subr.bf16.mxu0 %v10396_v31  ;;  %v2021_v14 = vrot.slane %v2007_v12, %v10040_v41 }
 0x1ae   :  { %7847 = vmatpush3.bf16.msra.mxu1 %v10347_v35 }
 0x1af   :  { %7848 = vmatprep.subr.bf16.mxu1 %v10403_v36 }
 0x1b0   :  { %7827 = vmatpush3.bf16.msra.mxu0 %v10409_v37 }
 0x1b1   :  { %7828 = vmatprep.subr.bf16.mxu0 %v10415_v38 }
 0x1b2   :  { %7849 = vmatpush3.bf16.msra.mxu1 %v10421_v39 }
 0x1b3   :  { %7850 = vmatprep.subr.bf16.mxu1 %v10427_v40 }
 0x1b4   :  { %7829 = vmatpush3.bf16.msra.mxu0 %v10433_v42 }
 0x1b5   :  { %7830 = vmatprep.subr.bf16.mxu0 %v10439_v43 }
 0x1b6   :  { %7851 = vmatpush3.bf16.msra.mxu1 %v10445_v44 }
 0x1b7   :  { %7852 = vmatprep.subr.bf16.mxu1 %v10451_v45 }
 0x1b8   :  { %7831 = vmatpush3.bf16.msra.mxu0 %v10462_v47 }
 0x1b9   :  { %7832 = vmatprep.subr.bf16.mxu0 %v10468_v0 }
 0x1ba   :  { %7853 = vmatpush3.bf16.msra.mxu1 %v10474_v1 }
 0x1bb   :  { %7854 = vmatprep.subr.bf16.mxu1 %v10482_v3 }
 0x1bc   :  { %7833 = vmatpush3.bf16.msra.mxu0 %v10488_v4 }
 0x1bd   :  { %7834 = vmatprep.subr.bf16.mxu0 %v10494_v6 }
 0x1be   :  { %7855 = vmatpush3.bf16.msra.mxu1 %v10502_v10 }
 0x1bf   :  { %7856 = vmatprep.subr.bf16.mxu1 %v10509_v51 }
 0x1c0   :  { %7835 = vmatpush3.bf16.msra.mxu0 %v10515_v52 }
 0x1c1   :  { %7864 = vmatprep.subr.bf16.mxu0 %v10271_v5 }
 0x1c2   :  { %7857 = vmatpush3.bf16.msra.mxu1 %v10567_v24 }
 0x1c3   :  { %v7572_v25 = vpop.f32.mrf.mxu0  ;;  %1835 = vmatmul.mubr.bf16.vlgmr.msra.gmra.mxu0 %v1788_v18  ;;  %7886 = vmatprep.subr.bf16.mxu1 %v10278_v8  ;;  %v2023_v18 = vcombine.high %v2021_v14, %v2021_v14 }
 0x1c4   :  { %7865 = vmatpush3.bf16.msra.mxu0 %v10284_v9  ;;  %1947 = vmatprep.mubr.bf16.mxu0 %v1908_v19 }
 0x1c5   :  { %v7594_v22 = vpop.f32.mrf.mxu1  ;;  %1875 = vmatmul.mubr.bf16.vlgmr.msra.gmra.mxu1 %v1796_v21  ;;  %v7573_v26 = vpop.f32.mrf.mxu0  ;;  %7866 = vmatprep.subr.bf16.mxu0 %v10295_v49 }
 0x1c6   :  { %7887 = vmatpush3.bf16.msra.mxu1 %v10301_v50  ;;  %v7574_v27 = vadd.f32 %v7573_v26, %v7572_v25  ;;  %1987 = vmatprep.mubr.bf16.mxu1 %v1910_v23 }
 0x1c7   :  { %v7595_v46 = vpop.f32.mrf.mxu1  ;;  %7888 = vmatprep.subr.bf16.mxu1 %v10307_v53  ;;  %v7575_v7 = vpop.f32.mrf.mxu0 }
 0x1c8   :  { %v1159_v2 = vadd.f32 %v7574_v27, %v10290_v11  ;;  %v7596_v48 = vadd.f32 %v7595_v46, %v7594_v22  ;;  %7867 = vmatpush3.bf16.msra.mxu0 %v10314_v57 }
 0x1c9   :  { %v7597_v54 = vpop.f32.mrf.mxu1  ;;  %7868 = vmatprep.subr.bf16.mxu0 %v10320_v59  ;;  %v7576_v55 = vpop.f32.mrf.mxu0 }
 0x1ca   :  { %v10739_v56 = vadd.f32 %v7596_v48, %v1159_v2  ;;  %7889 = vmatpush3.bf16.msra.mxu1 %v10328_v62  ;;  %v7000_v54 = vld.sshfl [vmem:[%s12853_s0 + $0x40] sm:$0x33 pattern:$0x75316420] }
 0x1cb   :  { %v7598_v60 = vpop.f32.mrf.mxu1  ;;  %7890 = vmatprep.subr.bf16.mxu1 %v10334_v28  ;;  %v2120_v55 = vcombine.high %v7000_v54, %v7000_v54 }
 0x1cc   :  { %7869 = vmatpush3.bf16.msra.mxu0 %v10340_v34  ;;  %v2014_v60 = vrot.slane %v6998_v63, %v10040_v41 }
 0x1cd   :  { %7870 = vmatprep.subr.bf16.mxu0 %v10396_v31  ;;  %v2134_v12 = vrot.slane %v2120_v55, %v10040_v41  ;;  %v10887_v55 = vld [vmem:[%s12854_s1 + $0xf0] sm:$0xff]  }
 0x1ce   :  { %7891 = vmatpush3.bf16.msra.mxu1 %v10347_v35 }
 0x1cf   :  { %7892 = vmatprep.subr.bf16.mxu1 %v10403_v36 }
 0x1d0   :  { %7871 = vmatpush3.bf16.msra.mxu0 %v10409_v37 }
 0x1d1   :  { %7872 = vmatprep.subr.bf16.mxu0 %v10415_v38 }
 0x1d2   :  { %7893 = vmatpush3.bf16.msra.mxu1 %v10421_v39 }
 0x1d3   :  { %7894 = vmatprep.subr.bf16.mxu1 %v10427_v40 }
 0x1d4   :  { %7873 = vmatpush3.bf16.msra.mxu0 %v10433_v42 }
 0x1d5   :  { %7874 = vmatprep.subr.bf16.mxu0 %v10439_v43 }
 0x1d6   :  { %7895 = vmatpush3.bf16.msra.mxu1 %v10445_v44 }
 0x1d7   :  { %7896 = vmatprep.subr.bf16.mxu1 %v10451_v45 }
 0x1d8   :  { %7875 = vmatpush3.bf16.msra.mxu0 %v10462_v47 }
 0x1d9   :  { %7876 = vmatprep.subr.bf16.mxu0 %v10468_v0 }
 0x1da   :  { %7897 = vmatpush3.bf16.msra.mxu1 %v10474_v1 }
 0x1db   :  { %7898 = vmatprep.subr.bf16.mxu1 %v10482_v3 }
 0x1dc   :  { %7877 = vmatpush3.bf16.msra.mxu0 %v10488_v4 }
 0x1dd   :  { %7878 = vmatprep.subr.bf16.mxu0 %v10494_v6 }
 0x1de   :  { %7899 = vmatpush3.bf16.msra.mxu1 %v10502_v10 }
 0x1df   :  { %7900 = vmatprep.subr.bf16.mxu1 %v10509_v51 }
 0x1e0   :  { %7879 = vmatpush3.bf16.msra.mxu0 %v10515_v52 }
 0x1e1   :  { %7908 = vmatprep.subr.bf16.mxu0 %v10271_v5 }
 0x1e2   :  { %7901 = vmatpush3.bf16.msra.mxu1 %v10567_v24 }
 0x1e3   :  { %v7616_v19 = vpop.f32.mrf.mxu0  ;;  %1948 = vmatmul.mubr.bf16.vlgmr.msra.gmra.mxu0 %v1901_v32  ;;  %7930 = vmatprep.subr.bf16.mxu1 %v10278_v8  ;;  %v2022_v32 = vcombine.high %v2014_v60, %v2014_v60 }
 0x1e4   :  { %7909 = vmatpush3.bf16.msra.mxu0 %v10284_v9  ;;  %2060 = vmatprep.mubr.bf16.mxu0 %v2021_v14  ;;  %v2136_v14 = vcombine.high %v2134_v12, %v2134_v12 }
 0x1e5   :  { %v7638_v15 = vpop.f32.mrf.mxu1  ;;  %1988 = vmatmul.mubr.bf16.vlgmr.msra.gmra.mxu1 %v1909_v16  ;;  %v7617_v21 = vpop.f32.mrf.mxu0  ;;  %7910 = vmatprep.subr.bf16.mxu0 %v10295_v49 }
 0x1e6   :  { %7931 = vmatpush3.bf16.msra.mxu1 %v10301_v50  ;;  %v7618_v23 = vadd.f32 %v7617_v21, %v7616_v19  ;;  %2100 = vmatprep.mubr.bf16.mxu1 %v2023_v18 }
 0x1e7   :  { %v7639_v25 = vpop.f32.mrf.mxu1  ;;  %7932 = vmatprep.subr.bf16.mxu1 %v10307_v53  ;;  %v7619_v22 = vpop.f32.mrf.mxu0 }
 0x1e8   :  { %v1272_v26 = vadd.f32 %v7618_v23, %v10290_v11  ;;  %v7640_v27 = vadd.f32 %v7639_v25, %v7638_v15  ;;  %7911 = vmatpush3.bf16.msra.mxu0 %v10314_v57  ;;  %v10869_v22 = vld [vmem:[%s12854_s1 + $0x38] sm:$0xff]  }
 0x1e9   :  { %v7641_v46 = vpop.f32.mrf.mxu1  ;;  %7912 = vmatprep.subr.bf16.mxu0 %v10320_v59  ;;  %v7620_v7 = vpop.f32.mrf.mxu0 }
 0x1ea   :  { %v10779_v2 = vadd.f32 %v7640_v27, %v1272_v26  ;;  %7933 = vmatpush3.bf16.msra.mxu1 %v10328_v62  ;;  %v10875_v46 = vld [vmem:[%s12854_s1 + $0x70] sm:$0xff]   ;;  %v10881_v7 = vld [vmem:[%s12854_s1 + $0xb8] sm:$0xff]  }
 0x1eb   :  { %v7642_v48 = vpop.f32.mrf.mxu1  ;;  %7934 = vmatprep.subr.bf16.mxu1 %v10334_v28 }
 0x1ec   :  { %7913 = vmatpush3.bf16.msra.mxu0 %v10340_v34 }
 0x1ed   :  { %7914 = vmatprep.subr.bf16.mxu0 %v10396_v31 }
 0x1ee   :  { %7935 = vmatpush3.bf16.msra.mxu1 %v10347_v35 }
 0x1ef   :  { %7936 = vmatprep.subr.bf16.mxu1 %v10403_v36 }
 0x1f0   :  { %7915 = vmatpush3.bf16.msra.mxu0 %v10409_v37 }
 0x1f1   :  { %7916 = vmatprep.subr.bf16.mxu0 %v10415_v38 }
 0x1f2   :  { %7937 = vmatpush3.bf16.msra.mxu1 %v10421_v39 }
 0x1f3   :  { %7938 = vmatprep.subr.bf16.mxu1 %v10427_v40 }
 0x1f4   :  { %7917 = vmatpush3.bf16.msra.mxu0 %v10433_v42 }
 0x1f5   :  { %7918 = vmatprep.subr.bf16.mxu0 %v10439_v43 }
 0x1f6   :  { %7939 = vmatpush3.bf16.msra.mxu1 %v10445_v44 }
 0x1f7   :  { %7940 = vmatprep.subr.bf16.mxu1 %v10451_v45 }
 0x1f8   :  { %7919 = vmatpush3.bf16.msra.mxu0 %v10462_v47 }
 0x1f9   :  { %7920 = vmatprep.subr.bf16.mxu0 %v10468_v0 }
 0x1fa   :  { %7941 = vmatpush3.bf16.msra.mxu1 %v10474_v1 }
 0x1fb   :  { %7942 = vmatprep.subr.bf16.mxu1 %v10482_v3 }
 0x1fc   :  { %7921 = vmatpush3.bf16.msra.mxu0 %v10488_v4 }
 0x1fd   :  { %7922 = vmatprep.subr.bf16.mxu0 %v10494_v6 }
 0x1fe   :  { %7943 = vmatpush3.bf16.msra.mxu1 %v10502_v10 }
 0x1ff   :  { %7944 = vmatprep.subr.bf16.mxu1 %v10509_v51 }
 0x200   :  { %7923 = vmatpush3.bf16.msra.mxu0 %v10515_v52 }
 0x201   :  { %7952 = vmatprep.subr.bf16.mxu0 %v10271_v5 }
 0x202   :  { %7945 = vmatpush3.bf16.msra.mxu1 %v10567_v24 }
 0x203   :  { %v7660_v16 = vpop.f32.mrf.mxu0  ;;  %2061 = vmatmul.mubr.bf16.vlgmr.msra.gmra.mxu0 %v2014_v60  ;;  %7974 = vmatprep.subr.bf16.mxu1 %v10278_v8 }
 0x204   :  { %7953 = vmatpush3.bf16.msra.mxu0 %v10284_v9  ;;  %2173 = vmatprep.mubr.bf16.mxu0 %v2134_v12  ;;  %v10893_v12 = vld [vmem:[%s12855_s2] ss:$0 sm:$0xff] }
 0x205   :  { %v7682_v63 = vpop.f32.mrf.mxu1  ;;  %2101 = vmatmul.mubr.bf16.vlgmr.msra.gmra.mxu1 %v2022_v32  ;;  %v7661_v18 = vpop.f32.mrf.mxu0  ;;  %7954 = vmatprep.subr.bf16.mxu0 %v10295_v49 }
 0x206   :  { %7975 = vmatpush3.bf16.msra.mxu1 %v10301_v50  ;;  %v7662_v19 = vadd.f32 %v7661_v18, %v7660_v16  ;;  %2213 = vmatprep.mubr.bf16.mxu1 %v2136_v14  ;;  %v10899_v16 = vld [vmem:[%s12854_s1 + $0x30] sm:$0xff]   ;;  %v10905_v18 = vld [vmem:[%s12854_s1 + $0x68] sm:$0xff]  }
 0x207   :  { %v7683_v5 = vpop.f32.mrf.mxu1  ;;  %7976 = vmatprep.subr.bf16.mxu1 %v10307_v53  ;;  %v7663_v15 = vpop.f32.mrf.mxu0  ;;  %v2127_v53 = vrot.slane %v7000_v54, %v10040_v41 }
 0x208   :  { %v1385_v21 = vadd.f32 %v7662_v19, %v10290_v11  ;;  %v7684_v23 = vadd.f32 %v7683_v5, %v7682_v63  ;;  %7955 = vmatpush3.bf16.msra.mxu0 %v10314_v57  ;;  %v10838_v11 = vld.sshfl [vmem:[%s12853_s0 + $0x44] sm:$0x33 pattern:$0x75316420]  ;;  %v10913_v15 = vld [vmem:[%s12854_s1 + $0xb0] sm:$0xff]  }
 0x209   :  { %v7685_v8 = vpop.f32.mrf.mxu1  ;;  %7956 = vmatprep.subr.bf16.mxu0 %v10320_v59  ;;  %v7664_v9 = vpop.f32.mrf.mxu0  ;;  %v2233_v50 = vcombine.high %v10838_v11, %v10838_v11  ;;  %v2135_v59 = vcombine.high %v2127_v53, %v2127_v53 }
 0x20a   :  { %v10819_v25 = vadd.f32 %v7684_v23, %v1385_v21  ;;  %7977 = vmatpush3.bf16.msra.mxu1 %v10328_v62  ;;  %v10856_v62 = vld [vmem:[%s12854_s1 + $0x78] sm:$0xff]   ;;  %v10919_v23 = vld [vmem:[%s12854_s1 + $0xe8] sm:$0xff]  }
 0x20b   :  { %v7686_v49 = vpop.f32.mrf.mxu1  ;;  %7978 = vmatprep.subr.bf16.mxu1 %v10334_v28  ;;  %v2247_v57 = vrot.slane %v2233_v50, %v10040_v41  ;;  %v10925_v8 = vld [vmem:[%s12854_s1 + $0x28] sm:$0xff]   ;;  %v11000_v50 = vld [vmem:[%s12854_s1 + $0x58] sm:$0xff]  }
 0x20c   :  { %7957 = vmatpush3.bf16.msra.mxu0 %v10340_v34  ;;  %v10932_v9 = vld [vmem:[%s12854_s1 + $0xa8] sm:$0xff]   ;;  %v10988_v49 = vld [vmem:[%s12854_s1 + $0xe0] sm:$0xff]  }
 0x20d   :  { %7958 = vmatprep.subr.bf16.mxu0 %v10396_v31  ;;  %v2249_v28 = vcombine.high %v2247_v57, %v2247_v57 }
 0x20e   :  { %7979 = vmatpush3.bf16.msra.mxu1 %v10347_v35  ;;  %v10863_v35 = vld [vmem:[%s12854_s1 + $0xf8] sm:$0xff]  }
 0x20f   :  { %7980 = vmatprep.subr.bf16.mxu1 %v10403_v36 }
 0x210   :  { %7959 = vmatpush3.bf16.msra.mxu0 %v10409_v37 }
 0x211   :  { %7960 = vmatprep.subr.bf16.mxu0 %v10415_v38 }
 0x212   :  { %7981 = vmatpush3.bf16.msra.mxu1 %v10421_v39 }
 0x213   :  { %7982 = vmatprep.subr.bf16.mxu1 %v10427_v40 }
 0x214   :  { %7961 = vmatpush3.bf16.msra.mxu0 %v10433_v42 }
 0x215   :  { %7962 = vmatprep.subr.bf16.mxu0 %v10439_v43 }
 0x216   :  { %7983 = vmatpush3.bf16.msra.mxu1 %v10445_v44 }
 0x217   :  { %7984 = vmatprep.subr.bf16.mxu1 %v10451_v45 }
 0x218   :  { %7963 = vmatpush3.bf16.msra.mxu0 %v10462_v47 }
 0x219   :  { %7964 = vmatprep.subr.bf16.mxu0 %v10468_v0 }
 0x21a   :  { %7985 = vmatpush3.bf16.msra.mxu1 %v10474_v1 }
 0x21b   :  { %7986 = vmatprep.subr.bf16.mxu1 %v10482_v3 }
 0x21c   :  { %7965 = vmatpush3.bf16.msra.mxu0 %v10488_v4 }
 0x21d   :  { %7966 = vmatprep.subr.bf16.mxu0 %v10494_v6 }
 0x21e   :  { %7987 = vmatpush3.bf16.msra.mxu1 %v10502_v10 }
 0x21f   :  { %7988 = vmatprep.subr.bf16.mxu1 %v10509_v51 }
 0x220   :  { %7967 = vmatpush3.bf16.msra.mxu0 %v10515_v52 }
 0x221   :  { %7996 = vmatprep.subr.bf16.mxu0 %v10856_v62 }
 0x222   :  { %7989 = vmatpush3.bf16.msra.mxu1 %v10567_v24 }
 0x223   :  { %v7704_v34 = vpop.f32.mrf.mxu0  ;;  %2174 = vmatmul.mubr.bf16.vlgmr.msra.gmra.mxu0 %v2127_v53  ;;  %8018 = vmatprep.subr.bf16.mxu1 %v10863_v35  ;;  %v11006_v53 = vld [vmem:[%s12854_s1 + $0xa0] sm:$0xff]  }
 0x224   :  { %7997 = vmatpush3.bf16.msra.mxu0 %v10869_v22  ;;  %2286 = vmatprep.mubr.bf16.mxu0 %v2247_v57  ;;  %v11012_v57 = vld [vmem:[%s12854_s1 + $0xd8] sm:$0xff]  }
 0x225   :  { %v7726_v26 = vpop.f32.mrf.mxu1  ;;  %2214 = vmatmul.mubr.bf16.vlgmr.msra.gmra.mxu1 %v2135_v59  ;;  %v7705_v27 = vpop.f32.mrf.mxu0  ;;  %7998 = vmatprep.subr.bf16.mxu0 %v10875_v46  ;;  %v11018_v59 = vld [vmem:[%s12854_s1 + $0x18] sm:$0xff]  }
 0x226   :  { %8019 = vmatpush3.bf16.msra.mxu1 %v10881_v7  ;;  %v7706_v48 = vadd.f32 %v7705_v27, %v7704_v34  ;;  %2326 = vmatprep.mubr.bf16.mxu1 %v2249_v28  ;;  %v11024_v28 = vld [vmem:[%s12854_s1 + $0x50] sm:$0xff]   ;;  %v11030_v34 = vld [vmem:[%s12854_s1 + $0x98] sm:$0xff]   ;;  %v11042_v27 = vld.sshfl [vmem:[%s12853_s0 + $0x4c] sm:$0x33 pattern:$0x75316420] }
 0x227   :  { %v7727_v54 = vpop.f32.mrf.mxu1  ;;  %8020 = vmatprep.subr.bf16.mxu1 %v10887_v55  ;;  %v7707_v60 = vpop.f32.mrf.mxu0 }
 0x228   :  { %v1498_v32 = vadd.f32 %v10893_v12, %v7706_v48  ;;  %v7728_v14 = vadd.f32 %v7727_v54, %v7726_v26  ;;  %7999 = vmatpush3.bf16.msra.mxu0 %v10899_v16  ;;  %v11036_v26 = vld [vmem:[%s12854_s1 + $0xd0] sm:$0xff]   ;;  %v11053_v54 = vld [vmem:[%s12854_s1 + $0x48] sm:$0xff]  }
 0x229   :  { %v7729_v63 = vpop.f32.mrf.mxu1  ;;  %8000 = vmatprep.subr.bf16.mxu0 %v10905_v18  ;;  %v7708_v19 = vpop.f32.mrf.mxu0  ;;  %v11047_v48 = vld [vmem:[%s12854_s1 + $0x10] sm:$0xff]  }
 0x22a   :  { %v10908_v5 = vadd.f32 %v7728_v14, %v1498_v32  ;;  %8021 = vmatpush3.bf16.msra.mxu1 %v10913_v15  ;;  %v11059_v60 = vld [vmem:[%s12854_s1 + $0x90] sm:$0xff]   ;;  %v2459_v32 = vcombine.high %v11042_v27, %v11042_v27  ;;  %v11067_v14 = vld [vmem:[%s12854_s1 + $0xc8] sm:$0xff]   ;;  %v11079_v19 = vld [vmem:[%s12854_s1 + $0x40] sm:$0xff]  }
 0x22b   :  { %v7730_v21 = vpop.f32.mrf.mxu1  ;;  %8022 = vmatprep.subr.bf16.mxu1 %v10919_v23  ;;  %v11073_v63 = vld [vmem:[%s12854_s1 + $0x8] sm:$0xff]  }
 0x22c   :  { %8001 = vmatpush3.bf16.msra.mxu0 %v10925_v8 }
 0x22d   :  { %8002 = vmatprep.subr.bf16.mxu0 %v10396_v31  ;;  %v10947_v31 = vld.sshfl [vmem:[%s12853_s0 + $0x48] sm:$0x33 pattern:$0x75316420] }
 0x22e   :  { %8023 = vmatpush3.bf16.msra.mxu1 %v10932_v9  ;;  %v2353_v21 = vrot.slane %v10947_v31, %v10040_v41 }
 0x22f   :  { %8024 = vmatprep.subr.bf16.mxu1 %v10403_v36  ;;  %v2346_v36 = vcombine.high %v10947_v31, %v10947_v31  ;;  %v11100_v31 = vld [vmem:[%s12854_s1] sm:$0xff]  }
 0x230   :  { %8003 = vmatpush3.bf16.msra.mxu0 %v10409_v37  ;;  %v2240_v37 = vrot.slane %v10838_v11, %v10040_v41  ;;  %v10994_v11 = vld [vmem:[%s12854_s1 + $0x20] sm:$0xff]  }
 0x231   :  { %8004 = vmatprep.subr.bf16.mxu0 %v10415_v38  ;;  %v2360_v38 = vrot.slane %v2346_v36, %v10040_v41  ;;  %v11087_v36 = vld [vmem:[%s12854_s1 + $0x88] sm:$0xff]  }
 0x232   :  { %8025 = vmatpush3.bf16.msra.mxu1 %v10421_v39  ;;  %v2248_v39 = vcombine.high %v2240_v37, %v2240_v37 }
 0x233   :  { %8026 = vmatprep.subr.bf16.mxu1 %v10427_v40  ;;  %v2362_v40 = vcombine.high %v2360_v38, %v2360_v38 }
 0x234   :  { %8005 = vmatpush3.bf16.msra.mxu0 %v10433_v42 }
 0x235   :  { %8006 = vmatprep.subr.bf16.mxu0 %v10439_v43 }
 0x236   :  { %8027 = vmatpush3.bf16.msra.mxu1 %v10445_v44 }
 0x237   :  { %8028 = vmatprep.subr.bf16.mxu1 %v10451_v45 }
 0x238   :  { %8007 = vmatpush3.bf16.msra.mxu0 %v10462_v47 }
 0x239   :  { %8008 = vmatprep.subr.bf16.mxu0 %v10468_v0 }
 0x23a   :  { %8029 = vmatpush3.bf16.msra.mxu1 %v10474_v1 }
 0x23b   :  { %8030 = vmatprep.subr.bf16.mxu1 %v10482_v3 }
 0x23c   :  { %8009 = vmatpush3.bf16.msra.mxu0 %v10488_v4 }
 0x23d   :  { %8010 = vmatprep.subr.bf16.mxu0 %v10494_v6 }
 0x23e   :  { %8031 = vmatpush3.bf16.msra.mxu1 %v10502_v10 }
 0x23f   :  { %8032 = vmatprep.subr.bf16.mxu1 %v10509_v51 }
 0x240   :  { %8011 = vmatpush3.bf16.msra.mxu0 %v10515_v52  ;;  %v10981_v52 = vld [vmem:[%s12854_s1 + $0x60] sm:$0xff]  }
 0x241   :  { %8040 = vmatprep.subr.bf16.mxu0 %v10856_v62 }
 0x242   :  { %8033 = vmatpush3.bf16.msra.mxu1 %v10567_v24 }
 0x243   :  { %v7748_v42 = vpop.f32.mrf.mxu0  ;;  %2287 = vmatmul.mubr.bf16.vlgmr.msra.gmra.mxu0 %v2240_v37  ;;  %8062 = vmatprep.subr.bf16.mxu1 %v10863_v35  ;;  %v2473_v37 = vrot.slane %v2459_v32, %v10040_v41  ;;  %v11132_v32 = vld.sshfl [vmem:[%s12853_s0 + $0x50] sm:$0x33 pattern:$0x75316420] }
 0x244   :  { %8041 = vmatpush3.bf16.msra.mxu0 %v10869_v22  ;;  %2399 = vmatprep.mubr.bf16.mxu0 %v2360_v38  ;;  %v11094_v38 = vld [vmem:[%s12854_s1 + $0xc0] sm:$0xff]  }
 0x245   :  { %v7770_v43 = vpop.f32.mrf.mxu1  ;;  %2327 = vmatmul.mubr.bf16.vlgmr.msra.gmra.mxu1 %v2248_v39  ;;  %v7749_v44 = vpop.f32.mrf.mxu0  ;;  %8042 = vmatprep.subr.bf16.mxu0 %v10875_v46  ;;  %v2361_v39 = vcombine.high %v2353_v21, %v2353_v21 }
 0x246   :  { %8063 = vmatpush3.bf16.msra.mxu1 %v10881_v7  ;;  %v7750_v45 = vadd.f32 %v7749_v44, %v7748_v42  ;;  %2439 = vmatprep.mubr.bf16.mxu1 %v2362_v40  ;;  %v2475_v40 = vcombine.high %v2473_v37, %v2473_v37 }
 0x247   :  { %v7771_v47 = vpop.f32.mrf.mxu1  ;;  %8064 = vmatprep.subr.bf16.mxu1 %v10887_v55  ;;  %v7751_v0 = vpop.f32.mrf.mxu0 }
 0x248   :  { %v1611_v1 = vadd.f32 %v10893_v12, %v7750_v45  ;;  %v7772_v3 = vadd.f32 %v7771_v47, %v7770_v43  ;;  %8043 = vmatpush3.bf16.msra.mxu0 %v10899_v16 }
 0x249   :  { %v7773_v4 = vpop.f32.mrf.mxu1  ;;  %8044 = vmatprep.subr.bf16.mxu0 %v10905_v18  ;;  %v7752_v6 = vpop.f32.mrf.mxu0 }
 0x24a   :  { %v10973_v10 = vadd.f32 %v7772_v3, %v1611_v1  ;;  %8065 = vmatpush3.bf16.msra.mxu1 %v10913_v15 }
 0x24b   :  { %v7774_v51 = vpop.f32.mrf.mxu1  ;;  %8066 = vmatprep.subr.bf16.mxu1 %v10919_v23 }
 0x24c   :  { %8045 = vmatpush3.bf16.msra.mxu0 %v10925_v8 }
 0x24d   :  { %8046 = vmatprep.subr.bf16.mxu0 %v10981_v52 }
 0x24e   :  { %8067 = vmatpush3.bf16.msra.mxu1 %v10932_v9 }
 0x24f   :  { %8068 = vmatprep.subr.bf16.mxu1 %v10988_v49 }
 0x250   :  { %8047 = vmatpush3.bf16.msra.mxu0 %v10994_v11 }
 0x251   :  { %8048 = vmatprep.subr.bf16.mxu0 %v11000_v50 }
 0x252   :  { %8069 = vmatpush3.bf16.msra.mxu1 %v11006_v53 }
 0x253   :  { %8070 = vmatprep.subr.bf16.mxu1 %v11012_v57 }
 0x254   :  { %8049 = vmatpush3.bf16.msra.mxu0 %v11018_v59 }
 0x255   :  { %8050 = vmatprep.subr.bf16.mxu0 %v11024_v28 }
 0x256   :  { %8071 = vmatpush3.bf16.msra.mxu1 %v11030_v34 }
 0x257   :  { %8072 = vmatprep.subr.bf16.mxu1 %v11036_v26 }
 0x258   :  { %8051 = vmatpush3.bf16.msra.mxu0 %v11047_v48 }
 0x259   :  { %8052 = vmatprep.subr.bf16.mxu0 %v11053_v54 }
 0x25a   :  { %8073 = vmatpush3.bf16.msra.mxu1 %v11059_v60 }
 0x25b   :  { %8074 = vmatprep.subr.bf16.mxu1 %v11067_v14 }
 0x25c   :  { %8053 = vmatpush3.bf16.msra.mxu0 %v11073_v63 }
 0x25d   :  { %8054 = vmatprep.subr.bf16.mxu0 %v11079_v19 }
 0x25e   :  { %8075 = vmatpush3.bf16.msra.mxu1 %v11087_v36 }
 0x25f   :  { %8076 = vmatprep.subr.bf16.mxu1 %v11094_v38 }
 0x260   :  { %8055 = vmatpush3.bf16.msra.mxu0 %v11100_v31 }
 0x261   :  { %8084 = vmatprep.subr.bf16.mxu0 %v10856_v62 }
 0x262   :  { %8077 = vmatpush3.bf16.msra.mxu1 %v10567_v24 }
 0x263   :  { %v7792_v42 = vpop.f32.mrf.mxu0  ;;  %2400 = vmatmul.mubr.bf16.vlgmr.msra.gmra.mxu0 %v2353_v21  ;;  %8106 = vmatprep.subr.bf16.mxu1 %v10863_v35  ;;  %v2572_v21 = vcombine.high %v11132_v32, %v11132_v32 }
 0x264   :  { %8085 = vmatpush3.bf16.msra.mxu0 %v10869_v22  ;;  %2512 = vmatprep.mubr.bf16.mxu0 %v2473_v37  ;;  %v2466_v37 = vrot.slane %v11042_v27, %v10040_v41 }
 0x265   :  { %v7814_v43 = vpop.f32.mrf.mxu1  ;;  %2440 = vmatmul.mubr.bf16.vlgmr.msra.gmra.mxu1 %v2361_v39  ;;  %v7793_v44 = vpop.f32.mrf.mxu0  ;;  %8086 = vmatprep.subr.bf16.mxu0 %v10875_v46  ;;  %v2586_v39 = vrot.slane %v2572_v21, %v10040_v41 }
 0x266   :  { %8107 = vmatpush3.bf16.msra.mxu1 %v10881_v7  ;;  %v7794_v45 = vadd.f32 %v7793_v44, %v7792_v42  ;;  %2552 = vmatprep.mubr.bf16.mxu1 %v2475_v40  ;;  %v2474_v40 = vcombine.high %v2466_v37, %v2466_v37  ;;  %v11152_v42 = vld [vmem:[%s12854_s1 + $0x80] sm:$0xff]  }
 0x267   :  { %v7815_v47 = vpop.f32.mrf.mxu1  ;;  %8108 = vmatprep.subr.bf16.mxu1 %v10887_v55  ;;  %v7795_v24 = vpop.f32.mrf.mxu0 }
 0x268   :  { %v1724_v0 = vadd.f32 %v10893_v12, %v7794_v45  ;;  %v7816_v1 = vadd.f32 %v7815_v47, %v7814_v43  ;;  %8087 = vmatpush3.bf16.msra.mxu0 %v10899_v16  ;;  %v2588_v43 = vcombine.high %v2586_v39, %v2586_v39 }
 0x269   :  { %v7817_v3 = vpop.f32.mrf.mxu1  ;;  %8088 = vmatprep.subr.bf16.mxu0 %v10905_v18  ;;  %v7796_v4 = vpop.f32.mrf.mxu0 }
 0x26a   :  { %v11113_v6 = vadd.f32 %v7816_v1, %v1724_v0  ;;  %8109 = vmatpush3.bf16.msra.mxu1 %v10913_v15 }
 0x26b   :  { %v7818_v51 = vpop.f32.mrf.mxu1  ;;  %8110 = vmatprep.subr.bf16.mxu1 %v10919_v23 }
 0x26c   :  { %8089 = vmatpush3.bf16.msra.mxu0 %v10925_v8 }
 0x26d   :  { %8090 = vmatprep.subr.bf16.mxu0 %v10981_v52 }
 0x26e   :  { %8111 = vmatpush3.bf16.msra.mxu1 %v10932_v9 }
 0x26f   :  { %8112 = vmatprep.subr.bf16.mxu1 %v10988_v49 }
 0x270   :  { %8091 = vmatpush3.bf16.msra.mxu0 %v10994_v11 }
 0x271   :  { %8092 = vmatprep.subr.bf16.mxu0 %v11000_v50 }
 0x272   :  { %8113 = vmatpush3.bf16.msra.mxu1 %v11006_v53 }
 0x273   :  { %8114 = vmatprep.subr.bf16.mxu1 %v11012_v57 }
 0x274   :  { %8093 = vmatpush3.bf16.msra.mxu0 %v11018_v59 }
 0x275   :  { %8094 = vmatprep.subr.bf16.mxu0 %v11024_v28 }
 0x276   :  { %8115 = vmatpush3.bf16.msra.mxu1 %v11030_v34 }
 0x277   :  { %8116 = vmatprep.subr.bf16.mxu1 %v11036_v26 }
 0x278   :  { %8095 = vmatpush3.bf16.msra.mxu0 %v11047_v48 }
 0x279   :  { %8096 = vmatprep.subr.bf16.mxu0 %v11053_v54 }
 0x27a   :  { %8117 = vmatpush3.bf16.msra.mxu1 %v11059_v60 }
 0x27b   :  { %8118 = vmatprep.subr.bf16.mxu1 %v11067_v14 }
 0x27c   :  { %8097 = vmatpush3.bf16.msra.mxu0 %v11073_v63 }
 0x27d   :  { %8098 = vmatprep.subr.bf16.mxu0 %v11079_v19 }
 0x27e   :  { %8119 = vmatpush3.bf16.msra.mxu1 %v11087_v36 }
 0x27f   :  { %8120 = vmatprep.subr.bf16.mxu1 %v11094_v38 }
 0x280   :  { %8099 = vmatpush3.bf16.msra.mxu0 %v11100_v31 }
 0x281   :  { %8128 = vmatprep.subr.bf16.mxu0 %v10856_v62 }
 0x282   :  { %8121 = vmatpush3.bf16.msra.mxu1 %v11152_v42 }
 0x283   :  { %v7836_v27 = vpop.f32.mrf.mxu0  ;;  %2513 = vmatmul.mubr.bf16.vlgmr.msra.gmra.mxu0 %v2466_v37  ;;  %8150 = vmatprep.subr.bf16.mxu1 %v10863_v35 }
 0x284   :  { %8129 = vmatpush3.bf16.msra.mxu0 %v10869_v22  ;;  %2625 = vmatprep.mubr.bf16.mxu0 %v2586_v39  ;;  %v7010_v39 = vld.sshfl [vmem:[%s12853_s0 + $0x54] sm:$0x33 pattern:$0x75316420] }
 0x285   :  { %v7858_v44 = vpop.f32.mrf.mxu1  ;;  %2553 = vmatmul.mubr.bf16.vlgmr.msra.gmra.mxu1 %v2474_v40  ;;  %v7837_v45 = vpop.f32.mrf.mxu0  ;;  %8130 = vmatprep.subr.bf16.mxu0 %v10875_v46  ;;  %v2685_v40 = vcombine.high %v7010_v39, %v7010_v39 }
 0x286   :  { %8151 = vmatpush3.bf16.msra.mxu1 %v10881_v7  ;;  %v7838_v47 = vadd.f32 %v7837_v45, %v7836_v27  ;;  %2665 = vmatprep.mubr.bf16.mxu1 %v2588_v43  ;;  %v2579_v43 = vrot.slane %v11132_v32, %v10040_v41 }
 0x287   :  { %v7859_v24 = vpop.f32.mrf.mxu1  ;;  %8152 = vmatprep.subr.bf16.mxu1 %v10887_v55  ;;  %v7839_v0 = vpop.f32.mrf.mxu0  ;;  %v2699_v27 = vrot.slane %v2685_v40, %v10040_v41 }
 0x288   :  { %v1837_v1 = vadd.f32 %v10893_v12, %v7838_v47  ;;  %v7860_v3 = vadd.f32 %v7859_v24, %v7858_v44  ;;  %8131 = vmatpush3.bf16.msra.mxu0 %v10899_v16  ;;  %v2587_v44 = vcombine.high %v2579_v43, %v2579_v43 }
 0x289   :  { %v7861_v4 = vpop.f32.mrf.mxu1  ;;  %8132 = vmatprep.subr.bf16.mxu0 %v10905_v18  ;;  %v7840_v51 = vpop.f32.mrf.mxu0  ;;  %v2701_v45 = vcombine.high %v2699_v27, %v2699_v27 }
 0x28a   :  { %v11163_v21 = vadd.f32 %v7860_v3, %v1837_v1  ;;  %8153 = vmatpush3.bf16.msra.mxu1 %v10913_v15 }
 0x28b   :  { %v7862_v37 = vpop.f32.mrf.mxu1  ;;  %8154 = vmatprep.subr.bf16.mxu1 %v10919_v23 }
 0x28c   :  { %8133 = vmatpush3.bf16.msra.mxu0 %v10925_v8 }
 0x28d   :  { %8134 = vmatprep.subr.bf16.mxu0 %v10981_v52 }
 0x28e   :  { %8155 = vmatpush3.bf16.msra.mxu1 %v10932_v9 }
 0x28f   :  { %8156 = vmatprep.subr.bf16.mxu1 %v10988_v49 }
 0x290   :  { %8135 = vmatpush3.bf16.msra.mxu0 %v10994_v11 }
 0x291   :  { %8136 = vmatprep.subr.bf16.mxu0 %v11000_v50 }
 0x292   :  { %8157 = vmatpush3.bf16.msra.mxu1 %v11006_v53 }
 0x293   :  { %8158 = vmatprep.subr.bf16.mxu1 %v11012_v57 }
 0x294   :  { %8137 = vmatpush3.bf16.msra.mxu0 %v11018_v59 }
 0x295   :  { %8138 = vmatprep.subr.bf16.mxu0 %v11024_v28 }
 0x296   :  { %8159 = vmatpush3.bf16.msra.mxu1 %v11030_v34 }
 0x297   :  { %8160 = vmatprep.subr.bf16.mxu1 %v11036_v26 }
 0x298   :  { %8139 = vmatpush3.bf16.msra.mxu0 %v11047_v48 }
 0x299   :  { %8140 = vmatprep.subr.bf16.mxu0 %v11053_v54 }
 0x29a   :  { %8161 = vmatpush3.bf16.msra.mxu1 %v11059_v60 }
 0x29b   :  { %8162 = vmatprep.subr.bf16.mxu1 %v11067_v14 }
 0x29c   :  { %8141 = vmatpush3.bf16.msra.mxu0 %v11073_v63 }
 0x29d   :  { %8142 = vmatprep.subr.bf16.mxu0 %v11079_v19 }
 0x29e   :  { %8163 = vmatpush3.bf16.msra.mxu1 %v11087_v36 }
 0x29f   :  { %8164 = vmatprep.subr.bf16.mxu1 %v11094_v38 }
 0x2a0   :  { %8143 = vmatpush3.bf16.msra.mxu0 %v11100_v31 }
 0x2a1   :  { %8172 = vmatprep.subr.bf16.mxu0 %v10856_v62 }
 0x2a2   :  { %8165 = vmatpush3.bf16.msra.mxu1 %v11152_v42 }
 0x2a3   :  { %v7880_v47 = vpop.f32.mrf.mxu0  ;;  %2626 = vmatmul.mubr.bf16.vlgmr.msra.gmra.mxu0 %v2579_v43  ;;  %8194 = vmatprep.subr.bf16.mxu1 %v10863_v35 }
 0x2a4   :  { %8173 = vmatpush3.bf16.msra.mxu0 %v10869_v22  ;;  %2738 = vmatprep.mubr.bf16.mxu0 %v2699_v27 }
 0x2a5   :  { %v7902_v32 = vpop.f32.mrf.mxu1  ;;  %2666 = vmatmul.mubr.bf16.vlgmr.msra.gmra.mxu1 %v2587_v44  ;;  %v7881_v24 = vpop.f32.mrf.mxu0  ;;  %8174 = vmatprep.subr.bf16.mxu0 %v10875_v46  ;;  %v7012_v44 = vld.sshfl [vmem:[%s12853_s0 + $0x58] sm:$0x33 pattern:$0x75316420] }
 0x2a6   :  { %8195 = vmatpush3.bf16.msra.mxu1 %v10881_v7  ;;  %v7882_v0 = vadd.f32 %v7881_v24, %v7880_v47  ;;  %2778 = vmatprep.mubr.bf16.mxu1 %v2701_v45  ;;  %v2798_v45 = vcombine.high %v7012_v44, %v7012_v44  ;;  %v2692_v47 = vrot.slane %v7010_v39, %v10040_v41 }
 0x2a7   :  { %v7903_v1 = vpop.f32.mrf.mxu1  ;;  %8196 = vmatprep.subr.bf16.mxu1 %v10887_v55  ;;  %v7883_v3 = vpop.f32.mrf.mxu0 }
 0x2a8   :  { %v1950_v4 = vadd.f32 %v10893_v12, %v7882_v0  ;;  %v7904_v51 = vadd.f32 %v7903_v1, %v7902_v32  ;;  %8175 = vmatpush3.bf16.msra.mxu0 %v10899_v16  ;;  %v2812_v32 = vrot.slane %v2798_v45, %v10040_v41  ;;  %v2700_v24 = vcombine.high %v2692_v47, %v2692_v47 }
 0x2a9   :  { %v7905_v37 = vpop.f32.mrf.mxu1  ;;  %8176 = vmatprep.subr.bf16.mxu0 %v10905_v18  ;;  %v7884_v40 = vpop.f32.mrf.mxu0 }
 0x2aa   :  { %v11204_v43 = vadd.f32 %v7904_v51, %v1950_v4  ;;  %8197 = vmatpush3.bf16.msra.mxu1 %v10913_v15  ;;  %v2814_v0 = vcombine.high %v2812_v32, %v2812_v32 }
 0x2ab   :  { %v7906_v27 = vpop.f32.mrf.mxu1  ;;  %8198 = vmatprep.subr.bf16.mxu1 %v10919_v23 }
 0x2ac   :  { %12868 = vst [vmem:[#allocation6_spill] sm:$0xff] %v11204_v43  ;;  %8177 = vmatpush3.bf16.msra.mxu0 %v10925_v8 }
 0x2ad   :  { %8178 = vmatprep.subr.bf16.mxu0 %v10981_v52 }
 0x2ae   :  { %8199 = vmatpush3.bf16.msra.mxu1 %v10932_v9 }
 0x2af   :  { %8200 = vmatprep.subr.bf16.mxu1 %v10988_v49 }
 0x2b0   :  { %8179 = vmatpush3.bf16.msra.mxu0 %v10994_v11 }
 0x2b1   :  { %8180 = vmatprep.subr.bf16.mxu0 %v11000_v50 }
 0x2b2   :  { %8201 = vmatpush3.bf16.msra.mxu1 %v11006_v53 }
 0x2b3   :  { %8202 = vmatprep.subr.bf16.mxu1 %v11012_v57 }
 0x2b4   :  { %8181 = vmatpush3.bf16.msra.mxu0 %v11018_v59 }
 0x2b5   :  { %8182 = vmatprep.subr.bf16.mxu0 %v11024_v28 }
 0x2b6   :  { %8203 = vmatpush3.bf16.msra.mxu1 %v11030_v34 }
 0x2b7   :  { %8204 = vmatprep.subr.bf16.mxu1 %v11036_v26 }
 0x2b8   :  { %8183 = vmatpush3.bf16.msra.mxu0 %v11047_v48 }
 0x2b9   :  { %8184 = vmatprep.subr.bf16.mxu0 %v11053_v54 }
 0x2ba   :  { %8205 = vmatpush3.bf16.msra.mxu1 %v11059_v60 }
 0x2bb   :  { %8206 = vmatprep.subr.bf16.mxu1 %v11067_v14 }
 0x2bc   :  { %8185 = vmatpush3.bf16.msra.mxu0 %v11073_v63 }
 0x2bd   :  { %8186 = vmatprep.subr.bf16.mxu0 %v11079_v19 }
 0x2be   :  { %8207 = vmatpush3.bf16.msra.mxu1 %v11087_v36 }
 0x2bf   :  { %8208 = vmatprep.subr.bf16.mxu1 %v11094_v38 }
 0x2c0   :  { %8187 = vmatpush3.bf16.msra.mxu0 %v11100_v31 }
 0x2c1   :  { %8216 = vmatprep.subr.bf16.mxu0 %v10856_v62 }
 0x2c2   :  { %8209 = vmatpush3.bf16.msra.mxu1 %v11152_v42 }
 0x2c3   :  { %v7924_v1 = vpop.f32.mrf.mxu0  ;;  %2739 = vmatmul.mubr.bf16.vlgmr.msra.gmra.mxu0 %v2692_v47  ;;  %8238 = vmatprep.subr.bf16.mxu1 %v10863_v35 }
 0x2c4   :  { %8217 = vmatpush3.bf16.msra.mxu0 %v10869_v22  ;;  %2851 = vmatprep.mubr.bf16.mxu0 %v2812_v32 }
 0x2c5   :  { %v7946_v39 = vpop.f32.mrf.mxu1  ;;  %2779 = vmatmul.mubr.bf16.vlgmr.msra.gmra.mxu1 %v2700_v24  ;;  %v7925_v3 = vpop.f32.mrf.mxu0  ;;  %8218 = vmatprep.subr.bf16.mxu0 %v10875_v46 }
 0x2c6   :  { %8239 = vmatpush3.bf16.msra.mxu1 %v10881_v7  ;;  %v7926_v4 = vadd.f32 %v7925_v3, %v7924_v1  ;;  %2891 = vmatprep.mubr.bf16.mxu1 %v2814_v0  ;;  %v7014_v0 = vld.sshfl [vmem:[%s12853_s0 + $0x5c] sm:$0x33 pattern:$0x75316420] }
 0x2c7   :  { %v7947_v51 = vpop.f32.mrf.mxu1  ;;  %8240 = vmatprep.subr.bf16.mxu1 %v10887_v55  ;;  %v7927_v37 = vpop.f32.mrf.mxu0  ;;  %v2911_v1 = vcombine.high %v7014_v0, %v7014_v0 }
 0x2c8   :  { %v2063_v40 = vadd.f32 %v10893_v12, %v7926_v4  ;;  %v7948_v27 = vadd.f32 %v7947_v51, %v7946_v39  ;;  %8219 = vmatpush3.bf16.msra.mxu0 %v10899_v16  ;;  %v2805_v39 = vrot.slane %v7012_v44, %v10040_v41 }
 0x2c9   :  { %v7949_v45 = vpop.f32.mrf.mxu1  ;;  %8220 = vmatprep.subr.bf16.mxu0 %v10905_v18  ;;  %v7928_v47 = vpop.f32.mrf.mxu0  ;;  %v2925_v3 = vrot.slane %v2911_v1, %v10040_v41 }
 0x2ca   :  { %v11244_v32 = vadd.f32 %v7948_v27, %v2063_v40  ;;  %8241 = vmatpush3.bf16.msra.mxu1 %v10913_v15  ;;  %v2813_v4 = vcombine.high %v2805_v39, %v2805_v39 }
 0x2cb   :  { %v7950_v24 = vpop.f32.mrf.mxu1  ;;  %8242 = vmatprep.subr.bf16.mxu1 %v10919_v23  ;;  %v2927_v51 = vcombine.high %v2925_v3, %v2925_v3 }
 0x2cc   :  { %8221 = vmatpush3.bf16.msra.mxu0 %v10925_v8 }
 0x2cd   :  { %8222 = vmatprep.subr.bf16.mxu0 %v10981_v52 }
 0x2ce   :  { %8243 = vmatpush3.bf16.msra.mxu1 %v10932_v9 }
 0x2cf   :  { %8244 = vmatprep.subr.bf16.mxu1 %v10988_v49 }
 0x2d0   :  { %8223 = vmatpush3.bf16.msra.mxu0 %v10994_v11 }
 0x2d1   :  { %8224 = vmatprep.subr.bf16.mxu0 %v11000_v50 }
 0x2d2   :  { %8245 = vmatpush3.bf16.msra.mxu1 %v11006_v53 }
 0x2d3   :  { %8246 = vmatprep.subr.bf16.mxu1 %v11012_v57 }
 0x2d4   :  { %8225 = vmatpush3.bf16.msra.mxu0 %v11018_v59 }
 0x2d5   :  { %8226 = vmatprep.subr.bf16.mxu0 %v11024_v28 }
 0x2d6   :  { %8247 = vmatpush3.bf16.msra.mxu1 %v11030_v34 }
 0x2d7   :  { %8248 = vmatprep.subr.bf16.mxu1 %v11036_v26 }
 0x2d8   :  { %8227 = vmatpush3.bf16.msra.mxu0 %v11047_v48 }
 0x2d9   :  { %8228 = vmatprep.subr.bf16.mxu0 %v11053_v54 }
 0x2da   :  { %8249 = vmatpush3.bf16.msra.mxu1 %v11059_v60 }
 0x2db   :  { %8250 = vmatprep.subr.bf16.mxu1 %v11067_v14 }
 0x2dc   :  { %8229 = vmatpush3.bf16.msra.mxu0 %v11073_v63 }
 0x2dd   :  { %8230 = vmatprep.subr.bf16.mxu0 %v11079_v19 }
 0x2de   :  { %8251 = vmatpush3.bf16.msra.mxu1 %v11087_v36 }
 0x2df   :  { %8252 = vmatprep.subr.bf16.mxu1 %v11094_v38 }
 0x2e0   :  { %8231 = vmatpush3.bf16.msra.mxu0 %v11100_v31 }
 0x2e1   :  { %8260 = vmatprep.subr.bf16.mxu0 %v10856_v62 }
 0x2e2   :  { %8253 = vmatpush3.bf16.msra.mxu1 %v11152_v42 }
 0x2e3   :  { %v7968_v37 = vpop.f32.mrf.mxu0  ;;  %2852 = vmatmul.mubr.bf16.vlgmr.msra.gmra.mxu0 %v2805_v39  ;;  %8282 = vmatprep.subr.bf16.mxu1 %v10863_v35 }
 0x2e4   :  { %8261 = vmatpush3.bf16.msra.mxu0 %v10869_v22  ;;  %2964 = vmatprep.mubr.bf16.mxu0 %v2925_v3 }
 0x2e5   :  { %v7990_v44 = vpop.f32.mrf.mxu1  ;;  %2892 = vmatmul.mubr.bf16.vlgmr.msra.gmra.mxu1 %v2813_v4  ;;  %v7969_v40 = vpop.f32.mrf.mxu0  ;;  %8262 = vmatprep.subr.bf16.mxu0 %v10875_v46 }
 0x2e6   :  { %8283 = vmatpush3.bf16.msra.mxu1 %v10881_v7  ;;  %v7970_v27 = vadd.f32 %v7969_v40, %v7968_v37  ;;  %3004 = vmatprep.mubr.bf16.mxu1 %v2927_v51  ;;  %v2918_v37 = vrot.slane %v7014_v0, %v10040_v41 }
 0x2e7   :  { %v7991_v45 = vpop.f32.mrf.mxu1  ;;  %8284 = vmatprep.subr.bf16.mxu1 %v10887_v55  ;;  %v7971_v47 = vpop.f32.mrf.mxu0 }
 0x2e8   :  { %v2176_v24 = vadd.f32 %v10893_v12, %v7970_v27  ;;  %v7992_v1 = vadd.f32 %v7991_v45, %v7990_v44  ;;  %8263 = vmatpush3.bf16.msra.mxu0 %v10899_v16  ;;  %v2926_v40 = vcombine.high %v2918_v37, %v2918_v37 }
 0x2e9   :  { %v7993_v39 = vpop.f32.mrf.mxu1  ;;  %8264 = vmatprep.subr.bf16.mxu0 %v10905_v18  ;;  %v7972_v3 = vpop.f32.mrf.mxu0 }
 0x2ea   :  { %v11284_v4 = vadd.f32 %v7992_v1, %v2176_v24  ;;  %8285 = vmatpush3.bf16.msra.mxu1 %v10913_v15 }
 0x2eb   :  { %v7994_v33 = vpop.f32.mrf.mxu1  ;;  %8286 = vmatprep.subr.bf16.mxu1 %v10919_v23 }
 0x2ec   :  { %12869 = vst [vmem:[#allocation7_spill] sm:$0xff] %v11284_v4  ;;  %8265 = vmatpush3.bf16.msra.mxu0 %v10925_v8  ;;  %v7016_v33 = vld.sshfl [vmem:[%s12853_s0 + $0x60] sm:$0x33 pattern:$0x75316420] }
 0x2ed   :  { %8266 = vmatprep.subr.bf16.mxu0 %v10981_v52  ;;  %v3024_v51 = vcombine.high %v7016_v33, %v7016_v33 }
 0x2ee   :  { %8287 = vmatpush3.bf16.msra.mxu1 %v10932_v9 }
 0x2ef   :  { %8288 = vmatprep.subr.bf16.mxu1 %v10988_v49  ;;  %v3038_v44 = vrot.slane %v3024_v51, %v10040_v41 }
 0x2f0   :  { %8267 = vmatpush3.bf16.msra.mxu0 %v10994_v11 }
 0x2f1   :  { %8268 = vmatprep.subr.bf16.mxu0 %v11000_v50  ;;  %v3040_v27 = vcombine.high %v3038_v44, %v3038_v44 }
 0x2f2   :  { %8289 = vmatpush3.bf16.msra.mxu1 %v11006_v53 }
 0x2f3   :  { %8290 = vmatprep.subr.bf16.mxu1 %v11012_v57 }
 0x2f4   :  { %8269 = vmatpush3.bf16.msra.mxu0 %v11018_v59 }
 0x2f5   :  { %8270 = vmatprep.subr.bf16.mxu0 %v11024_v28 }
 0x2f6   :  { %8291 = vmatpush3.bf16.msra.mxu1 %v11030_v34 }
 0x2f7   :  { %8292 = vmatprep.subr.bf16.mxu1 %v11036_v26 }
 0x2f8   :  { %8271 = vmatpush3.bf16.msra.mxu0 %v11047_v48 }
 0x2f9   :  { %8272 = vmatprep.subr.bf16.mxu0 %v11053_v54 }
 0x2fa   :  { %8293 = vmatpush3.bf16.msra.mxu1 %v11059_v60 }
 0x2fb   :  { %8294 = vmatprep.subr.bf16.mxu1 %v11067_v14 }
 0x2fc   :  { %8273 = vmatpush3.bf16.msra.mxu0 %v11073_v63 }
 0x2fd   :  { %8274 = vmatprep.subr.bf16.mxu0 %v11079_v19 }
 0x2fe   :  { %8295 = vmatpush3.bf16.msra.mxu1 %v11087_v36 }
 0x2ff   :  { %8296 = vmatprep.subr.bf16.mxu1 %v11094_v38 }
 0x300   :  { %8275 = vmatpush3.bf16.msra.mxu0 %v11100_v31 }
 0x301   :  { %8304 = vmatprep.subr.bf16.mxu0 %v10856_v62 }
 0x302   :  { %8297 = vmatpush3.bf16.msra.mxu1 %v11152_v42 }
 0x303   :  { %v8012_v45 = vpop.f32.mrf.mxu0  ;;  %2965 = vmatmul.mubr.bf16.vlgmr.msra.gmra.mxu0 %v2918_v37  ;;  %8326 = vmatprep.subr.bf16.mxu1 %v10863_v35 }
 0x304   :  { %8305 = vmatpush3.bf16.msra.mxu0 %v10869_v22  ;;  %3077 = vmatprep.mubr.bf16.mxu0 %v3038_v44 }
 0x305   :  { %v8034_v0 = vpop.f32.mrf.mxu1  ;;  %3005 = vmatmul.mubr.bf16.vlgmr.msra.gmra.mxu1 %v2926_v40  ;;  %v8013_v47 = vpop.f32.mrf.mxu0  ;;  %8306 = vmatprep.subr.bf16.mxu0 %v10875_v46 }
 0x306   :  { %8327 = vmatpush3.bf16.msra.mxu1 %v10881_v7  ;;  %v8014_v24 = vadd.f32 %v8013_v47, %v8012_v45  ;;  %3117 = vmatprep.mubr.bf16.mxu1 %v3040_v27  ;;  %v3031_v45 = vrot.slane %v7016_v33, %v10040_v41 }
 0x307   :  { %v8035_v1 = vpop.f32.mrf.mxu1  ;;  %8328 = vmatprep.subr.bf16.mxu1 %v10887_v55  ;;  %v8015_v39 = vpop.f32.mrf.mxu0 }
 0x308   :  { %v2289_v3 = vadd.f32 %v10893_v12, %v8014_v24  ;;  %v8036_v51 = vadd.f32 %v8035_v1, %v8034_v0  ;;  %8307 = vmatpush3.bf16.msra.mxu0 %v10899_v16  ;;  %v3039_v47 = vcombine.high %v3031_v45, %v3031_v45 }
 0x309   :  { %v8037_v37 = vpop.f32.mrf.mxu1  ;;  %8308 = vmatprep.subr.bf16.mxu0 %v10905_v18  ;;  %v8016_v44 = vpop.f32.mrf.mxu0 }
 0x30a   :  { %v11324_v40 = vadd.f32 %v8036_v51, %v2289_v3  ;;  %8329 = vmatpush3.bf16.msra.mxu1 %v10913_v15 }
 0x30b   :  { %v8038_v4 = vpop.f32.mrf.mxu1  ;;  %8330 = vmatprep.subr.bf16.mxu1 %v10919_v23 }
 0x30c   :  { %12870 = vst [vmem:[#allocation8_spill] sm:$0xff] %v11324_v40  ;;  %8309 = vmatpush3.bf16.msra.mxu0 %v10925_v8  ;;  %v7018_v4 = vld.sshfl [vmem:[%s12853_s0 + $0x64] sm:$0x33 pattern:$0x75316420] }
 0x30d   :  { %8310 = vmatprep.subr.bf16.mxu0 %v10981_v52  ;;  %v3137_v27 = vcombine.high %v7018_v4, %v7018_v4 }
 0x30e   :  { %8331 = vmatpush3.bf16.msra.mxu1 %v10932_v9 }
 0x30f   :  { %8332 = vmatprep.subr.bf16.mxu1 %v10988_v49  ;;  %v3151_v0 = vrot.slane %v3137_v27, %v10040_v41 }
 0x310   :  { %8311 = vmatpush3.bf16.msra.mxu0 %v10994_v11 }
 0x311   :  { %8312 = vmatprep.subr.bf16.mxu0 %v11000_v50  ;;  %v3153_v24 = vcombine.high %v3151_v0, %v3151_v0 }
 0x312   :  { %8333 = vmatpush3.bf16.msra.mxu1 %v11006_v53 }
 0x313   :  { %8334 = vmatprep.subr.bf16.mxu1 %v11012_v57 }
 0x314   :  { %8313 = vmatpush3.bf16.msra.mxu0 %v11018_v59 }
 0x315   :  { %8314 = vmatprep.subr.bf16.mxu0 %v11024_v28 }
 0x316   :  { %8335 = vmatpush3.bf16.msra.mxu1 %v11030_v34 }
 0x317   :  { %8336 = vmatprep.subr.bf16.mxu1 %v11036_v26 }
 0x318   :  { %8315 = vmatpush3.bf16.msra.mxu0 %v11047_v48 }
 0x319   :  { %8316 = vmatprep.subr.bf16.mxu0 %v11053_v54 }
 0x31a   :  { %8337 = vmatpush3.bf16.msra.mxu1 %v11059_v60 }
 0x31b   :  { %8338 = vmatprep.subr.bf16.mxu1 %v11067_v14 }
 0x31c   :  { %8317 = vmatpush3.bf16.msra.mxu0 %v11073_v63 }
 0x31d   :  { %8318 = vmatprep.subr.bf16.mxu0 %v11079_v19 }
 0x31e   :  { %8339 = vmatpush3.bf16.msra.mxu1 %v11087_v36 }
 0x31f   :  { %8340 = vmatprep.subr.bf16.mxu1 %v11094_v38 }
 0x320   :  { %8319 = vmatpush3.bf16.msra.mxu0 %v11100_v31 }
 0x321   :  { %8348 = vmatprep.subr.bf16.mxu0 %v10856_v62 }
 0x322   :  { %8341 = vmatpush3.bf16.msra.mxu1 %v11152_v42 }
 0x323   :  { %v8056_v1 = vpop.f32.mrf.mxu0  ;;  %3078 = vmatmul.mubr.bf16.vlgmr.msra.gmra.mxu0 %v3031_v45  ;;  %8370 = vmatprep.subr.bf16.mxu1 %v10863_v35 }
 0x324   :  { %8349 = vmatpush3.bf16.msra.mxu0 %v10869_v22  ;;  %3190 = vmatprep.mubr.bf16.mxu0 %v3151_v0 }
 0x325   :  { %v8078_v33 = vpop.f32.mrf.mxu1  ;;  %3118 = vmatmul.mubr.bf16.vlgmr.msra.gmra.mxu1 %v3039_v47  ;;  %v8057_v39 = vpop.f32.mrf.mxu0  ;;  %8350 = vmatprep.subr.bf16.mxu0 %v10875_v46 }
 0x326   :  { %8371 = vmatpush3.bf16.msra.mxu1 %v10881_v7  ;;  %v8058_v3 = vadd.f32 %v8057_v39, %v8056_v1  ;;  %3230 = vmatprep.mubr.bf16.mxu1 %v3153_v24  ;;  %v3144_v1 = vrot.slane %v7018_v4, %v10040_v41 }
 0x327   :  { %v8079_v51 = vpop.f32.mrf.mxu1  ;;  %8372 = vmatprep.subr.bf16.mxu1 %v10887_v55  ;;  %v8059_v37 = vpop.f32.mrf.mxu0 }
 0x328   :  { %v2402_v44 = vadd.f32 %v10893_v12, %v8058_v3  ;;  %v8080_v27 = vadd.f32 %v8079_v51, %v8078_v33  ;;  %8351 = vmatpush3.bf16.msra.mxu0 %v10899_v16  ;;  %v3152_v39 = vcombine.high %v3144_v1, %v3144_v1 }
 0x329   :  { %v8081_v45 = vpop.f32.mrf.mxu1  ;;  %8352 = vmatprep.subr.bf16.mxu0 %v10905_v18  ;;  %v8060_v0 = vpop.f32.mrf.mxu0 }
 0x32a   :  { %v11364_v47 = vadd.f32 %v8080_v27, %v2402_v44  ;;  %8373 = vmatpush3.bf16.msra.mxu1 %v10913_v15 }
 0x32b   :  { %v8082_v43 = vpop.f32.mrf.mxu1  ;;  %8374 = vmatprep.subr.bf16.mxu1 %v10919_v23 }
 0x32c   :  { %8353 = vmatpush3.bf16.msra.mxu0 %v10925_v8  ;;  %v7020_v43 = vld.sshfl [vmem:[%s12853_s0 + $0x68] sm:$0x33 pattern:$0x75316420] }
 0x32d   :  { %8354 = vmatprep.subr.bf16.mxu0 %v10981_v52  ;;  %v3250_v24 = vcombine.high %v7020_v43, %v7020_v43 }
 0x32e   :  { %8375 = vmatpush3.bf16.msra.mxu1 %v10932_v9 }
 0x32f   :  { %8376 = vmatprep.subr.bf16.mxu1 %v10988_v49  ;;  %v3264_v33 = vrot.slane %v3250_v24, %v10040_v41 }
 0x330   :  { %8355 = vmatpush3.bf16.msra.mxu0 %v10994_v11 }
 0x331   :  { %8356 = vmatprep.subr.bf16.mxu0 %v11000_v50  ;;  %v3266_v3 = vcombine.high %v3264_v33, %v3264_v33 }
 0x332   :  { %8377 = vmatpush3.bf16.msra.mxu1 %v11006_v53 }
 0x333   :  { %8378 = vmatprep.subr.bf16.mxu1 %v11012_v57 }
 0x334   :  { %8357 = vmatpush3.bf16.msra.mxu0 %v11018_v59 }
 0x335   :  { %8358 = vmatprep.subr.bf16.mxu0 %v11024_v28 }
 0x336   :  { %8379 = vmatpush3.bf16.msra.mxu1 %v11030_v34 }
 0x337   :  { %8380 = vmatprep.subr.bf16.mxu1 %v11036_v26 }
 0x338   :  { %8359 = vmatpush3.bf16.msra.mxu0 %v11047_v48 }
 0x339   :  { %8360 = vmatprep.subr.bf16.mxu0 %v11053_v54 }
 0x33a   :  { %8381 = vmatpush3.bf16.msra.mxu1 %v11059_v60 }
 0x33b   :  { %8382 = vmatprep.subr.bf16.mxu1 %v11067_v14 }
 0x33c   :  { %8361 = vmatpush3.bf16.msra.mxu0 %v11073_v63 }
 0x33d   :  { %8362 = vmatprep.subr.bf16.mxu0 %v11079_v19 }
 0x33e   :  { %8383 = vmatpush3.bf16.msra.mxu1 %v11087_v36 }
 0x33f   :  { %8384 = vmatprep.subr.bf16.mxu1 %v11094_v38 }
 0x340   :  { %8363 = vmatpush3.bf16.msra.mxu0 %v11100_v31 }
 0x341   :  { %8392 = vmatprep.subr.bf16.mxu0 %v10856_v62 }
 0x342   :  { %8385 = vmatpush3.bf16.msra.mxu1 %v11152_v42 }
 0x343   :  { %v8100_v51 = vpop.f32.mrf.mxu0  ;;  %3191 = vmatmul.mubr.bf16.vlgmr.msra.gmra.mxu0 %v3144_v1  ;;  %8414 = vmatprep.subr.bf16.mxu1 %v10863_v35 }
 0x344   :  { %8393 = vmatpush3.bf16.msra.mxu0 %v10869_v22  ;;  %3303 = vmatprep.mubr.bf16.mxu0 %v3264_v33 }
 0x345   :  { %v8122_v4 = vpop.f32.mrf.mxu1  ;;  %3231 = vmatmul.mubr.bf16.vlgmr.msra.gmra.mxu1 %v3152_v39  ;;  %v8101_v37 = vpop.f32.mrf.mxu0  ;;  %8394 = vmatprep.subr.bf16.mxu0 %v10875_v46  ;;  %v11460_v39 = vld [vmem:[%s12854_s1 + $0x70] sm:$0xff]  }
 0x346   :  { %8415 = vmatpush3.bf16.msra.mxu1 %v10881_v7  ;;  %v8102_v44 = vadd.f32 %v8101_v37, %v8100_v51  ;;  %3343 = vmatprep.mubr.bf16.mxu1 %v3266_v3  ;;  %v11423_v7 = vld.sshfl [vmem:[%s12853_s0 + $0x6c] sm:$0x33 pattern:$0x75316420]  ;;  %v11466_v3 = vld [vmem:[%s12854_s1 + $0xb8] sm:$0xff]   ;;  %v11472_v37 = vld [vmem:[%s12854_s1 + $0xf0] sm:$0xff]  }
 0x347   :  { %v8123_v62 = vpop.f32.mrf.mxu1  ;;  %8416 = vmatprep.subr.bf16.mxu1 %v10887_v55  ;;  %v8103_v27 = vpop.f32.mrf.mxu0  ;;  %v3363_v55 = vcombine.high %v11423_v7, %v11423_v7 }
 0x348   :  { %v2515_v45 = vadd.f32 %v10893_v12, %v8102_v44  ;;  %v8124_v0 = vadd.f32 %v8123_v62, %v8122_v4  ;;  %8395 = vmatpush3.bf16.msra.mxu0 %v10899_v16  ;;  %v3257_v12 = vrot.slane %v7020_v43, %v10040_v41  ;;  %v11454_v43 = vld [vmem:[%s12854_s1 + $0x38] sm:$0xff]   ;;  %v11478_v62 = vld [vmem:[%s12855_s2] ss:$0 sm:$0xff] }
 0x349   :  { %v8125_v35 = vpop.f32.mrf.mxu1  ;;  %8396 = vmatprep.subr.bf16.mxu0 %v10905_v18  ;;  %v8104_v22 = vpop.f32.mrf.mxu0  ;;  %v3377_v16 = vrot.slane %v3363_v55, %v10040_v41 }
 0x34a   :  { %v11404_v24 = vadd.f32 %v8124_v0, %v2515_v45  ;;  %8417 = vmatpush3.bf16.msra.mxu1 %v10913_v15  ;;  %v3265_v18 = vcombine.high %v3257_v12, %v3257_v12  ;;  %v11441_v15 = vld [vmem:[%s12854_s1 + $0x78] sm:$0xff]   ;;  %v11484_v0 = vld [vmem:[%s12854_s1 + $0x30] sm:$0xff]   ;;  %v11490_v22 = vld [vmem:[%s12854_s1 + $0x68] sm:$0xff]  }
 0x34b   :  { %v8126_v46 = vpop.f32.mrf.mxu1  ;;  %8418 = vmatprep.subr.bf16.mxu1 %v10919_v23  ;;  %v3379_v23 = vcombine.high %v3377_v16, %v3377_v16 }
 0x34c   :  { %12871 = vst [vmem:[#allocation9_spill] sm:$0xff] %v11404_v24  ;;  %8397 = vmatpush3.bf16.msra.mxu0 %v10925_v8 }
 0x34d   :  { %8398 = vmatprep.subr.bf16.mxu0 %v10981_v52 }
 0x34e   :  { %8419 = vmatpush3.bf16.msra.mxu1 %v10932_v9  ;;  %v11448_v9 = vld [vmem:[%s12854_s1 + $0xf8] sm:$0xff]  }
 0x34f   :  { %8420 = vmatprep.subr.bf16.mxu1 %v10988_v49 }
 0x350   :  { %8399 = vmatpush3.bf16.msra.mxu0 %v10994_v11 }
 0x351   :  { %8400 = vmatprep.subr.bf16.mxu0 %v11000_v50 }
 0x352   :  { %8421 = vmatpush3.bf16.msra.mxu1 %v11006_v53 }
 0x353   :  { %8422 = vmatprep.subr.bf16.mxu1 %v11012_v57 }
 0x354   :  { %8401 = vmatpush3.bf16.msra.mxu0 %v11018_v59 }
 0x355   :  { %8402 = vmatprep.subr.bf16.mxu0 %v11024_v28 }
 0x356   :  { %8423 = vmatpush3.bf16.msra.mxu1 %v11030_v34 }
 0x357   :  { %8424 = vmatprep.subr.bf16.mxu1 %v11036_v26 }
 0x358   :  { %8403 = vmatpush3.bf16.msra.mxu0 %v11047_v48 }
 0x359   :  { %8404 = vmatprep.subr.bf16.mxu0 %v11053_v54 }
 0x35a   :  { %8425 = vmatpush3.bf16.msra.mxu1 %v11059_v60 }
 0x35b   :  { %8426 = vmatprep.subr.bf16.mxu1 %v11067_v14 }
 0x35c   :  { %8405 = vmatpush3.bf16.msra.mxu0 %v11073_v63 }
 0x35d   :  { %8406 = vmatprep.subr.bf16.mxu0 %v11079_v19 }
 0x35e   :  { %8427 = vmatpush3.bf16.msra.mxu1 %v11087_v36 }
 0x35f   :  { %8428 = vmatprep.subr.bf16.mxu1 %v11094_v38 }
 0x360   :  { %8407 = vmatpush3.bf16.msra.mxu0 %v11100_v31 }
 0x361   :  { %8436 = vmatprep.subr.bf16.mxu0 %v11441_v15 }
 0x362   :  { %8429 = vmatpush3.bf16.msra.mxu1 %v11152_v42 }
 0x363   :  { %v8144_v8 = vpop.f32.mrf.mxu0  ;;  %3304 = vmatmul.mubr.bf16.vlgmr.msra.gmra.mxu0 %v3257_v12  ;;  %8458 = vmatprep.subr.bf16.mxu1 %v11448_v9  ;;  %v11498_v12 = vld [vmem:[%s12854_s1 + $0xb0] sm:$0xff]  }
 0x364   :  { %8437 = vmatpush3.bf16.msra.mxu0 %v11454_v43  ;;  %3416 = vmatprep.mubr.bf16.mxu0 %v3377_v16 }
 0x365   :  { %v8166_v1 = vpop.f32.mrf.mxu1  ;;  %3344 = vmatmul.mubr.bf16.vlgmr.msra.gmra.mxu1 %v3265_v18  ;;  %v8145_v33 = vpop.f32.mrf.mxu0  ;;  %8438 = vmatprep.subr.bf16.mxu0 %v11460_v39  ;;  %v11504_v18 = vld [vmem:[%s12854_s1 + $0xe8] sm:$0xff]  }
 0x366   :  { %8459 = vmatpush3.bf16.msra.mxu1 %v11466_v3  ;;  %v8146_v51 = vadd.f32 %v8145_v33, %v8144_v8  ;;  %3456 = vmatprep.mubr.bf16.mxu1 %v3379_v23  ;;  %v11510_v23 = vld [vmem:[%s12854_s1 + $0x28] sm:$0xff]   ;;  %v11585_v33 = vld [vmem:[%s12854_s1 + $0x58] sm:$0xff]  }
 0x367   :  { %v8167_v4 = vpop.f32.mrf.mxu1  ;;  %8460 = vmatprep.subr.bf16.mxu1 %v11472_v37  ;;  %v8147_v44 = vpop.f32.mrf.mxu0  ;;  %v11517_v8 = vld [vmem:[%s12854_s1 + $0xa8] sm:$0xff]  }
 0x368   :  { %v2628_v27 = vadd.f32 %v11478_v62, %v8146_v51  ;;  %v8168_v45 = vadd.f32 %v8167_v4, %v8166_v1  ;;  %8439 = vmatpush3.bf16.msra.mxu0 %v11484_v0  ;;  %v11579_v1 = vld [vmem:[%s12854_s1 + $0x20] sm:$0xff]   ;;  %v11597_v4 = vld [vmem:[%s12854_s1 + $0xd8] sm:$0xff]  }
 0x369   :  { %v8169_v35 = vpop.f32.mrf.mxu1  ;;  %8440 = vmatprep.subr.bf16.mxu0 %v11490_v22  ;;  %v8148_v46 = vpop.f32.mrf.mxu0  ;;  %v11591_v51 = vld [vmem:[%s12854_s1 + $0xa0] sm:$0xff]   ;;  %v11603_v44 = vld [vmem:[%s12854_s1 + $0x18] sm:$0xff]  }
 0x36a   :  { %v11493_v55 = vadd.f32 %v8168_v45, %v2628_v27  ;;  %8461 = vmatpush3.bf16.msra.mxu1 %v11498_v12  ;;  %v11609_v27 = vld [vmem:[%s12854_s1 + $0x50] sm:$0xff]   ;;  %v11615_v45 = vld [vmem:[%s12854_s1 + $0x98] sm:$0xff]  }
 0x36b   :  { %v8170_v16 = vpop.f32.mrf.mxu1  ;;  %8462 = vmatprep.subr.bf16.mxu1 %v11504_v18  ;;  %v11621_v35 = vld [vmem:[%s12854_s1 + $0xd0] sm:$0xff]  }
 0x36c   :  { %12872 = vst [vmem:[#allocation10_spill] sm:$0xff] %v11493_v55  ;;  %8441 = vmatpush3.bf16.msra.mxu0 %v11510_v23  ;;  %v11627_v46 = vld.sshfl [vmem:[%s12853_s0 + $0x74] sm:$0x33 pattern:$0x75316420] }
 0x36d   :  { %8442 = vmatprep.subr.bf16.mxu0 %v10981_v52  ;;  %v11532_v52 = vld.sshfl [vmem:[%s12853_s0 + $0x70] sm:$0x33 pattern:$0x75316420] }
 0x36e   :  { %8463 = vmatpush3.bf16.msra.mxu1 %v11517_v8  ;;  %v11632_v16 = vld [vmem:[%s12854_s1 + $0x10] sm:$0xff]  }
 0x36f   :  { %8464 = vmatprep.subr.bf16.mxu1 %v10988_v49  ;;  %v3476_v49 = vcombine.high %v11532_v52, %v11532_v52 }
 0x370   :  { %8443 = vmatpush3.bf16.msra.mxu0 %v10994_v11  ;;  %v3370_v11 = vrot.slane %v11423_v7, %v10040_v41  ;;  %v11573_v7 = vld [vmem:[%s12854_s1 + $0xe0] sm:$0xff]  }
 0x371   :  { %8444 = vmatprep.subr.bf16.mxu0 %v11000_v50  ;;  %v3490_v50 = vrot.slane %v3476_v49, %v10040_v41  ;;  %v11638_v49 = vld [vmem:[%s12854_s1 + $0x48] sm:$0xff]  }
 0x372   :  { %8465 = vmatpush3.bf16.msra.mxu1 %v11006_v53  ;;  %v3378_v53 = vcombine.high %v3370_v11, %v3370_v11 }
 0x373   :  { %8466 = vmatprep.subr.bf16.mxu1 %v11012_v57  ;;  %v3492_v57 = vcombine.high %v3490_v50, %v3490_v50 }
 0x374   :  { %8445 = vmatpush3.bf16.msra.mxu0 %v11018_v59 }
 0x375   :  { %8446 = vmatprep.subr.bf16.mxu0 %v11024_v28 }
 0x376   :  { %8467 = vmatpush3.bf16.msra.mxu1 %v11030_v34 }
 0x377   :  { %8468 = vmatprep.subr.bf16.mxu1 %v11036_v26 }
 0x378   :  { %8447 = vmatpush3.bf16.msra.mxu0 %v11047_v48 }
 0x379   :  { %8448 = vmatprep.subr.bf16.mxu0 %v11053_v54 }
 0x37a   :  { %8469 = vmatpush3.bf16.msra.mxu1 %v11059_v60 }
 0x37b   :  { %8470 = vmatprep.subr.bf16.mxu1 %v11067_v14 }
 0x37c   :  { %8449 = vmatpush3.bf16.msra.mxu0 %v11073_v63 }
 0x37d   :  { %8450 = vmatprep.subr.bf16.mxu0 %v11079_v19 }
 0x37e   :  { %8471 = vmatpush3.bf16.msra.mxu1 %v11087_v36 }
 0x37f   :  { %8472 = vmatprep.subr.bf16.mxu1 %v11094_v38 }
 0x380   :  { %8451 = vmatpush3.bf16.msra.mxu0 %v11100_v31  ;;  %v11566_v31 = vld [vmem:[%s12854_s1 + $0x60] sm:$0xff]  }
 0x381   :  { %8480 = vmatprep.subr.bf16.mxu0 %v11441_v15 }
 0x382   :  { %8473 = vmatpush3.bf16.msra.mxu1 %v11152_v42 }
 0x383   :  { %v8188_v59 = vpop.f32.mrf.mxu0  ;;  %3417 = vmatmul.mubr.bf16.vlgmr.msra.gmra.mxu0 %v3370_v11  ;;  %8502 = vmatprep.subr.bf16.mxu1 %v11448_v9  ;;  %v11644_v11 = vld [vmem:[%s12854_s1 + $0x90] sm:$0xff]  }
 0x384   :  { %8481 = vmatpush3.bf16.msra.mxu0 %v11454_v43  ;;  %3529 = vmatprep.mubr.bf16.mxu0 %v3490_v50  ;;  %v3589_v50 = vcombine.high %v11627_v46, %v11627_v46 }
 0x385   :  { %v8210_v28 = vpop.f32.mrf.mxu1  ;;  %3457 = vmatmul.mubr.bf16.vlgmr.msra.gmra.mxu1 %v3378_v53  ;;  %v8189_v34 = vpop.f32.mrf.mxu0  ;;  %8482 = vmatprep.subr.bf16.mxu0 %v11460_v39  ;;  %v11652_v53 = vld [vmem:[%s12854_s1 + $0xc8] sm:$0xff]  }
 0x386   :  { %8503 = vmatpush3.bf16.msra.mxu1 %v11466_v3  ;;  %v8190_v26 = vadd.f32 %v8189_v34, %v8188_v59  ;;  %3569 = vmatprep.mubr.bf16.mxu1 %v3492_v57  ;;  %v11658_v57 = vld [vmem:[%s12854_s1 + $0x8] sm:$0xff]   ;;  %v11664_v59 = vld [vmem:[%s12854_s1 + $0x40] sm:$0xff]  }
 0x387   :  { %v8211_v48 = vpop.f32.mrf.mxu1  ;;  %8504 = vmatprep.subr.bf16.mxu1 %v11472_v37  ;;  %v8191_v54 = vpop.f32.mrf.mxu0  ;;  %v11672_v34 = vld [vmem:[%s12854_s1 + $0x88] sm:$0xff]  }
 0x388   :  { %v2741_v60 = vadd.f32 %v11478_v62, %v8190_v26  ;;  %v8212_v14 = vadd.f32 %v8211_v48, %v8210_v28  ;;  %8483 = vmatpush3.bf16.msra.mxu0 %v11484_v0  ;;  %v3483_v28 = vrot.slane %v11532_v52, %v10040_v41  ;;  %v3603_v26 = vrot.slane %v3589_v50, %v10040_v41  ;;  %v11679_v48 = vld [vmem:[%s12854_s1 + $0xc0] sm:$0xff]  }
 0x389   :  { %v8213_v63 = vpop.f32.mrf.mxu1  ;;  %8484 = vmatprep.subr.bf16.mxu0 %v11490_v22  ;;  %v8192_v19 = vpop.f32.mrf.mxu0  ;;  %v11685_v52 = vld [vmem:[%s12854_s1] sm:$0xff]  }
 0x38a   :  { %v11558_v36 = vadd.f32 %v8212_v14, %v2741_v60  ;;  %8505 = vmatpush3.bf16.msra.mxu1 %v11498_v12  ;;  %v3491_v54 = vcombine.high %v3483_v28, %v3483_v28  ;;  %v3605_v60 = vcombine.high %v3603_v26, %v3603_v26 }
 0x38b   :  { %v8214_v38 = vpop.f32.mrf.mxu1  ;;  %8506 = vmatprep.subr.bf16.mxu1 %v11504_v18 }
 0x38c   :  { %12873 = vst [vmem:[#allocation11_spill] sm:$0xff] %v11558_v36  ;;  %8485 = vmatpush3.bf16.msra.mxu0 %v11510_v23 }
 0x38d   :  { %8486 = vmatprep.subr.bf16.mxu0 %v11566_v31 }
 0x38e   :  { %8507 = vmatpush3.bf16.msra.mxu1 %v11517_v8 }
 0x38f   :  { %8508 = vmatprep.subr.bf16.mxu1 %v11573_v7 }
 0x390   :  { %8487 = vmatpush3.bf16.msra.mxu0 %v11579_v1 }
 0x391   :  { %8488 = vmatprep.subr.bf16.mxu0 %v11585_v33 }
 0x392   :  { %8509 = vmatpush3.bf16.msra.mxu1 %v11591_v51 }
 0x393   :  { %8510 = vmatprep.subr.bf16.mxu1 %v11597_v4 }
 0x394   :  { %8489 = vmatpush3.bf16.msra.mxu0 %v11603_v44 }
 0x395   :  { %8490 = vmatprep.subr.bf16.mxu0 %v11609_v27 }
 0x396   :  { %8511 = vmatpush3.bf16.msra.mxu1 %v11615_v45 }
 0x397   :  { %8512 = vmatprep.subr.bf16.mxu1 %v11621_v35 }
 0x398   :  { %8491 = vmatpush3.bf16.msra.mxu0 %v11632_v16 }
 0x399   :  { %8492 = vmatprep.subr.bf16.mxu0 %v11638_v49 }
 0x39a   :  { %8513 = vmatpush3.bf16.msra.mxu1 %v11644_v11 }
 0x39b   :  { %8514 = vmatprep.subr.bf16.mxu1 %v11652_v53 }
 0x39c   :  { %8493 = vmatpush3.bf16.msra.mxu0 %v11658_v57 }
 0x39d   :  { %8494 = vmatprep.subr.bf16.mxu0 %v11664_v59 }
 0x39e   :  { %8515 = vmatpush3.bf16.msra.mxu1 %v11672_v34 }
 0x39f   :  { %8516 = vmatprep.subr.bf16.mxu1 %v11679_v48 }
 0x3a0   :  { %8495 = vmatpush3.bf16.msra.mxu0 %v11685_v52 }
 0x3a1   :  { %8524 = vmatprep.subr.bf16.mxu0 %v11441_v15 }
 0x3a2   :  { %8517 = vmatpush3.bf16.msra.mxu1 %v11152_v42 }
 0x3a3   :  { %v8232_v14 = vpop.f32.mrf.mxu0  ;;  %3530 = vmatmul.mubr.bf16.vlgmr.msra.gmra.mxu0 %v3483_v28  ;;  %8546 = vmatprep.subr.bf16.mxu1 %v11448_v9 }
 0x3a4   :  { %8525 = vmatpush3.bf16.msra.mxu0 %v11454_v43  ;;  %3642 = vmatprep.mubr.bf16.mxu0 %v3603_v26 }
 0x3a5   :  { %v8254_v63 = vpop.f32.mrf.mxu1  ;;  %3570 = vmatmul.mubr.bf16.vlgmr.msra.gmra.mxu1 %v3491_v54  ;;  %v8233_v19 = vpop.f32.mrf.mxu0  ;;  %8526 = vmatprep.subr.bf16.mxu0 %v11460_v39 }
 0x3a6   :  { %8547 = vmatpush3.bf16.msra.mxu1 %v11466_v3  ;;  %v8234_v38 = vadd.f32 %v8233_v19, %v8232_v14  ;;  %3682 = vmatprep.mubr.bf16.mxu1 %v3605_v60 }
 0x3a7   :  { %v8255_v50 = vpop.f32.mrf.mxu1  ;;  %8548 = vmatprep.subr.bf16.mxu1 %v11472_v37  ;;  %v8235_v42 = vpop.f32.mrf.mxu0 }
 0x3a8   :  { %v2854_v28 = vadd.f32 %v11478_v62, %v8234_v38  ;;  %v8256_v36 = vadd.f32 %v8255_v50, %v8254_v63  ;;  %8527 = vmatpush3.bf16.msra.mxu0 %v11484_v0  ;;  %v11737_v63 = vld [vmem:[%s12854_s1 + $0x80] sm:$0xff]  }
 0x3a9   :  { %v8257_v40 = vpop.f32.mrf.mxu1  ;;  %8528 = vmatprep.subr.bf16.mxu0 %v11490_v22  ;;  %v8236_v26 = vpop.f32.mrf.mxu0 }
 0x3aa   :  { %v11698_v54 = vadd.f32 %v8256_v36, %v2854_v28  ;;  %8549 = vmatpush3.bf16.msra.mxu1 %v11498_v12  ;;  %v11717_v40 = vld.sshfl [vmem:[%s12853_s0 + $0x78] sm:$0x33 pattern:$0x75316420]  ;;  %v3596_v36 = vrot.slane %v11627_v46, %v10040_v41 }
 0x3ab   :  { %v8258_v24 = vpop.f32.mrf.mxu1  ;;  %8550 = vmatprep.subr.bf16.mxu1 %v11504_v18 }
 0x3ac   :  { %12874 = vst [vmem:[#allocation12_spill] sm:$0xff] %v11698_v54  ;;  %8529 = vmatpush3.bf16.msra.mxu0 %v11510_v23  ;;  %v3702_v24 = vcombine.high %v11717_v40, %v11717_v40  ;;  %v3604_v14 = vcombine.high %v3596_v36, %v3596_v36 }
 0x3ad   :  { %8530 = vmatprep.subr.bf16.mxu0 %v11566_v31 }
 0x3ae   :  { %8551 = vmatpush3.bf16.msra.mxu1 %v11517_v8  ;;  %v3716_v60 = vrot.slane %v3702_v24, %v10040_v41 }
 0x3af   :  { %8552 = vmatprep.subr.bf16.mxu1 %v11573_v7 }
 0x3b0   :  { %8531 = vmatpush3.bf16.msra.mxu0 %v11579_v1  ;;  %v3718_v19 = vcombine.high %v3716_v60, %v3716_v60 }
 0x3b1   :  { %8532 = vmatprep.subr.bf16.mxu0 %v11585_v33 }
 0x3b2   :  { %8553 = vmatpush3.bf16.msra.mxu1 %v11591_v51 }
 0x3b3   :  { %8554 = vmatprep.subr.bf16.mxu1 %v11597_v4 }
 0x3b4   :  { %8533 = vmatpush3.bf16.msra.mxu0 %v11603_v44 }
 0x3b5   :  { %8534 = vmatprep.subr.bf16.mxu0 %v11609_v27 }
 0x3b6   :  { %8555 = vmatpush3.bf16.msra.mxu1 %v11615_v45 }
 0x3b7   :  { %8556 = vmatprep.subr.bf16.mxu1 %v11621_v35 }
 0x3b8   :  { %8535 = vmatpush3.bf16.msra.mxu0 %v11632_v16 }
 0x3b9   :  { %8536 = vmatprep.subr.bf16.mxu0 %v11638_v49 }
 0x3ba   :  { %8557 = vmatpush3.bf16.msra.mxu1 %v11644_v11 }
 0x3bb   :  { %8558 = vmatprep.subr.bf16.mxu1 %v11652_v53 }
 0x3bc   :  { %8537 = vmatpush3.bf16.msra.mxu0 %v11658_v57 }
 0x3bd   :  { %8538 = vmatprep.subr.bf16.mxu0 %v11664_v59 }
 0x3be   :  { %8559 = vmatpush3.bf16.msra.mxu1 %v11672_v34 }
 0x3bf   :  { %8560 = vmatprep.subr.bf16.mxu1 %v11679_v48 }
 0x3c0   :  { %8539 = vmatpush3.bf16.msra.mxu0 %v11685_v52 }
 0x3c1   :  { %8568 = vmatprep.subr.bf16.mxu0 %v11441_v15 }
 0x3c2   :  { %8561 = vmatpush3.bf16.msra.mxu1 %v11737_v63 }
 0x3c3   :  { %v8276_v46 = vpop.f32.mrf.mxu0  ;;  %3643 = vmatmul.mubr.bf16.vlgmr.msra.gmra.mxu0 %v3596_v36  ;;  %8590 = vmatprep.subr.bf16.mxu1 %v11448_v9 }
 0x3c4   :  { %8569 = vmatpush3.bf16.msra.mxu0 %v11454_v43  ;;  %3755 = vmatprep.mubr.bf16.mxu0 %v3716_v60 }
 0x3c5   :  { %v8298_v38 = vpop.f32.mrf.mxu1  ;;  %3683 = vmatmul.mubr.bf16.vlgmr.msra.gmra.mxu1 %v3604_v14  ;;  %v8277_v50 = vpop.f32.mrf.mxu0  ;;  %8570 = vmatprep.subr.bf16.mxu0 %v11460_v39 }
 0x3c6   :  { %8591 = vmatpush3.bf16.msra.mxu1 %v11466_v3  ;;  %v8278_v42 = vadd.f32 %v8277_v50, %v8276_v46  ;;  %3795 = vmatprep.mubr.bf16.mxu1 %v3718_v19  ;;  %v3709_v19 = vrot.slane %v11717_v40, %v10040_v41 }
 0x3c7   :  { %v8299_v28 = vpop.f32.mrf.mxu1  ;;  %8592 = vmatprep.subr.bf16.mxu1 %v11472_v37  ;;  %v8279_v26 = vpop.f32.mrf.mxu0 }
 0x3c8   :  { %v2967_v24 = vadd.f32 %v11478_v62, %v8278_v42  ;;  %v8300_v36 = vadd.f32 %v8299_v28, %v8298_v38  ;;  %8571 = vmatpush3.bf16.msra.mxu0 %v11484_v0  ;;  %v3717_v38 = vcombine.high %v3709_v19, %v3709_v19 }
 0x3c9   :  { %v8301_v54 = vpop.f32.mrf.mxu1  ;;  %8572 = vmatprep.subr.bf16.mxu0 %v11490_v22  ;;  %v8280_v60 = vpop.f32.mrf.mxu0 }
 0x3ca   :  { %v11748_v14 = vadd.f32 %v8300_v36, %v2967_v24  ;;  %8593 = vmatpush3.bf16.msra.mxu1 %v11498_v12 }
 0x3cb   :  { %v8302_v55 = vpop.f32.mrf.mxu1  ;;  %8594 = vmatprep.subr.bf16.mxu1 %v11504_v18 }
 0x3cc   :  { %12875 = vst [vmem:[#allocation13_spill] sm:$0xff] %v11748_v14  ;;  %8573 = vmatpush3.bf16.msra.mxu0 %v11510_v23  ;;  %v7030_v55 = vld.sshfl [vmem:[%s12853_s0 + $0x7c] sm:$0x33 pattern:$0x75316420] }
 0x3cd   :  { %8574 = vmatprep.subr.bf16.mxu0 %v11566_v31  ;;  %v3815_v54 = vcombine.high %v7030_v55, %v7030_v55 }
 0x3ce   :  { %8595 = vmatpush3.bf16.msra.mxu1 %v11517_v8 }
 0x3cf   :  { %8596 = vmatprep.subr.bf16.mxu1 %v11573_v7  ;;  %v3829_v46 = vrot.slane %v3815_v54, %v10040_v41 }
 0x3d0   :  { %8575 = vmatpush3.bf16.msra.mxu0 %v11579_v1 }
 0x3d1   :  { %8576 = vmatprep.subr.bf16.mxu0 %v11585_v33  ;;  %v3831_v50 = vcombine.high %v3829_v46, %v3829_v46 }
 0x3d2   :  { %8597 = vmatpush3.bf16.msra.mxu1 %v11591_v51 }
 0x3d3   :  { %8598 = vmatprep.subr.bf16.mxu1 %v11597_v4 }
 0x3d4   :  { %8577 = vmatpush3.bf16.msra.mxu0 %v11603_v44 }
 0x3d5   :  { %8578 = vmatprep.subr.bf16.mxu0 %v11609_v27 }
 0x3d6   :  { %8599 = vmatpush3.bf16.msra.mxu1 %v11615_v45 }
 0x3d7   :  { %8600 = vmatprep.subr.bf16.mxu1 %v11621_v35 }
 0x3d8   :  { %8579 = vmatpush3.bf16.msra.mxu0 %v11632_v16 }
 0x3d9   :  { %8580 = vmatprep.subr.bf16.mxu0 %v11638_v49 }
 0x3da   :  { %8601 = vmatpush3.bf16.msra.mxu1 %v11644_v11 }
 0x3db   :  { %8602 = vmatprep.subr.bf16.mxu1 %v11652_v53 }
 0x3dc   :  { %8581 = vmatpush3.bf16.msra.mxu0 %v11658_v57 }
 0x3dd   :  { %8582 = vmatprep.subr.bf16.mxu0 %v11664_v59 }
 0x3de   :  { %8603 = vmatpush3.bf16.msra.mxu1 %v11672_v34 }
 0x3df   :  { %8604 = vmatprep.subr.bf16.mxu1 %v11679_v48 }
 0x3e0   :  { %8583 = vmatpush3.bf16.msra.mxu0 %v11685_v52 }
 0x3e1   :  { %8612 = vmatprep.subr.bf16.mxu0 %v11441_v15 }
 0x3e2   :  { %8605 = vmatpush3.bf16.msra.mxu1 %v11737_v63 }
 0x3e3   :  { %v8320_v42 = vpop.f32.mrf.mxu0  ;;  %3756 = vmatmul.mubr.bf16.vlgmr.msra.gmra.mxu0 %v3709_v19  ;;  %8634 = vmatprep.subr.bf16.mxu1 %v11448_v9 }
 0x3e4   :  { %8613 = vmatpush3.bf16.msra.mxu0 %v11454_v43  ;;  %3868 = vmatprep.mubr.bf16.mxu0 %v3829_v46 }
 0x3e5   :  { %v8342_v40 = vpop.f32.mrf.mxu1  ;;  %3796 = vmatmul.mubr.bf16.vlgmr.msra.gmra.mxu1 %v3717_v38  ;;  %v8321_v28 = vpop.f32.mrf.mxu0  ;;  %8614 = vmatprep.subr.bf16.mxu0 %v11460_v39 }
 0x3e6   :  { %8635 = vmatpush3.bf16.msra.mxu1 %v11466_v3  ;;  %v8322_v26 = vadd.f32 %v8321_v28, %v8320_v42  ;;  %3908 = vmatprep.mubr.bf16.mxu1 %v3831_v50  ;;  %v3822_v42 = vrot.slane %v7030_v55, %v10040_v41 }
 0x3e7   :  { %v8343_v24 = vpop.f32.mrf.mxu1  ;;  %8636 = vmatprep.subr.bf16.mxu1 %v11472_v37  ;;  %v8323_v36 = vpop.f32.mrf.mxu0 }
 0x3e8   :  { %v3080_v60 = vadd.f32 %v11478_v62, %v8322_v26  ;;  %v8344_v54 = vadd.f32 %v8343_v24, %v8342_v40  ;;  %8615 = vmatpush3.bf16.msra.mxu0 %v11484_v0  ;;  %v3830_v28 = vcombine.high %v3822_v42, %v3822_v42 }
 0x3e9   :  { %v8345_v19 = vpop.f32.mrf.mxu1  ;;  %8616 = vmatprep.subr.bf16.mxu0 %v11490_v22  ;;  %v8324_v46 = vpop.f32.mrf.mxu0 }
 0x3ea   :  { %v11789_v38 = vadd.f32 %v8344_v54, %v3080_v60  ;;  %8637 = vmatpush3.bf16.msra.mxu1 %v11498_v12 }
 0x3eb   :  { %v8346_v14 = vpop.f32.mrf.mxu1  ;;  %8638 = vmatprep.subr.bf16.mxu1 %v11504_v18 }
 0x3ec   :  { %12876 = vst [vmem:[#allocation14_spill] sm:$0xff] %v11789_v38  ;;  %8617 = vmatpush3.bf16.msra.mxu0 %v11510_v23  ;;  %v7032_v14 = vld.sshfl [vmem:[%s12853_s0 + $0x80] sm:$0x33 pattern:$0x75316420] }
 0x3ed   :  { %8618 = vmatprep.subr.bf16.mxu0 %v11566_v31  ;;  %v3928_v50 = vcombine.high %v7032_v14, %v7032_v14 }
 0x3ee   :  { %8639 = vmatpush3.bf16.msra.mxu1 %v11517_v8 }
 0x3ef   :  { %8640 = vmatprep.subr.bf16.mxu1 %v11573_v7  ;;  %v3942_v40 = vrot.slane %v3928_v50, %v10040_v41 }
 0x3f0   :  { %8619 = vmatpush3.bf16.msra.mxu0 %v11579_v1 }
 0x3f1   :  { %8620 = vmatprep.subr.bf16.mxu0 %v11585_v33  ;;  %v3944_v26 = vcombine.high %v3942_v40, %v3942_v40 }
 0x3f2   :  { %8641 = vmatpush3.bf16.msra.mxu1 %v11591_v51 }
 0x3f3   :  { %8642 = vmatprep.subr.bf16.mxu1 %v11597_v4 }
 0x3f4   :  { %8621 = vmatpush3.bf16.msra.mxu0 %v11603_v44 }
 0x3f5   :  { %8622 = vmatprep.subr.bf16.mxu0 %v11609_v27 }
 0x3f6   :  { %8643 = vmatpush3.bf16.msra.mxu1 %v11615_v45 }
 0x3f7   :  { %8644 = vmatprep.subr.bf16.mxu1 %v11621_v35 }
 0x3f8   :  { %8623 = vmatpush3.bf16.msra.mxu0 %v11632_v16 }
 0x3f9   :  { %8624 = vmatprep.subr.bf16.mxu0 %v11638_v49 }
 0x3fa   :  { %8645 = vmatpush3.bf16.msra.mxu1 %v11644_v11 }
 0x3fb   :  { %8646 = vmatprep.subr.bf16.mxu1 %v11652_v53 }
 0x3fc   :  { %8625 = vmatpush3.bf16.msra.mxu0 %v11658_v57 }
 0x3fd   :  { %8626 = vmatprep.subr.bf16.mxu0 %v11664_v59 }
 0x3fe   :  { %8647 = vmatpush3.bf16.msra.mxu1 %v11672_v34 }
 0x3ff   :  { %8648 = vmatprep.subr.bf16.mxu1 %v11679_v48 }
 0x400   :  { %8627 = vmatpush3.bf16.msra.mxu0 %v11685_v52 }
 0x401   :  { %8656 = vmatprep.subr.bf16.mxu0 %v11441_v15 }
 0x402   :  { %8649 = vmatpush3.bf16.msra.mxu1 %v11737_v63 }
 0x403   :  { %v8364_v24 = vpop.f32.mrf.mxu0  ;;  %3869 = vmatmul.mubr.bf16.vlgmr.msra.gmra.mxu0 %v3822_v42  ;;  %8678 = vmatprep.subr.bf16.mxu1 %v11448_v9 }
 0x404   :  { %8657 = vmatpush3.bf16.msra.mxu0 %v11454_v43  ;;  %3981 = vmatprep.mubr.bf16.mxu0 %v3942_v40 }
 0x405   :  { %v8386_v55 = vpop.f32.mrf.mxu1  ;;  %3909 = vmatmul.mubr.bf16.vlgmr.msra.gmra.mxu1 %v3830_v28  ;;  %v8365_v36 = vpop.f32.mrf.mxu0  ;;  %8658 = vmatprep.subr.bf16.mxu0 %v11460_v39 }
 0x406   :  { %8679 = vmatpush3.bf16.msra.mxu1 %v11466_v3  ;;  %v8366_v60 = vadd.f32 %v8365_v36, %v8364_v24  ;;  %4021 = vmatprep.mubr.bf16.mxu1 %v3944_v26  ;;  %v3935_v24 = vrot.slane %v7032_v14, %v10040_v41 }
 0x407   :  { %v8387_v54 = vpop.f32.mrf.mxu1  ;;  %8680 = vmatprep.subr.bf16.mxu1 %v11472_v37  ;;  %v8367_v19 = vpop.f32.mrf.mxu0 }
 0x408   :  { %v3193_v46 = vadd.f32 %v11478_v62, %v8366_v60  ;;  %v8388_v50 = vadd.f32 %v8387_v54, %v8386_v55  ;;  %8659 = vmatpush3.bf16.msra.mxu0 %v11484_v0  ;;  %v3943_v36 = vcombine.high %v3935_v24, %v3935_v24 }
 0x409   :  { %v8389_v42 = vpop.f32.mrf.mxu1  ;;  %8660 = vmatprep.subr.bf16.mxu0 %v11490_v22  ;;  %v8368_v40 = vpop.f32.mrf.mxu0 }
 0x40a   :  { %v11829_v28 = vadd.f32 %v8388_v50, %v3193_v46  ;;  %8681 = vmatpush3.bf16.msra.mxu1 %v11498_v12 }
 0x40b   :  { %v8390_v38 = vpop.f32.mrf.mxu1  ;;  %8682 = vmatprep.subr.bf16.mxu1 %v11504_v18 }
 0x40c   :  { %12877 = vst [vmem:[#allocation15_spill] sm:$0xff] %v11829_v28  ;;  %8661 = vmatpush3.bf16.msra.mxu0 %v11510_v23  ;;  %v7034_v38 = vld.sshfl [vmem:[%s12853_s0 + $0x84] sm:$0x33 pattern:$0x75316420] }
 0x40d   :  { %8662 = vmatprep.subr.bf16.mxu0 %v11566_v31  ;;  %v4041_v26 = vcombine.high %v7034_v38, %v7034_v38 }
 0x40e   :  { %8683 = vmatpush3.bf16.msra.mxu1 %v11517_v8 }
 0x40f   :  { %8684 = vmatprep.subr.bf16.mxu1 %v11573_v7  ;;  %v4055_v55 = vrot.slane %v4041_v26, %v10040_v41 }
 0x410   :  { %8663 = vmatpush3.bf16.msra.mxu0 %v11579_v1 }
 0x411   :  { %8664 = vmatprep.subr.bf16.mxu0 %v11585_v33  ;;  %v4057_v60 = vcombine.high %v4055_v55, %v4055_v55 }
 0x412   :  { %8685 = vmatpush3.bf16.msra.mxu1 %v11591_v51 }
 0x413   :  { %8686 = vmatprep.subr.bf16.mxu1 %v11597_v4 }
 0x414   :  { %8665 = vmatpush3.bf16.msra.mxu0 %v11603_v44 }
 0x415   :  { %8666 = vmatprep.subr.bf16.mxu0 %v11609_v27 }
 0x416   :  { %8687 = vmatpush3.bf16.msra.mxu1 %v11615_v45 }
 0x417   :  { %8688 = vmatprep.subr.bf16.mxu1 %v11621_v35 }
 0x418   :  { %8667 = vmatpush3.bf16.msra.mxu0 %v11632_v16 }
 0x419   :  { %8668 = vmatprep.subr.bf16.mxu0 %v11638_v49 }
 0x41a   :  { %8689 = vmatpush3.bf16.msra.mxu1 %v11644_v11 }
 0x41b   :  { %8690 = vmatprep.subr.bf16.mxu1 %v11652_v53 }
 0x41c   :  { %8669 = vmatpush3.bf16.msra.mxu0 %v11658_v57 }
 0x41d   :  { %8670 = vmatprep.subr.bf16.mxu0 %v11664_v59 }
 0x41e   :  { %8691 = vmatpush3.bf16.msra.mxu1 %v11672_v34 }
 0x41f   :  { %8692 = vmatprep.subr.bf16.mxu1 %v11679_v48 }
 0x420   :  { %8671 = vmatpush3.bf16.msra.mxu0 %v11685_v52 }
 0x421   :  { %8700 = vmatprep.subr.bf16.mxu0 %v11441_v15 }
 0x422   :  { %8693 = vmatpush3.bf16.msra.mxu1 %v11737_v63 }
 0x423   :  { %v8408_v54 = vpop.f32.mrf.mxu0  ;;  %3982 = vmatmul.mubr.bf16.vlgmr.msra.gmra.mxu0 %v3935_v24  ;;  %8722 = vmatprep.subr.bf16.mxu1 %v11448_v9 }
 0x424   :  { %8701 = vmatpush3.bf16.msra.mxu0 %v11454_v43  ;;  %4094 = vmatprep.mubr.bf16.mxu0 %v4055_v55 }
 0x425   :  { %v8430_v14 = vpop.f32.mrf.mxu1  ;;  %4022 = vmatmul.mubr.bf16.vlgmr.msra.gmra.mxu1 %v3943_v36  ;;  %v8409_v19 = vpop.f32.mrf.mxu0  ;;  %8702 = vmatprep.subr.bf16.mxu0 %v11460_v39 }
 0x426   :  { %8723 = vmatpush3.bf16.msra.mxu1 %v11466_v3  ;;  %v8410_v46 = vadd.f32 %v8409_v19, %v8408_v54  ;;  %4134 = vmatprep.mubr.bf16.mxu1 %v4057_v60  ;;  %v4048_v54 = vrot.slane %v7034_v38, %v10040_v41 }
 0x427   :  { %v8431_v50 = vpop.f32.mrf.mxu1  ;;  %8724 = vmatprep.subr.bf16.mxu1 %v11472_v37  ;;  %v8411_v42 = vpop.f32.mrf.mxu0 }
 0x428   :  { %v3306_v40 = vadd.f32 %v11478_v62, %v8410_v46  ;;  %v8432_v26 = vadd.f32 %v8431_v50, %v8430_v14  ;;  %8703 = vmatpush3.bf16.msra.mxu0 %v11484_v0  ;;  %v4056_v19 = vcombine.high %v4048_v54, %v4048_v54 }
 0x429   :  { %v8433_v24 = vpop.f32.mrf.mxu1  ;;  %8704 = vmatprep.subr.bf16.mxu0 %v11490_v22  ;;  %v8412_v55 = vpop.f32.mrf.mxu0 }
 0x42a   :  { %v11869_v36 = vadd.f32 %v8432_v26, %v3306_v40  ;;  %8725 = vmatpush3.bf16.msra.mxu1 %v11498_v12 }
 0x42b   :  { %v8434_v28 = vpop.f32.mrf.mxu1  ;;  %8726 = vmatprep.subr.bf16.mxu1 %v11504_v18 }
 0x42c   :  { %12878 = vst [vmem:[#allocation16_spill] sm:$0xff] %v11869_v36  ;;  %8705 = vmatpush3.bf16.msra.mxu0 %v11510_v23  ;;  %v7036_v28 = vld.sshfl [vmem:[%s12853_s0 + $0x88] sm:$0x33 pattern:$0x75316420] }
 0x42d   :  { %8706 = vmatprep.subr.bf16.mxu0 %v11566_v31  ;;  %v4154_v60 = vcombine.high %v7036_v28, %v7036_v28 }
 0x42e   :  { %8727 = vmatpush3.bf16.msra.mxu1 %v11517_v8 }
 0x42f   :  { %8728 = vmatprep.subr.bf16.mxu1 %v11573_v7  ;;  %v4168_v14 = vrot.slane %v4154_v60, %v10040_v41 }
 0x430   :  { %8707 = vmatpush3.bf16.msra.mxu0 %v11579_v1 }
 0x431   :  { %8708 = vmatprep.subr.bf16.mxu0 %v11585_v33  ;;  %v4170_v46 = vcombine.high %v4168_v14, %v4168_v14 }
 0x432   :  { %8729 = vmatpush3.bf16.msra.mxu1 %v11591_v51 }
 0x433   :  { %8730 = vmatprep.subr.bf16.mxu1 %v11597_v4 }
 0x434   :  { %8709 = vmatpush3.bf16.msra.mxu0 %v11603_v44 }
 0x435   :  { %8710 = vmatprep.subr.bf16.mxu0 %v11609_v27 }
 0x436   :  { %8731 = vmatpush3.bf16.msra.mxu1 %v11615_v45 }
 0x437   :  { %8732 = vmatprep.subr.bf16.mxu1 %v11621_v35 }
 0x438   :  { %8711 = vmatpush3.bf16.msra.mxu0 %v11632_v16 }
 0x439   :  { %8712 = vmatprep.subr.bf16.mxu0 %v11638_v49 }
 0x43a   :  { %8733 = vmatpush3.bf16.msra.mxu1 %v11644_v11 }
 0x43b   :  { %8734 = vmatprep.subr.bf16.mxu1 %v11652_v53 }
 0x43c   :  { %8713 = vmatpush3.bf16.msra.mxu0 %v11658_v57 }
 0x43d   :  { %8714 = vmatprep.subr.bf16.mxu0 %v11664_v59 }
 0x43e   :  { %8735 = vmatpush3.bf16.msra.mxu1 %v11672_v34 }
 0x43f   :  { %8736 = vmatprep.subr.bf16.mxu1 %v11679_v48 }
 0x440   :  { %8715 = vmatpush3.bf16.msra.mxu0 %v11685_v52 }
 0x441   :  { %8744 = vmatprep.subr.bf16.mxu0 %v11441_v15 }
 0x442   :  { %8737 = vmatpush3.bf16.msra.mxu1 %v11737_v63 }
 0x443   :  { %v8452_v50 = vpop.f32.mrf.mxu0  ;;  %4095 = vmatmul.mubr.bf16.vlgmr.msra.gmra.mxu0 %v4048_v54  ;;  %8766 = vmatprep.subr.bf16.mxu1 %v11448_v9 }
 0x444   :  { %8745 = vmatpush3.bf16.msra.mxu0 %v11454_v43  ;;  %4207 = vmatprep.mubr.bf16.mxu0 %v4168_v14 }
 0x445   :  { %v8474_v38 = vpop.f32.mrf.mxu1  ;;  %4135 = vmatmul.mubr.bf16.vlgmr.msra.gmra.mxu1 %v4056_v19  ;;  %v8453_v42 = vpop.f32.mrf.mxu0  ;;  %8746 = vmatprep.subr.bf16.mxu0 %v11460_v39 }
 0x446   :  { %8767 = vmatpush3.bf16.msra.mxu1 %v11466_v3  ;;  %v8454_v40 = vadd.f32 %v8453_v42, %v8452_v50  ;;  %4247 = vmatprep.mubr.bf16.mxu1 %v4170_v46  ;;  %v4161_v50 = vrot.slane %v7036_v28, %v10040_v41 }
 0x447   :  { %v8475_v26 = vpop.f32.mrf.mxu1  ;;  %8768 = vmatprep.subr.bf16.mxu1 %v11472_v37  ;;  %v8455_v24 = vpop.f32.mrf.mxu0 }
 0x448   :  { %v3419_v55 = vadd.f32 %v11478_v62, %v8454_v40  ;;  %v8476_v60 = vadd.f32 %v8475_v26, %v8474_v38  ;;  %8747 = vmatpush3.bf16.msra.mxu0 %v11484_v0  ;;  %v4169_v42 = vcombine.high %v4161_v50, %v4161_v50 }
 0x449   :  { %v8477_v54 = vpop.f32.mrf.mxu1  ;;  %8748 = vmatprep.subr.bf16.mxu0 %v11490_v22  ;;  %v8456_v14 = vpop.f32.mrf.mxu0 }
 0x44a   :  { %v11909_v19 = vadd.f32 %v8476_v60, %v3419_v55  ;;  %8769 = vmatpush3.bf16.msra.mxu1 %v11498_v12 }
 0x44b   :  { %v8478_v36 = vpop.f32.mrf.mxu1  ;;  %8770 = vmatprep.subr.bf16.mxu1 %v11504_v18 }
 0x44c   :  { %8749 = vmatpush3.bf16.msra.mxu0 %v11510_v23  ;;  %v7038_v36 = vld.sshfl [vmem:[%s12853_s0 + $0x8c] sm:$0x33 pattern:$0x75316420] }
 0x44d   :  { %8750 = vmatprep.subr.bf16.mxu0 %v11566_v31  ;;  %v4267_v46 = vcombine.high %v7038_v36, %v7038_v36 }
 0x44e   :  { %8771 = vmatpush3.bf16.msra.mxu1 %v11517_v8 }
 0x44f   :  { %8772 = vmatprep.subr.bf16.mxu1 %v11573_v7  ;;  %v4281_v38 = vrot.slane %v4267_v46, %v10040_v41 }
 0x450   :  { %8751 = vmatpush3.bf16.msra.mxu0 %v11579_v1 }
 0x451   :  { %8752 = vmatprep.subr.bf16.mxu0 %v11585_v33  ;;  %v4283_v40 = vcombine.high %v4281_v38, %v4281_v38 }
 0x452   :  { %8773 = vmatpush3.bf16.msra.mxu1 %v11591_v51 }
 0x453   :  { %8774 = vmatprep.subr.bf16.mxu1 %v11597_v4 }
 0x454   :  { %8753 = vmatpush3.bf16.msra.mxu0 %v11603_v44 }
 0x455   :  { %8754 = vmatprep.subr.bf16.mxu0 %v11609_v27 }
 0x456   :  { %8775 = vmatpush3.bf16.msra.mxu1 %v11615_v45 }
 0x457   :  { %8776 = vmatprep.subr.bf16.mxu1 %v11621_v35 }
 0x458   :  { %8755 = vmatpush3.bf16.msra.mxu0 %v11632_v16 }
 0x459   :  { %8756 = vmatprep.subr.bf16.mxu0 %v11638_v49 }
 0x45a   :  { %8777 = vmatpush3.bf16.msra.mxu1 %v11644_v11 }
 0x45b   :  { %8778 = vmatprep.subr.bf16.mxu1 %v11652_v53 }
 0x45c   :  { %8757 = vmatpush3.bf16.msra.mxu0 %v11658_v57 }
 0x45d   :  { %8758 = vmatprep.subr.bf16.mxu0 %v11664_v59 }
 0x45e   :  { %8779 = vmatpush3.bf16.msra.mxu1 %v11672_v34 }
 0x45f   :  { %8780 = vmatprep.subr.bf16.mxu1 %v11679_v48 }
 0x460   :  { %8759 = vmatpush3.bf16.msra.mxu0 %v11685_v52 }
 0x461   :  { %8788 = vmatprep.subr.bf16.mxu0 %v11441_v15 }
 0x462   :  { %8781 = vmatpush3.bf16.msra.mxu1 %v11737_v63 }
 0x463   :  { %v8496_v26 = vpop.f32.mrf.mxu0  ;;  %4208 = vmatmul.mubr.bf16.vlgmr.msra.gmra.mxu0 %v4161_v50  ;;  %8810 = vmatprep.subr.bf16.mxu1 %v11448_v9 }
 0x464   :  { %8789 = vmatpush3.bf16.msra.mxu0 %v11454_v43  ;;  %4320 = vmatprep.mubr.bf16.mxu0 %v4281_v38 }
 0x465   :  { %v8518_v28 = vpop.f32.mrf.mxu1  ;;  %4248 = vmatmul.mubr.bf16.vlgmr.msra.gmra.mxu1 %v4169_v42  ;;  %v8497_v24 = vpop.f32.mrf.mxu0  ;;  %8790 = vmatprep.subr.bf16.mxu0 %v11460_v39 }
 0x466   :  { %8811 = vmatpush3.bf16.msra.mxu1 %v11466_v3  ;;  %v8498_v55 = vadd.f32 %v8497_v24, %v8496_v26  ;;  %4360 = vmatprep.mubr.bf16.mxu1 %v4283_v40  ;;  %v4274_v3 = vrot.slane %v7038_v36, %v10040_v41  ;;  %v11985_v41 = vld [vmem:[%s12856_s3 + $0x38] sm:$0xff]   ;;  %v413_v36 = vmax.f32 %v10323_v61, 0.0 }
 0x467   :  { %v8519_v15 = vpop.f32.mrf.mxu1  ;;  %8812 = vmatprep.subr.bf16.mxu1 %v11472_v37  ;;  %v8499_v60 = vpop.f32.mrf.mxu0  ;;  %v11978_v37 = vld [vmem:[%s12856_s3 + $0x58] sm:$0xff]  }
 0x468   :  { %v3532_v54 = vadd.f32 %v11478_v62, %v8498_v55  ;;  %v8520_v14 = vadd.f32 %v8519_v15, %v8518_v28  ;;  %8791 = vmatpush3.bf16.msra.mxu0 %v11484_v0  ;;  %v4282_v0 = vcombine.high %v4274_v3, %v4274_v3  ;;  %v414_v38 = vpack.c.bf16 %v413_v36, %v413_v36  ;;  %v12102_v28 = vld [vmem:[%s12856_s3 + $0x70] sm:$0xff]   ;;  %v12110_v15 = vld [vmem:[%s12855_s2] ss:$0 sm:$0xff] }
 0x469   :  { %v8521_v9 = vpop.f32.mrf.mxu1  ;;  %8792 = vmatprep.subr.bf16.mxu0 %v11490_v22  ;;  %v8500_v43 = vpop.f32.mrf.mxu0  ;;  %v9773_v22 = vmov 0.0   ;;  %v1543_v36 = vmax.f32 %v10908_v5, 0.0  ;;  %v865_v5 = vmax.f32 %v10619_v30, 0.0 }
 0x46a   :  { %v11949_v46 = vadd.f32 %v8520_v14, %v3532_v54  ;;  %8813 = vmatpush3.bf16.msra.mxu1 %v11498_v12 }
 0x46b   :  { %v8522_v39 = vpop.f32.mrf.mxu1  ;;  %8814 = vmatprep.subr.bf16.mxu1 %v11504_v18  ;;  %v11992_v18 = vld [vmem:[%s12856_s3 + $0x50] sm:$0xff]  }
 0x46c   :  { %8793 = vmatpush3.bf16.msra.mxu0 %v11510_v23  ;;  %v12121_v39 = vld [vmem:[%s12856_s3 + $0x68] sm:$0xff]  }
 0x46d   :  { %8794 = vmatprep.subr.bf16.mxu0 %v11566_v31 }
 0x46e   :  { %8815 = vmatpush3.bf16.msra.mxu1 %v11517_v8 }
 0x46f   :  { %8816 = vmatprep.subr.bf16.mxu1 %v11573_v7  ;;  %v12001_v7 = vld [vmem:[%s12856_s3 + $0x30] sm:$0xff]  }
 0x470   :  { %8795 = vmatpush3.bf16.msra.mxu0 %v11579_v1 }
 0x471   :  { %8796 = vmatprep.subr.bf16.mxu0 %v11585_v33 }
 0x472   :  { %8817 = vmatpush3.bf16.msra.mxu1 %v11591_v51 }
 0x473   :  { %8818 = vmatprep.subr.bf16.mxu1 %v11597_v4 }
 0x474   :  { %8797 = vmatpush3.bf16.msra.mxu0 %v11603_v44  ;;  %v12011_v44 = vld [vmem:[%s12856_s3 + $0x48] sm:$0xff]  }
 0x475   :  { %8798 = vmatprep.subr.bf16.mxu0 %v11609_v27 }
 0x476   :  { %8819 = vmatpush3.bf16.msra.mxu1 %v11615_v45 }
 0x477   :  { %8820 = vmatprep.subr.bf16.mxu1 %v11621_v35 }
 0x478   :  { %8799 = vmatpush3.bf16.msra.mxu0 %v11632_v16 }
 0x479   :  { %8800 = vmatprep.subr.bf16.mxu0 %v11638_v49  ;;  %v12027_v49 = vld [vmem:[%s12856_s3 + $0x40] sm:$0xff]  }
 0x47a   :  { %8821 = vmatpush3.bf16.msra.mxu1 %v11644_v11  ;;  %v1091_v11 = vmax.f32 %v10699_v13, 0.0  ;;  %v12045_v13 = vld [vmem:[%s12856_s3 + $0x18] sm:$0xff]  }
 0x47b   :  { %8822 = vmatprep.subr.bf16.mxu1 %v11652_v53  ;;  %v12035_v53 = vld [vmem:[%s12856_s3 + $0x20] sm:$0xff]  }
 0x47c   :  { %8801 = vmatpush3.bf16.msra.mxu0 %v11658_v57  ;;  %v526_v57 = vmax.f32 %v10388_v29, 0.0  ;;  %v12058_v29 = vld [vmem:[%s12856_s3 + $0x10] sm:$0xff]  }
 0x47d   :  { %8802 = vmatprep.subr.bf16.mxu0 %v11664_v59  ;;  %v1092_v59 = vpack.c.bf16 %v1091_v11, %v1091_v11 }
 0x47e   :  { %8823 = vmatpush3.bf16.msra.mxu1 %v11672_v34  ;;  %v527_v34 = vpack.c.bf16 %v526_v57, %v526_v57 }
 0x47f   :  { %8824 = vmatprep.subr.bf16.mxu1 %v11679_v48  ;;  %v12069_v48 = vld [vmem:[%s12856_s3 + $0x8] sm:$0xff]  }
 0x480   :  { %8803 = vmatpush3.bf16.msra.mxu0 %v11685_v52  ;;  %v752_v52 = vmax.f32 %v10578_v58, 0.0  ;;  %v12089_v58 = vld [vmem:[%s12856_s3 + $0x78] sm:$0xff]  }
 0x481   :  { %9060 = vmatprep.subr.bf16.mxu0 %v9773_v22 }
 0x482   :  { %8825 = vmatpush3.bf16.msra.mxu1 %v11737_v63  ;;  %v12079_v63 = vld [vmem:[%s12856_s3] sm:$0xff]   ;;  %v753_v50 = vpack.c.bf16 %v752_v52, %v752_v52 }
 0x483   :  { %v8540_v12 = vpop.f32.mrf.mxu0  ;;  %4321 = vmatmul.mubr.bf16.vlgmr.msra.gmra.mxu0 %v4274_v3  ;;  %9036 = vmatprep.subr.bf16.mxu1 %v9773_v22 }
 0x484   :  { %9061 = vmatpush3.bf16.msra.mxu0 %v11978_v37  ;;  %9068 = vmatprep.mubr.msk.bf16.mxu0 %vm9774_vm0, %v9773_v22 }
 0x485   :  { %v8562_v23 = vpop.f32.mrf.mxu1  ;;  %4361 = vmatmul.mubr.bf16.vlgmr.msra.gmra.mxu1 %v4282_v0  ;;  %v8541_v8 = vpop.f32.mrf.mxu0  ;;  %9062 = vmatprep.subr.bf16.mxu0 %v9773_v22  ;;  %v1317_v0 = vmax.f32 %v10779_v2, 0.0 }
 0x486   :  { %9037 = vmatpush3.bf16.msra.mxu1 %v11985_v41  ;;  %v8542_v31 = vadd.f32 %v8541_v8, %v8540_v12  ;;  %9044 = vmatprep.mubr.msk.bf16.mxu1 %vm9774_vm0, %v9773_v22  ;;  %v12131_v12 = vld [vmem:[%s12856_s3 + $0x60] sm:$0xff]  }
 0x487   :  { %v8563_v1 = vpop.f32.mrf.mxu1  ;;  %9038 = vmatprep.subr.bf16.mxu1 %v9773_v22  ;;  %v8543_v33 = vpop.f32.mrf.mxu0  ;;  %v1318_v8 = vpack.c.bf16 %v1317_v0, %v1317_v0 }
 0x488   :  { %v3645_v51 = vadd.f32 %v11478_v62, %v8542_v31  ;;  %v8564_v4 = vadd.f32 %v8563_v1, %v8562_v23  ;;  %9063 = vmatpush3.bf16.msra.mxu0 %v11992_v18  ;;  %v12020_v62 = vld [vmem:[%s12856_s3 + $0x28] sm:$0xff]   ;;  %v1204_v23 = vmax.f32 %v10739_v56, 0.0  ;;  %v978_v56 = vmax.f32 %v10659_v20, 0.0 }
 0x489   :  { %v8565_v27 = vpop.f32.mrf.mxu1  ;;  %9064 = vmatprep.subr.bf16.mxu0 %v9773_v22  ;;  %v8544_v45 = vpop.f32.mrf.mxu0  ;;  %v639_v31 = vmax.f32 %v10528_v17, 0.0 }
 0x48a   :  { %v12014_v35 = vadd.f32 %v8564_v4, %v3645_v51  ;;  %9039 = vmatpush3.bf16.msra.mxu1 %v12001_v7  ;;  %v1205_v2 = vpack.c.bf16 %v1204_v23, %v1204_v23  ;;  %v979_v1 = vpack.c.bf16 %v978_v56, %v978_v56 }
 0x48b   :  { %v8566_v16 = vpop.f32.mrf.mxu1  ;;  %9040 = vmatprep.subr.bf16.mxu1 %v9773_v22  ;;  %v640_v33 = vpack.c.bf16 %v639_v31, %v639_v31 }
 0x48c   :  { %9065 = vmatpush3.bf16.msra.mxu0 %v12011_v44 }
 0x48d   :  { %9066 = vmatprep.subr.bf16.mxu0 %v9773_v22 }
 0x48e   :  { %9041 = vmatpush3.bf16.msra.mxu1 %v12020_v62 }
 0x48f   :  { %9042 = vmatprep.subr.bf16.mxu1 %v9773_v22 }
 0x490   :  { %9067 = vmatpush3.bf16.msra.mxu0 %v12027_v49 }
 0x491   :  { %9084 = vmatprep.subr.bf16.mxu0 %v9773_v22 }
 0x492   :  { %9043 = vmatpush3.bf16.msra.mxu1 %v12035_v53 }
 0x493   :  { %9048 = vmatprep.subr.bf16.mxu1 %v9773_v22  ;;  %9069 = vmatmul.mubr.msk.bf16.vlgmr.msra.gmra.mxu0 %vm4411_vm1, %v1092_v59 }
 0x494   :  { %9085 = vmatpush3.bf16.msra.mxu0 %v11985_v41  ;;  %9092 = vmatprep.mubr.msk.bf16.mxu0 %vm9774_vm0, %v9773_v22 }
 0x495   :  { %9045 = vmatmul.mubr.msk.bf16.vlgmr.msra.gmra.mxu1 %vm4411_vm1, %v527_v34  ;;  %9086 = vmatprep.subr.bf16.mxu0 %v9773_v22 }
 0x496   :  { %9049 = vmatpush3.bf16.msra.mxu1 %v12045_v13  ;;  %9056 = vmatprep.mubr.msk.bf16.mxu1 %vm9774_vm0, %v9773_v22 }
 0x497   :  { %9050 = vmatprep.subr.bf16.mxu1 %v9773_v22 }
 0x498   :  { %9087 = vmatpush3.bf16.msra.mxu0 %v12001_v7 }
 0x499   :  { %9088 = vmatprep.subr.bf16.mxu0 %v9773_v22 }
 0x49a   :  { %9051 = vmatpush3.bf16.msra.mxu1 %v12058_v29 }
 0x49b   :  { %9052 = vmatprep.subr.bf16.mxu1 %v9773_v22 }
 0x49c   :  { %9089 = vmatpush3.bf16.msra.mxu0 %v12020_v62 }
 0x49d   :  { %9090 = vmatprep.subr.bf16.mxu0 %v9773_v22 }
 0x49e   :  { %9053 = vmatpush3.bf16.msra.mxu1 %v12069_v48 }
 0x49f   :  { %9054 = vmatprep.subr.bf16.mxu1 %v9773_v22 }
 0x4a0   :  { %9091 = vmatpush3.bf16.msra.mxu0 %v12035_v53 }
 0x4a1   :  { %9108 = vmatprep.subr.bf16.mxu0 %v9773_v22 }
 0x4a2   :  { %9055 = vmatpush3.bf16.msra.mxu1 %v12079_v63 }
 0x4a3   :  { %v8584_v42 = vpop.f32.mrf.mxu0  ;;  %9072 = vmatprep.subr.bf16.mxu1 %v9773_v22  ;;  %9093 = vmatmul.mubr.msk.bf16.vlgmr.msra.gmra.mxu0 %vm4411_vm1, %v753_v50  ;;  %v1430_v50 = vmax.f32 %v10819_v25, 0.0  ;;  %v1882_v25 = vmax.f32 %v11163_v21, 0.0 }
 0x4a4   :  { %9109 = vmatpush3.bf16.msra.mxu0 %v11978_v37  ;;  %9116 = vmatprep.mubr.msk.bf16.mxu0 %vm9774_vm0, %v9773_v22 }
 0x4a5   :  { %v8606_v61 = vpop.f32.mrf.mxu1  ;;  %9057 = vmatmul.mubr.msk.bf16.vlgmr.msra.gmra.mxu1 %vm4411_vm1, %v414_v38  ;;  %v8585_v40 = vpop.f32.mrf.mxu0  ;;  %9110 = vmatprep.subr.bf16.mxu0 %v9773_v22  ;;  %v1544_v38 = vpack.c.bf16 %v1543_v36, %v1543_v36 }
 0x4a6   :  { %9073 = vmatpush3.bf16.msra.mxu1 %v12089_v58  ;;  %v8586_v26 = vadd.f32 %v8585_v40, %v8584_v42  ;;  %9080 = vmatprep.mubr.msk.bf16.mxu1 %vm9774_vm0, %v9773_v22  ;;  %v1431_v42 = vpack.c.bf16 %v1430_v50, %v1430_v50  ;;  %v866_v40 = vpack.c.bf16 %v865_v5, %v865_v5  ;;  %v12880_v50 = vld [vmem:[#allocation9_spill] sm:$0xff]  ;;  %v12881_v5 = vld [vmem:[#allocation8_spill] sm:$0xff] }
 0x4a7   :  { %v8607_v24 = vpop.f32.mrf.mxu1  ;;  %9074 = vmatprep.subr.bf16.mxu1 %v9773_v22  ;;  %v8587_v55 = vpop.f32.mrf.mxu0 }
 0x4a8   :  { %v3758_v60 = vadd.f32 %v12110_v15, %v8586_v26  ;;  %v8608_v54 = vadd.f32 %v8607_v24, %v8606_v61  ;;  %9111 = vmatpush3.bf16.msra.mxu0 %v11992_v18  ;;  %v1883_v61 = vpack.c.bf16 %v1882_v25, %v1882_v25 }
 0x4a9   :  { %v8609_v14 = vpop.f32.mrf.mxu1  ;;  %9112 = vmatprep.subr.bf16.mxu0 %v9773_v22  ;;  %v8588_v9 = vpop.f32.mrf.mxu0 }
 0x4aa   :  { %v12115_v43 = vadd.f32 %v8608_v54, %v3758_v60  ;;  %9075 = vmatpush3.bf16.msra.mxu1 %v12102_v28 }
 0x4ab   :  { %v8610_v3 = vpop.f32.mrf.mxu1  ;;  %9076 = vmatprep.subr.bf16.mxu1 %v9773_v22 }
 0x4ac   :  { %9113 = vmatpush3.bf16.msra.mxu0 %v12011_v44 }
 0x4ad   :  { %9114 = vmatprep.subr.bf16.mxu0 %v9773_v22 }
 0x4ae   :  { %9077 = vmatpush3.bf16.msra.mxu1 %v12121_v39 }
 0x4af   :  { %9078 = vmatprep.subr.bf16.mxu1 %v9773_v22 }
 0x4b0   :  { %9115 = vmatpush3.bf16.msra.mxu0 %v12027_v49 }
 0x4b1   :  { %9132 = vmatprep.subr.bf16.mxu0 %v9773_v22 }
 0x4b2   :  { %9079 = vmatpush3.bf16.msra.mxu1 %v12131_v12 }
 0x4b3   :  { %9096 = vmatprep.subr.bf16.mxu1 %v9773_v22  ;;  %9117 = vmatmul.mubr.msk.bf16.vlgmr.msra.gmra.mxu0 %vm4411_vm1, %v1318_v8  ;;  %v2447_v8 = vmax.f32 %v11364_v47, 0.0  ;;  %v1769_v47 = vmax.f32 %v11113_v6, 0.0 }
 0x4b4   :  { %9133 = vmatpush3.bf16.msra.mxu0 %v11985_v41  ;;  %9140 = vmatprep.mubr.msk.bf16.mxu0 %vm9774_vm0, %v9773_v22 }
 0x4b5   :  { %9081 = vmatmul.mubr.msk.bf16.vlgmr.msra.gmra.mxu1 %vm4411_vm1, %v1205_v2  ;;  %9134 = vmatprep.subr.bf16.mxu0 %v9773_v22  ;;  %v1656_v2 = vmax.f32 %v10973_v10, 0.0  ;;  %v2448_v56 = vpack.c.bf16 %v2447_v8, %v2447_v8  ;;  %v2108_v10 = vmax.f32 %v11244_v32, 0.0 }
 0x4b6   :  { %9097 = vmatpush3.bf16.msra.mxu1 %v12045_v13  ;;  %9104 = vmatprep.mubr.msk.bf16.mxu1 %vm9774_vm0, %v9773_v22 }
 0x4b7   :  { %9098 = vmatprep.subr.bf16.mxu1 %v9773_v22  ;;  %v1657_v31 = vpack.c.bf16 %v1656_v2, %v1656_v2 }
 0x4b8   :  { %9135 = vmatpush3.bf16.msra.mxu0 %v12001_v7 }
 0x4b9   :  { %9136 = vmatprep.subr.bf16.mxu0 %v9773_v22 }
 0x4ba   :  { %9099 = vmatpush3.bf16.msra.mxu1 %v12058_v29 }
 0x4bb   :  { %9100 = vmatprep.subr.bf16.mxu1 %v9773_v22 }
 0x4bc   :  { %9137 = vmatpush3.bf16.msra.mxu0 %v12020_v62 }
 0x4bd   :  { %9138 = vmatprep.subr.bf16.mxu0 %v9773_v22 }
 0x4be   :  { %9101 = vmatpush3.bf16.msra.mxu1 %v12069_v48 }
 0x4bf   :  { %9102 = vmatprep.subr.bf16.mxu1 %v9773_v22 }
 0x4c0   :  { %9139 = vmatpush3.bf16.msra.mxu0 %v12035_v53 }
 0x4c1   :  { %9156 = vmatprep.subr.bf16.mxu0 %v9773_v22 }
 0x4c2   :  { %9103 = vmatpush3.bf16.msra.mxu1 %v12079_v63 }
 0x4c3   :  { %v8628_v51 = vpop.f32.mrf.mxu0  ;;  %9120 = vmatprep.subr.bf16.mxu1 %v9773_v22  ;;  %9141 = vmatmul.mubr.msk.bf16.vlgmr.msra.gmra.mxu0 %vm4411_vm1, %v979_v1  ;;  %v2109_v1 = vpack.c.bf16 %v2108_v10, %v2108_v10  ;;  %v12883_v10 = vld [vmem:[#allocation12_spill] sm:$0xff] }
 0x4c4   :  { %9157 = vmatpush3.bf16.msra.mxu0 %v11978_v37  ;;  %9164 = vmatprep.mubr.msk.bf16.mxu0 %vm9774_vm0, %v9773_v22 }
 0x4c5   :  { %v8650_v17 = vpop.f32.mrf.mxu1  ;;  %9105 = vmatmul.mubr.msk.bf16.vlgmr.msra.gmra.mxu1 %vm4411_vm1, %v640_v33  ;;  %v8629_v20 = vpop.f32.mrf.mxu0  ;;  %9158 = vmatprep.subr.bf16.mxu0 %v9773_v22  ;;  %v1770_v33 = vpack.c.bf16 %v1769_v47, %v1769_v47  ;;  %v2899_v47 = vmax.f32 %v12883_v10, 0.0 }
 0x4c6   :  { %9121 = vmatpush3.bf16.msra.mxu1 %v12089_v58  ;;  %v8630_v4 = vadd.f32 %v8629_v20, %v8628_v51  ;;  %9128 = vmatprep.mubr.msk.bf16.mxu1 %vm9774_vm0, %v9773_v22 }
 0x4c7   :  { %v8651_v27 = vpop.f32.mrf.mxu1  ;;  %9122 = vmatprep.subr.bf16.mxu1 %v9773_v22  ;;  %v8631_v45 = vpop.f32.mrf.mxu0 }
 0x4c8   :  { %v3871_v16 = vadd.f32 %v12110_v15, %v8630_v4  ;;  %v8652_v11 = vadd.f32 %v8651_v27, %v8650_v17  ;;  %9159 = vmatpush3.bf16.msra.mxu0 %v11992_v18 }
 0x4c9   :  { %v8653_v57 = vpop.f32.mrf.mxu1  ;;  %9160 = vmatprep.subr.bf16.mxu0 %v9773_v22  ;;  %v8632_v59 = vpop.f32.mrf.mxu0 }
 0x4ca   :  { %v12176_v34 = vadd.f32 %v8652_v11, %v3871_v16  ;;  %9123 = vmatpush3.bf16.msra.mxu1 %v12102_v28 }
 0x4cb   :  { %v8654_v52 = vpop.f32.mrf.mxu1  ;;  %9124 = vmatprep.subr.bf16.mxu1 %v9773_v22 }
 0x4cc   :  { %9161 = vmatpush3.bf16.msra.mxu0 %v12011_v44  ;;  %v12879_v52 = vld [vmem:[#allocation10_spill] sm:$0xff] }
 0x4cd   :  { %9162 = vmatprep.subr.bf16.mxu0 %v9773_v22  ;;  %v2673_v36 = vmax.f32 %v12879_v52, 0.0 }
 0x4ce   :  { %9125 = vmatpush3.bf16.msra.mxu1 %v12121_v39 }
 0x4cf   :  { %9126 = vmatprep.subr.bf16.mxu1 %v9773_v22 }
 0x4d0   :  { %9163 = vmatpush3.bf16.msra.mxu0 %v12027_v49 }
 0x4d1   :  { %9180 = vmatprep.subr.bf16.mxu0 %v9773_v22 }
 0x4d2   :  { %9127 = vmatpush3.bf16.msra.mxu1 %v12131_v12 }
 0x4d3   :  { %9144 = vmatprep.subr.bf16.mxu1 %v9773_v22  ;;  %9165 = vmatmul.mubr.msk.bf16.vlgmr.msra.gmra.mxu0 %vm4411_vm1, %v1544_v38  ;;  %v2560_v38 = vmax.f32 %v12880_v50, 0.0 }
 0x4d4   :  { %9181 = vmatpush3.bf16.msra.mxu0 %v11985_v41  ;;  %9188 = vmatprep.mubr.msk.bf16.mxu0 %vm9774_vm0, %v9773_v22 }
 0x4d5   :  { %9129 = vmatmul.mubr.msk.bf16.vlgmr.msra.gmra.mxu1 %vm4411_vm1, %v1431_v42  ;;  %9182 = vmatprep.subr.bf16.mxu0 %v9773_v22  ;;  %v2674_v42 = vpack.c.bf16 %v2673_v36, %v2673_v36  ;;  %v2561_v25 = vpack.c.bf16 %v2560_v38, %v2560_v38 }
 0x4d6   :  { %9145 = vmatpush3.bf16.msra.mxu1 %v12045_v13  ;;  %9152 = vmatprep.mubr.msk.bf16.mxu1 %vm9774_vm0, %v9773_v22 }
 0x4d7   :  { %9146 = vmatprep.subr.bf16.mxu1 %v9773_v22 }
 0x4d8   :  { %9183 = vmatpush3.bf16.msra.mxu0 %v12001_v7 }
 0x4d9   :  { %9184 = vmatprep.subr.bf16.mxu0 %v9773_v22 }
 0x4da   :  { %9147 = vmatpush3.bf16.msra.mxu1 %v12058_v29 }
 0x4db   :  { %9148 = vmatprep.subr.bf16.mxu1 %v9773_v22 }
 0x4dc   :  { %9185 = vmatpush3.bf16.msra.mxu0 %v12020_v62 }
 0x4dd   :  { %9186 = vmatprep.subr.bf16.mxu0 %v9773_v22 }
 0x4de   :  { %9149 = vmatpush3.bf16.msra.mxu1 %v12069_v48 }
 0x4df   :  { %9150 = vmatprep.subr.bf16.mxu1 %v9773_v22 }
 0x4e0   :  { %9187 = vmatpush3.bf16.msra.mxu0 %v12035_v53 }
 0x4e1   :  { %9204 = vmatprep.subr.bf16.mxu0 %v9773_v22 }
 0x4e2   :  { %9151 = vmatpush3.bf16.msra.mxu1 %v12079_v63 }
 0x4e3   :  { %v8672_v26 = vpop.f32.mrf.mxu0  ;;  %9168 = vmatprep.subr.bf16.mxu1 %v9773_v22  ;;  %9189 = vmatmul.mubr.msk.bf16.vlgmr.msra.gmra.mxu0 %vm4411_vm1, %v1883_v61  ;;  %v2334_v61 = vmax.f32 %v12881_v5, 0.0 }
 0x4e4   :  { %9205 = vmatpush3.bf16.msra.mxu0 %v11978_v37  ;;  %9212 = vmatprep.mubr.msk.bf16.mxu0 %vm9774_vm0, %v9773_v22 }
 0x4e5   :  { %v8694_v30 = vpop.f32.mrf.mxu1  ;;  %9153 = vmatmul.mubr.msk.bf16.vlgmr.msra.gmra.mxu1 %vm4411_vm1, %v866_v40  ;;  %v8673_v21 = vpop.f32.mrf.mxu0  ;;  %9206 = vmatprep.subr.bf16.mxu0 %v9773_v22  ;;  %v12882_v40 = vld [vmem:[#allocation6_spill] sm:$0xff] }
 0x4e6   :  { %9169 = vmatpush3.bf16.msra.mxu1 %v12089_v58  ;;  %v8674_v24 = vadd.f32 %v8673_v21, %v8672_v26  ;;  %9176 = vmatprep.mubr.msk.bf16.mxu1 %vm9774_vm0, %v9773_v22  ;;  %v1995_v26 = vmax.f32 %v12882_v40, 0.0 }
 0x4e7   :  { %v8695_v55 = vpop.f32.mrf.mxu1  ;;  %9170 = vmatprep.subr.bf16.mxu1 %v9773_v22  ;;  %v8675_v60 = vpop.f32.mrf.mxu0 }
 0x4e8   :  { %v3984_v54 = vadd.f32 %v12110_v15, %v8674_v24  ;;  %v8696_v14 = vadd.f32 %v8695_v55, %v8694_v30  ;;  %9207 = vmatpush3.bf16.msra.mxu0 %v11992_v18  ;;  %v2335_v30 = vpack.c.bf16 %v2334_v61, %v2334_v61  ;;  %v1996_v21 = vpack.c.bf16 %v1995_v26, %v1995_v26 }
 0x4e9   :  { %v8697_v9 = vpop.f32.mrf.mxu1  ;;  %9208 = vmatprep.subr.bf16.mxu0 %v9773_v22  ;;  %v8676_v3 = vpop.f32.mrf.mxu0  ;;  %v3803_v26 = vmax.f32 %v12115_v43, 0.0 }
 0x4ea   :  { %v12227_v0 = vadd.f32 %v8696_v14, %v3984_v54  ;;  %9171 = vmatpush3.bf16.msra.mxu1 %v12102_v28 }
 0x4eb   :  { %v8698_v23 = vpop.f32.mrf.mxu1  ;;  %9172 = vmatprep.subr.bf16.mxu1 %v9773_v22 }
 0x4ec   :  { %9209 = vmatpush3.bf16.msra.mxu0 %v12011_v44 }
 0x4ed   :  { %9210 = vmatprep.subr.bf16.mxu0 %v9773_v22 }
 0x4ee   :  { %9173 = vmatpush3.bf16.msra.mxu1 %v12121_v39 }
 0x4ef   :  { %9174 = vmatprep.subr.bf16.mxu1 %v9773_v22 }
 0x4f0   :  { %9211 = vmatpush3.bf16.msra.mxu0 %v12027_v49 }
 0x4f1   :  { %9228 = vmatprep.subr.bf16.mxu0 %v9773_v22 }
 0x4f2   :  { %9175 = vmatpush3.bf16.msra.mxu1 %v12131_v12 }
 0x4f3   :  { %9192 = vmatprep.subr.bf16.mxu1 %v9773_v22  ;;  %9213 = vmatmul.mubr.msk.bf16.vlgmr.msra.gmra.mxu0 %vm4411_vm1, %v2448_v56 }
 0x4f4   :  { %9229 = vmatpush3.bf16.msra.mxu0 %v11985_v41  ;;  %9236 = vmatprep.mubr.msk.bf16.mxu0 %vm9774_vm0, %v9773_v22 }
 0x4f5   :  { %9177 = vmatmul.mubr.msk.bf16.vlgmr.msra.gmra.mxu1 %vm4411_vm1, %v1657_v31  ;;  %9230 = vmatprep.subr.bf16.mxu0 %v9773_v22 }
 0x4f6   :  { %9193 = vmatpush3.bf16.msra.mxu1 %v12045_v13  ;;  %9200 = vmatprep.mubr.msk.bf16.mxu1 %vm9774_vm0, %v9773_v22 }
 0x4f7   :  { %9194 = vmatprep.subr.bf16.mxu1 %v9773_v22 }
 0x4f8   :  { %9231 = vmatpush3.bf16.msra.mxu0 %v12001_v7 }
 0x4f9   :  { %9232 = vmatprep.subr.bf16.mxu0 %v9773_v22 }
 0x4fa   :  { %9195 = vmatpush3.bf16.msra.mxu1 %v12058_v29 }
 0x4fb   :  { %9196 = vmatprep.subr.bf16.mxu1 %v9773_v22 }
 0x4fc   :  { %9233 = vmatpush3.bf16.msra.mxu0 %v12020_v62 }
 0x4fd   :  { %9234 = vmatprep.subr.bf16.mxu0 %v9773_v22 }
 0x4fe   :  { %9197 = vmatpush3.bf16.msra.mxu1 %v12069_v48 }
 0x4ff   :  { %9198 = vmatprep.subr.bf16.mxu1 %v9773_v22 }
 0x500   :  { %9235 = vmatpush3.bf16.msra.mxu0 %v12035_v53 }
 0x501   :  { %9252 = vmatprep.subr.bf16.mxu0 %v9773_v22 }
 0x502   :  { %9199 = vmatpush3.bf16.msra.mxu1 %v12079_v63 }
 0x503   :  { %v8716_v51 = vpop.f32.mrf.mxu0  ;;  %9216 = vmatprep.subr.bf16.mxu1 %v9773_v22  ;;  %9237 = vmatmul.mubr.msk.bf16.vlgmr.msra.gmra.mxu0 %vm4411_vm1, %v2109_v1  ;;  %v12884_v1 = vld [vmem:[#allocation11_spill] sm:$0xff] }
 0x504   :  { %9253 = vmatpush3.bf16.msra.mxu0 %v11978_v37  ;;  %9260 = vmatprep.mubr.msk.bf16.mxu0 %vm9774_vm0, %v9773_v22 }
 0x505   :  { %v8738_v6 = vpop.f32.mrf.mxu1  ;;  %9201 = vmatmul.mubr.msk.bf16.vlgmr.msra.gmra.mxu1 %vm4411_vm1, %v1770_v33  ;;  %v8717_v32 = vpop.f32.mrf.mxu0  ;;  %9254 = vmatprep.subr.bf16.mxu0 %v9773_v22  ;;  %v2786_v33 = vmax.f32 %v12884_v1, 0.0 }
 0x506   :  { %9217 = vmatpush3.bf16.msra.mxu1 %v12089_v58  ;;  %v8718_v17 = vadd.f32 %v8717_v32, %v8716_v51  ;;  %9224 = vmatprep.mubr.msk.bf16.mxu1 %vm9774_vm0, %v9773_v22  ;;  %v2900_v51 = vpack.c.bf16 %v2899_v47, %v2899_v47  ;;  %v12885_v32 = vld [vmem:[#allocation15_spill] sm:$0xff] }
 0x507   :  { %v8739_v20 = vpop.f32.mrf.mxu1  ;;  %9218 = vmatprep.subr.bf16.mxu1 %v9773_v22  ;;  %v8719_v4 = vpop.f32.mrf.mxu0 }
 0x508   :  { %v4097_v27 = vadd.f32 %v12110_v15, %v8718_v17  ;;  %v8740_v45 = vadd.f32 %v8739_v20, %v8738_v6  ;;  %9255 = vmatpush3.bf16.msra.mxu0 %v11992_v18  ;;  %v2787_v6 = vpack.c.bf16 %v2786_v33, %v2786_v33  ;;  %v3238_v17 = vmax.f32 %v12885_v32, 0.0  ;;  %v12886_v20 = vld [vmem:[#allocation7_spill] sm:$0xff] }
 0x509   :  { %v8741_v16 = vpop.f32.mrf.mxu1  ;;  %9256 = vmatprep.subr.bf16.mxu0 %v9773_v22  ;;  %v8720_v11 = vpop.f32.mrf.mxu0  ;;  %v2221_v4 = vmax.f32 %v12886_v20, 0.0 }
 0x50a   :  { %v12278_v57 = vadd.f32 %v8740_v45, %v4097_v27  ;;  %9219 = vmatpush3.bf16.msra.mxu1 %v12102_v28  ;;  %v3239_v27 = vpack.c.bf16 %v3238_v17, %v3238_v17 }
 0x50b   :  { %v8742_v59 = vpop.f32.mrf.mxu1  ;;  %9220 = vmatprep.subr.bf16.mxu1 %v9773_v22  ;;  %v2222_v45 = vpack.c.bf16 %v2221_v4, %v2221_v4 }
 0x50c   :  { %9257 = vmatpush3.bf16.msra.mxu0 %v12011_v44 }
 0x50d   :  { %9258 = vmatprep.subr.bf16.mxu0 %v9773_v22 }
 0x50e   :  { %9221 = vmatpush3.bf16.msra.mxu1 %v12121_v39 }
 0x50f   :  { %9222 = vmatprep.subr.bf16.mxu1 %v9773_v22 }
 0x510   :  { %9259 = vmatpush3.bf16.msra.mxu0 %v12027_v49 }
 0x511   :  { %9276 = vmatprep.subr.bf16.mxu0 %v9773_v22 }
 0x512   :  { %9223 = vmatpush3.bf16.msra.mxu1 %v12131_v12 }
 0x513   :  { %9240 = vmatprep.subr.bf16.mxu1 %v9773_v22  ;;  %9261 = vmatmul.mubr.msk.bf16.vlgmr.msra.gmra.mxu0 %vm4411_vm1, %v2674_v42 }
 0x514   :  { %9277 = vmatpush3.bf16.msra.mxu0 %v11985_v41  ;;  %9284 = vmatprep.mubr.msk.bf16.mxu0 %vm9774_vm0, %v9773_v22 }
 0x515   :  { %9225 = vmatmul.mubr.msk.bf16.vlgmr.msra.gmra.mxu1 %vm4411_vm1, %v2561_v25  ;;  %9278 = vmatprep.subr.bf16.mxu0 %v9773_v22 }
 0x516   :  { %9241 = vmatpush3.bf16.msra.mxu1 %v12045_v13  ;;  %9248 = vmatprep.mubr.msk.bf16.mxu1 %vm9774_vm0, %v9773_v22 }
 0x517   :  { %9242 = vmatprep.subr.bf16.mxu1 %v9773_v22 }
 0x518   :  { %9279 = vmatpush3.bf16.msra.mxu0 %v12001_v7 }
 0x519   :  { %9280 = vmatprep.subr.bf16.mxu0 %v9773_v22 }
 0x51a   :  { %9243 = vmatpush3.bf16.msra.mxu1 %v12058_v29 }
 0x51b   :  { %9244 = vmatprep.subr.bf16.mxu1 %v9773_v22 }
 0x51c   :  { %9281 = vmatpush3.bf16.msra.mxu0 %v12020_v62 }
 0x51d   :  { %9282 = vmatprep.subr.bf16.mxu0 %v9773_v22 }
 0x51e   :  { %9245 = vmatpush3.bf16.msra.mxu1 %v12069_v48 }
 0x51f   :  { %9246 = vmatprep.subr.bf16.mxu1 %v9773_v22 }
 0x520   :  { %9283 = vmatpush3.bf16.msra.mxu0 %v12035_v53 }
 0x521   :  { %9300 = vmatprep.subr.bf16.mxu0 %v9773_v22 }
 0x522   :  { %9247 = vmatpush3.bf16.msra.mxu1 %v12079_v63 }
 0x523   :  { %v8760_v24 = vpop.f32.mrf.mxu0  ;;  %9264 = vmatprep.subr.bf16.mxu1 %v9773_v22  ;;  %9285 = vmatmul.mubr.msk.bf16.vlgmr.msra.gmra.mxu0 %vm4411_vm1, %v2335_v30 }
 0x524   :  { %9301 = vmatpush3.bf16.msra.mxu0 %v11978_v37  ;;  %9308 = vmatprep.mubr.msk.bf16.mxu0 %vm9774_vm0, %v9773_v22 }
 0x525   :  { %v8782_v55 = vpop.f32.mrf.mxu1  ;;  %9249 = vmatmul.mubr.msk.bf16.vlgmr.msra.gmra.mxu1 %vm4411_vm1, %v1996_v21  ;;  %v8761_v60 = vpop.f32.mrf.mxu0  ;;  %9302 = vmatprep.subr.bf16.mxu0 %v9773_v22  ;;  %v3804_v21 = vpack.c.bf16 %v3803_v26, %v3803_v26 }
 0x526   :  { %9265 = vmatpush3.bf16.msra.mxu1 %v12089_v58  ;;  %v8762_v54 = vadd.f32 %v8761_v60, %v8760_v24  ;;  %9272 = vmatprep.mubr.msk.bf16.mxu1 %vm9774_vm0, %v9773_v22 }
 0x527   :  { %v8783_v14 = vpop.f32.mrf.mxu1  ;;  %9266 = vmatprep.subr.bf16.mxu1 %v9773_v22  ;;  %v8763_v9 = vpop.f32.mrf.mxu0 }
 0x528   :  { %v4210_v3 = vadd.f32 %v12110_v15, %v8762_v54  ;;  %v8784_v23 = vadd.f32 %v8783_v14, %v8782_v55  ;;  %9303 = vmatpush3.bf16.msra.mxu0 %v11992_v18 }
 0x529   :  { %v8785_v8 = vpop.f32.mrf.mxu1  ;;  %9304 = vmatprep.subr.bf16.mxu0 %v9773_v22  ;;  %v8764_v2 = vpop.f32.mrf.mxu0 }
 0x52a   :  { %v12329_v56 = vadd.f32 %v8784_v23, %v4210_v3  ;;  %9267 = vmatpush3.bf16.msra.mxu1 %v12102_v28  ;;  %v3464_v8 = vmax.f32 %v11909_v19, 0.0  ;;  %v12888_v2 = vld [vmem:[#allocation14_spill] sm:$0xff] }
 0x52b   :  { %v8786_v31 = vpop.f32.mrf.mxu1  ;;  %9268 = vmatprep.subr.bf16.mxu1 %v9773_v22 }
 0x52c   :  { %9305 = vmatpush3.bf16.msra.mxu0 %v12011_v44  ;;  %v3125_v31 = vmax.f32 %v12888_v2, 0.0  ;;  %v3465_v10 = vpack.c.bf16 %v3464_v8, %v3464_v8  ;;  %v9742_v2 = vld [vmem:[%s12856_s3 + $0x18] sm:$0xff]  }
 0x52d   :  { %9306 = vmatprep.subr.bf16.mxu0 %v9773_v22 }
 0x52e   :  { %9269 = vmatpush3.bf16.msra.mxu1 %v12121_v39  ;;  %v3126_v47 = vpack.c.bf16 %v3125_v31, %v3125_v31 }
 0x52f   :  { %9270 = vmatprep.subr.bf16.mxu1 %v9773_v22 }
 0x530   :  { %9307 = vmatpush3.bf16.msra.mxu0 %v12027_v49 }
 0x531   :  { %9324 = vmatprep.subr.bf16.mxu0 %v9773_v22 }
 0x532   :  { %9271 = vmatpush3.bf16.msra.mxu1 %v12131_v12 }
 0x533   :  { %9288 = vmatprep.subr.bf16.mxu1 %v9773_v22  ;;  %9309 = vmatmul.mubr.msk.bf16.vlgmr.msra.gmra.mxu0 %vm4411_vm1, %v2900_v51 }
 0x534   :  { %9325 = vmatpush3.bf16.msra.mxu0 %v11985_v41  ;;  %9332 = vmatprep.mubr.msk.bf16.mxu0 %vm9774_vm0, %v9773_v22 }
 0x535   :  { %9273 = vmatmul.mubr.msk.bf16.vlgmr.msra.gmra.mxu1 %vm4411_vm1, %v2787_v6  ;;  %9326 = vmatprep.subr.bf16.mxu0 %v9773_v22 }
 0x536   :  { %9289 = vmatpush3.bf16.msra.mxu1 %v12045_v13  ;;  %9296 = vmatprep.mubr.msk.bf16.mxu1 %vm9774_vm0, %v9773_v22 }
 0x537   :  { %9290 = vmatprep.subr.bf16.mxu1 %v9773_v22 }
 0x538   :  { %9327 = vmatpush3.bf16.msra.mxu0 %v12001_v7 }
 0x539   :  { %9328 = vmatprep.subr.bf16.mxu0 %v9773_v22 }
 0x53a   :  { %9291 = vmatpush3.bf16.msra.mxu1 %v12058_v29 }
 0x53b   :  { %9292 = vmatprep.subr.bf16.mxu1 %v9773_v22 }
 0x53c   :  { %9329 = vmatpush3.bf16.msra.mxu0 %v12020_v62 }
 0x53d   :  { %9330 = vmatprep.subr.bf16.mxu0 %v9773_v22 }
 0x53e   :  { %9293 = vmatpush3.bf16.msra.mxu1 %v12069_v48 }
 0x53f   :  { %9294 = vmatprep.subr.bf16.mxu1 %v9773_v22 }
 0x540   :  { %9331 = vmatpush3.bf16.msra.mxu0 %v12035_v53 }
 0x541   :  { %9348 = vmatprep.subr.bf16.mxu0 %v9773_v22 }
 0x542   :  { %9295 = vmatpush3.bf16.msra.mxu1 %v12079_v63 }
 0x543   :  { %v8804_v16 = vpop.f32.mrf.mxu0  ;;  %9312 = vmatprep.subr.bf16.mxu1 %v9773_v22  ;;  %9333 = vmatmul.mubr.msk.bf16.vlgmr.msra.gmra.mxu0 %vm4411_vm1, %v3239_v27  ;;  %v4029_v27 = vmax.f32 %v12227_v0, 0.0 }
 0x544   :  { %9349 = vmatpush3.bf16.msra.mxu0 %v11978_v37  ;;  %9356 = vmatprep.mubr.msk.bf16.mxu0 %vm9774_vm0, %v9773_v22 }
 0x545   :  { %v8826_v11 = vpop.f32.mrf.mxu1  ;;  %9297 = vmatmul.mubr.msk.bf16.vlgmr.msra.gmra.mxu1 %vm4411_vm1, %v2222_v45  ;;  %v8805_v59 = vpop.f32.mrf.mxu0  ;;  %9350 = vmatprep.subr.bf16.mxu0 %v9773_v22  ;;  %v4030_v45 = vpack.c.bf16 %v4029_v27, %v4029_v27  ;;  %v9565_v27 = vld [vmem:[%s12858_s5 + $0xb4] ss:$8 sps:$4 sm:$0xff]  }
 0x546   :  { %9313 = vmatpush3.bf16.msra.mxu1 %v12089_v58  ;;  %v8806_v52 = vadd.f32 %v8805_v59, %v8804_v16  ;;  %9320 = vmatprep.mubr.msk.bf16.mxu1 %vm9774_vm0, %v9773_v22 }
 0x547   :  { %v8827_v36 = vpop.f32.mrf.mxu1  ;;  %9314 = vmatprep.subr.bf16.mxu1 %v9773_v22  ;;  %v8807_v50 = vpop.f32.mrf.mxu0 }
 0x548   :  { %v4323_v38 = vadd.f32 %v12110_v15, %v8806_v52  ;;  %v8828_v42 = vadd.f32 %v8827_v36, %v8826_v11  ;;  %9351 = vmatpush3.bf16.msra.mxu0 %v11992_v18  ;;  %v12887_v15 = vld [vmem:[#allocation13_spill] sm:$0xff] }
 0x549   :  { %v8829_v25 = vpop.f32.mrf.mxu1  ;;  %9352 = vmatprep.subr.bf16.mxu0 %v9773_v22  ;;  %v8808_v5 = vpop.f32.mrf.mxu0  ;;  %v3012_v30 = vmax.f32 %v12887_v15, 0.0 }
 0x54a   :  { %v12380_v61 = vadd.f32 %v8828_v42, %v4323_v38  ;;  %9315 = vmatpush3.bf16.msra.mxu1 %v12102_v28  ;;  %v12889_v38 = vld [vmem:[#allocation16_spill] sm:$0xff] }
 0x54b   :  { %v8830_v40 = vpop.f32.mrf.mxu1  ;;  %9316 = vmatprep.subr.bf16.mxu1 %v9773_v22  ;;  %v3013_v24 = vpack.c.bf16 %v3012_v30, %v3012_v30  ;;  %v3351_v42 = vmax.f32 %v12889_v38, 0.0 }
 0x54c   :  { %9353 = vmatpush3.bf16.msra.mxu0 %v12011_v44  ;;  %v9740_v40 = vld [vmem:[%s12856_s3 + $0x50] sm:$0xff]  }
 0x54d   :  { %9354 = vmatprep.subr.bf16.mxu0 %v9773_v22 }
 0x54e   :  { %9317 = vmatpush3.bf16.msra.mxu1 %v12121_v39 }
 0x54f   :  { %9318 = vmatprep.subr.bf16.mxu1 %v9773_v22 }
 0x550   :  { %9355 = vmatpush3.bf16.msra.mxu0 %v12027_v49 }
 0x551   :  { %9372 = vmatprep.subr.bf16.mxu0 %v9773_v22 }
 0x552   :  { %9319 = vmatpush3.bf16.msra.mxu1 %v12131_v12 }
 0x553   :  { %v4592_v55 = vpop.f32.mrf.mxu0  ;;  %9336 = vmatprep.subr.bf16.mxu1 %v9773_v22  ;;  %9357 = vmatmul.mubr.msk.bf16.vlgmr.msra.gmra.mxu0 %vm4411_vm1, %v3804_v21  ;;  %v9741_v21 = vld [vmem:[%s12856_s3 + $0x48] sm:$0xff]  }
 0x554   :  { %9373 = vmatpush3.bf16.msra.mxu0 %v11985_v41  ;;  %9380 = vmatprep.mubr.msk.bf16.mxu0 %vm9774_vm0, %v9773_v22 }
 0x555   :  { %v4449_v43 = vpop.f32.mrf.mxu1  ;;  %9321 = vmatmul.mubr.msk.bf16.vlgmr.msra.gmra.mxu1 %vm4411_vm1, %v3013_v24  ;;  %v9070_v60 = vpop.f32.mrf.mxu0  ;;  %9374 = vmatprep.subr.bf16.mxu0 %v9773_v22  ;;  %v4255_v24 = vmax.f32 %v12329_v56, 0.0  ;;  %v9556_v56 = vld [vmem:[%s12858_s5 + $0xe4] ss:$8 sps:$4 sm:$0xff]  }
 0x556   :  { %9337 = vmatpush3.bf16.msra.mxu1 %v12045_v13  ;;  %9344 = vmatprep.mubr.msk.bf16.mxu1 %vm9774_vm0, %v9773_v22 }
 0x557   :  { %v9046_v54 = vpop.f32.mrf.mxu1  ;;  %v4595_v14 = vpop.f32.mrf.mxu0  ;;  %9338 = vmatprep.subr.bf16.mxu1 %v9773_v22  ;;  %v4256_v60 = vpack.c.bf16 %v4255_v24, %v4255_v24 }
 0x558   :  { %9375 = vmatpush3.bf16.msra.mxu0 %v12001_v7  ;;  %v9775_v14 = vmov 0  }
 0x559   :  { %v4452_v9 = vpop.f32.mrf.mxu1  ;;  %v9071_v3 = vpop.f32.mrf.mxu0  ;;  %9376 = vmatprep.subr.bf16.mxu0 %v9773_v22 }
 0x55a   :  { %9339 = vmatpush3.bf16.msra.mxu1 %v12058_v29  ;;  %v9559_v3 = vld [vmem:[%s12858_s5 + $0xd4] ss:$8 sps:$4 sm:$0xff]  }
 0x55b   :  { %v9047_v23 = vpop.f32.mrf.mxu1  ;;  %9340 = vmatprep.subr.bf16.mxu1 %v9773_v22 }
 0x55c   :  { %9377 = vmatpush3.bf16.msra.mxu0 %v12020_v62 }
 0x55d   :  { %9378 = vmatprep.subr.bf16.mxu0 %v9773_v22 }
 0x55e   :  { %9341 = vmatpush3.bf16.msra.mxu1 %v12069_v48 }
 0x55f   :  { %9342 = vmatprep.subr.bf16.mxu1 %v9773_v22 }
 0x560   :  { %9379 = vmatpush3.bf16.msra.mxu0 %v12035_v53 }
 0x561   :  { %9396 = vmatprep.subr.bf16.mxu0 %v9773_v22 }
 0x562   :  { %9343 = vmatpush3.bf16.msra.mxu1 %v12079_v63 }
 0x563   :  { %v12417_v1 = vpop.f32.mrf.mxu0  ;;  %9360 = vmatprep.subr.bf16.mxu1 %v9773_v22  ;;  %9381 = vmatmul.mubr.msk.bf16.vlgmr.msra.gmra.mxu0 %vm4411_vm1, %v3465_v10 }
 0x564   :  { %9397 = vmatpush3.bf16.msra.mxu0 %v11978_v37  ;;  %9404 = vmatprep.mubr.msk.bf16.mxu0 %vm9774_vm0, %v9773_v22 }
 0x565   :  { %v4516_v19 = vpop.f32.mrf.mxu1  ;;  %9345 = vmatmul.mubr.msk.bf16.vlgmr.msra.gmra.mxu1 %vm4411_vm1, %v3126_v47  ;;  %v9094_v33 = vpop.f32.mrf.mxu0  ;;  %9398 = vmatprep.subr.bf16.mxu0 %v9773_v22 }
 0x566   :  { %v4517_v51 = vadd.f32 %v4516_v19, %v4449_v43  ;;  %9361 = vmatpush3.bf16.msra.mxu1 %v12089_v58  ;;  %9368 = vmatprep.mubr.msk.bf16.mxu1 %vm9774_vm0, %v9773_v22  ;;  %v9551_v43 = vld [vmem:[%s12858_s5 + $0xf0] ss:$8 sps:$4 sm:$0xff]  }
 0x567   :  { %v9058_v6 = vpop.f32.mrf.mxu1  ;;  %v4725_v32 = vpop.f32.mrf.mxu0  ;;  %9362 = vmatprep.subr.bf16.mxu1 %v9773_v22 }
 0x568   :  { %9399 = vmatpush3.bf16.msra.mxu0 %v11992_v18  ;;  %v4598_v37 = vadd.f32 %v4592_v55, %v4517_v51  ;;  %v3916_v18 = vmax.f32 %v12176_v34, 0.0  ;;  %v9553_v55 = vld [vmem:[%s12858_s5 + $0xf4] ss:$8 sps:$4 sm:$0xff]   ;;  %v9562_v51 = vld [vmem:[%s12858_s5 + $0xc4] ss:$8 sps:$4 sm:$0xff]  }
 0x569   :  { %v4519_v17 = vpop.f32.mrf.mxu1  ;;  %v9095_v20 = vpop.f32.mrf.mxu0  ;;  %9400 = vmatprep.subr.bf16.mxu0 %v9773_v22 }
 0x56a   :  { %9363 = vmatpush3.bf16.msra.mxu1 %v12102_v28  ;;  %v3917_v16 = vpack.c.bf16 %v3916_v18, %v3916_v18  ;;  %v9744_v18 = vld [vmem:[%s12856_s3 + $0x8] sm:$0xff]  }
 0x56b   :  { %v9059_v4 = vpop.f32.mrf.mxu1  ;;  %9364 = vmatprep.subr.bf16.mxu1 %v9773_v22 }
 0x56c   :  { %9401 = vmatpush3.bf16.msra.mxu0 %v12011_v44  ;;  %v9560_v4 = vld [vmem:[%s12858_s5 + $0xc0] ss:$8 sps:$4 sm:$0xff]  }
 0x56d   :  { %9402 = vmatprep.subr.bf16.mxu0 %v9773_v22 }
 0x56e   :  { %9365 = vmatpush3.bf16.msra.mxu1 %v12121_v39 }
 0x56f   :  { %9366 = vmatprep.subr.bf16.mxu1 %v9773_v22 }
 0x570   :  { %9403 = vmatpush3.bf16.msra.mxu0 %v12027_v49 }
 0x571   :  { %9420 = vmatprep.subr.bf16.mxu0 %v9773_v22 }
 0x572   :  { %9367 = vmatpush3.bf16.msra.mxu1 %v12131_v12 }
 0x573   :  { %v4808_v11 = vpop.f32.mrf.mxu0  ;;  %9384 = vmatprep.subr.bf16.mxu1 %v9773_v22  ;;  %9405 = vmatmul.mubr.msk.bf16.vlgmr.msra.gmra.mxu0 %vm4411_vm1, %v4030_v45  ;;  %v3577_v45 = vmax.f32 %v11949_v46, 0.0  ;;  %v9566_v46 = vld [vmem:[%s12858_s5 + $0xa0] ss:$8 sps:$4 sm:$0xff]  }
 0x574   :  { %9421 = vmatpush3.bf16.msra.mxu0 %v11985_v41  ;;  %9428 = vmatprep.mubr.msk.bf16.mxu0 %vm9774_vm0, %v9773_v22 }
 0x575   :  { %v4669_v44 = vpop.f32.mrf.mxu1  ;;  %9369 = vmatmul.mubr.msk.bf16.vlgmr.msra.gmra.mxu1 %vm4411_vm1, %v3917_v16  ;;  %v9118_v34 = vpop.f32.mrf.mxu0  ;;  %9422 = vmatprep.subr.bf16.mxu0 %v9773_v22  ;;  %v9563_v16 = vld [vmem:[%s12858_s5 + $0xb0] ss:$8 sps:$4 sm:$0xff]  }
 0x576   :  { %v12450_v0 = vadd.f32 %v4669_v44, %v4598_v37  ;;  %9385 = vmatpush3.bf16.msra.mxu1 %v12045_v13  ;;  %9392 = vmatprep.mubr.msk.bf16.mxu1 %vm9774_vm0, %v9773_v22  ;;  %v3690_v13 = vmax.f32 %v12014_v35, 0.0  ;;  %v9739_v35 = vld [vmem:[%s12856_s3 + $0x58] sm:$0xff]   ;;  %v9743_v37 = vld [vmem:[%s12856_s3 + $0x10] sm:$0xff]   ;;  %v9745_v44 = vld [vmem:[%s12856_s3] sm:$0xff]   ;;  %v3578_v34 = vpack.c.bf16 %v3577_v45, %v3577_v45 }
 0x577   :  { %v9082_v59 = vpop.f32.mrf.mxu1  ;;  %v4811_v52 = vpop.f32.mrf.mxu0  ;;  %9386 = vmatprep.subr.bf16.mxu1 %v9773_v22 }
 0x578   :  { %9423 = vmatpush3.bf16.msra.mxu0 %v12001_v7  ;;  %v3691_v7 = vpack.c.bf16 %v3690_v13, %v3690_v13 }
 0x579   :  { %v4672_v41 = vpop.f32.mrf.mxu1  ;;  %v9119_v36 = vpop.f32.mrf.mxu0  ;;  %9424 = vmatprep.subr.bf16.mxu0 %v9773_v22 }
 0x57a   :  { %9387 = vmatpush3.bf16.msra.mxu1 %v12058_v29  ;;  %v3352_v29 = vpack.c.bf16 %v3351_v42, %v3351_v42  ;;  %v9571_v41 = vld [vmem:[%s12858_s5 + $0x94] ss:$8 sps:$4 sm:$0xff]  }
 0x57b   :  { %v9083_v50 = vpop.f32.mrf.mxu1  ;;  %9388 = vmatprep.subr.bf16.mxu1 %v9773_v22 }
 0x57c   :  { %9425 = vmatpush3.bf16.msra.mxu0 %v12020_v62  ;;  %v9746_v50 = vld [vmem:[%s12856_s3 + $0x78] sm:$0xff]  }
 0x57d   :  { %9426 = vmatprep.subr.bf16.mxu0 %v9773_v22 }
 0x57e   :  { %9389 = vmatpush3.bf16.msra.mxu1 %v12069_v48 }
 0x57f   :  { %9390 = vmatprep.subr.bf16.mxu1 %v9773_v22 }
 0x580   :  { %9427 = vmatpush3.bf16.msra.mxu0 %v12035_v53 }
 0x581   :  { %9444 = vmatprep.subr.bf16.mxu0 %v9773_v22 }
 0x582   :  { %9391 = vmatpush3.bf16.msra.mxu1 %v12079_v63 }
 0x583   :  { %v12469_v25 = vpop.f32.mrf.mxu0  ;;  %9408 = vmatprep.subr.bf16.mxu1 %v9773_v22  ;;  %9429 = vmatmul.mubr.msk.bf16.vlgmr.msra.gmra.mxu0 %vm4411_vm1, %v3691_v7  ;;  %v9569_v7 = vld [vmem:[%s12858_s5 + $0x90] ss:$8 sps:$4 sm:$0xff]  }
 0x584   :  { %9445 = vmatpush3.bf16.msra.mxu0 %v9739_v35  ;;  %9452 = vmatprep.mubr.msk.bf16.mxu0 %vm9774_vm0, %v9773_v22  ;;  %v9574_v35 = vld [vmem:[%s12858_s5 + $0x84] ss:$8 sps:$4 sm:$0xff]  }
 0x585   :  { %v4765_v62 = vpop.f32.mrf.mxu1  ;;  %9393 = vmatmul.mubr.msk.bf16.vlgmr.msra.gmra.mxu1 %vm4411_vm1, %v3352_v29  ;;  %v9142_v53 = vpop.f32.mrf.mxu0  ;;  %9446 = vmatprep.subr.bf16.mxu0 %v9773_v22 }
 0x586   :  { %v4766_v48 = vadd.f32 %v4765_v62, %v12417_v1  ;;  %9409 = vmatpush3.bf16.msra.mxu1 %v12089_v58  ;;  %9416 = vmatprep.mubr.msk.bf16.mxu1 %vm9774_vm0, %v9773_v22  ;;  %v9557_v1 = vld [vmem:[%s12858_s5 + $0xd0] ss:$8 sps:$4 sm:$0xff]  }
 0x587   :  { %v9106_v63 = vpop.f32.mrf.mxu1  ;;  %v4901_v5 = vpop.f32.mrf.mxu0  ;;  %9410 = vmatprep.subr.bf16.mxu1 %v9773_v22  ;;  %v9747_v62 = vld [vmem:[%s12856_s3 + $0x70] sm:$0xff]  }
 0x588   :  { %9447 = vmatpush3.bf16.msra.mxu0 %v9740_v40  ;;  %v4814_v26 = vadd.f32 %v4808_v11, %v4766_v48  ;;  %v9568_v11 = vld [vmem:[%s12858_s5 + $0xa4] ss:$8 sps:$4 sm:$0xff]   ;;  %v9572_v48 = vld [vmem:[%s12858_s5 + $0x80] ss:$8 sps:$4 sm:$0xff]   ;;  %v4368_v5 = vmax.f32 %v12380_v61, 0.0 }
 0x589   :  { %v4768_v15 = vpop.f32.mrf.mxu1  ;;  %v9143_v30 = vpop.f32.mrf.mxu0  ;;  %9448 = vmatprep.subr.bf16.mxu0 %v9773_v22  ;;  %v9748_v63 = vld [vmem:[%s12856_s3 + $0x68] sm:$0xff]   ;;  %v9529_v40 = vld [vmem:[%s12858_s5 + $0x74] ss:$8 sps:$4 sm:$0xff]  }
 0x58a   :  { %9411 = vmatpush3.bf16.msra.mxu1 %v12102_v28  ;;  %v4142_v28 = vmax.f32 %v12278_v57, 0.0  ;;  %v9527_v15 = vld [vmem:[%s12858_s5 + $0x70] ss:$8 sps:$4 sm:$0xff]   ;;  %v4369_v30 = vpack.c.bf16 %v4368_v5, %v4368_v5  ;;  %v9532_v61 = vld [vmem:[%s12858_s5 + $0x64] ss:$8 sps:$4 sm:$0xff]  }
 0x58b   :  { %v9107_v58 = vpop.f32.mrf.mxu1  ;;  %9412 = vmatprep.subr.bf16.mxu1 %v9773_v22 }
 0x58c   :  { %9449 = vmatpush3.bf16.msra.mxu0 %v9741_v21  ;;  %v4143_v54 = vpack.c.bf16 %v4142_v28, %v4142_v28  ;;  %v9530_v28 = vld [vmem:[%s12858_s5 + $0x60] ss:$8 sps:$4 sm:$0xff]  }
 0x58d   :  { %9450 = vmatprep.subr.bf16.mxu0 %v9773_v22 }
 0x58e   :  { %9413 = vmatpush3.bf16.msra.mxu1 %v12121_v39  ;;  %v12513_v39 = vld [vmem:[%s12857_s4] ss:$0 sm:$0xff] }
 0x58f   :  { %9414 = vmatprep.subr.bf16.mxu1 %v9773_v22  ;;  %v4683_v23 = vadd.f32 %v12513_v39, %v12450_v0 }
 0x590   :  { %9451 = vmatpush3.bf16.msra.mxu0 %v12027_v49  ;;  %v9554_v49 = vld [vmem:[%s12858_s5 + $0xe0] ss:$8 sps:$4 sm:$0xff]  }
 0x591   :  { %6214 = vmatprep.subr.bf16.mxu0 %v9553_v55  ;;  %v4684_v6 = vmax.f32 %v4683_v23, 0.0  ;;  %v9538_v23 = vld [vmem:[%s12858_s5 + $0x44] ss:$8 sps:$4 sm:$0xff]  }
 0x592   :  { %9415 = vmatpush3.bf16.msra.mxu1 %v12131_v12 }
 0x593   :  { %v12515_v57 = vpop.f32.mrf.mxu0  ;;  %9432 = vmatprep.subr.bf16.mxu1 %v9773_v22  ;;  %9453 = vmatmul.mubr.msk.bf16.vlgmr.msra.gmra.mxu0 %vm4411_vm1, %v4256_v60 }
 0x594   :  { %6215 = vmatpush1.bf16.msra.mxu0 %v9551_v43  ;;  %6246 = vmatprep.mubr.bf16.mxu0 %v9775_v14 }
 0x595   :  { %v4852_v12 = vpop.f32.mrf.mxu1  ;;  %9417 = vmatmul.mubr.msk.bf16.vlgmr.msra.gmra.mxu1 %vm4411_vm1, %v4143_v54  ;;  %v9166_v9 = vpop.f32.mrf.mxu0  ;;  %6216 = vmatprep.subr.bf16.mxu0 %v9556_v56  ;;  %v9535_v56 = vld [vmem:[%s12858_s5 + $0x54] ss:$8 sps:$4 sm:$0xff]  }
 0x596   :  { %v4858_v8 = vadd.f32 %v4852_v12, %v4814_v26  ;;  %9433 = vmatpush3.bf16.msra.mxu1 %v9742_v2  ;;  %9440 = vmatprep.mubr.msk.bf16.mxu1 %vm9774_vm0, %v9773_v22  ;;  %v9749_v26 = vld [vmem:[%s12856_s3 + $0x60] sm:$0xff]   ;;  %v9533_v9 = vld [vmem:[%s12858_s5 + $0x50] ss:$8 sps:$4 sm:$0xff]  }
 0x597   :  { %v9130_v31 = vpop.f32.mrf.mxu1  ;;  %v4987_v10 = vpop.f32.mrf.mxu0  ;;  %9434 = vmatprep.subr.bf16.mxu1 %v9773_v22 }
 0x598   :  { %v12536_v47 = vadd.f32 %v12513_v39, %v4858_v8  ;;  %6217 = vmatpush1.bf16.msra.mxu0 %v9554_v49  ;;  %v9577_v8 = vld [vmem:[%s12858_s5 + $0x174] ss:$8 sps:$4 sm:$0xff]   ;;  %v9536_v31 = vld [vmem:[%s12858_s5 + $0x40] ss:$8 sps:$4 sm:$0xff]  }
 0x599   :  { %v4855_v19 = vpop.f32.mrf.mxu1  ;;  %v9167_v33 = vpop.f32.mrf.mxu0  ;;  %6218 = vmatprep.subr.bf16.mxu0 %v9559_v3  ;;  %v9541_v10 = vld [vmem:[%s12858_s5 + $0x34] ss:$8 sps:$4 sm:$0xff]  }
 0x59a   :  { %v4860_v32 = vmax.f32 %v12536_v47, 0.0  ;;  %9435 = vmatpush3.bf16.msra.mxu1 %v9743_v37  ;;  %v9544_v47 = vld [vmem:[%s12858_s5 + $0x24] ss:$8 sps:$4 sm:$0xff]  }
 0x59b   :  { %v9131_v17 = vpop.f32.mrf.mxu1  ;;  %9436 = vmatprep.subr.bf16.mxu1 %v9773_v22 }
 0x59c   :  { %v12551_v20 = vmax.f32 %v4684_v6, %v4860_v32  ;;  %6219 = vmatpush1.bf16.msra.mxu0 %v9557_v1  ;;  %v9539_v1 = vld [vmem:[%s12858_s5 + $0x30] ss:$8 sps:$4 sm:$0xff]  }
 0x59d   :  { %6220 = vmatprep.subr.bf16.mxu0 %v9562_v51 }
 0x59e   :  { %9437 = vmatpush3.bf16.msra.mxu1 %v9744_v18 }
 0x59f   :  { %9438 = vmatprep.subr.bf16.mxu1 %v9773_v22 }
 0x5a0   :  { %6221 = vmatpush1.bf16.msra.mxu0 %v9560_v4  ;;  %v9547_v4 = vld [vmem:[%s12858_s5 + $0x14] ss:$8 sps:$4 sm:$0xff]  }
 0x5a1   :  { %6222 = vmatprep.subr.bf16.mxu0 %v9565_v27 }
 0x5a2   :  { %9439 = vmatpush3.bf16.msra.mxu1 %v9745_v44  ;;  %v9550_v44 = vld [vmem:[%s12858_s5 + $0x4] ss:$8 sps:$4 sm:$0xff]  }
 0x5a3   :  { %v12573_v0 = vpop.f32.mrf.mxu0  ;;  %9456 = vmatprep.subr.bf16.mxu1 %v9773_v22 }
 0x5a4   :  { %6223 = vmatpush1.bf16.msra.mxu0 %v9563_v16  ;;  %v9545_v16 = vld [vmem:[%s12858_s5 + $0x10] ss:$8 sps:$4 sm:$0xff]  }
 0x5a5   :  { %v4941_v59 = vpop.f32.mrf.mxu1  ;;  %9441 = vmatmul.mubr.msk.bf16.vlgmr.msra.gmra.mxu1 %vm4411_vm1, %v3578_v34  ;;  %v9190_v52 = vpop.f32.mrf.mxu0  ;;  %6224 = vmatprep.subr.bf16.mxu0 %v9568_v11  ;;  %v9548_v34 = vld [vmem:[%s12858_s5] ss:$8 sps:$4 sm:$0xff]  }
 0x5a6   :  { %v4942_v36 = vadd.f32 %v4941_v59, %v12469_v25  ;;  %9457 = vmatpush3.bf16.msra.mxu1 %v9746_v50  ;;  %9464 = vmatprep.mubr.msk.bf16.mxu1 %vm9774_vm0, %v9773_v22 }
 0x5a7   :  { %v9154_v13 = vpop.f32.mrf.mxu1  ;;  %v5077_v38 = vpop.f32.mrf.mxu0  ;;  %9458 = vmatprep.subr.bf16.mxu1 %v9773_v22 }
 0x5a8   :  { %v4990_v42 = vadd.f32 %v12515_v57, %v4942_v36  ;;  %6225 = vmatpush1.bf16.msra.mxu0 %v9566_v46  ;;  %v9601_v38 = vld [vmem:[%s12858_s5 + $0x1f4] ss:$8 sps:$4 sm:$0xff]  }
 0x5a9   :  { %v4944_v29 = vpop.f32.mrf.mxu1  ;;  %v9191_v25 = vpop.f32.mrf.mxu0  ;;  %6226 = vmatprep.subr.bf16.mxu0 %v9571_v41 }
 0x5aa   :  { %9459 = vmatpush3.bf16.msra.mxu1 %v9747_v62 }
 0x5ab   :  { %v9155_v53 = vpop.f32.mrf.mxu1  ;;  %9460 = vmatprep.subr.bf16.mxu1 %v9773_v22 }
 0x5ac   :  { %6227 = vmatpush1.bf16.msra.mxu0 %v9569_v7 }
 0x5ad   :  { %6228 = vmatprep.subr.bf16.mxu0 %v9574_v35 }
 0x5ae   :  { %9461 = vmatpush3.bf16.msra.mxu1 %v9748_v63 }
 0x5af   :  { %9462 = vmatprep.subr.bf16.mxu1 %v9773_v22 }
 0x5b0   :  { %6229 = vmatpush1.bf16.msra.mxu0 %v9572_v48 }
 0x5b1   :  { %6476 = vmatprep.subr.bf16.mxu0 %v9577_v8  ;;  %v9602_v8 = vld [vmem:[%s12858_s5 + $0x1e0] ss:$8 sps:$4 sm:$0xff]  }
 0x5b2   :  { %9463 = vmatpush3.bf16.msra.mxu1 %v9749_v26 }
 0x5b3   :  { %v5160_v58 = vpop.f32.mrf.mxu0  ;;  %6335 = vmatprep.subr.bf16.mxu1 %v9529_v40 }
 0x5b5   :  { %v5028_v21 = vpop.f32.mrf.mxu1  ;;  %9465 = vmatmul.mubr.msk.bf16.vlgmr.msra.gmra.mxu1 %vm4411_vm1, %v4369_v30  ;;  %v9214_v24 = vpop.f32.mrf.mxu0 }
 0x5b6   :  { %v5034_v55 = vadd.f32 %v5028_v21, %v4990_v42  ;;  %6336 = vmatpush1.bf16.msra.mxu1 %v9527_v15  ;;  %6367 = vmatprep.mubr.bf16.mxu1 %v9775_v14 }
 0x5b7   :  { %v9178_v43 = vpop.f32.mrf.mxu1  ;;  %v5163_v60 = vpop.f32.mrf.mxu0  ;;  %6337 = vmatprep.subr.bf16.mxu1 %v9532_v61 }
 0x5b8   :  { %v5035_v54 = vadd.f32 %v12513_v39, %v5034_v55 }
 0x5b9   :  { %v5031_v57 = vpop.f32.mrf.mxu1  ;;  %v9215_v49 = vpop.f32.mrf.mxu0 }
 0x5ba   :  { %v5036_v12 = vmax.f32 %v5035_v54, 0.0  ;;  %6338 = vmatpush1.bf16.msra.mxu1 %v9530_v28 }
 0x5bb   :  { %v9179_v3 = vpop.f32.mrf.mxu1  ;;  %6339 = vmatprep.subr.bf16.mxu1 %v9535_v56 }
 0x5bc   :  { %v12641_v2 = vmax.f32 %v4860_v32, %v5036_v12  ;;  %v9542_v32 = vld [vmem:[%s12858_s5 + $0x20] ss:$8 sps:$4 sm:$0xff]   ;;  %v9599_v12 = vld [vmem:[%s12858_s5 + $0x1f0] ss:$8 sps:$4 sm:$0xff]   ;;  %v9604_v3 = vld [vmem:[%s12858_s5 + $0x1e4] ss:$8 sps:$4 sm:$0xff]  }
 0x5be   :  { %6340 = vmatpush1.bf16.msra.mxu1 %v9533_v9 }
 0x5bf   :  { %6341 = vmatprep.subr.bf16.mxu1 %v9538_v23 }
 0x5c2   :  { %6342 = vmatpush1.bf16.msra.mxu1 %v9536_v31 }
 0x5c3   :  { %v5250_v19 = vpop.f32.mrf.mxu0  ;;  %6343 = vmatprep.subr.bf16.mxu1 %v9541_v10 }
 0x5c5   :  { %v5117_v33 = vpop.f32.mrf.mxu1  ;;  %v9238_v51 = vpop.f32.mrf.mxu0 }
 0x5c6   :  { %v5118_v6 = vadd.f32 %v5117_v33, %v12573_v0  ;;  %6344 = vmatpush1.bf16.msra.mxu1 %v9539_v1  ;;  %v9610_v33 = vld [vmem:[%s12858_s5 + $0x1c4] ss:$8 sps:$4 sm:$0xff]  }
 0x5c7   :  { %v9202_v37 = vpop.f32.mrf.mxu1  ;;  %v5253_v17 = vpop.f32.mrf.mxu0  ;;  %6345 = vmatprep.subr.bf16.mxu1 %v9544_v47  ;;  %v9605_v47 = vld [vmem:[%s12858_s5 + $0x1d0] ss:$8 sps:$4 sm:$0xff]  }
 0x5c8   :  { %v5166_v27 = vadd.f32 %v5160_v58, %v5118_v6  ;;  %v9608_v37 = vld [vmem:[%s12858_s5 + $0x1c0] ss:$8 sps:$4 sm:$0xff]   ;;  %v9613_v17 = vld [vmem:[%s12858_s5 + $0x1b4] ss:$8 sps:$4 sm:$0xff]  }
 0x5c9   :  { %v5120_v18 = vpop.f32.mrf.mxu1  ;;  %v9239_v45 = vpop.f32.mrf.mxu0 }
 0x5ca   :  { %6346 = vmatpush1.bf16.msra.mxu1 %v9542_v32  ;;  %v9616_v18 = vld [vmem:[%s12858_s5 + $0x1a4] ss:$8 sps:$4 sm:$0xff]  }
 0x5cb   :  { %v9203_v11 = vpop.f32.mrf.mxu1  ;;  %6347 = vmatprep.subr.bf16.mxu1 %v9547_v4  ;;  %v9611_v4 = vld [vmem:[%s12858_s5 + $0x1b0] ss:$8 sps:$4 sm:$0xff]  }
 0x5ce   :  { %6348 = vmatpush1.bf16.msra.mxu1 %v9545_v16  ;;  %v9614_v16 = vld [vmem:[%s12858_s5 + $0x1a0] ss:$8 sps:$4 sm:$0xff]  }
 0x5cf   :  { %6349 = vmatprep.subr.bf16.mxu1 %v9550_v44  ;;  %v9619_v44 = vld [vmem:[%s12858_s5 + $0x194] ss:$8 sps:$4 sm:$0xff]  }
 0x5d2   :  { %6350 = vmatpush1.bf16.msra.mxu1 %v9548_v34 }
 0x5d3   :  { %v5336_v0 = vpop.f32.mrf.mxu0  ;;  %6619 = vmatprep.subr.bf16.mxu1 %v9601_v38 }
 0x5d5   :  { %v5204_v46 = vpop.f32.mrf.mxu1  ;;  %v9262_v59 = vpop.f32.mrf.mxu0 }
 0x5d6   :  { %v5210_v5 = vadd.f32 %v5204_v46, %v5166_v27 }
 0x5d7   :  { %v9226_v52 = vpop.f32.mrf.mxu1  ;;  %v5339_v41 = vpop.f32.mrf.mxu0 }
 0x5d8   :  { %v5211_v58 = vadd.f32 %v12513_v39, %v5210_v5  ;;  %v9617_v41 = vld [vmem:[%s12858_s5 + $0x190] ss:$8 sps:$4 sm:$0xff]   ;;  %v9578_v5 = vld [vmem:[%s12858_s5 + $0x160] ss:$8 sps:$4 sm:$0xff]  }
 0x5d9   :  { %v5207_v36 = vpop.f32.mrf.mxu1  ;;  %v9263_v50 = vpop.f32.mrf.mxu0 }
 0x5da   :  { %v5212_v60 = vmax.f32 %v5211_v58, 0.0  ;;  %v9622_v50 = vld [vmem:[%s12858_s5 + $0x184] ss:$8 sps:$4 sm:$0xff]  }
 0x5db   :  { %v9227_v13 = vpop.f32.mrf.mxu1 }
 0x5e3   :  { %v5426_v42 = vpop.f32.mrf.mxu0 }
 0x5e5   :  { %v5293_v7 = vpop.f32.mrf.mxu1  ;;  %v9286_v29 = vpop.f32.mrf.mxu0 }
 0x5e6   :  { %v5294_v63 = vadd.f32 %v5293_v7, %v5250_v19  ;;  %v9620_v29 = vld [vmem:[%s12858_s5 + $0x180] ss:$8 sps:$4 sm:$0xff]  }
 0x5e7   :  { %v9250_v25 = vpop.f32.mrf.mxu1  ;;  %v5429_v35 = vpop.f32.mrf.mxu0 }
 0x5e8   :  { %v5342_v26 = vadd.f32 %v5336_v0, %v5294_v63 }
 0x5e9   :  { %v5296_v62 = vpop.f32.mrf.mxu1  ;;  %v9287_v53 = vpop.f32.mrf.mxu0 }
 0x5ea   :  { %v9575_v62 = vld [vmem:[%s12858_s5 + $0x170] ss:$8 sps:$4 sm:$0xff]  }
 0x5eb   :  { %v9251_v48 = vpop.f32.mrf.mxu1 }
 0x5ec   :  { %v9580_v48 = vld [vmem:[%s12858_s5 + $0x164] ss:$8 sps:$4 sm:$0xff]  }
 0x5f3   :  { %v5512_v40 = vpop.f32.mrf.mxu0 }
 0x5f5   :  { %v5380_v15 = vpop.f32.mrf.mxu1  ;;  %v9310_v30 = vpop.f32.mrf.mxu0 }
 0x5f6   :  { %v5386_v61 = vadd.f32 %v5380_v15, %v5342_v26 }
 0x5f7   :  { %v9274_v21 = vpop.f32.mrf.mxu1  ;;  %v5515_v24 = vpop.f32.mrf.mxu0 }
 0x5f8   :  { %v5387_v55 = vadd.f32 %v12513_v39, %v5386_v61  ;;  %v9581_v61 = vld [vmem:[%s12858_s5 + $0x150] ss:$8 sps:$4 sm:$0xff]  }
 0x5f9   :  { %v5383_v28 = vpop.f32.mrf.mxu1  ;;  %v9311_v43 = vpop.f32.mrf.mxu0 }
 0x5fa   :  { %v5388_v56 = vmax.f32 %v5387_v55, 0.0  ;;  %v9584_v43 = vld [vmem:[%s12858_s5 + $0x140] ss:$8 sps:$4 sm:$0xff]  }
 0x5fb   :  { %v9275_v54 = vpop.f32.mrf.mxu1 }
 0x5fc   :  { %v12676_v57 = vmax.f32 %v5212_v60, %v5388_v56  ;;  %v9589_v60 = vld [vmem:[%s12858_s5 + $0x134] ss:$8 sps:$4 sm:$0xff]   ;;  %v9592_v54 = vld [vmem:[%s12858_s5 + $0x124] ss:$8 sps:$4 sm:$0xff]  }
 0x5fe   :  { %v6095_v49 = vmax.f32 %v12551_v20, %v12676_v57  ;;  %v9607_v20 = vld [vmem:[%s12858_s5 + $0x1d4] ss:$8 sps:$4 sm:$0xff]  }
 0x600   :  { %v6096_v9 = vpack.c.bf16 %v6095_v49, %v6095_v49 }
 0x602   :  { %6368 = vmatmul.mubr.bf16.vlgmr.msra.gmra.mxu1 %v6096_v9  ;;  %v9595_v9 = vld [vmem:[%s12858_s5 + $0x114] ss:$8 sps:$4 sm:$0xff]  }
 0x603   :  { %v12686_v23 = vpop.f32.mrf.mxu0  ;;  %6620 = vmatpush1.bf16.msra.mxu1 %v9599_v12  ;;  %6651 = vmatprep.mubr.bf16.mxu1 %v9775_v14  ;;  %v9590_v12 = vld [vmem:[%s12858_s5 + $0x120] ss:$8 sps:$4 sm:$0xff]  }
 0x604   :  { %6621 = vmatprep.subr.bf16.mxu1 %v9604_v3 }
 0x605   :  { %v5469_v31 = vpop.f32.mrf.mxu1  ;;  %v9334_v10 = vpop.f32.mrf.mxu0 }
 0x606   :  { %v5470_v27 = vadd.f32 %v5469_v31, %v5426_v42  ;;  %v9593_v31 = vld [vmem:[%s12858_s5 + $0x110] ss:$8 sps:$4 sm:$0xff]   ;;  %v9598_v10 = vld [vmem:[%s12858_s5 + $0x104] ss:$8 sps:$4 sm:$0xff]  }
 0x607   :  { %v9298_v1 = vpop.f32.mrf.mxu1  ;;  %v5605_v19 = vpop.f32.mrf.mxu0  ;;  %6622 = vmatpush1.bf16.msra.mxu1 %v9602_v8 }
 0x608   :  { %6623 = vmatprep.subr.bf16.mxu1 %v9607_v20  ;;  %v5518_v11 = vadd.f32 %v5512_v40, %v5470_v27 }
 0x609   :  { %v5472_v51 = vpop.f32.mrf.mxu1  ;;  %v9335_v6 = vpop.f32.mrf.mxu0 }
 0x60b   :  { %v9299_v32 = vpop.f32.mrf.mxu1  ;;  %6624 = vmatpush1.bf16.msra.mxu1 %v9605_v47 }
 0x60c   :  { %6625 = vmatprep.subr.bf16.mxu1 %v9610_v33  ;;  %v9596_v33 = vld [vmem:[%s12858_s5 + $0x100] ss:$8 sps:$4 sm:$0xff]  }
 0x60f   :  { %6626 = vmatpush1.bf16.msra.mxu1 %v9608_v37 }
 0x610   :  { %6627 = vmatprep.subr.bf16.mxu1 %v9613_v17 }
 0x613   :  { %v5688_v45 = vpop.f32.mrf.mxu0  ;;  %6628 = vmatpush1.bf16.msra.mxu1 %v9611_v4 }
 0x614   :  { %6629 = vmatprep.subr.bf16.mxu1 %v9616_v18 }
 0x615   :  { %v5556_v34 = vpop.f32.mrf.mxu1  ;;  %v9358_v0 = vpop.f32.mrf.mxu0 }
 0x616   :  { %v5562_v46 = vadd.f32 %v5556_v34, %v5518_v11 }
 0x617   :  { %v9322_v59 = vpop.f32.mrf.mxu1  ;;  %v5691_v52 = vpop.f32.mrf.mxu0  ;;  %6630 = vmatpush1.bf16.msra.mxu1 %v9614_v16 }
 0x618   :  { %v5563_v36 = vadd.f32 %v12513_v39, %v5562_v46  ;;  %6631 = vmatprep.subr.bf16.mxu1 %v9619_v44 }
 0x619   :  { %v5559_v13 = vpop.f32.mrf.mxu1  ;;  %v9359_v38 = vpop.f32.mrf.mxu0 }
 0x61a   :  { %v5564_v42 = vmax.f32 %v5563_v36, 0.0 }
 0x61b   :  { %v9323_v7 = vpop.f32.mrf.mxu1  ;;  %6632 = vmatpush1.bf16.msra.mxu1 %v9617_v41 }
 0x61c   :  { %v12729_v25 = vmax.f32 %v5388_v56, %v5564_v42  ;;  %6633 = vmatprep.subr.bf16.mxu1 %v9622_v50  ;;  %v9587_v56 = vld [vmem:[%s12858_s5 + $0x130] ss:$8 sps:$4 sm:$0xff]  }
 0x61e   :  { %v6115_v35 = vmax.f32 %v12641_v2, %v12729_v25  ;;  %v9583_v2 = vld [vmem:[%s12858_s5 + $0x154] ss:$8 sps:$4 sm:$0xff]  }
 0x61f   :  { %6634 = vmatpush1.bf16.msra.mxu1 %v9620_v29 }
 0x620   :  { %v6116_v53 = vpack.c.bf16 %v6115_v35, %v6115_v35  ;;  %9468 = vmatprep.subr.bf16.mxu1 %v9773_v22 }
 0x622   :  { %6247 = vmatmul.mubr.bf16.vlgmr.msra.gmra.mxu0 %v6116_v53 }
 0x623   :  { %v5778_v63 = vpop.f32.mrf.mxu0  ;;  %6477 = vmatpush1.bf16.msra.mxu0 %v9575_v62  ;;  %6508 = vmatprep.mubr.bf16.mxu0 %v9775_v14  ;;  %v9586_v14 = vld [vmem:[%s12858_s5 + $0x144] ss:$8 sps:$4 sm:$0xff]  }
 0x624   :  { %6478 = vmatprep.subr.bf16.mxu0 %v9580_v48 }
 0x625   :  { %v5645_v40 = vpop.f32.mrf.mxu1  ;;  %v9382_v26 = vpop.f32.mrf.mxu0 }
 0x626   :  { %v5646_v15 = vadd.f32 %v5645_v40, %v12686_v23 }
 0x627   :  { %v9346_v30 = vpop.f32.mrf.mxu1  ;;  %v5781_v58 = vpop.f32.mrf.mxu0  ;;  %6479 = vmatpush1.bf16.msra.mxu0 %v9578_v5 }
 0x628   :  { %v5694_v21 = vadd.f32 %v5688_v45, %v5646_v15  ;;  %6480 = vmatprep.subr.bf16.mxu0 %v9583_v2 }
 0x629   :  { %v5648_v24 = vpop.f32.mrf.mxu1  ;;  %v9383_v55 = vpop.f32.mrf.mxu0 }
 0x62b   :  { %v9347_v28 = vpop.f32.mrf.mxu1  ;;  %6481 = vmatpush1.bf16.msra.mxu0 %v9581_v61 }
 0x62c   :  { %6482 = vmatprep.subr.bf16.mxu0 %v9586_v14  ;;  %v9623_v28 = vld [vmem:[%s12860_s7 + $0x78] sm:$0xff]  }
 0x62f   :  { %6483 = vmatpush1.bf16.msra.mxu0 %v9584_v43  ;;  %v9624_v43 = vld [vmem:[%s12860_s7 + $0x38] sm:$0xff]  }
 0x630   :  { %6484 = vmatprep.subr.bf16.mxu0 %v9589_v60  ;;  %v9628_v60 = vld [vmem:[%s12860_s7 + $0x28] sm:$0xff]  }
 0x633   :  { %v5864_v49 = vpop.f32.mrf.mxu0  ;;  %6485 = vmatpush1.bf16.msra.mxu0 %v9587_v56  ;;  %v9629_v56 = vld [vmem:[%s12860_s7 + $0x60] sm:$0xff]  }
 0x634   :  { %6486 = vmatprep.subr.bf16.mxu0 %v9592_v54  ;;  %v9630_v54 = vld [vmem:[%s12860_s7 + $0x20] sm:$0xff]  }
 0x635   :  { %v5732_v3 = vpop.f32.mrf.mxu1  ;;  %v9406_v23 = vpop.f32.mrf.mxu0 }
 0x636   :  { %v5738_v16 = vadd.f32 %v5732_v3, %v5694_v21  ;;  %v9634_v3 = vld [vmem:[%s12860_s7 + $0x10] sm:$0xff]  }
 0x637   :  { %v9370_v8 = vpop.f32.mrf.mxu1  ;;  %v5867_v20 = vpop.f32.mrf.mxu0  ;;  %6487 = vmatpush1.bf16.msra.mxu0 %v9590_v12  ;;  %v9632_v12 = vld [vmem:[%s12860_s7 + $0x18] sm:$0xff]  }
 0x638   :  { %6488 = vmatprep.subr.bf16.mxu0 %v9595_v9  ;;  %v5739_v46 = vadd.f32 %v12513_v39, %v5738_v16  ;;  %v9633_v9 = vld [vmem:[%s12860_s7 + $0x50] sm:$0xff]   ;;  %v9635_v20 = vld [vmem:[%s12860_s7 + $0x48] sm:$0xff]  }
 0x639   :  { %v5735_v1 = vpop.f32.mrf.mxu1  ;;  %v9407_v19 = vpop.f32.mrf.mxu0  ;;  %v12890_v16 = vld [vmem:[#allocation5_spill] sm:$0xff] }
 0x63a   :  { %v5740_v38 = vmax.f32 %v5739_v46, 0.0  ;;  %v9637_v19 = vld [vmem:[%s12860_s7 + $0x40] sm:$0xff]  }
 0x63b   :  { %v9371_v47 = vpop.f32.mrf.mxu1  ;;  %6489 = vmatpush1.bf16.msra.mxu0 %v9593_v31  ;;  %v9636_v31 = vld [vmem:[%s12860_s7 + $0x8] sm:$0xff]  }
 0x63c   :  { %6490 = vmatprep.subr.bf16.mxu0 %v9598_v10  ;;  %v9638_v47 = vld [vmem:[%s12860_s7] sm:$0xff]  }
 0x63f   :  { %6491 = vmatpush1.bf16.msra.mxu0 %v9596_v33 }
 0x640   :  { %9012 = vmatprep.subr.bf16.mxu0 %v9623_v28 }
 0x643   :  { %v5954_v51 = vpop.f32.mrf.mxu0 }
 0x645   :  { %v5821_v6 = vpop.f32.mrf.mxu1  ;;  %v9430_v32 = vpop.f32.mrf.mxu0 }
 0x646   :  { %v5822_v45 = vadd.f32 %v5821_v6, %v5778_v63 }
 0x647   :  { %v9394_v37 = vpop.f32.mrf.mxu1  ;;  %v5957_v17 = vpop.f32.mrf.mxu0 }
 0x648   :  { %v5870_v44 = vadd.f32 %v5864_v49, %v5822_v45  ;;  %v9631_v49 = vld [vmem:[%s12860_s7 + $0x58] sm:$0xff]  }
 0x649   :  { %v5824_v4 = vpop.f32.mrf.mxu1  ;;  %v9431_v27 = vpop.f32.mrf.mxu0 }
 0x64b   :  { %v9395_v18 = vpop.f32.mrf.mxu1 }
 0x653   :  { %v6040_v11 = vpop.f32.mrf.mxu0 }
 0x655   :  { %v5908_v34 = vpop.f32.mrf.mxu1  ;;  %v9454_v0 = vpop.f32.mrf.mxu0 }
 0x656   :  { %v5914_v59 = vadd.f32 %v5908_v34, %v5870_v44  ;;  %v6662_v44 = vld [vmem:[%s12859_s6] sm:$0x3]  ;;  %v6670_v34 = vsub.s32 1, %v12890_v16 }
 0x657   :  { %v9418_v52 = vpop.f32.mrf.mxu1  ;;  %v6043_v41 = vpop.f32.mrf.mxu0 }
 0x658   :  { %v5915_v36 = vadd.f32 %v12513_v39, %v5914_v59 }
 0x659   :  { %v5911_v50 = vpop.f32.mrf.mxu1  ;;  %v9455_v13 = vpop.f32.mrf.mxu0 }
 0x65a   :  { %v5916_v42 = vmax.f32 %v5915_v36, 0.0  ;;  %v6671_v36 = vrot.slane %v6662_v44, %v6670_v34 }
 0x65b   :  { %v9419_v7 = vpop.f32.mrf.mxu1 }
 0x65c   :  { %v6376_v29 = vmax.f32 %v5740_v38, %v5916_v42 }
 0x65e   :  { %v6377_v35 = vmax.f32 %v12676_v57, %v6376_v29 }
 0x660   :  { %v6378_v62 = vpack.c.bf16 %v6377_v35, %v6377_v35 }
 0x662   :  { %6509 = vmatmul.mubr.bf16.vlgmr.msra.gmra.mxu0 %v6378_v62 }
 0x663   :  { %9013 = vmatpush3.bf16.msra.mxu0 %v9624_v43 }
 0x665   :  { %v5997_v53 = vpop.f32.mrf.mxu1 }
 0x666   :  { %v5998_v2 = vadd.f32 %v5997_v53, %v5954_v51 }
 0x667   :  { %v9442_v48 = vpop.f32.mrf.mxu1 }
 0x668   :  { %v6046_v40 = vadd.f32 %v6040_v11, %v5998_v2  ;;  %v6666_v11 = vsub.s32 0, %v12890_v16 }
 0x669   :  { %v6000_v63 = vpop.f32.mrf.mxu1 }
 0x66a   :  { %v6667_v46 = vrot.slane %v6662_v44, %v6666_v11  ;;  %v9639_v63 = vld [vmem:[%s12862_s9] sm:$0x1f]   ;;  %s9776_s9 = smov [#allocation2]  }
 0x66b   :  { %v9443_v5 = vpop.f32.mrf.mxu1  ;;  %s6927_s2 = sshll.u32 %s9776_s9, 4  ;;  %s6928_s2 = int_to_ptr.vmem [resolvable:$true] %s6927_s2 }
 0x66c   :  { %v6877_v5 = vsel %vm6875_vm2, %v9639_v63, 0  ;;  %p9755_p1 = scmp.lt.s32.totalorder %s6928_s2, %s6928_s2 }
 0x675   :  { %v6084_v26 = vpop.f32.mrf.mxu1 }
 0x676   :  { %v6090_v15 = vadd.f32 %v6084_v26, %v6046_v40  ;;  %v7228_v40 = vld [vmem:[%s12861_s8] ss:$0 sm:$0xff]  ;;  %s9750_s8 = scalar_lea.vmem %s6928_s2, 32 }
 0x677   :  { %v9466_v30 = vpop.f32.mrf.mxu1  ;;  %p9751_p0 = scmp.ne.s32.totalorder %s6928_s2, %s9750_s8  ;;  %p9756_p2 = scmp.lt.s32.totalorder %s9750_s8, %s9750_s8 }
 0x678   :  { %v6091_v58 = vadd.f32 %v12513_v39, %v6090_v15  ;;  %v9625_v39 = vld [vmem:[%s12860_s7 + $0x70] sm:$0xff]  }
 0x679   :  { %v6087_v61 = vpop.f32.mrf.mxu1  ;;  %9014 = vmatprep.subr.bf16.mxu0 %v9625_v39  ;;  %p9757_p3 = por %p9756_p2, %p9755_p1 }
 0x67a   :  { %v6092_v21 = vmax.f32 %v6091_v58, 0.0 }
 0x67b   :  { %v9467_v14 = vpop.f32.mrf.mxu1  ;;  %p9758_p4 = pnand %p9757_p3, %p9751_p0 }
 0x67c   :  { %v6519_v24 = vmax.f32 %v5916_v42, %v6092_v21 }
 0x67e   :  { %v6520_v55 = vmax.f32 %v12729_v25, %v6519_v24  ;;  %v9626_v25 = vld [vmem:[%s12860_s7 + $0x30] sm:$0xff]   ;;  %v7245_v24 = vld [vmem:[%s12863_s10] ss:$0 sm:$0xff] }
 0x67f   :  { %9015 = vmatpush3.bf16.msra.mxu0 %v9626_v25 }
 0x680   :  { %v6521_v57 = vpack.c.bf16 %v6520_v55, %v6520_v55 }
 0x682   :  { %6652 = vmatmul.mubr.bf16.vlgmr.msra.gmra.mxu1 %v6521_v57 }
 0x683   :  { %9470 = vmatprep.mubr.msk.bf16.mxu1 %vm9774_vm0, %v9773_v22  ;;  %v9627_v22 = vld [vmem:[%s12860_s7 + $0x68] sm:$0xff]   ;;  %9469 = vmatpush3.bf16.msra.mxu1 %v6877_v5 }
 0x684   :  { %9016 = vmatprep.subr.bf16.mxu0 %v9627_v22 }
 0x685   :  { %9017 = vmatpush3.bf16.msra.mxu0 %v9628_v60 }
 0x686   :  { %9018 = vmatprep.subr.bf16.mxu0 %v9629_v56 }
 0x689   :  { %9019 = vmatpush3.bf16.msra.mxu0 %v9630_v54 }
 0x68a   :  { %9020 = vmatprep.subr.bf16.mxu0 %v9631_v49 }
 0x68d   :  { %9021 = vmatpush3.bf16.msra.mxu0 %v9632_v12 }
 0x68e   :  { %9022 = vmatprep.subr.bf16.mxu0 %v9633_v9 }
 0x691   :  { %9023 = vmatpush3.bf16.msra.mxu0 %v9634_v3 }
 0x692   :  { %9024 = vmatprep.subr.bf16.mxu0 %v9635_v20 }
 0x695   :  { %9025 = vmatpush3.bf16.msra.mxu0 %v9636_v31 }
 0x696   :  { %9026 = vmatprep.subr.bf16.mxu0 %v9637_v19 }
 0x699   :  { %9027 = vmatpush3.bf16.msra.mxu0 %v9638_v47 }
 0x6c2   :  { %v6369_v23 = vpop.f32.mrf.mxu1 }
 0x6c4   :  { %v6371_v8 = vpop.f32.mrf.mxu1 }
 0x6c6   :  { %v6373_v10 = vpop.f32.mrf.mxu1 }
 0x6c8   :  { %v6374_v1 = vpop.f32.mrf.mxu1 }
 0x6e2   :  { %v6248_v33 = vpop.f32.mrf.mxu0 }
 0x6e3   :  { %v6370_v51 = vadd.f32 %v6369_v23, %v6248_v33 }
 0x6e4   :  { %v6250_v6 = vpop.f32.mrf.mxu0 }
 0x6e5   :  { %v6372_v32 = vadd.f32 %v6371_v8, %v6250_v6 }
 0x6e6   :  { %v6252_v37 = vpop.f32.mrf.mxu0 }
 0x6e8   :  { %v6253_v17 = vpop.f32.mrf.mxu0 }
 0x722   :  { %v6510_v4 = vpop.f32.mrf.mxu0 }
 0x723   :  { %v6517_v0 = vadd.f32 %v6510_v4, %v6370_v51 }
 0x724   :  { %v6512_v27 = vpop.f32.mrf.mxu0 }
 0x725   :  { %v6518_v52 = vadd.f32 %v6512_v27, %v6372_v32 }
 0x726   :  { %v6514_v18 = vpop.f32.mrf.mxu0 }
 0x728   :  { %v6515_v45 = vpop.f32.mrf.mxu0 }
 0x742   :  { %v6653_v59 = vpop.f32.mrf.mxu1 }
 0x743   :  { %v6660_v41 = vadd.f32 %v6653_v59, %v6517_v0 }
 0x744   :  { %v6655_v50 = vpop.f32.mrf.mxu1 }
 0x745   :  { %v6674_v13 = vadd.f32 %v6667_v46, %v6660_v41  ;;  %v6661_v38 = vadd.f32 %v6655_v50, %v6518_v52 }
 0x746   :  { %v6657_v42 = vpop.f32.mrf.mxu1 }
 0x747   :  { %v6675_v7 = vadd.f32 %v6671_v36, %v6661_v38  ;;  %v6676_v29 = vmax.f32 %v6674_v13, 0.0 }
 0x748   :  { %v6658_v35 = vpop.f32.mrf.mxu1 }
 0x749   :  { %v6677_v62 = vmax.f32 %v6675_v7, 0.0  ;;  %v6678_v48 = vpack.c.bf16 %v6676_v29, %v6676_v29 }
 0x74b   :  { %v6679_v53 = vpack.c.bf16 %v6677_v62, %v6677_v62 }
 0x74d   :  { %6847 = vmatprep.mubr.bf16.mxu0 %v6679_v53 }
 0x74e   :  { %6848 = vmatmul.mubr.bf16.vlgmr.msra.gmra.mxu0 %v6678_v48 }
 0x80e   :  { %v9028_v2 = vpop.f32.mrf.mxu0 }
 0x810   :  { %v9029_v26 = vpop.f32.mrf.mxu0 }
 0x811   :  { %v9030_v15 = vadd.f32 %v9029_v26, %v9028_v2 }
 0x812   :  { %v9031_v30 = vpop.f32.mrf.mxu0 }
 0x813   :  { %v6850_v58 = vadd.f32 %v9030_v15, %v7228_v40 }
 0x814   :  { %v9032_v61 = vpop.f32.mrf.mxu0 }
 0x815   :  { %v6855_v21 = vmax.f32 %v6850_v58, 0.0 }
 0x817   :  { %v6856_v14 = vpack.c.bf16 %v6855_v21, %v6855_v21 }
 0x819   :  { %9471 = vmatmul.mubr.msk.bf16.vlgmr.msra.gmra.mxu1 %vm6871_vm3, %v6856_v14 }
 0x8d9   :  { %v6913_v55 = vpop.f32.mrf.mxu1 }
 0x8da   :  { %v6914_v57 = vadd.f32 %v7245_v24, %v6913_v55 }
 0x8db   :  { %v9472_v28 = vpop.f32.mrf.mxu1 }
 0x8dc   :  { %6920 = vst.msk [vmem:[#allocation2] sm:$0x3] %vm6919_vm4, %v6914_v57 }
 0x8dd   :  { %v6916_v43 = vpop.f32.mrf.mxu1 }
 0x8de   :  { %9761 = shalt.err (!%p9758_p4)
}
 0x8df   :  { %6930 = dma.vmem_to_hbm [thread:$0]  %s6928_s2, 32, %s12864_s11, [#allocation3]   ;;  %v9473_v39 = vpop.f32.mrf.mxu1 }
 0x8e0   :  { %9770 = dma.done.wait [#allocation3], 32  }
 0x8e1   :  { %9771 = vsyncadd [#allocation3], 4294967264 }
 0x8e2   :  { %6934 = vsyncpa [#allocation3], 1 }

</bundles_post_ra>
